<compile_context>
chip_gen: v7x
topology: tpu7x:2x2x1
jax: 0.10.0
libtpu: 0.0.40
codegen_flags: <defaults>
</compile_context>

<pallas_src>
import functools

import jax
import jax.numpy as jnp
from jax.experimental import pallas as pl
from jax.experimental.pallas import tpu as pltpu


# ----------------------------------------------------------------------------
# Tiling helpers
# ----------------------------------------------------------------------------
def _round_up(x, m):
    return -(-x // m) * m


def _choose_tm(rows, pool, target=1024):
    """Row tile for kernel B: multiple of 8*pool (pooled output stays sublane
    aligned), as close to `target` as the problem allows.  Only split into >=2
    grid steps (v7x dual-TC) when each step still gets >=256 rows; on v5e/v6e
    the grid is a serial loop so one big tile is at least as good."""
    base = 8 * pool
    r_pad = _round_up(rows, base)
    tm = min(max(base, (target // base) * base), r_pad)
    if r_pad // tm < 2:
        half = (r_pad // 2 // base) * base
        if half >= max(base, 256):
            tm = half
    return tm


def _choose_bb_batch(batch, rows_per_b, target_rows=1024):
    """Batch elements per grid step for kernel C.  The 2-D (bb, out) output block
    needs bb % 8 == 0 or bb == batch (sublane tiling rule); per-batch work is tiny,
    so prefer multiples of 8, otherwise take the whole batch in one step."""
    if batch % 8 == 0:
        bb = min(batch, 8 * max(1, target_rows // max(8 * rows_per_b, 1)))
        bb = max(8, (bb // 8) * 8)
        while batch % bb:
            bb -= 8
        return bb
    return batch


def _choose_n1_chunk(n1, k, target_rows=2048):
    """Rows of n1 processed per grid step in kernel A's conv+pool stage.  The
    input block's last dim is chunk*k, which must be a multiple of 128 (lane
    tile) or cover the full n1*k extent."""
    cands = [c for c in range(1, n1 + 1)
             if n1 % c == 0 and (c * k) % 128 == 0 and c * k <= target_rows]
    return max(cands) if cands else n1


# ----------------------------------------------------------------------------
# Kernel A: netR_1 (3x conv+BN+ReLU) + MaxPool over knn_K + non-local attention
#   grid = (B, n1 chunks); pooled features accumulate in a (n1, 128) VMEM scratch,
#   attention epilogue runs on the last chunk.
# ----------------------------------------------------------------------------
def _netr1_nonlocal_kernel(x_ref, w1_ref, b1_ref, w2_ref, b2_ref, w3_ref, b3_ref,
                           wt_ref, bt_ref, wp_ref, bp_ref, wg_ref, bg_ref,
                           ww_ref, bw_ref, o_ref, feat_sc, *, pool, n1_chunk):
    c_idx = pl.program_id(1)
    x = x_ref[...]                                         # (cin, n1_chunk*pool) bf16
    # Layer 1 contracts over dim 0 of both operands so the input block stays
    # channels-first / lane-dense.  K = cin is tiny, so run this matmul in f32.
    h = jax.lax.dot_general(
        x.astype(jnp.float32), w1_ref[...].astype(jnp.float32),
        (((0,), (0,)), ((), ())), preferred_element_type=jnp.float32) + b1_ref[...]
    h = jnp.maximum(h, 0.0).astype(jnp.bfloat16)           # (rows, c1)
    h = jnp.dot(h, w2_ref[...], preferred_element_type=jnp.float32) + b2_ref[...]
    h = jnp.maximum(h, 0.0).astype(jnp.bfloat16)
    h = jnp.dot(h, w3_ref[...], preferred_element_type=jnp.float32) + b3_ref[...]
    h = jnp.maximum(h, 0.0)                                # (rows, c3) f32
    c3 = h.shape[-1]
    pooled = jnp.max(h.reshape(n1_chunk, pool, c3), axis=1)       # MaxPool2d((1, knn_K))

    n1 = feat_sc.shape[0]
    if n1 == n1_chunk:                                     # single chunk: static store
        feat_sc[...] = pooled
    else:
        start = pl.multiple_of(c_idx * n1_chunk, n1_chunk)
        feat_sc[pl.ds(start, n1_chunk), :] = pooled

    # _embedded_gaussian non-local attention (fused epilogue, last chunk only)
    @pl.when(c_idx == pl.num_programs(1) - 1)
    def _():
        feat = feat_sc[...]                                # (n1, c3) f32
        fb = feat.astype(jnp.bfloat16)
        theta = (jnp.dot(fb, wt_ref[...], preferred_element_type=jnp.float32)
                 + bt_ref[...]).astype(jnp.bfloat16)
        phi = (jnp.dot(fb, wp_ref[...], preferred_element_type=jnp.float32)
               + bp_ref[...]).astype(jnp.bfloat16)
        g = (jnp.dot(fb, wg_ref[...], preferred_element_type=jnp.float32)
             + bg_ref[...]).astype(jnp.bfloat16)
        f = jax.lax.dot_general(theta, phi, (((1,), (1,)), ((), ())),
                                preferred_element_type=jnp.float32)   # theta @ phi^T
        f = f - jnp.max(f, axis=-1, keepdims=True)
        p = jnp.exp(f)
        inv = pl.reciprocal(jnp.sum(p, axis=-1, keepdims=True), approx=True)
        p = (p * inv).astype(jnp.bfloat16)                 # softmax(dim=-1)
        y = jnp.dot(p, g, preferred_element_type=jnp.float32)         # (n1, ci)
        wy = jnp.dot(y.astype(jnp.bfloat16), ww_ref[...],
                     preferred_element_type=jnp.float32) + bw_ref[...]
        o_ref[...] = (wy + feat).astype(o_ref.dtype)       # z = W(y) + x, stored bf16


def netr1_nonlocal_block(x, layers, nl_params, *, pool, n1):
    """x: (B, cin, n1*k) bf16 (channels-first) -> (B, n1, 128) bf16."""
    (w1, b1), (w2, b2), (w3, b3) = layers
    wt, bt, wp, bp, wg, bg, ww, bw = nl_params
    B, cin, nk = x.shape
    assert nk == n1 * pool
    c1, c2, c3 = w1.shape[1], w2.shape[1], w3.shape[1]
    ci = wt.shape[1]
    chunk = _choose_n1_chunk(n1, pool)
    nchunks = n1 // chunk
    const = lambda shape: pl.BlockSpec(shape, lambda b, c: (0,) * len(shape))
    kernel = functools.partial(_netr1_nonlocal_kernel, pool=pool, n1_chunk=chunk)
    return pl.pallas_call(
        kernel,
        out_shape=jax.ShapeDtypeStruct((B, n1, c3), jnp.bfloat16),
        grid_spec=pltpu.PrefetchScalarGridSpec(
            num_scalar_prefetch=0,
            grid=(B, nchunks),
            in_specs=[
                pl.BlockSpec((None, cin, chunk * pool), lambda b, c: (b, 0, c)),
                const((cin, c1)), const((1, c1)),
                const((c1, c2)), const((1, c2)),
                const((c2, c3)), const((1, c3)),
                const((c3, ci)), const((1, ci)),
                const((c3, ci)), const((1, ci)),
                const((c3, ci)), const((1, ci)),
                const((ci, c3)), const((1, c3)),
            ],
            out_specs=pl.BlockSpec((None, n1, c3), lambda b, c: (b, 0, 0)),
            scratch_shapes=[pltpu.VMEM((n1, c3), jnp.float32)],
        ),
        compiler_params=pltpu.CompilerParams(
            dimension_semantics=("parallel", "arbitrary")),
    )(x, w1, b1, w2, b2, w3, b3, wt, bt, wp, bp, wg, bg, ww, bw)


# ----------------------------------------------------------------------------
# Kernel B: netR_2 = 3x(conv+BN+ReLU) + MaxPool over `pool` consecutive rows.
#   The xyz/feature concat is folded into the first contraction (split weights).
# ----------------------------------------------------------------------------
def _mlp_pool_kernel(xyz_ref, feat_ref, w1x_ref, w1f_ref, b1_ref,
                     w2_ref, b2_ref, w3_ref, b3_ref, o_ref, *, pool):
    h = jnp.dot(feat_ref[...], w1f_ref[...], preferred_element_type=jnp.float32)
    h = h + jnp.dot(xyz_ref[...], w1x_ref[...], preferred_element_type=jnp.float32)
    h = jnp.maximum(h + b1_ref[...], 0.0).astype(jnp.bfloat16)
    h = jnp.dot(h, w2_ref[...], preferred_element_type=jnp.float32) + b2_ref[...]
    h = jnp.maximum(h, 0.0).astype(jnp.bfloat16)
    h = jnp.dot(h, w3_ref[...], preferred_element_type=jnp.float32) + b3_ref[...]
    h = jnp.maximum(h, 0.0)
    tm, c = h.shape
    o_ref[...] = jnp.max(h.reshape(tm // pool, pool, c), axis=1).astype(o_ref.dtype)


def mlp_pool_block(xyz_rows, feat_rows, layers, *, pool):
    """xyz_rows: (R, 3) bf16, feat_rows: (R, 128) bf16; each group of `pool`
    consecutive rows shares a max.  Returns (R // pool, 256) bf16."""
    (w1x, w1f, b1), (w2, b2), (w3, b3) = layers
    R, cf = feat_rows.shape
    assert R % pool == 0
    c1, c2, c3 = w1f.shape[1], w2.shape[1], w3.shape[1]
    tm = _choose_tm(R, pool)
    r_pad = _round_up(R, tm)
    if r_pad != R:        # pad whole pool-groups; garbage output rows sliced off below
        xyz_rows = jnp.pad(xyz_rows, ((0, r_pad - R), (0, 0)))
        feat_rows = jnp.pad(feat_rows, ((0, r_pad - R), (0, 0)))
    const = lambda shape: pl.BlockSpec(shape, lambda i: (0,) * len(shape))
    kernel = functools.partial(_mlp_pool_kernel, pool=pool)
    out = pl.pallas_call(
        kernel,
        out_shape=jax.ShapeDtypeStruct((r_pad // pool, c3), jnp.bfloat16),
        grid_spec=pltpu.PrefetchScalarGridSpec(
            num_scalar_prefetch=0,
            grid=(r_pad // tm,),
            in_specs=[
                pl.BlockSpec((tm, 3), lambda i: (i, 0)),
                pl.BlockSpec((tm, cf), lambda i: (i, 0)),
                const((3, c1)), const((cf, c1)), const((1, c1)),
                const((c1, c2)), const((1, c2)),
                const((c2, c3)), const((1, c3)),
            ],
            out_specs=pl.BlockSpec((tm // pool, c3), lambda i: (i, 0)),
        ),
        compiler_params=pltpu.CompilerParams(dimension_semantics=("parallel",)),
    )(xyz_rows, feat_rows, w1x, w1f, b1, w2, b2, w3, b3)
    return out[: R // pool]


# ----------------------------------------------------------------------------
# Kernel C: netR_3 + max_3 (MaxPool over n2 + BN + ReLU) + netR_FC, fused.
#   Split 3/256 first contraction; flat lane-dense (B, 128) output.
# ----------------------------------------------------------------------------
def _netr3_fc_kernel(xyz_ref, feat_ref, w1x_ref, w1f_ref, b1_ref,
                     w2_ref, b2_ref, w3_ref, b3_ref,
                     ps_ref, pb_ref, fw1_ref, fb1_ref, fw2_ref, fb2_ref, o_ref):
    xyz3 = xyz_ref[...]                                    # (bb, n2, 3)   bf16
    feat3 = feat_ref[...]                                  # (bb, n2, 256) bf16
    bb, n2, cf = feat3.shape
    feat = feat3.reshape(bb * n2, cf)
    xyz = xyz3.reshape(bb * n2, 3)
    h = jnp.dot(feat, w1f_ref[...], preferred_element_type=jnp.float32)
    h = h + jnp.dot(xyz, w1x_ref[...], preferred_element_type=jnp.float32)
    h = jnp.maximum(h + b1_ref[...], 0.0).astype(jnp.bfloat16)
    h = jnp.dot(h, w2_ref[...], preferred_element_type=jnp.float32) + b2_ref[...]
    h = jnp.maximum(h, 0.0).astype(jnp.bfloat16)
    h = jnp.dot(h, w3_ref[...], preferred_element_type=jnp.float32) + b3_ref[...]
    h = jnp.maximum(h, 0.0)                                # (bb*n2, 1024) f32
    c = h.shape[-1]
    pooled = jnp.max(h.reshape(bb, n2, c), axis=1)         # MaxPool2d((n2, 1))
    pooled = jnp.maximum(pooled * ps_ref[...] + pb_ref[...], 0.0)   # max_3 BN + ReLU
    fh = jnp.dot(pooled.astype(jnp.bfloat16), fw1_ref[...],
                 preferred_element_type=jnp.float32) + fb1_ref[...]
    fh = jnp.maximum(fh, 0.0).astype(jnp.bfloat16)         # Linear + folded BN1d + ReLU
    out = jnp.dot(fh, fw2_ref[...], preferred_element_type=jnp.float32) + fb2_ref[...]
    o_ref[...] = out                                       # (bb, 128) lane-dense store


def netr3_fc_block(xyz, feat, layers, post_scale, post_shift, fc_layers):
    """xyz: (B, n2, 3) bf16, feat: (B, n2, 256) bf16 -> (B, 128) f32
    (last dim zero-padded past Num_Class)."""
    (w1x, w1f, b1), (w2, b2), (w3, b3) = layers
    (fw1, fb1), (fw2, fb2) = fc_layers
    B, n2, cf = feat.shape
    c1, c2, c3 = w1f.shape[1], w2.shape[1], w3.shape[1]
    dh, dout = fw1.shape[1], fw2.shape[1]
    bb = _choose_bb_batch(B, n2)
    const = lambda shape: pl.BlockSpec(shape, lambda i: (0,) * len(shape))
    return pl.pallas_call(
        _netr3_fc_kernel,
        out_shape=jax.ShapeDtypeStruct((B, dout), jnp.float32),
        grid_spec=pltpu.PrefetchScalarGridSpec(
            num_scalar_prefetch=0,
            grid=(B // bb,),
            in_specs=[
                pl.BlockSpec((bb, n2, 3), lambda i: (i, 0, 0)),
                pl.BlockSpec((bb, n2, cf), lambda i: (i, 0, 0)),
                const((3, c1)), const((cf, c1)), const((1, c1)),
                const((c1, c2)), const((1, c2)),
                const((c2, c3)), const((1, c3)),
                const((1, c3)), const((1, c3)),
                const((c3, dh)), const((1, dh)),
                const((dh, dout)), const((1, dout)),
            ],
            out_specs=pl.BlockSpec((bb, dout), lambda i: (i, 0)),
        ),
        compiler_params=pltpu.CompilerParams(dimension_semantics=("parallel",)),
    )(xyz, feat, w1x, w1f, b1, w2, b2, w3, b3,
      post_scale, post_shift, fw1, fb1, fw2, fb2)


# ----------------------------------------------------------------------------
# Parameter construction (deterministic, synthetic) with BatchNorm folding.
# Weights are stored bf16 (MXU inputs), biases / BN scale-shift stay f32.
# ----------------------------------------------------------------------------
def _fold_bn(w, b, gamma, beta, mean, var, eps=1e-5):
    s = gamma / jnp.sqrt(var + eps)
    return w * s[None, :], (b - mean) * s + beta


def _init_conv_bn(key, cin, cout):
    k = jax.random.split(key, 6)
    w = jax.random.normal(k[0], (cin, cout), jnp.float32) / jnp.sqrt(cin)
    b = 0.01 * jax.random.normal(k[1], (cout,), jnp.float32)
    gamma = 1.0 + 0.1 * jax.random.normal(k[2], (cout,), jnp.float32)
    beta = 0.1 * jax.random.normal(k[3], (cout,), jnp.float32)
    mean = 0.1 * jax.random.normal(k[4], (cout,), jnp.float32)
    var = jnp.abs(jax.random.normal(k[5], (cout,), jnp.float32)) + 0.5
    wf, bf = _fold_bn(w, b, gamma, beta, mean, var)
    return wf.astype(jnp.bfloat16), bf.reshape(1, cout)


def _init_linear(key, cin, cout, scale=1.0):
    k1, k2 = jax.random.split(key)
    w = scale * jax.random.normal(k1, (cin, cout), jnp.float32) / jnp.sqrt(cin)
    b = 0.01 * jax.random.normal(k2, (cout,), jnp.float32)
    return w, b


def init_params(key, opt):
    ns1, ns2, ns3 = [64, 64, 128], [128, 128, 256], [256, 512, 1024, 1024, 256]
    keys = jax.random.split(key, 20)
    p = {}
    p["netR_1"] = [_init_conv_bn(keys[0], opt["INPUT_FEATURE_NUM"], ns1[0]),
                   _init_conv_bn(keys[1], ns1[0], ns1[1]),
                   _init_conv_bn(keys[2], ns1[1], ns1[2])]
    # netR_2 / netR_3: first conv consumes cat(xyz(3), feat); split the weight rows
    # so the concat is folded into the kernel's contraction (128/256-aligned pass
    # plus a tiny 3-wide pass) instead of materialized in HBM.
    w21, b21 = _init_conv_bn(keys[3], 3 + ns1[2], ns2[0])
    p["netR_2"] = [(w21[:3], w21[3:], b21),
                   _init_conv_bn(keys[4], ns2[0], ns2[1]),
                   _init_conv_bn(keys[5], ns2[1], ns2[2])]
    w31, b31 = _init_conv_bn(keys[6], 3 + ns2[2], ns3[0])
    p["netR_3"] = [(w31[:3], w31[3:], b31),
                   _init_conv_bn(keys[7], ns3[0], ns3[1]),
                   _init_conv_bn(keys[8], ns3[1], ns3[2])]
    # max_3 BatchNorm2d(1024) applied AFTER the maxpool (folded to scale/shift)
    k = jax.random.split(keys[9], 4)
    gamma = 1.0 + 0.1 * jax.random.normal(k[0], (ns3[2],), jnp.float32)
    beta = 0.1 * jax.random.normal(k[1], (ns3[2],), jnp.float32)
    mean = 0.1 * jax.random.normal(k[2], (ns3[2],), jnp.float32)
    var = jnp.abs(jax.random.normal(k[3], (ns3[2],), jnp.float32)) + 0.5
    s = gamma / jnp.sqrt(var + 1e-5)
    p["max_3_scale"] = s.reshape(1, ns3[2])
    p["max_3_shift"] = (beta - mean * s).reshape(1, ns3[2])
    # non-local embedded-gaussian block on level-1 features (C=128, inter=64)
    # TODO(synk): if the reference NONLocalBlock uses bn_layer=True, fold that BN into ww/bw.
    C, Ci = ns1[2], ns1[2] // 2
    wt, bt = _init_linear(keys[10], C, Ci)
    wp, bp = _init_linear(keys[11], C, Ci)
    wg, bg = _init_linear(keys[12], C, Ci)
    ww, bw = _init_linear(keys[13], Ci, C, scale=0.1)
    p["nonlocal"] = (wt.astype(jnp.bfloat16), bt.reshape(1, Ci),
                     wp.astype(jnp.bfloat16), bp.reshape(1, Ci),
                     wg.astype(jnp.bfloat16), bg.reshape(1, Ci),
                     ww.astype(jnp.bfloat16), bw.reshape(1, C))
    # netR_FC: Linear(dim_out, 256)+BN1d+ReLU+Linear(256, Num_Class)
    # TODO(synk): self.dim_out is undefined in the source module; use 1024 (netR_3/max_3 output).
    dim_out = ns3[2]
    w1, b1 = _init_linear(keys[14], dim_out, ns3[4])
    k = jax.random.split(keys[15], 4)
    gamma = 1.0 + 0.1 * jax.random.normal(k[0], (ns3[4],), jnp.float32)
    beta = 0.1 * jax.random.normal(k[1], (ns3[4],), jnp.float32)
    mean = 0.1 * jax.random.normal(k[2], (ns3[4],), jnp.float32)
    var = jnp.abs(jax.random.normal(k[3], (ns3[4],), jnp.float32)) + 0.5
    w1f, b1f = _fold_bn(w1, b1, gamma, beta, mean, var)
    w2, b2 = _init_linear(keys[16], ns3[4], opt["Num_Class"])
    out_pad = _round_up(opt["Num_Class"], 128)     # lane-dense final store; slice in wrapper
    w2p = jnp.zeros((ns3[4], out_pad), jnp.float32).at[:, :opt["Num_Class"]].set(w2)
    b2p = jnp.zeros((out_pad,), jnp.float32).at[:opt["Num_Class"]].set(b2)
    p["netR_FC"] = [(w1f.astype(jnp.bfloat16), b1f.reshape(1, ns3[4])),
                    (w2p.astype(jnp.bfloat16), b2p.reshape(1, out_pad))]
    return p


# ----------------------------------------------------------------------------
# group_points_2 stand-in (the real op is a CUDA ball-query/kNN grouping).
# Channels-last so no transposes of the large feature map are needed.
# TODO(synk): group_points_2 is an external undefined op; deterministic stub here
#             (the real op should ideally be folded into kernel B via scalar-prefetched
#             gather indices; the ball_radius2 random jitter only matters there).
# ----------------------------------------------------------------------------
def group_points_2_stub(xyz, feat, n1, n2, k):
    # xyz: (B, n1, 3) f32, feat: (B, n1, C) bf16
    centers = xyz[:, :n2, :]                                          # (B, n2, 3)
    idx = (jnp.arange(n2)[:, None] + jnp.arange(k)[None, :]) % n1      # (n2, k)
    g_xyz = xyz[:, idx, :] - centers[:, :, None, :]                    # (B, n2, k, 3) rel xyz
    g_feat = feat[:, idx, :]                                           # (B, n2, k, C)
    return g_xyz, g_feat, centers


# ----------------------------------------------------------------------------
# Forward pass (xt branch; the xs branch of the source forward uses undefined
# netR_C*/netDI_* modules and self.pooling, and is structurally identical).
# ----------------------------------------------------------------------------
def attension_point_forward(params, xt, yt, opt):
    B, cin, n1, k = xt.shape
    n2 = opt["sample_num_level2"]
    # --- netR_1 + MaxPool(1,knn_K) + non-local attention (fused Pallas kernel A) ---
    # channels-first input: plain reshape of the NCHW tensor, lane-dense (n1*k lanes)
    x1 = xt.reshape(B, cin, n1 * k).astype(jnp.bfloat16)
    feat1 = netr1_nonlocal_block(x1, params["netR_1"], params["nonlocal"],
                                 pool=k, n1=n1)                        # (B, n1, 128) bf16
    # --- cat(yt, feat) + group_points_2: kept channels-last; the 3/128 concat is
    #     folded into kernel B's first contraction instead of materialized ---
    xyz1 = jnp.transpose(yt[..., 0], (0, 2, 1))                        # (B, n1, 3)
    g_xyz, g_feat, centers = group_points_2_stub(xyz1, feat1, n1, n2, k)
    # --- netR_2 + MaxPool(1,knn_K) (Pallas kernel B) ---
    feat2 = mlp_pool_block(g_xyz.reshape(B * n2 * k, 3).astype(jnp.bfloat16),
                           g_feat.reshape(B * n2 * k, -1),
                           params["netR_2"], pool=k)                   # (B*n2, 256) bf16
    feat2 = feat2.reshape(B, n2, -1)
    # --- cat(center, feat2) folded into kernel C: netR_3 + max_3 + netR_FC ---
    out = netr3_fc_block(centers.astype(jnp.bfloat16), feat2, params["netR_3"],
                         params["max_3_scale"], params["max_3_shift"],
                         params["netR_FC"])                            # (B, 128) f32
    return out[:, :opt["Num_Class"]]                                   # (B, Num_Class)


if __name__ == "__main__":
    opt = dict(knn_K=8, sample_num_level1=16, sample_num_level2=8,
               INPUT_FEATURE_NUM=6, Num_Class=10, ball_radius2=0.11)
    B = 2
    key = jax.random.PRNGKey(0)
    kx, ky, kp = jax.random.split(key, 3)
    xt = jax.random.normal(kx, (B, opt["INPUT_FEATURE_NUM"],
                                opt["sample_num_level1"], opt["knn_K"]), jnp.float32)
    yt = jax.random.normal(ky, (B, 3, opt["sample_num_level1"], 1), jnp.float32)
    params = init_params(kp, opt)

    fwd = jax.jit(functools.partial(attension_point_forward, opt=opt))
    out = fwd(params, xt, yt)
    out = jax.block_until_ready(out)
    assert out.shape == (B, opt["Num_Class"]) and bool(jnp.all(jnp.isfinite(out)))
    print("KERNEL_OK")
</pallas_src>

<mosaic_0001>
module attributes {stable_mosaic.version = 11 : i64} {
  func.func @_netr1_nonlocal_kernel(%arg0: i32, %arg1: i32, %arg2: memref<1x6x128xbf16, #tpu.memory_space<vmem>>, %arg3: memref<6x64xbf16, #tpu.memory_space<vmem>>, %arg4: memref<1x64xf32, #tpu.memory_space<vmem>>, %arg5: memref<64x64xbf16, #tpu.memory_space<vmem>>, %arg6: memref<1x64xf32, #tpu.memory_space<vmem>>, %arg7: memref<64x128xbf16, #tpu.memory_space<vmem>>, %arg8: memref<1x128xf32, #tpu.memory_space<vmem>>, %arg9: memref<128x64xbf16, #tpu.memory_space<vmem>>, %arg10: memref<1x64xf32, #tpu.memory_space<vmem>>, %arg11: memref<128x64xbf16, #tpu.memory_space<vmem>>, %arg12: memref<1x64xf32, #tpu.memory_space<vmem>>, %arg13: memref<128x64xbf16, #tpu.memory_space<vmem>>, %arg14: memref<1x64xf32, #tpu.memory_space<vmem>>, %arg15: memref<64x128xbf16, #tpu.memory_space<vmem>>, %arg16: memref<1x128xf32, #tpu.memory_space<vmem>>, %arg17: memref<1x16x128xbf16, #tpu.memory_space<vmem>>, %arg18: memref<16x128xf32, #tpu.memory_space<vmem>>) attributes {dimension_semantics = [#tpu.dimension_semantics<parallel>, #tpu.dimension_semantics<arbitrary>], iteration_bounds = array<i64: 2, 1>, scalar_prefetch = 0 : i64, scratch_operands = 1 : i64, tpu.core_type = #tpu.core_type<tc>, window_params = [{transform_indices = @transform_0, window_bounds = array<i64: 1, 6, 128>}, {pipeline_mode = #tpu.pipeline_mode<synchronous>, transform_indices = @transform_1, window_bounds = array<i64: 6, 64>}, {pipeline_mode = #tpu.pipeline_mode<synchronous>, transform_indices = @transform_2, window_bounds = array<i64: 1, 64>}, {pipeline_mode = #tpu.pipeline_mode<synchronous>, transform_indices = @transform_3, window_bounds = array<i64: 64, 64>}, {pipeline_mode = #tpu.pipeline_mode<synchronous>, transform_indices = @transform_4, window_bounds = array<i64: 1, 64>}, {pipeline_mode = #tpu.pipeline_mode<synchronous>, transform_indices = @transform_5, window_bounds = array<i64: 64, 128>}, {pipeline_mode = #tpu.pipeline_mode<synchronous>, transform_indices = @transform_6, window_bounds = array<i64: 1, 128>}, {pipeline_mode = #tpu.pipeline_mode<synchronous>, transform_indices = @transform_7, window_bounds = array<i64: 128, 64>}, {pipeline_mode = #tpu.pipeline_mode<synchronous>, transform_indices = @transform_8, window_bounds = array<i64: 1, 64>}, {pipeline_mode = #tpu.pipeline_mode<synchronous>, transform_indices = @transform_9, window_bounds = array<i64: 128, 64>}, {pipeline_mode = #tpu.pipeline_mode<synchronous>, transform_indices = @transform_10, window_bounds = array<i64: 1, 64>}, {pipeline_mode = #tpu.pipeline_mode<synchronous>, transform_indices = @transform_11, window_bounds = array<i64: 128, 64>}, {pipeline_mode = #tpu.pipeline_mode<synchronous>, transform_indices = @transform_12, window_bounds = array<i64: 1, 64>}, {pipeline_mode = #tpu.pipeline_mode<synchronous>, transform_indices = @transform_13, window_bounds = array<i64: 64, 128>}, {pipeline_mode = #tpu.pipeline_mode<synchronous>, transform_indices = @transform_14, window_bounds = array<i64: 1, 128>}, {transform_indices = @transform_15, window_bounds = array<i64: 1, 16, 128>}]} {
    %c0 = arith.constant 0 : index
    %c0_0 = arith.constant 0 : index
    %c0_1 = arith.constant 0 : index
    %0 = vector.load %arg2[%c0, %c0_0, %c0_1] : memref<1x6x128xbf16, #tpu.memory_space<vmem>>, vector<1x6x128xbf16>
    %1 = vector.shape_cast %0 : vector<1x6x128xbf16> to vector<6x128xbf16>
    %2 = arith.extf %1 : vector<6x128xbf16> to vector<6x128xf32>
    %c0_2 = arith.constant 0 : index
    %c0_3 = arith.constant 0 : index
    %3 = vector.load %arg3[%c0_2, %c0_3] : memref<6x64xbf16, #tpu.memory_space<vmem>>, vector<6x64xbf16>
    %4 = arith.extf %3 : vector<6x64xbf16> to vector<6x64xf32>
    %cst = arith.constant dense<0.000000e+00> : vector<128x64xf32>
    %5 = tpu.matmul %2, %4, %cst {dimension_numbers = #tpu.dot_dimension_numbers<[0], [0], [1], [1], [0, 1, 1, 1], [], []>} : vector<6x128xf32>, vector<6x64xf32>, vector<128x64xf32> -> vector<128x64xf32>
    %c0_4 = arith.constant 0 : index
    %c0_5 = arith.constant 0 : index
    %6 = vector.load %arg4[%c0_4, %c0_5] : memref<1x64xf32, #tpu.memory_space<vmem>>, vector<1x64xf32>
    %7 = vector.broadcast %6 : vector<1x64xf32> to vector<128x64xf32>
    %8 = arith.addf %5, %7 : vector<128x64xf32>
    %cst_6 = arith.constant 0.000000e+00 : f32
    %9 = vector.broadcast %cst_6 : f32 to vector<128x64xf32>
    %10 = arith.maximumf %8, %9 : vector<128x64xf32>
    %11 = arith.truncf %10 : vector<128x64xf32> to vector<128x64xbf16>
    %c0_7 = arith.constant 0 : index
    %c0_8 = arith.constant 0 : index
    %12 = vector.load %arg5[%c0_7, %c0_8] : memref<64x64xbf16, #tpu.memory_space<vmem>>, vector<64x64xbf16>
    %cst_9 = arith.constant dense<0.000000e+00> : vector<128x64xf32>
    %13 = tpu.matmul %11, %12, %cst_9 {dimension_numbers = #tpu.dot_dimension_numbers<[1], [0], [0], [1], [0, 0, 1, 1], [], []>} : vector<128x64xbf16>, vector<64x64xbf16>, vector<128x64xf32> -> vector<128x64xf32>
    %c0_10 = arith.constant 0 : index
    %c0_11 = arith.constant 0 : index
    %14 = vector.load %arg6[%c0_10, %c0_11] : memref<1x64xf32, #tpu.memory_space<vmem>>, vector<1x64xf32>
    %15 = vector.broadcast %14 : vector<1x64xf32> to vector<128x64xf32>
    %16 = arith.addf %13, %15 : vector<128x64xf32>
    %cst_12 = arith.constant 0.000000e+00 : f32
    %17 = vector.broadcast %cst_12 : f32 to vector<128x64xf32>
    %18 = arith.maximumf %16, %17 : vector<128x64xf32>
    %19 = arith.truncf %18 : vector<128x64xf32> to vector<128x64xbf16>
    %c0_13 = arith.constant 0 : index
    %c0_14 = arith.constant 0 : index
    %20 = vector.load %arg7[%c0_13, %c0_14] : memref<64x128xbf16, #tpu.memory_space<vmem>>, vector<64x128xbf16>
    %cst_15 = arith.constant dense<0.000000e+00> : vector<128x128xf32>
    %21 = tpu.matmul %19, %20, %cst_15 {dimension_numbers = #tpu.dot_dimension_numbers<[1], [0], [0], [1], [0, 0, 1, 1], [], []>} : vector<128x64xbf16>, vector<64x128xbf16>, vector<128x128xf32> -> vector<128x128xf32>
    %c0_16 = arith.constant 0 : index
    %c0_17 = arith.constant 0 : index
    %22 = vector.load %arg8[%c0_16, %c0_17] : memref<1x128xf32, #tpu.memory_space<vmem>>, vector<1x128xf32>
    %23 = vector.broadcast %22 : vector<1x128xf32> to vector<128x128xf32>
    %24 = arith.addf %21, %23 : vector<128x128xf32>
    %cst_18 = arith.constant 0.000000e+00 : f32
    %25 = vector.broadcast %cst_18 : f32 to vector<128x128xf32>
    %26 = arith.maximumf %24, %25 : vector<128x128xf32>
    %27 = vector.shape_cast %26 : vector<128x128xf32> to vector<16x8x128xf32>
    %cst_19 = arith.constant dense<0xFF800000> : vector<16x128xf32>
    %28 = vector.multi_reduction <maximumf>, %27, %cst_19 [1] : vector<16x8x128xf32> to vector<16x128xf32>
    %c0_20 = arith.constant 0 : index
    %c0_21 = arith.constant 0 : index
    %29 = vector.load %arg18[%c0_20, %c0_21] : memref<16x128xf32, #tpu.memory_space<vmem>>, vector<16x128xf32>
    tpu.vector_store %arg18[%c0_20, %c0_21], %28 {strides = array<i32>} : memref<16x128xf32, #tpu.memory_space<vmem>>, vector<16x128xf32>,
    %c0_i32 = arith.constant 0 : i32
    %30 = arith.cmpi eq, %arg1, %c0_i32 : i32
    %31 = arith.extui %30 : i1 to i32
    %c0_i32_22 = arith.constant 0 : i32
    %32 = arith.cmpi ne, %31, %c0_i32_22 : i32
    scf.if %32 {
      %c0_23 = arith.constant 0 : index
      %c0_24 = arith.constant 0 : index
      %33 = vector.load %arg18[%c0_23, %c0_24] : memref<16x128xf32, #tpu.memory_space<vmem>>, vector<16x128xf32>
      %34 = arith.truncf %33 : vector<16x128xf32> to vector<16x128xbf16>
      %c0_25 = arith.constant 0 : index
      %c0_26 = arith.constant 0 : index
      %35 = vector.load %arg9[%c0_25, %c0_26] : memref<128x64xbf16, #tpu.memory_space<vmem>>, vector<128x64xbf16>
      %cst_27 = arith.constant dense<0.000000e+00> : vector<16x64xf32>
      %36 = tpu.matmul %34, %35, %cst_27 {dimension_numbers = #tpu.dot_dimension_numbers<[1], [0], [0], [1], [0, 0, 1, 1], [], []>} : vector<16x128xbf16>, vector<128x64xbf16>, vector<16x64xf32> -> vector<16x64xf32>
      %c0_28 = arith.constant 0 : index
      %c0_29 = arith.constant 0 : index
      %37 = vector.load %arg10[%c0_28, %c0_29] : memref<1x64xf32, #tpu.memory_space<vmem>>, vector<1x64xf32>
      %38 = vector.broadcast %37 : vector<1x64xf32> to vector<16x64xf32>
      %39 = arith.addf %36, %38 : vector<16x64xf32>
      %40 = arith.truncf %39 : vector<16x64xf32> to vector<16x64xbf16>
      %c0_30 = arith.constant 0 : index
      %c0_31 = arith.constant 0 : index
      %41 = vector.load %arg11[%c0_30, %c0_31] : memref<128x64xbf16, #tpu.memory_space<vmem>>, vector<128x64xbf16>
      %cst_32 = arith.constant dense<0.000000e+00> : vector<16x64xf32>
      %42 = tpu.matmul %34, %41, %cst_32 {dimension_numbers = #tpu.dot_dimension_numbers<[1], [0], [0], [1], [0, 0, 1, 1], [], []>} : vector<16x128xbf16>, vector<128x64xbf16>, vector<16x64xf32> -> vector<16x64xf32>
      %c0_33 = arith.constant 0 : index
      %c0_34 = arith.constant 0 : index
      %43 = vector.load %arg12[%c0_33, %c0_34] : memref<1x64xf32, #tpu.memory_space<vmem>>, vector<1x64xf32>
      %44 = vector.broadcast %43 : vector<1x64xf32> to vector<16x64xf32>
      %45 = arith.addf %42, %44 : vector<16x64xf32>
      %46 = arith.truncf %45 : vector<16x64xf32> to vector<16x64xbf16>
      %c0_35 = arith.constant 0 : index
      %c0_36 = arith.constant 0 : index
      %47 = vector.load %arg13[%c0_35, %c0_36] : memref<128x64xbf16, #tpu.memory_space<vmem>>, vector<128x64xbf16>
      %cst_37 = arith.constant dense<0.000000e+00> : vector<16x64xf32>
      %48 = tpu.matmul %34, %47, %cst_37 {dimension_numbers = #tpu.dot_dimension_numbers<[1], [0], [0], [1], [0, 0, 1, 1], [], []>} : vector<16x128xbf16>, vector<128x64xbf16>, vector<16x64xf32> -> vector<16x64xf32>
      %c0_38 = arith.constant 0 : index
      %c0_39 = arith.constant 0 : index
      %49 = vector.load %arg14[%c0_38, %c0_39] : memref<1x64xf32, #tpu.memory_space<vmem>>, vector<1x64xf32>
      %50 = vector.broadcast %49 : vector<1x64xf32> to vector<16x64xf32>
      %51 = arith.addf %48, %50 : vector<16x64xf32>
      %52 = arith.truncf %51 : vector<16x64xf32> to vector<16x64xbf16>
      %cst_40 = arith.constant dense<0.000000e+00> : vector<16x16xf32>
      %53 = tpu.matmul %40, %46, %cst_40 {dimension_numbers = #tpu.dot_dimension_numbers<[1], [1], [0], [0], [0, 0, 1, 0], [], []>} : vector<16x64xbf16>, vector<16x64xbf16>, vector<16x16xf32> -> vector<16x16xf32>
      %cst_41 = arith.constant dense<0xFF800000> : vector<16xf32>
      %54 = vector.multi_reduction <maximumf>, %53, %cst_41 [1] : vector<16x16xf32> to vector<16xf32>
      %55 = vector.shape_cast %54 : vector<16xf32> to vector<16x1xf32>
      %56 = vector.broadcast %55 : vector<16x1xf32> to vector<16x16xf32>
      %57 = arith.subf %53, %56 : vector<16x16xf32>
      %58 = math.exp %57 : vector<16x16xf32>
      %cst_42 = arith.constant dense<0.000000e+00> : vector<16xf32>
      %59 = vector.multi_reduction <add>, %58, %cst_42 [1] : vector<16x16xf32> to vector<16xf32>
      %60 = vector.shape_cast %59 : vector<16xf32> to vector<16x1xf32>
      %61 = tpu.reciprocal %60 {approx = true} : vector<16x1xf32> -> vector<16x1xf32>
      %62 = vector.broadcast %61 : vector<16x1xf32> to vector<16x16xf32>
      %63 = arith.mulf %58, %62 : vector<16x16xf32>
      %64 = arith.truncf %63 : vector<16x16xf32> to vector<16x16xbf16>
      %cst_43 = arith.constant dense<0.000000e+00> : vector<16x64xf32>
      %65 = tpu.matmul %64, %52, %cst_43 {dimension_numbers = #tpu.dot_dimension_numbers<[1], [0], [0], [1], [0, 0, 1, 1], [], []>} : vector<16x16xbf16>, vector<16x64xbf16>, vector<16x64xf32> -> vector<16x64xf32>
      %66 = arith.truncf %65 : vector<16x64xf32> to vector<16x64xbf16>
      %c0_44 = arith.constant 0 : index
      %c0_45 = arith.constant 0 : index
      %67 = vector.load %arg15[%c0_44, %c0_45] : memref<64x128xbf16, #tpu.memory_space<vmem>>, vector<64x128xbf16>
      %cst_46 = arith.constant dense<0.000000e+00> : vector<16x128xf32>
      %68 = tpu.matmul %66, %67, %cst_46 {dimension_numbers = #tpu.dot_dimension_numbers<[1], [0], [0], [1], [0, 0, 1, 1], [], []>} : vector<16x64xbf16>, vector<64x128xbf16>, vector<16x128xf32> -> vector<16x128xf32>
      %c0_47 = arith.constant 0 : index
      %c0_48 = arith.constant 0 : index
      %69 = vector.load %arg16[%c0_47, %c0_48] : memref<1x128xf32, #tpu.memory_space<vmem>>, vector<1x128xf32>
      %70 = vector.broadcast %69 : vector<1x128xf32> to vector<16x128xf32>
      %71 = arith.addf %68, %70 : vector<16x128xf32>
      %72 = arith.addf %71, %33 : vector<16x128xf32>
      %73 = arith.truncf %72 : vector<16x128xf32> to vector<16x128xbf16>
      %c0_49 = arith.constant 0 : index
      %c0_50 = arith.constant 0 : index
      %c0_51 = arith.constant 0 : index
      %74 = vector.load %arg17[%c0_49, %c0_50, %c0_51] : memref<1x16x128xbf16, #tpu.memory_space<vmem>>, vector<1x16x128xbf16>
      %75 = vector.shape_cast %74 : vector<1x16x128xbf16> to vector<16x128xbf16>
      %76 = vector.shape_cast %73 : vector<16x128xbf16> to vector<1x16x128xbf16>
      tpu.vector_store %arg17[%c0_49, %c0_50, %c0_51], %76 {strides = array<i32>} : memref<1x16x128xbf16, #tpu.memory_space<vmem>>, vector<1x16x128xbf16>,
    } else {
    }
    return
  }
  func.func @transform_0(%arg0: i32, %arg1: i32) -> (i32, i32, i32) {
    %c0_i32 = arith.constant 0 : i32
    %c0_i32_0 = arith.constant 0 : i32
    return %arg0, %c0_i32, %arg1 : i32, i32, i32
  }
  func.func @transform_1(%arg0: i32, %arg1: i32) -> (i32, i32) {
    %c0_i32 = arith.constant 0 : i32
    %c0_i32_0 = arith.constant 0 : i32
    %c0_i32_1 = arith.constant 0 : i32
    return %c0_i32, %c0_i32_0 : i32, i32
  }
  func.func @transform_2(%arg0: i32, %arg1: i32) -> (i32, i32) {
    %c0_i32 = arith.constant 0 : i32
    %c0_i32_0 = arith.constant 0 : i32
    %c0_i32_1 = arith.constant 0 : i32
    return %c0_i32, %c0_i32_0 : i32, i32
  }
  func.func @transform_3(%arg0: i32, %arg1: i32) -> (i32, i32) {
    %c0_i32 = arith.constant 0 : i32
    %c0_i32_0 = arith.constant 0 : i32
    %c0_i32_1 = arith.constant 0 : i32
    return %c0_i32, %c0_i32_0 : i32, i32
  }
  func.func @transform_4(%arg0: i32, %arg1: i32) -> (i32, i32) {
    %c0_i32 = arith.constant 0 : i32
    %c0_i32_0 = arith.constant 0 : i32
    %c0_i32_1 = arith.constant 0 : i32
    return %c0_i32, %c0_i32_0 : i32, i32
  }
  func.func @transform_5(%arg0: i32, %arg1: i32) -> (i32, i32) {
    %c0_i32 = arith.constant 0 : i32
    %c0_i32_0 = arith.constant 0 : i32
    %c0_i32_1 = arith.constant 0 : i32
    return %c0_i32, %c0_i32_0 : i32, i32
  }
  func.func @transform_6(%arg0: i32, %arg1: i32) -> (i32, i32) {
    %c0_i32 = arith.constant 0 : i32
    %c0_i32_0 = arith.constant 0 : i32
    %c0_i32_1 = arith.constant 0 : i32
    return %c0_i32, %c0_i32_0 : i32, i32
  }
  func.func @transform_7(%arg0: i32, %arg1: i32) -> (i32, i32) {
    %c0_i32 = arith.constant 0 : i32
    %c0_i32_0 = arith.constant 0 : i32
    %c0_i32_1 = arith.constant 0 : i32
    return %c0_i32, %c0_i32_0 : i32, i32
  }
  func.func @transform_8(%arg0: i32, %arg1: i32) -> (i32, i32) {
    %c0_i32 = arith.constant 0 : i32
    %c0_i32_0 = arith.constant 0 : i32
    %c0_i32_1 = arith.constant 0 : i32
    return %c0_i32, %c0_i32_0 : i32, i32
  }
  func.func @transform_9(%arg0: i32, %arg1: i32) -> (i32, i32) {
    %c0_i32 = arith.constant 0 : i32
    %c0_i32_0 = arith.constant 0 : i32
    %c0_i32_1 = arith.constant 0 : i32
    return %c0_i32, %c0_i32_0 : i32, i32
  }
  func.func @transform_10(%arg0: i32, %arg1: i32) -> (i32, i32) {
    %c0_i32 = arith.constant 0 : i32
    %c0_i32_0 = arith.constant 0 : i32
    %c0_i32_1 = arith.constant 0 : i32
    return %c0_i32, %c0_i32_0 : i32, i32
  }
  func.func @transform_11(%arg0: i32, %arg1: i32) -> (i32, i32) {
    %c0_i32 = arith.constant 0 : i32
    %c0_i32_0 = arith.constant 0 : i32
    %c0_i32_1 = arith.constant 0 : i32
    return %c0_i32, %c0_i32_0 : i32, i32
  }
  func.func @transform_12(%arg0: i32, %arg1: i32) -> (i32, i32) {
    %c0_i32 = arith.constant 0 : i32
    %c0_i32_0 = arith.constant 0 : i32
    %c0_i32_1 = arith.constant 0 : i32
    return %c0_i32, %c0_i32_0 : i32, i32
  }
  func.func @transform_13(%arg0: i32, %arg1: i32) -> (i32, i32) {
    %c0_i32 = arith.constant 0 : i32
    %c0_i32_0 = arith.constant 0 : i32
    %c0_i32_1 = arith.constant 0 : i32
    return %c0_i32, %c0_i32_0 : i32, i32
  }
  func.func @transform_14(%arg0: i32, %arg1: i32) -> (i32, i32) {
    %c0_i32 = arith.constant 0 : i32
    %c0_i32_0 = arith.constant 0 : i32
    %c0_i32_1 = arith.constant 0 : i32
    return %c0_i32, %c0_i32_0 : i32, i32
  }
  func.func @transform_15(%arg0: i32, %arg1: i32) -> (i32, i32, i32) {
    %c0_i32 = arith.constant 0 : i32
    %c0_i32_0 = arith.constant 0 : i32
    %c0_i32_1 = arith.constant 0 : i32
    return %arg0, %c0_i32, %c0_i32_0 : i32, i32, i32
  }
}

module attributes {stable_mosaic.version = 11 : i64} {
  func.func @_mlp_pool_kernel(%arg0: i32, %arg1: memref<128x3xbf16, #tpu.memory_space<vmem>>, %arg2: memref<128x128xbf16, #tpu.memory_space<vmem>>, %arg3: memref<3x128xbf16, #tpu.memory_space<vmem>>, %arg4: memref<128x128xbf16, #tpu.memory_space<vmem>>, %arg5: memref<1x128xf32, #tpu.memory_space<vmem>>, %arg6: memref<128x128xbf16, #tpu.memory_space<vmem>>, %arg7: memref<1x128xf32, #tpu.memory_space<vmem>>, %arg8: memref<128x256xbf16, #tpu.memory_space<vmem>>, %arg9: memref<1x256xf32, #tpu.memory_space<vmem>>, %arg10: memref<16x256xbf16, #tpu.memory_space<vmem>>) attributes {dimension_semantics = [#tpu.dimension_semantics<parallel>], iteration_bounds = array<i64: 1>, scalar_prefetch = 0 : i64, scratch_operands = 0 : i64, tpu.core_type = #tpu.core_type<tc>, window_params = [{transform_indices = @transform_0, window_bounds = array<i64: 128, 3>}, {transform_indices = @transform_1, window_bounds = array<i64: 128, 128>}, {pipeline_mode = #tpu.pipeline_mode<synchronous>, transform_indices = @transform_2, window_bounds = array<i64: 3, 128>}, {pipeline_mode = #tpu.pipeline_mode<synchronous>, transform_indices = @transform_3, window_bounds = array<i64: 128, 128>}, {pipeline_mode = #tpu.pipeline_mode<synchronous>, transform_indices = @transform_4, window_bounds = array<i64: 1, 128>}, {pipeline_mode = #tpu.pipeline_mode<synchronous>, transform_indices = @transform_5, window_bounds = array<i64: 128, 128>}, {pipeline_mode = #tpu.pipeline_mode<synchronous>, transform_indices = @transform_6, window_bounds = array<i64: 1, 128>}, {pipeline_mode = #tpu.pipeline_mode<synchronous>, transform_indices = @transform_7, window_bounds = array<i64: 128, 256>}, {pipeline_mode = #tpu.pipeline_mode<synchronous>, transform_indices = @transform_8, window_bounds = array<i64: 1, 256>}, {transform_indices = @transform_9, window_bounds = array<i64: 16, 256>}]} {
    %c0 = arith.constant 0 : index
    %c0_0 = arith.constant 0 : index
    %0 = vector.load %arg2[%c0, %c0_0] : memref<128x128xbf16, #tpu.memory_space<vmem>>, vector<128x128xbf16>
    %c0_1 = arith.constant 0 : index
    %c0_2 = arith.constant 0 : index
    %1 = vector.load %arg4[%c0_1, %c0_2] : memref<128x128xbf16, #tpu.memory_space<vmem>>, vector<128x128xbf16>
    %cst = arith.constant dense<0.000000e+00> : vector<128x128xf32>
    %2 = tpu.matmul %0, %1, %cst {dimension_numbers = #tpu.dot_dimension_numbers<[1], [0], [0], [1], [0, 0, 1, 1], [], []>} : vector<128x128xbf16>, vector<128x128xbf16>, vector<128x128xf32> -> vector<128x128xf32>
    %c0_3 = arith.constant 0 : index
    %c0_4 = arith.constant 0 : index
    %3 = vector.load %arg1[%c0_3, %c0_4] : memref<128x3xbf16, #tpu.memory_space<vmem>>, vector<128x3xbf16>
    %c0_5 = arith.constant 0 : index
    %c0_6 = arith.constant 0 : index
    %4 = vector.load %arg3[%c0_5, %c0_6] : memref<3x128xbf16, #tpu.memory_space<vmem>>, vector<3x128xbf16>
    %cst_7 = arith.constant dense<0.000000e+00> : vector<128x128xf32>
    %5 = tpu.matmul %3, %4, %cst_7 {dimension_numbers = #tpu.dot_dimension_numbers<[1], [0], [0], [1], [0, 0, 1, 1], [], []>} : vector<128x3xbf16>, vector<3x128xbf16>, vector<128x128xf32> -> vector<128x128xf32>
    %6 = arith.addf %2, %5 : vector<128x128xf32>
    %c0_8 = arith.constant 0 : index
    %c0_9 = arith.constant 0 : index
    %7 = vector.load %arg5[%c0_8, %c0_9] : memref<1x128xf32, #tpu.memory_space<vmem>>, vector<1x128xf32>
    %8 = vector.broadcast %7 : vector<1x128xf32> to vector<128x128xf32>
    %9 = arith.addf %6, %8 : vector<128x128xf32>
    %cst_10 = arith.constant 0.000000e+00 : f32
    %10 = vector.broadcast %cst_10 : f32 to vector<128x128xf32>
    %11 = arith.maximumf %9, %10 : vector<128x128xf32>
    %12 = arith.truncf %11 : vector<128x128xf32> to vector<128x128xbf16>
    %c0_11 = arith.constant 0 : index
    %c0_12 = arith.constant 0 : index
    %13 = vector.load %arg6[%c0_11, %c0_12] : memref<128x128xbf16, #tpu.memory_space<vmem>>, vector<128x128xbf16>
    %cst_13 = arith.constant dense<0.000000e+00> : vector<128x128xf32>
    %14 = tpu.matmul %12, %13, %cst_13 {dimension_numbers = #tpu.dot_dimension_numbers<[1], [0], [0], [1], [0, 0, 1, 1], [], []>} : vector<128x128xbf16>, vector<128x128xbf16>, vector<128x128xf32> -> vector<128x128xf32>
    %c0_14 = arith.constant 0 : index
    %c0_15 = arith.constant 0 : index
    %15 = vector.load %arg7[%c0_14, %c0_15] : memref<1x128xf32, #tpu.memory_space<vmem>>, vector<1x128xf32>
    %16 = vector.broadcast %15 : vector<1x128xf32> to vector<128x128xf32>
    %17 = arith.addf %14, %16 : vector<128x128xf32>
    %cst_16 = arith.constant 0.000000e+00 : f32
    %18 = vector.broadcast %cst_16 : f32 to vector<128x128xf32>
    %19 = arith.maximumf %17, %18 : vector<128x128xf32>
    %20 = arith.truncf %19 : vector<128x128xf32> to vector<128x128xbf16>
    %c0_17 = arith.constant 0 : index
    %c0_18 = arith.constant 0 : index
    %21 = vector.load %arg8[%c0_17, %c0_18] : memref<128x256xbf16, #tpu.memory_space<vmem>>, vector<128x256xbf16>
    %cst_19 = arith.constant dense<0.000000e+00> : vector<128x256xf32>
    %22 = tpu.matmul %20, %21, %cst_19 {dimension_numbers = #tpu.dot_dimension_numbers<[1], [0], [0], [1], [0, 0, 1, 1], [], []>} : vector<128x128xbf16>, vector<128x256xbf16>, vector<128x256xf32> -> vector<128x256xf32>
    %c0_20 = arith.constant 0 : index
    %c0_21 = arith.constant 0 : index
    %23 = vector.load %arg9[%c0_20, %c0_21] : memref<1x256xf32, #tpu.memory_space<vmem>>, vector<1x256xf32>
    %24 = vector.broadcast %23 : vector<1x256xf32> to vector<128x256xf32>
    %25 = arith.addf %22, %24 : vector<128x256xf32>
    %cst_22 = arith.constant 0.000000e+00 : f32
    %26 = vector.broadcast %cst_22 : f32 to vector<128x256xf32>
    %27 = arith.maximumf %25, %26 : vector<128x256xf32>
    %28 = vector.shape_cast %27 : vector<128x256xf32> to vector<16x8x256xf32>
    %cst_23 = arith.constant dense<0xFF800000> : vector<16x256xf32>
    %29 = vector.multi_reduction <maximumf>, %28, %cst_23 [1] : vector<16x8x256xf32> to vector<16x256xf32>
    %30 = arith.truncf %29 : vector<16x256xf32> to vector<16x256xbf16>
    %c0_24 = arith.constant 0 : index
    %c0_25 = arith.constant 0 : index
    %31 = vector.load %arg10[%c0_24, %c0_25] : memref<16x256xbf16, #tpu.memory_space<vmem>>, vector<16x256xbf16>
    tpu.vector_store %arg10[%c0_24, %c0_25], %30 {strides = array<i32>} : memref<16x256xbf16, #tpu.memory_space<vmem>>, vector<16x256xbf16>,
    return
  }
  func.func @transform_0(%arg0: i32) -> (i32, i32) {
    %c0_i32 = arith.constant 0 : i32
    %c0_i32_0 = arith.constant 0 : i32
    return %arg0, %c0_i32 : i32, i32
  }
  func.func @transform_1(%arg0: i32) -> (i32, i32) {
    %c0_i32 = arith.constant 0 : i32
    %c0_i32_0 = arith.constant 0 : i32
    return %arg0, %c0_i32 : i32, i32
  }
  func.func @transform_2(%arg0: i32) -> (i32, i32) {
    %c0_i32 = arith.constant 0 : i32
    %c0_i32_0 = arith.constant 0 : i32
    %c0_i32_1 = arith.constant 0 : i32
    return %c0_i32, %c0_i32_0 : i32, i32
  }
  func.func @transform_3(%arg0: i32) -> (i32, i32) {
    %c0_i32 = arith.constant 0 : i32
    %c0_i32_0 = arith.constant 0 : i32
    %c0_i32_1 = arith.constant 0 : i32
    return %c0_i32, %c0_i32_0 : i32, i32
  }
  func.func @transform_4(%arg0: i32) -> (i32, i32) {
    %c0_i32 = arith.constant 0 : i32
    %c0_i32_0 = arith.constant 0 : i32
    %c0_i32_1 = arith.constant 0 : i32
    return %c0_i32, %c0_i32_0 : i32, i32
  }
  func.func @transform_5(%arg0: i32) -> (i32, i32) {
    %c0_i32 = arith.constant 0 : i32
    %c0_i32_0 = arith.constant 0 : i32
    %c0_i32_1 = arith.constant 0 : i32
    return %c0_i32, %c0_i32_0 : i32, i32
  }
  func.func @transform_6(%arg0: i32) -> (i32, i32) {
    %c0_i32 = arith.constant 0 : i32
    %c0_i32_0 = arith.constant 0 : i32
    %c0_i32_1 = arith.constant 0 : i32
    return %c0_i32, %c0_i32_0 : i32, i32
  }
  func.func @transform_7(%arg0: i32) -> (i32, i32) {
    %c0_i32 = arith.constant 0 : i32
    %c0_i32_0 = arith.constant 0 : i32
    %c0_i32_1 = arith.constant 0 : i32
    return %c0_i32, %c0_i32_0 : i32, i32
  }
  func.func @transform_8(%arg0: i32) -> (i32, i32) {
    %c0_i32 = arith.constant 0 : i32
    %c0_i32_0 = arith.constant 0 : i32
    %c0_i32_1 = arith.constant 0 : i32
    return %c0_i32, %c0_i32_0 : i32, i32
  }
  func.func @transform_9(%arg0: i32) -> (i32, i32) {
    %c0_i32 = arith.constant 0 : i32
    %c0_i32_0 = arith.constant 0 : i32
    return %arg0, %c0_i32 : i32, i32
  }
}

module attributes {stable_mosaic.version = 11 : i64} {
  func.func @_netr3_fc_kernel(%arg0: i32, %arg1: memref<2x8x3xbf16, #tpu.memory_space<vmem>>, %arg2: memref<2x8x256xbf16, #tpu.memory_space<vmem>>, %arg3: memref<3x256xbf16, #tpu.memory_space<vmem>>, %arg4: memref<256x256xbf16, #tpu.memory_space<vmem>>, %arg5: memref<1x256xf32, #tpu.memory_space<vmem>>, %arg6: memref<256x512xbf16, #tpu.memory_space<vmem>>, %arg7: memref<1x512xf32, #tpu.memory_space<vmem>>, %arg8: memref<512x1024xbf16, #tpu.memory_space<vmem>>, %arg9: memref<1x1024xf32, #tpu.memory_space<vmem>>, %arg10: memref<1x1024xf32, #tpu.memory_space<vmem>>, %arg11: memref<1x1024xf32, #tpu.memory_space<vmem>>, %arg12: memref<1024x256xbf16, #tpu.memory_space<vmem>>, %arg13: memref<1x256xf32, #tpu.memory_space<vmem>>, %arg14: memref<256x128xbf16, #tpu.memory_space<vmem>>, %arg15: memref<1x128xf32, #tpu.memory_space<vmem>>, %arg16: memref<2x128xf32, #tpu.memory_space<vmem>>) attributes {dimension_semantics = [#tpu.dimension_semantics<parallel>], iteration_bounds = array<i64: 1>, scalar_prefetch = 0 : i64, scratch_operands = 0 : i64, tpu.core_type = #tpu.core_type<tc>, window_params = [{transform_indices = @transform_0, window_bounds = array<i64: 2, 8, 3>}, {transform_indices = @transform_1, window_bounds = array<i64: 2, 8, 256>}, {pipeline_mode = #tpu.pipeline_mode<synchronous>, transform_indices = @transform_2, window_bounds = array<i64: 3, 256>}, {pipeline_mode = #tpu.pipeline_mode<synchronous>, transform_indices = @transform_3, window_bounds = array<i64: 256, 256>}, {pipeline_mode = #tpu.pipeline_mode<synchronous>, transform_indices = @transform_4, window_bounds = array<i64: 1, 256>}, {pipeline_mode = #tpu.pipeline_mode<synchronous>, transform_indices = @transform_5, window_bounds = array<i64: 256, 512>}, {pipeline_mode = #tpu.pipeline_mode<synchronous>, transform_indices = @transform_6, window_bounds = array<i64: 1, 512>}, {pipeline_mode = #tpu.pipeline_mode<synchronous>, transform_indices = @transform_7, window_bounds = array<i64: 512, 1024>}, {pipeline_mode = #tpu.pipeline_mode<synchronous>, transform_indices = @transform_8, window_bounds = array<i64: 1, 1024>}, {pipeline_mode = #tpu.pipeline_mode<synchronous>, transform_indices = @transform_9, window_bounds = array<i64: 1, 1024>}, {pipeline_mode = #tpu.pipeline_mode<synchronous>, transform_indices = @transform_10, window_bounds = array<i64: 1, 1024>}, {pipeline_mode = #tpu.pipeline_mode<synchronous>, transform_indices = @transform_11, window_bounds = array<i64: 1024, 256>}, {pipeline_mode = #tpu.pipeline_mode<synchronous>, transform_indices = @transform_12, window_bounds = array<i64: 1, 256>}, {pipeline_mode = #tpu.pipeline_mode<synchronous>, transform_indices = @transform_13, window_bounds = array<i64: 256, 128>}, {pipeline_mode = #tpu.pipeline_mode<synchronous>, transform_indices = @transform_14, window_bounds = array<i64: 1, 128>}, {transform_indices = @transform_15, window_bounds = array<i64: 2, 128>}]} {
    %c0 = arith.constant 0 : index
    %c0_0 = arith.constant 0 : index
    %c0_1 = arith.constant 0 : index
    %0 = vector.load %arg1[%c0, %c0_0, %c0_1] : memref<2x8x3xbf16, #tpu.memory_space<vmem>>, vector<2x8x3xbf16>
    %c0_2 = arith.constant 0 : index
    %c0_3 = arith.constant 0 : index
    %c0_4 = arith.constant 0 : index
    %1 = vector.load %arg2[%c0_2, %c0_3, %c0_4] : memref<2x8x256xbf16, #tpu.memory_space<vmem>>, vector<2x8x256xbf16>
    %2 = vector.shape_cast %1 : vector<2x8x256xbf16> to vector<16x256xbf16>
    %3 = vector.shape_cast %0 : vector<2x8x3xbf16> to vector<16x3xbf16>
    %c0_5 = arith.constant 0 : index
    %c0_6 = arith.constant 0 : index
    %4 = vector.load %arg4[%c0_5, %c0_6] : memref<256x256xbf16, #tpu.memory_space<vmem>>, vector<256x256xbf16>
    %cst = arith.constant dense<0.000000e+00> : vector<16x256xf32>
    %5 = tpu.matmul %2, %4, %cst {dimension_numbers = #tpu.dot_dimension_numbers<[1], [0], [0], [1], [0, 0, 1, 1], [], []>} : vector<16x256xbf16>, vector<256x256xbf16>, vector<16x256xf32> -> vector<16x256xf32>
    %c0_7 = arith.constant 0 : index
    %c0_8 = arith.constant 0 : index
    %6 = vector.load %arg3[%c0_7, %c0_8] : memref<3x256xbf16, #tpu.memory_space<vmem>>, vector<3x256xbf16>
    %cst_9 = arith.constant dense<0.000000e+00> : vector<16x256xf32>
    %7 = tpu.matmul %3, %6, %cst_9 {dimension_numbers = #tpu.dot_dimension_numbers<[1], [0], [0], [1], [0, 0, 1, 1], [], []>} : vector<16x3xbf16>, vector<3x256xbf16>, vector<16x256xf32> -> vector<16x256xf32>
    %8 = arith.addf %5, %7 : vector<16x256xf32>
    %c0_10 = arith.constant 0 : index
    %c0_11 = arith.constant 0 : index
    %9 = vector.load %arg5[%c0_10, %c0_11] : memref<1x256xf32, #tpu.memory_space<vmem>>, vector<1x256xf32>
    %10 = vector.broadcast %9 : vector<1x256xf32> to vector<16x256xf32>
    %11 = arith.addf %8, %10 : vector<16x256xf32>
    %cst_12 = arith.constant 0.000000e+00 : f32
    %12 = vector.broadcast %cst_12 : f32 to vector<16x256xf32>
    %13 = arith.maximumf %11, %12 : vector<16x256xf32>
    %14 = arith.truncf %13 : vector<16x256xf32> to vector<16x256xbf16>
    %c0_13 = arith.constant 0 : index
    %c0_14 = arith.constant 0 : index
    %15 = vector.load %arg6[%c0_13, %c0_14] : memref<256x512xbf16, #tpu.memory_space<vmem>>, vector<256x512xbf16>
    %cst_15 = arith.constant dense<0.000000e+00> : vector<16x512xf32>
    %16 = tpu.matmul %14, %15, %cst_15 {dimension_numbers = #tpu.dot_dimension_numbers<[1], [0], [0], [1], [0, 0, 1, 1], [], []>} : vector<16x256xbf16>, vector<256x512xbf16>, vector<16x512xf32> -> vector<16x512xf32>
    %c0_16 = arith.constant 0 : index
    %c0_17 = arith.constant 0 : index
    %17 = vector.load %arg7[%c0_16, %c0_17] : memref<1x512xf32, #tpu.memory_space<vmem>>, vector<1x512xf32>
    %18 = vector.broadcast %17 : vector<1x512xf32> to vector<16x512xf32>
    %19 = arith.addf %16, %18 : vector<16x512xf32>
    %cst_18 = arith.constant 0.000000e+00 : f32
    %20 = vector.broadcast %cst_18 : f32 to vector<16x512xf32>
    %21 = arith.maximumf %19, %20 : vector<16x512xf32>
    %22 = arith.truncf %21 : vector<16x512xf32> to vector<16x512xbf16>
    %c0_19 = arith.constant 0 : index
    %c0_20 = arith.constant 0 : index
    %23 = vector.load %arg8[%c0_19, %c0_20] : memref<512x1024xbf16, #tpu.memory_space<vmem>>, vector<512x1024xbf16>
    %cst_21 = arith.constant dense<0.000000e+00> : vector<16x1024xf32>
    %24 = tpu.matmul %22, %23, %cst_21 {dimension_numbers = #tpu.dot_dimension_numbers<[1], [0], [0], [1], [0, 0, 1, 1], [], []>} : vector<16x512xbf16>, vector<512x1024xbf16>, vector<16x1024xf32> -> vector<16x1024xf32>
    %c0_22 = arith.constant 0 : index
    %c0_23 = arith.constant 0 : index
    %25 = vector.load %arg9[%c0_22, %c0_23] : memref<1x1024xf32, #tpu.memory_space<vmem>>, vector<1x1024xf32>
    %26 = vector.broadcast %25 : vector<1x1024xf32> to vector<16x1024xf32>
    %27 = arith.addf %24, %26 : vector<16x1024xf32>
    %cst_24 = arith.constant 0.000000e+00 : f32
    %28 = vector.broadcast %cst_24 : f32 to vector<16x1024xf32>
    %29 = arith.maximumf %27, %28 : vector<16x1024xf32>
    %30 = vector.shape_cast %29 : vector<16x1024xf32> to vector<2x8x1024xf32>
    %cst_25 = arith.constant dense<0xFF800000> : vector<2x1024xf32>
    %31 = vector.multi_reduction <maximumf>, %30, %cst_25 [1] : vector<2x8x1024xf32> to vector<2x1024xf32>
    %c0_26 = arith.constant 0 : index
    %c0_27 = arith.constant 0 : index
    %32 = vector.load %arg10[%c0_26, %c0_27] : memref<1x1024xf32, #tpu.memory_space<vmem>>, vector<1x1024xf32>
    %33 = vector.broadcast %32 : vector<1x1024xf32> to vector<2x1024xf32>
    %34 = arith.mulf %31, %33 : vector<2x1024xf32>
    %c0_28 = arith.constant 0 : index
    %c0_29 = arith.constant 0 : index
    %35 = vector.load %arg11[%c0_28, %c0_29] : memref<1x1024xf32, #tpu.memory_space<vmem>>, vector<1x1024xf32>
    %36 = vector.broadcast %35 : vector<1x1024xf32> to vector<2x1024xf32>
    %37 = arith.addf %34, %36 : vector<2x1024xf32>
    %cst_30 = arith.constant 0.000000e+00 : f32
    %38 = vector.broadcast %cst_30 : f32 to vector<2x1024xf32>
    %39 = arith.maximumf %37, %38 : vector<2x1024xf32>
    %40 = arith.truncf %39 : vector<2x1024xf32> to vector<2x1024xbf16>
    %c0_31 = arith.constant 0 : index
    %c0_32 = arith.constant 0 : index
    %41 = vector.load %arg12[%c0_31, %c0_32] : memref<1024x256xbf16, #tpu.memory_space<vmem>>, vector<1024x256xbf16>
    %cst_33 = arith.constant dense<0.000000e+00> : vector<2x256xf32>
    %42 = tpu.matmul %40, %41, %cst_33 {dimension_numbers = #tpu.dot_dimension_numbers<[1], [0], [0], [1], [0, 0, 1, 1], [], []>} : vector<2x1024xbf16>, vector<1024x256xbf16>, vector<2x256xf32> -> vector<2x256xf32>
    %c0_34 = arith.constant 0 : index
    %c0_35 = arith.constant 0 : index
    %43 = vector.load %arg13[%c0_34, %c0_35] : memref<1x256xf32, #tpu.memory_space<vmem>>, vector<1x256xf32>
    %44 = vector.broadcast %43 : vector<1x256xf32> to vector<2x256xf32>
    %45 = arith.addf %42, %44 : vector<2x256xf32>
    %cst_36 = arith.constant 0.000000e+00 : f32
    %46 = vector.broadcast %cst_36 : f32 to vector<2x256xf32>
    %47 = arith.maximumf %45, %46 : vector<2x256xf32>
    %48 = arith.truncf %47 : vector<2x256xf32> to vector<2x256xbf16>
    %c0_37 = arith.constant 0 : index
    %c0_38 = arith.constant 0 : index
    %49 = vector.load %arg14[%c0_37, %c0_38] : memref<256x128xbf16, #tpu.memory_space<vmem>>, vector<256x128xbf16>
    %cst_39 = arith.constant dense<0.000000e+00> : vector<2x128xf32>
    %50 = tpu.matmul %48, %49, %cst_39 {dimension_numbers = #tpu.dot_dimension_numbers<[1], [0], [0], [1], [0, 0, 1, 1], [], []>} : vector<2x256xbf16>, vector<256x128xbf16>, vector<2x128xf32> -> vector<2x128xf32>
    %c0_40 = arith.constant 0 : index
    %c0_41 = arith.constant 0 : index
    %51 = vector.load %arg15[%c0_40, %c0_41] : memref<1x128xf32, #tpu.memory_space<vmem>>, vector<1x128xf32>
    %52 = vector.broadcast %51 : vector<1x128xf32> to vector<2x128xf32>
    %53 = arith.addf %50, %52 : vector<2x128xf32>
    %c0_42 = arith.constant 0 : index
    %c0_43 = arith.constant 0 : index
    %54 = vector.load %arg16[%c0_42, %c0_43] : memref<2x128xf32, #tpu.memory_space<vmem>>, vector<2x128xf32>
    tpu.vector_store %arg16[%c0_42, %c0_43], %53 {strides = array<i32>} : memref<2x128xf32, #tpu.memory_space<vmem>>, vector<2x128xf32>,
    return
  }
  func.func @transform_0(%arg0: i32) -> (i32, i32, i32) {
    %c0_i32 = arith.constant 0 : i32
    %c0_i32_0 = arith.constant 0 : i32
    %c0_i32_1 = arith.constant 0 : i32
    return %arg0, %c0_i32, %c0_i32_0 : i32, i32, i32
  }
  func.func @transform_1(%arg0: i32) -> (i32, i32, i32) {
    %c0_i32 = arith.constant 0 : i32
    %c0_i32_0 = arith.constant 0 : i32
    %c0_i32_1 = arith.constant 0 : i32
    return %arg0, %c0_i32, %c0_i32_0 : i32, i32, i32
  }
  func.func @transform_2(%arg0: i32) -> (i32, i32) {
    %c0_i32 = arith.constant 0 : i32
    %c0_i32_0 = arith.constant 0 : i32
    %c0_i32_1 = arith.constant 0 : i32
    return %c0_i32, %c0_i32_0 : i32, i32
  }
  func.func @transform_3(%arg0: i32) -> (i32, i32) {
    %c0_i32 = arith.constant 0 : i32
    %c0_i32_0 = arith.constant 0 : i32
    %c0_i32_1 = arith.constant 0 : i32
    return %c0_i32, %c0_i32_0 : i32, i32
  }
  func.func @transform_4(%arg0: i32) -> (i32, i32) {
    %c0_i32 = arith.constant 0 : i32
    %c0_i32_0 = arith.constant 0 : i32
    %c0_i32_1 = arith.constant 0 : i32
    return %c0_i32, %c0_i32_0 : i32, i32
  }
  func.func @transform_5(%arg0: i32) -> (i32, i32) {
    %c0_i32 = arith.constant 0 : i32
    %c0_i32_0 = arith.constant 0 : i32
    %c0_i32_1 = arith.constant 0 : i32
    return %c0_i32, %c0_i32_0 : i32, i32
  }
  func.func @transform_6(%arg0: i32) -> (i32, i32) {
    %c0_i32 = arith.constant 0 : i32
    %c0_i32_0 = arith.constant 0 : i32
    %c0_i32_1 = arith.constant 0 : i32
    return %c0_i32, %c0_i32_0 : i32, i32
  }
  func.func @transform_7(%arg0: i32) -> (i32, i32) {
    %c0_i32 = arith.constant 0 : i32
    %c0_i32_0 = arith.constant 0 : i32
    %c0_i32_1 = arith.constant 0 : i32
    return %c0_i32, %c0_i32_0 : i32, i32
  }
  func.func @transform_8(%arg0: i32) -> (i32, i32) {
    %c0_i32 = arith.constant 0 : i32
    %c0_i32_0 = arith.constant 0 : i32
    %c0_i32_1 = arith.constant 0 : i32
    return %c0_i32, %c0_i32_0 : i32, i32
  }
  func.func @transform_9(%arg0: i32) -> (i32, i32) {
    %c0_i32 = arith.constant 0 : i32
    %c0_i32_0 = arith.constant 0 : i32
    %c0_i32_1 = arith.constant 0 : i32
    return %c0_i32, %c0_i32_0 : i32, i32
  }
  func.func @transform_10(%arg0: i32) -> (i32, i32) {
    %c0_i32 = arith.constant 0 : i32
    %c0_i32_0 = arith.constant 0 : i32
    %c0_i32_1 = arith.constant 0 : i32
    return %c0_i32, %c0_i32_0 : i32, i32
  }
  func.func @transform_11(%arg0: i32) -> (i32, i32) {
    %c0_i32 = arith.constant 0 : i32
    %c0_i32_0 = arith.constant 0 : i32
    %c0_i32_1 = arith.constant 0 : i32
    return %c0_i32, %c0_i32_0 : i32, i32
  }
  func.func @transform_12(%arg0: i32) -> (i32, i32) {
    %c0_i32 = arith.constant 0 : i32
    %c0_i32_0 = arith.constant 0 : i32
    %c0_i32_1 = arith.constant 0 : i32
    return %c0_i32, %c0_i32_0 : i32, i32
  }
  func.func @transform_13(%arg0: i32) -> (i32, i32) {
    %c0_i32 = arith.constant 0 : i32
    %c0_i32_0 = arith.constant 0 : i32
    %c0_i32_1 = arith.constant 0 : i32
    return %c0_i32, %c0_i32_0 : i32, i32
  }
  func.func @transform_14(%arg0: i32) -> (i32, i32) {
    %c0_i32 = arith.constant 0 : i32
    %c0_i32_0 = arith.constant 0 : i32
    %c0_i32_1 = arith.constant 0 : i32
    return %c0_i32, %c0_i32_0 : i32, i32
  }
  func.func @transform_15(%arg0: i32) -> (i32, i32) {
    %c0_i32 = arith.constant 0 : i32
    %c0_i32_0 = arith.constant 0 : i32
    return %arg0, %c0_i32 : i32, i32
  }
}

</mosaic_0001>

<bundles_post_ra>
// kernel: attension_point_forward.4
= control target key start
LH: loop header
LB: loop body
LE: loop exit
PB: predicated region body
PF: predicated region fallthrough
CT: control target
= control target key end

     0   :  { %14 = vsyncpa [#allocation3], 0  ;;  %s2155_s0 = inlined_call_operand.vmem [shape: bf16[128,3], index: 0, kind: input, shape index: {}]   ;;  %s2156_s1 = inlined_call_operand.vmem [shape: bf16[128,128], index: 1, kind: input, shape index: {}]   ;;  %s2157_s2 = inlined_call_operand.hbm [shape: bf16[3,128], index: 2, kind: input, shape index: {}]   ;;  %s2158_s3 = inlined_call_operand.hbm [shape: bf16[128,128], index: 3, kind: input, shape index: {}]   ;;  %s2159_s4 = inlined_call_operand.hbm [shape: f32[1,128], index: 4, kind: input, shape index: {}]   ;;  %s2160_s5 = inlined_call_operand.hbm [shape: bf16[128,128], index: 5, kind: input, shape index: {}]   ;;  %s2161_s6 = inlined_call_operand.hbm [shape: f32[1,128], index: 6, kind: input, shape index: {}]   ;;  %s2162_s7 = inlined_call_operand.hbm [shape: bf16[128,256], index: 7, kind: input, shape index: {}]   ;;  %s2163_s8 = inlined_call_operand.hbm [shape: f32[1,256], index: 8, kind: input, shape index: {}]   ;;  %s2164_s9 = inlined_call_operand.vmem [shape: bf16[16,256], index: 9, kind: output, shape index: {}]  }
   0x1   :  { %15 = vsyncpa [#allocation5], 0 }
   0x2   :  { %16 = vsyncpa [#allocation8], 0 }
   0x3   :  { %17 = vsyncpa [#allocation11], 0  ;;  %s1868_s30 = smov [#allocation4]   ;;  %s1706_s13 = scalar_lea.hbm %s2158_s3, 1024 }
   0x4   :  { %s37_s10 = sshll.u32 %s1868_s30, 4  ;;  %p1707_p0 = scmp.ne.s32.totalorder %s2158_s3, %s1706_s13  ;;  %s38_s10 = int_to_ptr.vmem [resolvable:$true] %s37_s10 }
   0x5   :  { %p1710_p1 = scmp.lt.u32.totalorder %s1706_s13, %s2158_s3 }
   0x7   :  { %p1712_p2 = pnand %p1710_p1, %p1707_p0 }
   0x9   :  { %1715 = shalt.err (!%p1712_p2)
}
   0xa   :  { %s1716_s18 = scalar_lea.vmem %s38_s10, 1024  ;;  %p1721_p4 = scmp.lt.s32.totalorder %s38_s10, %s38_s10 }
   0xb   :  { %p1717_p3 = scmp.ne.s32.totalorder %s38_s10, %s1716_s18  ;;  %p1722_p5 = scmp.lt.s32.totalorder %s1716_s18, %s1716_s18 }
   0xd   :  { %p1723_p6 = por %p1722_p5, %p1721_p4 }
   0xf   :  { %p1724_p7 = pnand %p1723_p6, %p1717_p3 }
  0x11   :  { %1727 = shalt.err (!%p1724_p7)
}
  0x12   :  { %s1869_s19 = smov 64   ;;  %s1870_s20 = smov 4  }
  0x13   :  { %43 = dma.hbm_to_vmem [thread:$0]  %s2158_s3, 1024, %s38_s10, [#allocation5], %s1869_s19, %s1869_s19, %s1870_s20  }
  0x14   :  { %s1871_s23 = smov [#allocation7]   ;;  %s1872_s25 = smov [#allocation10]  }
  0x15   :  { %s59_s24 = sshll.u32 %s1871_s23, 4  ;;  %s81_s26 = sshll.u32 %s1872_s25, 4  ;;  %s60_s24 = int_to_ptr.vmem [resolvable:$true] %s59_s24  ;;  %s82_s26 = int_to_ptr.vmem [resolvable:$true] %s81_s26 }
  0x16   :  { %s1728_s29 = scalar_lea.hbm %s2160_s5, 1024 }
  0x17   :  { %p1729_p8 = scmp.ne.s32.totalorder %s2160_s5, %s1728_s29  ;;  %p1732_p9 = scmp.lt.u32.totalorder %s1728_s29, %s2160_s5 }
  0x19   :  { %p1734_p10 = pnand %p1732_p9, %p1729_p8 }
  0x1b   :  { %1737 = shalt.err (!%p1734_p10)
}
  0x1c   :  { %s1738_s3 = scalar_lea.vmem %s60_s24, 1024  ;;  %p1743_p12 = scmp.lt.s32.totalorder %s60_s24, %s60_s24 }
  0x1d   :  { %p1739_p11 = scmp.ne.s32.totalorder %s60_s24, %s1738_s3  ;;  %p1744_p13 = scmp.lt.s32.totalorder %s1738_s3, %s1738_s3 }
  0x1f   :  { %p1745_p0 = por %p1744_p13, %p1743_p12 }
  0x21   :  { %p1746_p1 = pnand %p1745_p0, %p1739_p11 }
  0x23   :  { %1749 = shalt.err (!%p1746_p1)
}
  0x24   :  { %65 = dma.hbm_to_vmem [thread:$0]  %s2160_s5, 1024, %s60_s24, [#allocation8], %s1869_s19, %s1869_s19, %s1870_s20  }
  0x25   :  { %s1750_s17 = scalar_lea.hbm %s2162_s7, 2048 }
  0x26   :  { %p1751_p2 = scmp.ne.s32.totalorder %s2162_s7, %s1750_s17  ;;  %p1754_p3 = scmp.lt.u32.totalorder %s1750_s17, %s2162_s7 }
  0x28   :  { %p1756_p4 = pnand %p1754_p3, %p1751_p2 }
  0x2a   :  { %1759 = shalt.err (!%p1756_p4)
}
  0x2b   :  { %s1760_s25 = scalar_lea.vmem %s82_s26, 2048  ;;  %p1765_p6 = scmp.lt.s32.totalorder %s82_s26, %s82_s26 }
  0x2c   :  { %p1761_p5 = scmp.ne.s32.totalorder %s82_s26, %s1760_s25  ;;  %p1766_p7 = scmp.lt.s32.totalorder %s1760_s25, %s1760_s25 }
  0x2e   :  { %p1767_p8 = por %p1766_p7, %p1765_p6 }
  0x30   :  { %p1768_p9 = pnand %p1767_p8, %p1761_p5 }
  0x32   :  { %1771 = shalt.err (!%p1768_p9)
}
  0x33   :  { %s1873_s5 = smov 128   ;;  %s1874_s19 = smov 8  }
  0x34   :  { %87 = dma.hbm_to_vmem [thread:$0]  %s2162_s7, 2048, %s82_s26, [#allocation11], %s1873_s5, %s1873_s5, %s1874_s19  }
  0x35   :  { %s1875_s27 = smov [#allocation2]   ;;  %s1876_s29 = smov [#allocation6]  }
  0x36   :  { %s28_s28 = sshll.u32 %s1875_s27, 4  ;;  %s50_s30 = sshll.u32 %s1876_s29, 4  ;;  %s29_s28 = int_to_ptr.vmem [resolvable:$true] %s28_s28  ;;  %s51_s30 = int_to_ptr.vmem [resolvable:$true] %s50_s30 }
  0x37   :  { %s1772_s13 = scalar_lea.hbm %s2157_s2, 32 }
  0x38   :  { %p1773_p10 = scmp.ne.s32.totalorder %s2157_s2, %s1772_s13  ;;  %p1776_p11 = scmp.lt.u32.totalorder %s1772_s13, %s2157_s2 }
  0x3a   :  { %p1778_p12 = pnand %p1776_p11, %p1773_p10 }
  0x3c   :  { %1781 = shalt.err (!%p1778_p12)
}
  0x3d   :  { %s1782_s7 = scalar_lea.vmem %s29_s28, 32  ;;  %p1787_p0 = scmp.lt.s32.totalorder %s29_s28, %s29_s28 }
  0x3e   :  { %p1783_p13 = scmp.ne.s32.totalorder %s29_s28, %s1782_s7  ;;  %p1788_p1 = scmp.lt.s32.totalorder %s1782_s7, %s1782_s7 }
  0x40   :  { %p1789_p2 = por %p1788_p1, %p1787_p0 }
  0x42   :  { %p1790_p3 = pnand %p1789_p2, %p1783_p13 }
  0x44   :  { %1793 = shalt.err (!%p1790_p3)
}
  0x45   :  { %31 = dma.hbm_to_vmem [thread:$0]  %s2157_s2, 32, %s29_s28, [#allocation3]  }
  0x46   :  { %s1794_s21 = scalar_lea.hbm %s2159_s4, 16 }
  0x47   :  { %p1795_p4 = scmp.ne.s32.totalorder %s2159_s4, %s1794_s21  ;;  %p1798_p5 = scmp.lt.u32.totalorder %s1794_s21, %s2159_s4 }
  0x49   :  { %p1800_p6 = pnand %p1798_p5, %p1795_p4 }
  0x4b   :  { %1803 = shalt.err (!%p1800_p6)
}
  0x4c   :  { %s1804_s19 = scalar_lea.vmem %s51_s30, 16  ;;  %s1808_s20 = scalar_lea.vmem %s51_s30, 32 }
  0x4d   :  { %p1805_p7 = scmp.ne.s32.totalorder %s51_s30, %s1804_s19  ;;  %p1809_p8 = scmp.lt.s32.totalorder %s51_s30, %s51_s30 }
  0x4e   :  { %p1810_p9 = scmp.lt.s32.totalorder %s1808_s20, %s1804_s19 }
  0x50   :  { %p1811_p10 = por %p1810_p9, %p1809_p8 }
  0x52   :  { %p1812_p11 = pnand %p1811_p10, %p1805_p7 }
  0x54   :  { %1815 = shalt.err (!%p1812_p11)
}
  0x55   :  { %53 = dma.hbm_to_vmem [thread:$0]  %s2159_s4, 16, %s51_s30, [#allocation5]  }
  0x56   :  { %s1877_s27 = smov [#allocation9]   ;;  %s1878_s29 = smov [#allocation12]  }
  0x57   :  { %s72_s28 = sshll.u32 %s1877_s27, 4  ;;  %s94_s11 = sshll.u32 %s1878_s29, 4  ;;  %s73_s28 = int_to_ptr.vmem [resolvable:$true] %s72_s28  ;;  %s95_s11 = int_to_ptr.vmem [resolvable:$true] %s94_s11 }
  0x58   :  { %s1816_s3 = scalar_lea.hbm %s2161_s6, 16 }
  0x59   :  { %p1817_p12 = scmp.ne.s32.totalorder %s2161_s6, %s1816_s3  ;;  %p1820_p13 = scmp.lt.u32.totalorder %s1816_s3, %s2161_s6 }
  0x5b   :  { %p1822_p0 = pnand %p1820_p13, %p1817_p12 }
  0x5d   :  { %1825 = shalt.err (!%p1822_p0)
}
  0x5e   :  { %s1826_s4 = scalar_lea.vmem %s73_s28, 16  ;;  %s1830_s30 = scalar_lea.vmem %s73_s28, 32 }
  0x5f   :  { %p1827_p1 = scmp.ne.s32.totalorder %s73_s28, %s1826_s4  ;;  %p1831_p2 = scmp.lt.s32.totalorder %s73_s28, %s73_s28 }
  0x60   :  { %p1832_p3 = scmp.lt.s32.totalorder %s1830_s30, %s1826_s4 }
  0x62   :  { %p1833_p4 = por %p1832_p3, %p1831_p2 }
  0x64   :  { %p1834_p5 = pnand %p1833_p4, %p1827_p1 }
  0x66   :  { %1837 = shalt.err (!%p1834_p5)
}
  0x67   :  { %75 = dma.hbm_to_vmem [thread:$0]  %s2161_s6, 16, %s73_s28, [#allocation8]  }
  0x68   :  { %s1838_s21 = scalar_lea.hbm %s2163_s8, 32 }
  0x69   :  { %p1839_p6 = scmp.ne.s32.totalorder %s2163_s8, %s1838_s21  ;;  %p1842_p7 = scmp.lt.u32.totalorder %s1838_s21, %s2163_s8 }
  0x6b   :  { %p1844_p8 = pnand %p1842_p7, %p1839_p6 }
  0x6d   :  { %1847 = shalt.err (!%p1844_p8)
}
  0x6e   :  { %s1848_s19 = scalar_lea.vmem %s95_s11, 32  ;;  %p1853_p10 = scmp.lt.s32.totalorder %s95_s11, %s95_s11 }
  0x6f   :  { %p1849_p9 = scmp.ne.s32.totalorder %s95_s11, %s1848_s19  ;;  %p1854_p11 = scmp.lt.s32.totalorder %s1848_s19, %s1848_s19 }
  0x71   :  { %p1855_p12 = por %p1854_p11, %p1853_p10 }
  0x73   :  { %p1856_p13 = pnand %p1855_p12, %p1849_p9 }
  0x75   :  { %1859 = shalt.err (!%p1856_p13)
}
  0x76   :  { %97 = dma.hbm_to_vmem [thread:$0]  %s2163_s8, 32, %s95_s11, [#allocation11]  }
  0x77   :  { %1860 = dma.done.wait [#allocation3], 32  }
  0x78   :  { %1861 = vsyncadd [#allocation3], 4294967264 }
  0x79   :  { %1862 = dma.done.wait [#allocation5], 1040  }
  0x7a   :  { %1863 = vsyncadd [#allocation5], 4294966256 }
  0x7b   :  { %1864 = dma.done.wait [#allocation8], 1040  }
  0x7c   :  { %1865 = vsyncadd [#allocation8], 4294966256 }
  0x7d   :  { %1866 = dma.done.wait [#allocation11], 2080  }
  0x7e   :  { %1867 = vsyncadd [#allocation11], 4294965216  ;;  %vm234_vm0 = vcmask 1040384   ;;  %vm235_vm1 = vcmask 1041408   ;;  %v1879_v0 = vmov 65535   ;;  %vm209_vm2 = vcmask 23552  }
  0x7f   :  { %v236_v1 = vsel %vm234_vm0, 4294967295, %v1879_v0  ;;  %v168_v3 = vld [vmem:[#allocation2] sm:$0x3]  ;;  %v1651_v6 = vld [vmem:[%s2155_s0 + $0x8] sm:$0xff]   ;;  %v1654_v9 = vld [vmem:[%s2155_s0 + $0x10] sm:$0xff]   ;;  %vm1359_vm3 = vcmask 1041409  }
  0x80   :  { %v237_v2 = vsel %vm235_vm1, %v236_v1, 0  ;;  %v1650_v5 = vld [vmem:[%s2155_s0] sm:$0xff]   ;;  %v1653_v8 = vld [vmem:[#allocation4 + $0x8] sm:$0xff]   ;;  %v1656_v10 = vld [vmem:[#allocation4 + $0x10] sm:$0xff]   ;;  %vm1361_vm4 = vcmask 1042434   ;;  %vm1363_vm5 = vcmask 1043459  }
  0x81   :  { %v239_v4 = vand.u32 %v237_v2, %v168_v3  ;;  %1541 = vmatprep.mubr.msk.bf16.mxu0 %vm209_vm2, %v1650_v5  ;;  %v1652_v7 = vld [vmem:[#allocation4] sm:$0xff]   ;;  %v1655_v11 = vld [vmem:[%s2155_s0 + $0x18] sm:$0xff]   ;;  %v1662_v16 = vld [vmem:[%s2155_s0 + $0x30] sm:$0xff]   ;;  %vm1365_vm6 = vcmask 1044484   ;;  %vm1367_vm7 = vcmask 1045509   ;;  %vm1369_vm8 = vcmask 1046534  }
  0x82   :  { %v1658_v12 = vld [vmem:[%s2155_s0 + $0x20] sm:$0xff]   ;;  %v1659_v15 = vld [vmem:[%s2155_s0 + $0x28] sm:$0xff]   ;;  %v1664_v18 = vld [vmem:[#allocation4 + $0x30] sm:$0xff]   ;;  %vm1371_vm9 = vcmask 1047559  }
  0x83   :  { %1539 = vmatprep.subr.bf16.mxu0 %v239_v4  ;;  %v1657_v13 = vld [vmem:[#allocation4 + $0x18] sm:$0xff]   ;;  %v1660_v14 = vld [vmem:[#allocation4 + $0x20] sm:$0xff]   ;;  %v1661_v17 = vld [vmem:[#allocation4 + $0x28] sm:$0xff]  }
  0x84   :  { %1540 = vmatpush3.bf16.msra.mxu0 %v239_v4  ;;  %v1663_v19 = vld [vmem:[%s2155_s0 + $0x38] sm:$0xff]   ;;  %v1666_v20 = vld [vmem:[%s2156_s1] sm:$0xff]   ;;  %v1667_v23 = vld [vmem:[%s2156_s1 + $0x8] sm:$0xff]  }
  0x85   :  { %1557 = vmatprep.subr.bf16.mxu0 %v1652_v7  ;;  %v1665_v21 = vld [vmem:[#allocation4 + $0x38] sm:$0xff]   ;;  %v1674_v22 = vld [vmem:[#allocation7] sm:$0xff]   ;;  %v1668_v24 = vld [vmem:[%s2156_s1 + $0x10] sm:$0xff]  }
  0x86   :  { %v1675_v25 = vld [vmem:[#allocation7 + $0x8] sm:$0xff]   ;;  %v1676_v26 = vld [vmem:[#allocation7 + $0x10] sm:$0xff]   ;;  %v1670_v28 = vld [vmem:[%s2156_s1 + $0x20] sm:$0xff]  }
  0x87   :  { %1542 = vmatmul.mubr.msk.bf16.vlgmr.msra.gmra.mrb[0].mxu0 %vm209_vm2, %v1651_v6  ;;  %v1669_v27 = vld [vmem:[%s2156_s1 + $0x18] sm:$0xff]   ;;  %v1678_v30 = vld [vmem:[#allocation7 + $0x20] sm:$0xff]   ;;  %v1672_v32 = vld [vmem:[%s2156_s1 + $0x30] sm:$0xff]  }
  0x88   :  { %1558 = vmatpush3.bf16.msra.mxu0 %v1652_v7  ;;  %1545 = vmatprep.mubr.msk.bf16.mxu0 %vm209_vm2, %v1654_v9  ;;  %v1677_v29 = vld [vmem:[#allocation7 + $0x18] sm:$0xff]   ;;  %v1671_v31 = vld [vmem:[%s2156_s1 + $0x28] sm:$0xff]   ;;  %v1680_v35 = vld [vmem:[#allocation7 + $0x30] sm:$0xff]  }
  0x89   :  { %1559 = vmatprep.subr.bf16.mxu0 %v1653_v8  ;;  %v1679_v33 = vld [vmem:[#allocation7 + $0x28] sm:$0xff]   ;;  %v1673_v34 = vld [vmem:[%s2156_s1 + $0x38] sm:$0xff]   ;;  %v1440_v49 = vld [vmem:[#allocation6] ss:$0 sm:$0xff] }
  0x8a   :  { %v1681_v36 = vld [vmem:[#allocation7 + $0x38] sm:$0xff]   ;;  %v1682_v37 = vld [vmem:[#allocation10 + $0x4] ss:$8 sps:$4 sm:$0xff]   ;;  %v1684_v38 = vld [vmem:[#allocation10] ss:$8 sps:$4 sm:$0xff]  }
  0x8b   :  { %v1685_v39 = vld [vmem:[#allocation10 + $0x14] ss:$8 sps:$4 sm:$0xff]   ;;  %878 = vmatprep.subr.bf16.mxu1 %v1682_v37  ;;  %v1687_v40 = vld [vmem:[#allocation10 + $0x10] ss:$8 sps:$4 sm:$0xff]   ;;  %v1688_v41 = vld [vmem:[#allocation10 + $0x24] ss:$8 sps:$4 sm:$0xff]  }
  0x8c   :  { %1560 = vmatpush3.bf16.msra.mxu0 %v1653_v8  ;;  %879 = vmatpush1.bf16.msra.mxu1 %v1684_v38  ;;  %v1690_v42 = vld [vmem:[#allocation10 + $0x20] ss:$8 sps:$4 sm:$0xff]   ;;  %v1691_v43 = vld [vmem:[#allocation10 + $0x34] ss:$8 sps:$4 sm:$0xff]   ;;  %v1693_v44 = vld [vmem:[#allocation10 + $0x30] ss:$8 sps:$4 sm:$0xff]  }
  0x8d   :  { %1561 = vmatprep.subr.bf16.mxu0 %v1656_v10  ;;  %880 = vmatprep.subr.bf16.mxu1 %v1685_v39  ;;  %v1694_v45 = vld [vmem:[#allocation10 + $0x44] ss:$8 sps:$4 sm:$0xff]   ;;  %v1696_v46 = vld [vmem:[#allocation10 + $0x40] ss:$8 sps:$4 sm:$0xff]   ;;  %v1697_v47 = vld [vmem:[#allocation10 + $0x54] ss:$8 sps:$4 sm:$0xff]  }
  0x8e   :  { %v1699_v48 = vld [vmem:[#allocation10 + $0x50] ss:$8 sps:$4 sm:$0xff]  }
  0x8f   :  { %1546 = vmatmul.mubr.msk.bf16.gmra.mrb[4].mxu0 %vm209_vm2, %v1655_v11 }
  0x90   :  { %1562 = vmatpush3.bf16.msra.mxu0 %v1656_v10  ;;  %1549 = vmatprep.mubr.msk.bf16.mxu0 %vm209_vm2, %v1658_v12 }
  0x91   :  { %1563 = vmatprep.subr.bf16.mxu0 %v1657_v13  ;;  %881 = vmatpush1.bf16.msra.mxu1 %v1687_v40 }
  0x92   :  { %882 = vmatprep.subr.bf16.mxu1 %v1688_v41 }
  0x94   :  { %1564 = vmatpush3.bf16.msra.mxu0 %v1657_v13 }
  0x95   :  { %1565 = vmatprep.subr.bf16.mxu0 %v1660_v14  ;;  %883 = vmatpush1.bf16.msra.mxu1 %v1690_v42  ;;  %v1700_v42 = vld [vmem:[#allocation10 + $0x64] ss:$8 sps:$4 sm:$0xff]  }
  0x96   :  { %884 = vmatprep.subr.bf16.mxu1 %v1691_v43  ;;  %v1702_v43 = vld [vmem:[#allocation10 + $0x60] ss:$8 sps:$4 sm:$0xff]  }
  0x97   :  { %1550 = vmatmul.mubr.msk.bf16.gmra.mrb[8].mxu0 %vm209_vm2, %v1659_v15 }
  0x98   :  { %1566 = vmatpush3.bf16.msra.mxu0 %v1660_v14  ;;  %1553 = vmatprep.mubr.msk.bf16.mxu0 %vm209_vm2, %v1662_v16 }
  0x99   :  { %1567 = vmatprep.subr.bf16.mxu0 %v1661_v17  ;;  %885 = vmatpush1.bf16.msra.mxu1 %v1693_v44  ;;  %v1703_v44 = vld [vmem:[#allocation10 + $0x74] ss:$8 sps:$4 sm:$0xff]  }
  0x9a   :  { %886 = vmatprep.subr.bf16.mxu1 %v1694_v45  ;;  %v1705_v45 = vld [vmem:[#allocation10 + $0x70] ss:$8 sps:$4 sm:$0xff]  }
  0x9c   :  { %1568 = vmatpush3.bf16.msra.mxu0 %v1661_v17 }
  0x9d   :  { %1569 = vmatprep.subr.bf16.mxu0 %v1664_v18  ;;  %887 = vmatpush1.bf16.msra.mxu1 %v1696_v46  ;;  %v1880_v46 = vmov 0  }
  0x9e   :  { %888 = vmatprep.subr.bf16.mxu1 %v1697_v47  ;;  %910 = vmatprep.mubr.bf16.mxu1 %v1880_v46  ;;  %v1441_v47 = vld [vmem:[#allocation9] ss:$0 sm:$0xff] }
  0x9f   :  { %1554 = vmatmul.mubr.msk.bf16.gmra.mrb[12].mxu0 %vm209_vm2, %v1663_v19 }
  0xa0   :  { %1570 = vmatpush3.bf16.msra.mxu0 %v1664_v18  ;;  %1573 = vmatprep.mubr.bf16.mxu0 %v1666_v20 }
  0xa1   :  { %1571 = vmatprep.subr.bf16.mxu0 %v1665_v21  ;;  %889 = vmatpush1.bf16.msra.mxu1 %v1699_v48 }
  0xa2   :  { %890 = vmatprep.subr.bf16.mxu1 %v1700_v42 }
  0xa4   :  { %1572 = vmatpush3.bf16.msra.mxu0 %v1665_v21 }
  0xa5   :  { %1589 = vmatprep.subr.bf16.mxu0 %v1674_v22  ;;  %891 = vmatpush1.bf16.msra.mxu1 %v1702_v43  ;;  %v786_v43 = vld [vmem:[#allocation12] sm:$0x3] }
  0xa6   :  { %892 = vmatprep.subr.bf16.mxu1 %v1703_v44 }
  0xa7   :  { %1574 = vmatmul.mubr.bf16.vlgmr.msra.gmra.mrb[0].mxu0 %v1667_v23 }
  0xa8   :  { %1577 = vmatprep.mubr.bf16.mxu0 %v1668_v24  ;;  %1590 = vmatpush3.bf16.msra.mxu0 %v1674_v22 }
  0xa9   :  { %1591 = vmatprep.subr.bf16.mxu0 %v1675_v25  ;;  %893 = vmatpush1.bf16.msra.mxu1 %v1705_v45 }
  0xac   :  { %1592 = vmatpush3.bf16.msra.mxu0 %v1675_v25 }
  0xad   :  { %1593 = vmatprep.subr.bf16.mxu0 %v1676_v26 }
  0xaf   :  { %1578 = vmatmul.mubr.bf16.gmra.mrb[4].mxu0 %v1669_v27 }
  0xb0   :  { %1581 = vmatprep.mubr.bf16.mxu0 %v1670_v28  ;;  %1594 = vmatpush3.bf16.msra.mxu0 %v1676_v26 }
  0xb1   :  { %1595 = vmatprep.subr.bf16.mxu0 %v1677_v29 }
  0xb4   :  { %1596 = vmatpush3.bf16.msra.mxu0 %v1677_v29 }
  0xb5   :  { %1597 = vmatprep.subr.bf16.mxu0 %v1678_v30 }
  0xb7   :  { %1582 = vmatmul.mubr.bf16.gmra.mrb[8].mxu0 %v1671_v31 }
  0xb8   :  { %1585 = vmatprep.mubr.bf16.mxu0 %v1672_v32  ;;  %1598 = vmatpush3.bf16.msra.mxu0 %v1678_v30 }
  0xb9   :  { %1599 = vmatprep.subr.bf16.mxu0 %v1679_v33 }
  0xbc   :  { %1600 = vmatpush3.bf16.msra.mxu0 %v1679_v33 }
  0xbd   :  { %1601 = vmatprep.subr.bf16.mxu0 %v1680_v35 }
  0xbf   :  { %1586 = vmatmul.mubr.bf16.gmra.mrb[12].mxu0 %v1673_v34 }
  0xc0   :  { %1602 = vmatpush3.bf16.msra.mxu0 %v1680_v35 }
  0xc1   :  { %1603 = vmatprep.subr.bf16.mxu0 %v1681_v36 }
  0xc4   :  { %1604 = vmatpush3.bf16.msra.mxu0 %v1681_v36 }
 0x17a   :  { %v1575_v50 = vpop.f32.mrb[0].mxu0 }
 0x17b   :  { %v540_v51 = vadd.f32 %v1575_v50, %v1440_v49  ;;  %v468_v52 = vpop.f32.mrb[1].mxu0 }
 0x17c   :  { %v538_v53 = vadd.f32 %v1440_v49, %v468_v52  ;;  %v1576_v54 = vpop.f32.mrb[2].mxu0 }
 0x17d   :  { %v541_v55 = vadd.f32 %v1576_v54, %v1440_v49  ;;  %v471_v56 = vpop.f32.mrb[3].mxu0  ;;  %v556_v58 = vmax.f32 %v540_v51, 0.0 }
 0x17e   :  { %v539_v57 = vadd.f32 %v1440_v49, %v471_v56  ;;  %v554_v60 = vmax.f32 %v538_v53, 0.0 }
 0x17f   :  { %v557_v59 = vmax.f32 %v541_v55, 0.0 }
 0x180   :  { %v555_v61 = vmax.f32 %v539_v57, 0.0 }
 0x181   :  { %v571_v62 = vpack.c.bf16 %v557_v59, %v556_v58 }
 0x182   :  { %v570_v63 = vpack.c.bf16 %v555_v61, %v554_v60  ;;  %v1579_v0 = vpop.f32.mrb[4].mxu0 }
 0x183   :  { %v544_v1 = vadd.f32 %v1579_v0, %v1440_v49  ;;  %v484_v2 = vpop.f32.mrb[5].mxu0 }
 0x184   :  { %v542_v3 = vadd.f32 %v1440_v49, %v484_v2  ;;  %v1580_v4 = vpop.f32.mrb[6].mxu0  ;;  %1605 = vmatprep.mubr.bf16.mxu0 %v570_v63 }
 0x185   :  { %v545_v5 = vadd.f32 %v1580_v4, %v1440_v49  ;;  %v487_v6 = vpop.f32.mrb[7].mxu0  ;;  %1606 = vmatmul.mubr.bf16.vlgmr.msra.gmra.mrb[16].mxu0 %v571_v62  ;;  %v560_v8 = vmax.f32 %v544_v1, 0.0 }
 0x186   :  { %v543_v7 = vadd.f32 %v1440_v49, %v487_v6  ;;  %v558_v10 = vmax.f32 %v542_v3, 0.0 }
 0x187   :  { %v561_v9 = vmax.f32 %v545_v5, 0.0 }
 0x188   :  { %v559_v11 = vmax.f32 %v543_v7, 0.0 }
 0x189   :  { %v573_v12 = vpack.c.bf16 %v561_v9, %v560_v8 }
 0x18a   :  { %v572_v13 = vpack.c.bf16 %v559_v11, %v558_v10  ;;  %v1583_v14 = vpop.f32.mrb[8].mxu0 }
 0x18b   :  { %v548_v15 = vadd.f32 %v1583_v14, %v1440_v49  ;;  %v500_v16 = vpop.f32.mrb[9].mxu0 }
 0x18c   :  { %v546_v17 = vadd.f32 %v1440_v49, %v500_v16  ;;  %v1584_v18 = vpop.f32.mrb[10].mxu0  ;;  %1609 = vmatprep.mubr.bf16.mxu0 %v572_v13 }
 0x18d   :  { %v549_v19 = vadd.f32 %v1584_v18, %v1440_v49  ;;  %v503_v20 = vpop.f32.mrb[11].mxu0  ;;  %1610 = vmatmul.mubr.bf16.gmra.mrb[20].mxu0 %v573_v12  ;;  %v564_v22 = vmax.f32 %v548_v15, 0.0 }
 0x18e   :  { %v547_v21 = vadd.f32 %v1440_v49, %v503_v20  ;;  %v562_v24 = vmax.f32 %v546_v17, 0.0 }
 0x18f   :  { %v565_v23 = vmax.f32 %v549_v19, 0.0 }
 0x190   :  { %v563_v25 = vmax.f32 %v547_v21, 0.0 }
 0x191   :  { %v575_v26 = vpack.c.bf16 %v565_v23, %v564_v22 }
 0x192   :  { %v574_v27 = vpack.c.bf16 %v563_v25, %v562_v24  ;;  %v1587_v28 = vpop.f32.mrb[12].mxu0 }
 0x193   :  { %v552_v29 = vadd.f32 %v1587_v28, %v1440_v49  ;;  %v516_v30 = vpop.f32.mrb[13].mxu0 }
 0x194   :  { %v550_v31 = vadd.f32 %v1440_v49, %v516_v30  ;;  %v1588_v32 = vpop.f32.mrb[14].mxu0  ;;  %1613 = vmatprep.mubr.bf16.mxu0 %v574_v27 }
 0x195   :  { %v553_v33 = vadd.f32 %v1588_v32, %v1440_v49  ;;  %v519_v34 = vpop.f32.mrb[15].mxu0  ;;  %1614 = vmatmul.mubr.bf16.gmra.mrb[24].mxu0 %v575_v26  ;;  %v568_v36 = vmax.f32 %v552_v29, 0.0 }
 0x196   :  { %v551_v35 = vadd.f32 %v1440_v49, %v519_v34  ;;  %v566_v38 = vmax.f32 %v550_v31, 0.0 }
 0x197   :  { %v569_v37 = vmax.f32 %v553_v33, 0.0 }
 0x198   :  { %v567_v39 = vmax.f32 %v551_v35, 0.0 }
 0x199   :  { %v577_v40 = vpack.c.bf16 %v569_v37, %v568_v36 }
 0x19a   :  { %v576_v41 = vpack.c.bf16 %v567_v39, %v566_v38 }
 0x19c   :  { %1617 = vmatprep.mubr.bf16.mxu0 %v576_v41 }
 0x19d   :  { %1618 = vmatmul.mubr.bf16.gmra.mrb[28].mxu0 %v577_v40  ;;  %v788_v40 = vlaneseq }
 0x19f   :  { %v789_v41 = vshrl.u32 %v788_v40, 7 }
 0x1a1   :  { %v790_v42 = vsub.s32 0, %v789_v41  ;;  %v794_v44 = vsub.s32 1, %v789_v41 }
 0x1a3   :  { %v2079_v45 = vrot.slane %v786_v43, %v790_v42 }
 0x258   :  { %v1607_v48 = vpop.f32.mrb[16].mxu0 }
 0x259   :  { %v692_v49 = vadd.f32 %v1607_v48, %v1441_v47  ;;  %v683_v50 = vpop.f32.mrb[17].mxu0 }
 0x25a   :  { %v684_v51 = vadd.f32 %v1441_v47, %v683_v50  ;;  %v1608_v52 = vpop.f32.mrb[18].mxu0 }
 0x25b   :  { %v695_v53 = vadd.f32 %v1608_v52, %v1441_v47  ;;  %v686_v54 = vpop.f32.mrb[19].mxu0  ;;  %v748_v56 = vmax.f32 %v692_v49, 0.0 }
 0x25c   :  { %v687_v55 = vadd.f32 %v1441_v47, %v686_v54  ;;  %v746_v58 = vmax.f32 %v684_v51, 0.0 }
 0x25d   :  { %v749_v57 = vmax.f32 %v695_v53, 0.0 }
 0x25e   :  { %v747_v59 = vmax.f32 %v687_v55, 0.0 }
 0x25f   :  { %v763_v60 = vpack.c.bf16 %v749_v57, %v748_v56 }
 0x260   :  { %v762_v61 = vpack.c.bf16 %v747_v59, %v746_v58  ;;  %v1611_v62 = vpop.f32.mrb[20].mxu0 }
 0x261   :  { %v708_v63 = vadd.f32 %v1611_v62, %v1441_v47  ;;  %v699_v0 = vpop.f32.mrb[21].mxu0 }
 0x262   :  { %v700_v1 = vadd.f32 %v1441_v47, %v699_v0  ;;  %v1612_v2 = vpop.f32.mrb[22].mxu0  ;;  %911 = vmatmul.mubr.bf16.vlgmr.msra.gmra.mrb[0].mxu1 %v762_v61 }
 0x263   :  { %v711_v3 = vadd.f32 %v1612_v2, %v1441_v47  ;;  %v702_v4 = vpop.f32.mrb[23].mxu0  ;;  %920 = vmatprep.mubr.bf16.mxu1 %v1880_v46  ;;  %v752_v6 = vmax.f32 %v708_v63, 0.0 }
 0x264   :  { %v703_v5 = vadd.f32 %v1441_v47, %v702_v4  ;;  %v750_v8 = vmax.f32 %v700_v1, 0.0 }
 0x265   :  { %v753_v7 = vmax.f32 %v711_v3, 0.0 }
 0x266   :  { %v751_v9 = vmax.f32 %v703_v5, 0.0 }
 0x267   :  { %v765_v10 = vpack.c.bf16 %v753_v7, %v752_v6 }
 0x268   :  { %v764_v11 = vpack.c.bf16 %v751_v9, %v750_v8  ;;  %v1615_v12 = vpop.f32.mrb[24].mxu0 }
 0x269   :  { %v724_v13 = vadd.f32 %v1615_v12, %v1441_v47  ;;  %v715_v14 = vpop.f32.mrb[25].mxu0 }
 0x26a   :  { %v716_v15 = vadd.f32 %v1441_v47, %v715_v14  ;;  %v1616_v16 = vpop.f32.mrb[26].mxu0  ;;  %921 = vmatmul.mubr.bf16.gmra.mrb[4].mxu1 %v763_v60 }
 0x26b   :  { %v727_v17 = vadd.f32 %v1616_v16, %v1441_v47  ;;  %v718_v18 = vpop.f32.mrb[27].mxu0  ;;  %930 = vmatprep.mubr.bf16.mxu1 %v1880_v46  ;;  %v756_v20 = vmax.f32 %v724_v13, 0.0 }
 0x26c   :  { %v719_v19 = vadd.f32 %v1441_v47, %v718_v18  ;;  %v754_v22 = vmax.f32 %v716_v15, 0.0 }
 0x26d   :  { %v757_v21 = vmax.f32 %v727_v17, 0.0 }
 0x26e   :  { %v755_v23 = vmax.f32 %v719_v19, 0.0 }
 0x26f   :  { %v767_v24 = vpack.c.bf16 %v757_v21, %v756_v20 }
 0x270   :  { %v766_v25 = vpack.c.bf16 %v755_v23, %v754_v22  ;;  %v1619_v26 = vpop.f32.mrb[28].mxu0 }
 0x271   :  { %v740_v27 = vadd.f32 %v1619_v26, %v1441_v47  ;;  %v731_v28 = vpop.f32.mrb[29].mxu0 }
 0x272   :  { %v732_v29 = vadd.f32 %v1441_v47, %v731_v28  ;;  %v1620_v30 = vpop.f32.mrb[30].mxu0  ;;  %931 = vmatmul.mubr.bf16.gmra.mrb[8].mxu1 %v764_v11 }
 0x273   :  { %v743_v31 = vadd.f32 %v1620_v30, %v1441_v47  ;;  %v734_v32 = vpop.f32.mrb[31].mxu0  ;;  %940 = vmatprep.mubr.bf16.mxu1 %v1880_v46  ;;  %v760_v34 = vmax.f32 %v740_v27, 0.0 }
 0x274   :  { %v735_v33 = vadd.f32 %v1441_v47, %v734_v32  ;;  %v758_v36 = vmax.f32 %v732_v29, 0.0  ;;  %v2081_v47 = vrot.slane %v786_v43, %v794_v44 }
 0x275   :  { %v761_v35 = vmax.f32 %v743_v31, 0.0 }
 0x276   :  { %v759_v37 = vmax.f32 %v735_v33, 0.0 }
 0x277   :  { %v769_v38 = vpack.c.bf16 %v761_v35, %v760_v34 }
 0x278   :  { %v768_v39 = vpack.c.bf16 %v759_v37, %v758_v36 }
 0x27a   :  { %941 = vmatmul.mubr.bf16.gmra.mrb[12].mxu1 %v765_v10 }
 0x27b   :  { %950 = vmatprep.mubr.bf16.mxu1 %v1880_v46 }
 0x282   :  { %951 = vmatmul.mubr.bf16.gmra.mrb[16].mxu1 %v766_v25 }
 0x283   :  { %960 = vmatprep.mubr.bf16.mxu1 %v1880_v46 }
 0x28a   :  { %961 = vmatmul.mubr.bf16.gmra.mrb[20].mxu1 %v767_v24 }
 0x28b   :  { %970 = vmatprep.mubr.bf16.mxu1 %v1880_v46 }
 0x292   :  { %971 = vmatmul.mubr.bf16.gmra.mrb[24].mxu1 %v768_v39 }
 0x293   :  { %980 = vmatprep.mubr.bf16.mxu1 %v1880_v46 }
 0x29a   :  { %981 = vmatmul.mubr.bf16.gmra.mrb[28].mxu1 %v769_v38 }
 0x335   :  { %v912_v48 = vpop.f32.mrb[0].mxu1 }
 0x336   :  { %v913_v49 = vadd.f32 %v912_v48, %v2079_v45  ;;  %v914_v50 = vpop.f32.mrb[1].mxu1 }
 0x337   :  { %v915_v51 = vadd.f32 %v914_v50, %v2081_v47  ;;  %v916_v52 = vpop.f32.mrb[2].mxu1 }
 0x338   :  { %v991_v53 = vmax.f32 %v913_v49, 0.0  ;;  %v917_v46 = vadd.f32 %v916_v52, %v2079_v45  ;;  %v918_v54 = vpop.f32.mrb[3].mxu1 }
 0x339   :  { %v992_v55 = vmax.f32 %v915_v51, 0.0  ;;  %v919_v56 = vadd.f32 %v918_v54, %v2081_v47 }
 0x33a   :  { %v1023_v57 = vrot.slane %v991_v53, 4  ;;  %v993_v58 = vmax.f32 %v917_v46, 0.0 }
 0x33b   :  { %v1029_v59 = vrot.slane %v992_v55, 4  ;;  %v994_v60 = vmax.f32 %v919_v56, 0.0 }
 0x33c   :  { %v1024_v61 = vmax.f32 %v991_v53, %v1023_v57  ;;  %v1035_v62 = vrot.slane %v993_v58, 4 }
 0x33d   :  { %v1030_v63 = vmax.f32 %v992_v55, %v1029_v59  ;;  %v1041_v0 = vrot.slane %v994_v60, 4  ;;  %v922_v1 = vpop.f32.mrb[4].mxu1 }
 0x33e   :  { %v1025_v2 = vrot.slane %v1024_v61, 2  ;;  %v1036_v3 = vmax.f32 %v993_v58, %v1035_v62  ;;  %v923_v4 = vadd.f32 %v922_v1, %v2079_v45  ;;  %v924_v5 = vpop.f32.mrb[5].mxu1 }
 0x33f   :  { %v1031_v6 = vrot.slane %v1030_v63, 2  ;;  %v1042_v7 = vmax.f32 %v994_v60, %v1041_v0  ;;  %v925_v8 = vadd.f32 %v924_v5, %v2081_v47  ;;  %v926_v9 = vpop.f32.mrb[6].mxu1 }
 0x340   :  { %v1026_v10 = vmax.f32 %v1024_v61, %v1025_v2  ;;  %v1037_v11 = vrot.slane %v1036_v3, 2  ;;  %v995_v12 = vmax.f32 %v923_v4, 0.0  ;;  %v927_v13 = vadd.f32 %v926_v9, %v2079_v45  ;;  %v928_v14 = vpop.f32.mrb[7].mxu1 }
 0x341   :  { %v1032_v15 = vmax.f32 %v1030_v63, %v1031_v6  ;;  %v1043_v16 = vrot.slane %v1042_v7, 2  ;;  %v996_v17 = vmax.f32 %v925_v8, 0.0  ;;  %v929_v18 = vadd.f32 %v928_v14, %v2081_v47 }
 0x342   :  { %v1027_v19 = vrot.slane %v1026_v10, 1  ;;  %v1038_v20 = vmax.f32 %v1036_v3, %v1037_v11  ;;  %v1047_v21 = vrot.slane %v995_v12, 4  ;;  %v997_v22 = vmax.f32 %v927_v13, 0.0 }
 0x343   :  { %v1033_v23 = vrot.slane %v1032_v15, 1  ;;  %v1044_v24 = vmax.f32 %v1042_v7, %v1043_v16  ;;  %v1053_v25 = vrot.slane %v996_v17, 4  ;;  %v998_v26 = vmax.f32 %v929_v18, 0.0 }
 0x344   :  { %v1028_v27 = vmax.f32 %v1026_v10, %v1027_v19  ;;  %v1039_v28 = vrot.slane %v1038_v20, 1  ;;  %v1048_v29 = vmax.f32 %v995_v12, %v1047_v21  ;;  %v1059_v30 = vrot.slane %v997_v22, 4 }
 0x345   :  { %v1034_v31 = vmax.f32 %v1032_v15, %v1033_v23  ;;  %v1045_v32 = vrot.slane %v1044_v24, 1  ;;  %v1054_v33 = vmax.f32 %v996_v17, %v1053_v25  ;;  %v1065_v34 = vrot.slane %v998_v26, 4  ;;  %v932_v35 = vpop.f32.mrb[8].mxu1 }
 0x346   :  { %v1040_v36 = vmax.f32 %v1038_v20, %v1039_v28  ;;  %v1049_v37 = vrot.slane %v1048_v29, 2  ;;  %v1060_v38 = vmax.f32 %v997_v22, %v1059_v30  ;;  %v933_v39 = vadd.f32 %v932_v35, %v2079_v45  ;;  %v934_v40 = vpop.f32.mrb[9].mxu1 }
 0x347   :  { %v1482_v41 = vpack.c.bf16 %v1034_v31, %v1028_v27  ;;  %v1046_v42 = vmax.f32 %v1044_v24, %v1045_v32  ;;  %v1055_v43 = vrot.slane %v1054_v33, 2  ;;  %v1066_v44 = vmax.f32 %v998_v26, %v1065_v34  ;;  %v936_v48 = vpop.f32.mrb[10].mxu1 }
 0x348   :  { %v1050_v49 = vmax.f32 %v1048_v29, %v1049_v37  ;;  %v1061_v50 = vrot.slane %v1060_v38, 2  ;;  %v999_v51 = vmax.f32 %v933_v39, 0.0  ;;  %v935_v52 = vadd.f32 %v934_v40, %v2081_v47  ;;  %v938_v53 = vpop.f32.mrb[11].mxu1 }
 0x349   :  { %v1327_v46 = vunpack.c.l.b16 %v1482_v41  ;;  %v1328_v54 = vunpack.c.h.b16 %v1482_v41  ;;  %v1483_v55 = vpack.c.bf16 %v1046_v42, %v1040_v36  ;;  %v1056_v56 = vmax.f32 %v1054_v33, %v1055_v43 }
 0x34a   :  { %v1051_v57 = vrot.slane %v1050_v49, 1  ;;  %v1062_v58 = vmax.f32 %v1060_v38, %v1061_v50  ;;  %v1067_v59 = vrot.slane %v1066_v44, 2  ;;  %v1071_v60 = vrot.slane %v999_v51, 4 }
 0x34b   :  { %v1329_v61 = vunpack.c.l.b16 %v1483_v55  ;;  %v1330_v62 = vunpack.c.h.b16 %v1483_v55  ;;  %v1057_v63 = vrot.slane %v1056_v56, 1  ;;  %v1000_v0 = vmax.f32 %v935_v52, 0.0 }
 0x34c   :  { %v1052_v1 = vmax.f32 %v1050_v49, %v1051_v57  ;;  %v1063_v2 = vrot.slane %v1062_v58, 1  ;;  %v1068_v3 = vmax.f32 %v1066_v44, %v1067_v59  ;;  %v1072_v4 = vmax.f32 %v999_v51, %v1071_v60 }
 0x34d   :  { %v1360_v5 = vsel %vm1359_vm3, %v1329_v61, %v1327_v46  ;;  %v1373_v6 = vsel %vm1359_vm3, %v1330_v62, %v1328_v54  ;;  %v1058_v7 = vmax.f32 %v1056_v56, %v1057_v63  ;;  %v1077_v8 = vrot.slane %v1000_v0, 4  ;;  %v942_v9 = vpop.f32.mrb[12].mxu1 }
 0x34e   :  { %v1064_v10 = vmax.f32 %v1062_v58, %v1063_v2  ;;  %v1069_v11 = vrot.slane %v1068_v3, 1  ;;  %v1073_v12 = vrot.slane %v1072_v4, 2  ;;  %v937_v13 = vadd.f32 %v936_v48, %v2079_v45  ;;  %v944_v14 = vpop.f32.mrb[13].mxu1 }
 0x34f   :  { %v1484_v15 = vpack.c.bf16 %v1058_v7, %v1052_v1  ;;  %v1078_v16 = vmax.f32 %v1000_v0, %v1077_v8  ;;  %v939_v17 = vadd.f32 %v938_v53, %v2081_v47  ;;  %v943_v18 = vadd.f32 %v942_v9, %v2079_v45  ;;  %v946_v19 = vpop.f32.mrb[14].mxu1 }
 0x350   :  { %v1070_v20 = vmax.f32 %v1068_v3, %v1069_v11  ;;  %v1074_v21 = vmax.f32 %v1072_v4, %v1073_v12  ;;  %v1001_v22 = vmax.f32 %v937_v13, 0.0  ;;  %v945_v23 = vadd.f32 %v944_v14, %v2081_v47  ;;  %v948_v24 = vpop.f32.mrb[15].mxu1 }
 0x351   :  { %v1331_v25 = vunpack.c.l.b16 %v1484_v15  ;;  %v1332_v26 = vunpack.c.h.b16 %v1484_v15  ;;  %v1079_v27 = vrot.slane %v1078_v16, 2  ;;  %v1002_v28 = vmax.f32 %v939_v17, 0.0 }
 0x352   :  { %v1485_v29 = vpack.c.bf16 %v1070_v20, %v1064_v10  ;;  %v1075_v30 = vrot.slane %v1074_v21, 1  ;;  %v1083_v31 = vrot.slane %v1001_v22, 4  ;;  %v1003_v32 = vmax.f32 %v943_v18, 0.0 }
 0x353   :  { %v1362_v33 = vsel %vm1361_vm4, %v1331_v25, %v1360_v5  ;;  %v1374_v34 = vsel %vm1361_vm4, %v1332_v26, %v1373_v6  ;;  %v1080_v35 = vmax.f32 %v1078_v16, %v1079_v27  ;;  %v1089_v36 = vrot.slane %v1002_v28, 4 }
 0x354   :  { %v1333_v37 = vunpack.c.l.b16 %v1485_v29  ;;  %v1334_v38 = vunpack.c.h.b16 %v1485_v29  ;;  %v1076_v39 = vmax.f32 %v1074_v21, %v1075_v30  ;;  %v1084_v40 = vmax.f32 %v1001_v22, %v1083_v31 }
 0x355   :  { %v1081_v41 = vrot.slane %v1080_v35, 1  ;;  %v1090_v42 = vmax.f32 %v1002_v28, %v1089_v36  ;;  %v1095_v43 = vrot.slane %v1003_v32, 4  ;;  %v1004_v44 = vmax.f32 %v945_v23, 0.0  ;;  %v952_v48 = vpop.f32.mrb[16].mxu1 }
 0x356   :  { %v1364_v49 = vsel %vm1363_vm5, %v1333_v37, %v1362_v33  ;;  %v1375_v50 = vsel %vm1363_vm5, %v1334_v38, %v1374_v34  ;;  %v1085_v51 = vrot.slane %v1084_v40, 2  ;;  %v947_v52 = vadd.f32 %v946_v19, %v2079_v45  ;;  %v954_v53 = vpop.f32.mrb[17].mxu1 }
 0x357   :  { %v1082_v46 = vmax.f32 %v1080_v35, %v1081_v41  ;;  %v1091_v54 = vrot.slane %v1090_v42, 2  ;;  %v1096_v55 = vmax.f32 %v1003_v32, %v1095_v43  ;;  %v1101_v56 = vrot.slane %v1004_v44, 4  ;;  %v956_v57 = vpop.f32.mrb[18].mxu1 }
 0x358   :  { %v1086_v58 = vmax.f32 %v1084_v40, %v1085_v51  ;;  %v1005_v59 = vmax.f32 %v947_v52, 0.0  ;;  %v949_v60 = vadd.f32 %v948_v24, %v2081_v47  ;;  %v953_v61 = vadd.f32 %v952_v48, %v2079_v45  ;;  %v958_v62 = vpop.f32.mrb[19].mxu1 }
 0x359   :  { %v1486_v63 = vpack.c.bf16 %v1082_v46, %v1076_v39  ;;  %v1092_v0 = vmax.f32 %v1090_v42, %v1091_v54  ;;  %v1097_v1 = vrot.slane %v1096_v55, 2  ;;  %v1102_v2 = vmax.f32 %v1004_v44, %v1101_v56 }
 0x35a   :  { %v1087_v3 = vrot.slane %v1086_v58, 1  ;;  %v1107_v4 = vrot.slane %v1005_v59, 4  ;;  %v1006_v5 = vmax.f32 %v949_v60, 0.0  ;;  %v1007_v6 = vmax.f32 %v953_v61, 0.0 }
 0x35b   :  { %v1335_v7 = vunpack.c.l.b16 %v1486_v63  ;;  %v1336_v8 = vunpack.c.h.b16 %v1486_v63  ;;  %v1093_v9 = vrot.slane %v1092_v0, 1  ;;  %v1098_v10 = vmax.f32 %v1096_v55, %v1097_v1 }
 0x35c   :  { %v1088_v11 = vmax.f32 %v1086_v58, %v1087_v3  ;;  %v1103_v12 = vrot.slane %v1102_v2, 2  ;;  %v1108_v13 = vmax.f32 %v1005_v59, %v1107_v4  ;;  %v1113_v14 = vrot.slane %v1006_v5, 4 }
 0x35d   :  { %v1366_v15 = vsel %vm1365_vm6, %v1335_v7, %v1364_v49  ;;  %v1376_v16 = vsel %vm1365_vm6, %v1336_v8, %v1375_v50  ;;  %v1094_v17 = vmax.f32 %v1092_v0, %v1093_v9  ;;  %v1099_v18 = vrot.slane %v1098_v10, 1  ;;  %v962_v19 = vpop.f32.mrb[20].mxu1 }
 0x35e   :  { %v1104_v20 = vmax.f32 %v1102_v2, %v1103_v12  ;;  %v1109_v21 = vrot.slane %v1108_v13, 2  ;;  %v1114_v22 = vmax.f32 %v1006_v5, %v1113_v14  ;;  %v1119_v23 = vrot.slane %v1007_v6, 4  ;;  %v964_v24 = vpop.f32.mrb[21].mxu1 }
 0x35f   :  { %v1487_v25 = vpack.c.bf16 %v1094_v17, %v1088_v11  ;;  %v1100_v26 = vmax.f32 %v1098_v10, %v1099_v18  ;;  %v955_v27 = vadd.f32 %v954_v53, %v2081_v47  ;;  %v957_v28 = vadd.f32 %v956_v57, %v2079_v45  ;;  %v966_v29 = vpop.f32.mrb[22].mxu1 }
 0x360   :  { %v1105_v30 = vrot.slane %v1104_v20, 1  ;;  %v1110_v31 = vmax.f32 %v1108_v13, %v1109_v21  ;;  %v1115_v32 = vrot.slane %v1114_v22, 2  ;;  %v1120_v33 = vmax.f32 %v1007_v6, %v1119_v23  ;;  %v968_v34 = vpop.f32.mrb[23].mxu1 }
 0x361   :  { %v1337_v35 = vunpack.c.l.b16 %v1487_v25  ;;  %v1338_v36 = vunpack.c.h.b16 %v1487_v25  ;;  %v1008_v37 = vmax.f32 %v955_v27, 0.0  ;;  %v1009_v38 = vmax.f32 %v957_v28, 0.0 }
 0x362   :  { %v1106_v39 = vmax.f32 %v1104_v20, %v1105_v30  ;;  %v1111_v40 = vrot.slane %v1110_v31, 1  ;;  %v1116_v41 = vmax.f32 %v1114_v22, %v1115_v32  ;;  %v1121_v42 = vrot.slane %v1120_v33, 2 }
 0x363   :  { %v1368_v43 = vsel %vm1367_vm7, %v1337_v35, %v1366_v15  ;;  %v1377_v44 = vsel %vm1367_vm7, %v1338_v36, %v1376_v16  ;;  %v1125_v48 = vrot.slane %v1008_v37, 4  ;;  %v1131_v49 = vrot.slane %v1009_v38, 4 }
 0x364   :  { %v1488_v50 = vpack.c.bf16 %v1106_v39, %v1100_v26  ;;  %v1112_v51 = vmax.f32 %v1110_v31, %v1111_v40  ;;  %v1117_v52 = vrot.slane %v1116_v41, 1  ;;  %v1122_v53 = vmax.f32 %v1120_v33, %v1121_v42 }
 0x365   :  { %v1126_v46 = vmax.f32 %v1008_v37, %v1125_v48  ;;  %v1132_v54 = vmax.f32 %v1009_v38, %v1131_v49  ;;  %v959_v55 = vadd.f32 %v958_v62, %v2081_v47  ;;  %v963_v56 = vadd.f32 %v962_v19, %v2079_v45  ;;  %v972_v57 = vpop.f32.mrb[24].mxu1 }
 0x366   :  { %v1339_v58 = vunpack.c.l.b16 %v1488_v50  ;;  %v1340_v59 = vunpack.c.h.b16 %v1488_v50  ;;  %v1118_v60 = vmax.f32 %v1116_v41, %v1117_v52  ;;  %v1123_v61 = vrot.slane %v1122_v53, 1  ;;  %v974_v63 = vpop.f32.mrb[25].mxu1 }
 0x367   :  { %v1127_v0 = vrot.slane %v1126_v46, 2  ;;  %v1133_v1 = vrot.slane %v1132_v54, 2  ;;  %v1010_v2 = vmax.f32 %v959_v55, 0.0  ;;  %v1011_v3 = vmax.f32 %v963_v56, 0.0  ;;  %v976_v4 = vpop.f32.mrb[26].mxu1 }
 0x368   :  { %v1370_v5 = vsel %vm1369_vm8, %v1339_v58, %v1368_v43  ;;  %v1378_v6 = vsel %vm1369_vm8, %v1340_v59, %v1377_v44  ;;  %v1489_v7 = vpack.c.bf16 %v1118_v60, %v1112_v51  ;;  %v1124_v8 = vmax.f32 %v1122_v53, %v1123_v61  ;;  %v978_v62 = vpop.f32.mrb[27].mxu1 }
 0x369   :  { %v1128_v9 = vmax.f32 %v1126_v46, %v1127_v0  ;;  %v1134_v10 = vmax.f32 %v1132_v54, %v1133_v1  ;;  %v1137_v11 = vrot.slane %v1010_v2, 4  ;;  %v1143_v12 = vrot.slane %v1011_v3, 4 }
 0x36a   :  { %v1341_v13 = vunpack.c.l.b16 %v1489_v7  ;;  %v1342_v14 = vunpack.c.h.b16 %v1489_v7  ;;  %v965_v15 = vadd.f32 %v964_v24, %v2081_v47  ;;  %v967_v16 = vadd.f32 %v966_v29, %v2079_v45 }
 0x36b   :  { %v1129_v17 = vrot.slane %v1128_v9, 1  ;;  %v1135_v18 = vrot.slane %v1134_v10, 1  ;;  %v1138_v19 = vmax.f32 %v1010_v2, %v1137_v11  ;;  %v1144_v20 = vmax.f32 %v1011_v3, %v1143_v12 }
 0x36c   :  { %v1372_v21 = vsel %vm1371_vm9, %v1341_v13, %v1370_v5  ;;  %v1379_v22 = vsel %vm1371_vm9, %v1342_v14, %v1378_v6  ;;  %v1012_v23 = vmax.f32 %v965_v15, 0.0  ;;  %v1013_v25 = vmax.f32 %v967_v16, 0.0 }
 0x36d   :  { %v1394_v26 = vpack.c.b16 %v1379_v22, %v1372_v21  ;;  %v1130_v27 = vmax.f32 %v1128_v9, %v1129_v17  ;;  %v1136_v28 = vmax.f32 %v1134_v10, %v1135_v18  ;;  %v1139_v30 = vrot.slane %v1138_v19, 2  ;;  %v982_v31 = vpop.f32.mrb[28].mxu1 }
 0x36e   :  { %v1145_v32 = vrot.slane %v1144_v20, 2  ;;  %v1149_v33 = vrot.slane %v1012_v23, 4  ;;  %v1155_v24 = vrot.slane %v1013_v25, 4  ;;  %v969_v29 = vadd.f32 %v968_v34, %v2081_v47  ;;  %v984_v35 = vpop.f32.mrb[29].mxu1 }
 0x36f   :  { %1398 = vst [vmem:[%s2164_s9] sm:$0xff] %v1394_v26  ;;  %v1490_v36 = vpack.c.bf16 %v1130_v27, %v1124_v8  ;;  %v1140_v37 = vmax.f32 %v1138_v19, %v1139_v30  ;;  %v973_v38 = vadd.f32 %v972_v57, %v2079_v45  ;;  %v975_v39 = vadd.f32 %v974_v63, %v2081_v47  ;;  %v2126_v40 = vpop.f32.mrb[30].mxu1 }
 0x370   :  { %v1146_v41 = vmax.f32 %v1144_v20, %v1145_v32  ;;  %v1150_v42 = vmax.f32 %v1012_v23, %v1149_v33  ;;  %v1156_v43 = vmax.f32 %v1013_v25, %v1155_v24  ;;  %v1014_v44 = vmax.f32 %v969_v29, 0.0  ;;  %v2128_v48 = vpop.f32.mrb[31].mxu1 }
 0x371   :  { %v1343_v34 = vunpack.c.l.b16 %v1490_v36  ;;  %v1344_v49 = vunpack.c.h.b16 %v1490_v36  ;;  %v1141_v50 = vrot.slane %v1140_v37, 1  ;;  %v1015_v51 = vmax.f32 %v973_v38, 0.0 }
 0x372   :  { %v1147_v52 = vrot.slane %v1146_v41, 1  ;;  %v1151_v53 = vrot.slane %v1150_v42, 2  ;;  %v1157_v46 = vrot.slane %v1156_v43, 2  ;;  %v1161_v54 = vrot.slane %v1014_v44, 4 }
 0x373   :  { %v1142_v55 = vmax.f32 %v1140_v37, %v1141_v50  ;;  %v1167_v56 = vrot.slane %v1015_v51, 4  ;;  %v1016_v57 = vmax.f32 %v975_v39, 0.0  ;;  %v977_v58 = vadd.f32 %v976_v4, %v2079_v45 }
 0x374   :  { %v1148_v59 = vmax.f32 %v1146_v41, %v1147_v52  ;;  %v1152_v60 = vmax.f32 %v1150_v42, %v1151_v53  ;;  %v1158_v61 = vmax.f32 %v1156_v43, %v1157_v46  ;;  %v1162_v63 = vmax.f32 %v1014_v44, %v1161_v54 }
 0x375   :  { %v1491_v0 = vpack.c.bf16 %v1142_v55, %v1136_v28  ;;  %v1168_v1 = vmax.f32 %v1015_v51, %v1167_v56  ;;  %v1173_v2 = vrot.slane %v1016_v57, 4  ;;  %v1017_v3 = vmax.f32 %v977_v58, 0.0 }
 0x376   :  { %v1153_v5 = vrot.slane %v1152_v60, 1  ;;  %v1159_v6 = vrot.slane %v1158_v61, 1  ;;  %v1163_v7 = vrot.slane %v1162_v63, 2  ;;  %v979_v8 = vadd.f32 %v978_v62, %v2081_v47 }
 0x377   :  { %v1345_v9 = vunpack.c.l.b16 %v1491_v0  ;;  %v1346_v10 = vunpack.c.h.b16 %v1491_v0  ;;  %v1169_v11 = vrot.slane %v1168_v1, 2  ;;  %v1174_v12 = vmax.f32 %v1016_v57, %v1173_v2 }
 0x378   :  { %v1154_v13 = vmax.f32 %v1152_v60, %v1153_v5  ;;  %v1160_v14 = vmax.f32 %v1158_v61, %v1159_v6  ;;  %v1164_v4 = vmax.f32 %v1162_v63, %v1163_v7  ;;  %v1179_v15 = vrot.slane %v1017_v3, 4 }
 0x379   :  { %v1380_v16 = vsel %vm1359_vm3, %v1345_v9, %v1343_v34  ;;  %v1387_v17 = vsel %vm1359_vm3, %v1346_v10, %v1344_v49  ;;  %v1170_v18 = vmax.f32 %v1168_v1, %v1169_v11  ;;  %v1175_v19 = vrot.slane %v1174_v12, 2 }
 0x37a   :  { %v1492_v20 = vpack.c.bf16 %v1154_v13, %v1148_v59  ;;  %v1165_v21 = vrot.slane %v1164_v4, 1  ;;  %v1180_v22 = vmax.f32 %v1017_v3, %v1179_v15  ;;  %v1018_v23 = vmax.f32 %v979_v8, 0.0 }
 0x37b   :  { %v1171_v25 = vrot.slane %v1170_v18, 1  ;;  %v1176_v62 = vmax.f32 %v1174_v12, %v1175_v19  ;;  %v983_v26 = vadd.f32 %v982_v31, %v2079_v45  ;;  %v985_v27 = vadd.f32 %v984_v35, %v2081_v47 }
 0x37c   :  { %v1347_v28 = vunpack.c.l.b16 %v1492_v20  ;;  %v1348_v30 = vunpack.c.h.b16 %v1492_v20  ;;  %v1166_v32 = vmax.f32 %v1164_v4, %v1165_v21  ;;  %v1181_v33 = vrot.slane %v1180_v22, 2 }
 0x37d   :  { %v1172_v24 = vmax.f32 %v1170_v18, %v1171_v25  ;;  %v1177_v29 = vrot.slane %v1176_v62, 1  ;;  %v1185_v36 = vrot.slane %v1018_v23, 4  ;;  %v1019_v37 = vmax.f32 %v983_v26, 0.0 }
 0x37e   :  { %v1381_v38 = vsel %vm1361_vm4, %v1347_v28, %v1380_v16  ;;  %v1388_v39 = vsel %vm1361_vm4, %v1348_v30, %v1387_v17  ;;  %v1493_v41 = vpack.c.bf16 %v1166_v32, %v1160_v14  ;;  %v1182_v42 = vmax.f32 %v1180_v22, %v1181_v33 }
 0x37f   :  { %v1178_v43 = vmax.f32 %v1176_v62, %v1177_v29  ;;  %v1186_v44 = vmax.f32 %v1018_v23, %v1185_v36  ;;  %v1191_v34 = vrot.slane %v1019_v37, 4  ;;  %v1020_v31 = vmax.f32 %v985_v27, 0.0 }
 0x380   :  { %v1349_v49 = vunpack.c.l.b16 %v1493_v41  ;;  %v1350_v35 = vunpack.c.h.b16 %v1493_v41  ;;  %v1183_v50 = vrot.slane %v1182_v42, 1  ;;  %v987_v51 = vadd.f32 %v2126_v40, %v2079_v45 }
 0x381   :  { %v1494_v52 = vpack.c.bf16 %v1178_v43, %v1172_v24  ;;  %v1187_v53 = vrot.slane %v1186_v44, 2  ;;  %v1192_v46 = vmax.f32 %v1019_v37, %v1191_v34  ;;  %v1197_v54 = vrot.slane %v1020_v31, 4 }
 0x382   :  { %v1382_v55 = vsel %vm1363_vm5, %v1349_v49, %v1381_v38  ;;  %v1389_v56 = vsel %vm1363_vm5, %v1350_v35, %v1388_v39  ;;  %v1021_v57 = vmax.f32 %v987_v51, 0.0  ;;  %v1184_v63 = vmax.f32 %v1182_v42, %v1183_v50 }
 0x383   :  { %v1351_v58 = vunpack.c.l.b16 %v1494_v52  ;;  %v1352_v59 = vunpack.c.h.b16 %v1494_v52  ;;  %v1188_v60 = vmax.f32 %v1186_v44, %v1187_v53  ;;  %v1193_v61 = vrot.slane %v1192_v46, 2 }
 0x384   :  { %v1198_v0 = vmax.f32 %v1020_v31, %v1197_v54  ;;  %v1203_v1 = vrot.slane %v1021_v57, 4  ;;  %v989_v2 = vadd.f32 %v2128_v48, %v2081_v47 }
 0x385   :  { %v1383_v45 = vsel %vm1365_vm6, %v1351_v58, %v1382_v55  ;;  %v1390_v40 = vsel %vm1365_vm6, %v1352_v59, %v1389_v56  ;;  %v1189_v3 = vrot.slane %v1188_v60, 1  ;;  %v1194_v5 = vmax.f32 %v1192_v46, %v1193_v61 }
 0x386   :  { %v1199_v6 = vrot.slane %v1198_v0, 2  ;;  %v1204_v7 = vmax.f32 %v1021_v57, %v1203_v1  ;;  %v1022_v8 = vmax.f32 %v989_v2, 0.0 }
 0x387   :  { %v1190_v9 = vmax.f32 %v1188_v60, %v1189_v3  ;;  %v1195_v10 = vrot.slane %v1194_v5, 1 }
 0x388   :  { %v1200_v11 = vmax.f32 %v1198_v0, %v1199_v6  ;;  %v1205_v12 = vrot.slane %v1204_v7, 2  ;;  %v1209_v13 = vrot.slane %v1022_v8, 4 }
 0x389   :  { %v1495_v14 = vpack.c.bf16 %v1190_v9, %v1184_v63  ;;  %v1196_v4 = vmax.f32 %v1194_v5, %v1195_v10 }
 0x38a   :  { %v1201_v15 = vrot.slane %v1200_v11, 1  ;;  %v1206_v16 = vmax.f32 %v1204_v7, %v1205_v12  ;;  %v1210_v17 = vmax.f32 %v1022_v8, %v1209_v13 }
 0x38b   :  { %v1353_v47 = vunpack.c.l.b16 %v1495_v14  ;;  %v1354_v48 = vunpack.c.h.b16 %v1495_v14 }
 0x38c   :  { %v1202_v18 = vmax.f32 %v1200_v11, %v1201_v15  ;;  %v1207_v19 = vrot.slane %v1206_v16, 1  ;;  %v1211_v20 = vrot.slane %v1210_v17, 2 }
 0x38d   :  { %v1384_v21 = vsel %vm1367_vm7, %v1353_v47, %v1383_v45  ;;  %v1391_v22 = vsel %vm1367_vm7, %v1354_v48, %v1390_v40 }
 0x38e   :  { %v1496_v23 = vpack.c.bf16 %v1202_v18, %v1196_v4  ;;  %v1212_v25 = vmax.f32 %v1210_v17, %v1211_v20  ;;  %v1208_v27 = vmax.f32 %v1206_v16, %v1207_v19 }
 0x390   :  { %v1355_v62 = vunpack.c.l.b16 %v1496_v23  ;;  %v1356_v26 = vunpack.c.h.b16 %v1496_v23  ;;  %v1213_v28 = vrot.slane %v1212_v25, 1 }
 0x392   :  { %v1385_v30 = vsel %vm1369_vm8, %v1355_v62, %v1384_v21  ;;  %v1392_v32 = vsel %vm1369_vm8, %v1356_v26, %v1391_v22  ;;  %v1214_v33 = vmax.f32 %v1212_v25, %v1213_v28 }
 0x394   :  { %v1497_v24 = vpack.c.bf16 %v1214_v33, %v1208_v27 }
 0x396   :  { %v1357_v29 = vunpack.c.l.b16 %v1497_v24  ;;  %v1358_v36 = vunpack.c.h.b16 %v1497_v24 }
 0x398   :  { %v1386_v37 = vsel %vm1371_vm9, %v1357_v29, %v1385_v30  ;;  %v1393_v38 = vsel %vm1371_vm9, %v1358_v36, %v1392_v32 }
 0x399   :  { %v1395_v39 = vpack.c.b16 %v1393_v38, %v1386_v37 }
 0x39b   :  { %1399 = vst [vmem:[%s2164_s9 + $0x8] sm:$0xff] %v1395_v39 }
 0x39c   :  { %1404 = vsyncpa [#allocation3], 1 }
 0x39d   :  { %1405 = vsyncpa [#allocation5], 1 }
 0x39e   :  { %1406 = vsyncpa [#allocation8], 1 }
 0x39f   :  { %1407 = vsyncpa [#allocation11], 1 }

// kernel: attension_point_forward.3
= control target key start
LH: loop header
LB: loop body
LE: loop exit
PB: predicated region body
PF: predicated region fallthrough
CT: control target
= control target key end

     0   :  { %s3596_s0 = inlined_call_operand.vmem [shape: bf16[2,6,128], index: 0, kind: input, shape index: {}]   ;;  %s3597_s1 = inlined_call_operand.hbm [shape: bf16[6,64], index: 1, kind: input, shape index: {}]   ;;  %s3598_s2 = inlined_call_operand.hbm [shape: f32[1,64], index: 2, kind: input, shape index: {}]   ;;  %s3599_s3 = inlined_call_operand.hbm [shape: bf16[64,64], index: 3, kind: input, shape index: {}]   ;;  %s3600_s4 = inlined_call_operand.hbm [shape: f32[1,64], index: 4, kind: input, shape index: {}]   ;;  %s3601_s5 = inlined_call_operand.hbm [shape: bf16[64,128], index: 5, kind: input, shape index: {}]   ;;  %s3602_s6 = inlined_call_operand.hbm [shape: f32[1,128], index: 6, kind: input, shape index: {}]   ;;  %s3603_s7 = inlined_call_operand.vmem [shape: bf16[128,64], index: 7, kind: input, shape index: {}]   ;;  %s3604_s8 = inlined_call_operand.hbm [shape: f32[1,64], index: 8, kind: input, shape index: {}]   ;;  %s3605_s9 = inlined_call_operand.vmem [shape: bf16[128,64], index: 9, kind: input, shape index: {}]   ;;  %s3606_s10 = inlined_call_operand.hbm [shape: f32[1,64], index: 10, kind: input, shape index: {}]   ;;  %s3607_s11 = inlined_call_operand.vmem [shape: bf16[128,64], index: 11, kind: input, shape index: {}]   ;;  %s3608_s12 = inlined_call_operand.hbm [shape: f32[1,64], index: 12, kind: input, shape index: {}]   ;;  %s3609_s13 = inlined_call_operand.hbm [shape: bf16[64,128], index: 13, kind: input, shape index: {}]   ;;  %s3610_s14 = inlined_call_operand.vmem [shape: f32[1,128], index: 14, kind: input, shape index: {}]   ;;  %s3611_s15 = inlined_call_operand.vmem [shape: bf16[2,16,128], index: 15, kind: output, shape index: {}]  }
   0x1   :  { %3618 = sst [smem:[#allocation26_spill]] %s3597_s1 }
   0x2   :  { %3619 = sst [smem:[#allocation27_spill]] %s3598_s2 }
   0x3   :  { %3620 = sst [smem:[#allocation28_spill]] %s3600_s4 }
   0x4   :  { %3621 = sst [smem:[#allocation29_spill]] %s3602_s6 }
   0x5   :  { %3622 = sst [smem:[#allocation30_spill]] %s3605_s9 }
   0x6   :  { %3623 = sst [smem:[#allocation31_spill]] %s3607_s11 }
   0x7   :  { %3624 = sst [smem:[#allocation32_spill]] %s3610_s14 }
   0x8   :  { %3625 = sst [smem:[#allocation33_spill]] %s3611_s15 }
   0x9   :  { %20 = vsyncpa [#allocation4], 0 }
   0xa   :  { %21 = vsyncpa [#allocation6], 0 }
   0xb   :  { %22 = vsyncpa [#allocation9], 0 }
   0xc   :  { %23 = vsyncpa [#allocation12], 0 }
   0xd   :  { %24 = vsyncpa [#allocation15], 0 }
   0xe   :  { %25 = vsyncpa [#allocation18], 0  ;;  %s3082_s18 = smov 0   ;;  %s3084_s19 = smov 0  }
   0xf   :  { %s3086_s20 = smov 0  }
  0x10 LB: > { %3626 = sst [smem:[#allocation25_spill]] %s2986_s20  ;;  %s2988_s21 = smov [#allocation5]   ;;  %s2986_s20 = sphi %s3086_s20, %s31_s20   ;;  %s2982_s19 = sphi %s3084_s19, %s3645_s19   ;;  %s2978_s18 = sphi %s3082_s18, %s3644_s18  }
  0x11   : > { %s420_s22 = sshll.u32 %s2988_s21, 4  ;;  %s2133_s23 = sadd.s32 4294967295, %s2986_s20   ;;  %s3104_s22 = int_to_ptr.vmem [resolvable:$true] %s420_s22 }
  0x12   : > { %p2135_p0 = scmp.ge.s32.totalorder %s2986_s20, 1  ;;  %p396_p1 = scmp.lt.s32.totalorder %s2986_s20, 3 }
  0x13   : > { %p3100_p2 = scmp.eq.s32.totalorder %s2133_s23, 0  ;;  %s2989_s26 = smov [#allocation8]  }
  0x14   : > { %p3106_p3 = pnand %p2135_p0, %p396_p1  ;;  %s444_s27 = sshll.u32 %s2989_s26, 4  ;;  %s3112_s27 = int_to_ptr.vmem [resolvable:$true] %s444_s27 }
  0x15   : > { %s3627_s24 = scalar_select %p3100_p2, 1, 0 }
  0x16   : > { %s3628_s25 = scalar_select %p3106_p3, 1, 0 }
  0x17   : > { %p2527_p4 = pneg %p3106_p3  ;;  %s2990_s28 = smov [#allocation11]  }
  0x18   : > { %s468_s29 = sshll.u32 %s2990_s28, 4  ;;  %s2991_s16 = smov [#allocation14]   ;;  %s3120_s29 = int_to_ptr.vmem [resolvable:$true] %s468_s29 }
  0x19   : > { %p3116_p5 = pnand %p3100_p2, %p2527_p4  ;;  %s496_s17 = sshll.u32 %s2991_s16, 4  ;;  %s3122_s17 = int_to_ptr.vmem [resolvable:$true] %s496_s17 }
  0x1a   : > { %s3630_s2 = sld [smem:[#allocation27_spill]] }
  0x1b   : > { %p3132_p7 = pneg %p3116_p5 }
  0x20   : > { %s2660_s26 = scalar_lea.hbm %s3630_s2, 16 }
  0x21   : > { %p2661_p6 = scmp.ne.s32.totalorder %s3630_s2, %s2660_s26  ;;  %p2667_p10 = scmp.lt.u32.totalorder %s2660_s26, %s3630_s2 }
  0x23   : > { %p2663_p8 = pnand %p3132_p7, %p2661_p6 }
  0x25   : > { %p2664_p9 = pneg %p2663_p8 }
  0x27   : > { %p2669_p11 = pnand %p2667_p10, %p2664_p9 }
  0x29   : > { %2672 = shalt.err (!%p2669_p11)
}
  0x2a   : > { %s2673_s15 = scalar_lea.vmem %s3104_s22, 16  ;;  %s2680_s20 = scalar_lea.vmem %s3104_s22, 32 }
  0x2b   : > { %p2674_p12 = scmp.ne.s32.totalorder %s3104_s22, %s2673_s15  ;;  %p2681_p1 = scmp.lt.s32.totalorder %s3104_s22, %s3104_s22 }
  0x2c   : > { %p2682_p4 = scmp.lt.s32.totalorder %s2680_s20, %s2673_s15 }
  0x2d   : > { %p2676_p13 = pnand %p2674_p12, %p3132_p7 }
  0x2e   : > { %p2683_p6 = por %p2682_p4, %p2681_p1 }
  0x2f   : > { %p2677_p0 = pneg %p2676_p13 }
  0x31   : > { %p2684_p8 = pnand %p2683_p6, %p2677_p0 }
  0x33   : > { %2687 = shalt.err (!%p2684_p8)
}
  0x34   : > { %2533 = dma.hbm_to_vmem [thread:$0]  (!%p3116_p5), %s3630_s2, 16, %s3104_s22, [#allocation6]  }
  0x35   : > { %s3632_s4 = sld [smem:[#allocation28_spill]] }
  0x3b   : > { %s2688_s16 = scalar_lea.hbm %s3632_s4, 16 }
  0x3c   : > { %p2689_p9 = scmp.ne.s32.totalorder %s3632_s4, %s2688_s16  ;;  %p2695_p12 = scmp.lt.u32.totalorder %s2688_s16, %s3632_s4 }
  0x3e   : > { %p2691_p10 = pnand %p2689_p9, %p3132_p7 }
  0x40   : > { %p2692_p11 = pneg %p2691_p10 }
  0x42   : > { %p2697_p13 = pnand %p2695_p12, %p2692_p11 }
  0x44   : > { %2700 = shalt.err (!%p2697_p13)
}
  0x45   : > { %s2701_s22 = scalar_lea.vmem %s3112_s27, 16  ;;  %s2708_s9 = scalar_lea.vmem %s3112_s27, 32 }
  0x46   : > { %p2702_p0 = scmp.ne.s32.totalorder %s3112_s27, %s2701_s22  ;;  %p2709_p6 = scmp.lt.s32.totalorder %s3112_s27, %s3112_s27 }
  0x47   : > { %p2710_p8 = scmp.lt.s32.totalorder %s2708_s9, %s2701_s22 }
  0x48   : > { %p2704_p1 = pnand %p2702_p0, %p3132_p7 }
  0x49   : > { %p2711_p9 = por %p2710_p8, %p2709_p6 }
  0x4a   : > { %p2705_p4 = pneg %p2704_p1 }
  0x4c   : > { %p2712_p10 = pnand %p2711_p9, %p2705_p4 }
  0x4e   : > { %2715 = shalt.err (!%p2712_p10)
}
  0x4f   : > { %2539 = dma.hbm_to_vmem [thread:$0]  (!%p3116_p5), %s3632_s4, 16, %s3112_s27, [#allocation9]  }
  0x50   : > { %s3633_s6 = sld [smem:[#allocation29_spill]] }
  0x56   : > { %s2716_s26 = scalar_lea.hbm %s3633_s6, 16 }
  0x57   : > { %p2717_p11 = scmp.ne.s32.totalorder %s3633_s6, %s2716_s26  ;;  %p2723_p0 = scmp.lt.u32.totalorder %s2716_s26, %s3633_s6 }
  0x59   : > { %p2719_p12 = pnand %p2717_p11, %p3132_p7 }
  0x5b   : > { %p2720_p13 = pneg %p2719_p12 }
  0x5d   : > { %p2725_p1 = pnand %p2723_p0, %p2720_p13 }
  0x5f   : > { %2728 = shalt.err (!%p2725_p1)
}
  0x60   : > { %s2729_s27 = scalar_lea.vmem %s3120_s29, 16  ;;  %s2736_s9 = scalar_lea.vmem %s3120_s29, 32 }
  0x61   : > { %p2730_p4 = scmp.ne.s32.totalorder %s3120_s29, %s2729_s27  ;;  %p2737_p9 = scmp.lt.s32.totalorder %s3120_s29, %s3120_s29 }
  0x62   : > { %p2738_p10 = scmp.lt.s32.totalorder %s2736_s9, %s2729_s27 }
  0x63   : > { %p2732_p6 = pnand %p2730_p4, %p3132_p7 }
  0x64   : > { %p2739_p11 = por %p2738_p10, %p2737_p9 }
  0x65   : > { %p2733_p8 = pneg %p2732_p6 }
  0x67   : > { %p2740_p12 = pnand %p2739_p11, %p2733_p8 }
  0x69   : > { %2743 = shalt.err (!%p2740_p12)
}
  0x6a   : > { %2545 = dma.hbm_to_vmem [thread:$0]  (!%p3116_p5), %s3633_s6, 16, %s3120_s29, [#allocation12]  }
  0x6b   : > { %s2744_s26 = scalar_lea.hbm %s3606_s10, 16 }
  0x6c   : > { %p2745_p13 = scmp.ne.s32.totalorder %s3606_s10, %s2744_s26  ;;  %p2751_p4 = scmp.lt.u32.totalorder %s2744_s26, %s3606_s10 }
  0x6e   : > { %p2747_p0 = pnand %p2745_p13, %p3132_p7 }
  0x70   : > { %p2748_p1 = pneg %p2747_p0 }
  0x72   : > { %p2753_p6 = pnand %p2751_p4, %p2748_p1 }
  0x74   : > { %2756 = shalt.err (!%p2753_p6)
}
  0x75   : > { %s2757_s29 = scalar_lea.vmem %s3122_s17, 16  ;;  %s2764_s27 = scalar_lea.vmem %s3122_s17, 32 }
  0x76   : > { %p2758_p8 = scmp.ne.s32.totalorder %s3122_s17, %s2757_s29  ;;  %p2765_p11 = scmp.lt.s32.totalorder %s3122_s17, %s3122_s17 }
  0x77   : > { %p2766_p12 = scmp.lt.s32.totalorder %s2764_s27, %s2757_s29 }
  0x78   : > { %p2760_p9 = pnand %p2758_p8, %p3132_p7 }
  0x79   : > { %p2767_p13 = por %p2766_p12, %p2765_p11 }
  0x7a   : > { %p2761_p10 = pneg %p2760_p9 }
  0x7c   : > { %p2768_p0 = pnand %p2767_p13, %p2761_p10 }
  0x7e   : > { %2771 = shalt.err (!%p2768_p0)
}
  0x7f   : > { %2551 = dma.hbm_to_vmem [thread:$0]  (!%p3116_p5), %s3606_s10, 16, %s3122_s17, [#allocation15]  }
  0x80   : > { %s43_s14 = sadd.s32 1, %s2982_s19  ;;  %s2992_s21 = smov [#allocation3]  }
  0x81   : > { %s409_s23 = sshll.u32 %s2992_s21, 4  ;;  %p3227_p1 = scmp.ge.s32.totalorder %s43_s14, 2  ;;  %s410_s23 = int_to_ptr.vmem [resolvable:$true] %s409_s23 }
  0x82   : > { %s3635_s1 = sld [smem:[#allocation26_spill]] }
  0x83   : > { %s3634_s26 = scalar_select %p3227_p1, 1, 0 }
  0x88   : > { %s2772_s20 = scalar_lea.hbm %s3635_s1, 64 }
  0x89   : > { %p2773_p4 = scmp.ne.s32.totalorder %s3635_s1, %s2772_s20  ;;  %p2779_p9 = scmp.lt.u32.totalorder %s2772_s20, %s3635_s1 }
  0x8b   : > { %p2775_p6 = pnand %p2773_p4, %p3132_p7 }
  0x8d   : > { %p2776_p8 = pneg %p2775_p6 }
  0x8f   : > { %p2781_p10 = pnand %p2779_p9, %p2776_p8 }
  0x91   : > { %2784 = shalt.err (!%p2781_p10)
}
  0x92   : > { %s2785_s9 = scalar_lea.vmem %s410_s23, 64  ;;  %p2793_p0 = scmp.lt.s32.totalorder %s410_s23, %s410_s23 }
  0x93   : > { %p2786_p11 = scmp.ne.s32.totalorder %s410_s23, %s2785_s9  ;;  %p2794_p2 = scmp.lt.s32.totalorder %s2785_s9, %s2785_s9 }
  0x95   : > { %p2788_p12 = pnand %p2786_p11, %p3132_p7  ;;  %p2795_p3 = por %p2794_p2, %p2793_p0 }
  0x97   : > { %p2789_p13 = pneg %p2788_p12 }
  0x99   : > { %p2796_p1 = pnand %p2795_p3, %p2789_p13 }
  0x9b   : > { %2799 = shalt.err (!%p2796_p1)
}
  0x9c   : > { %2530 = dma.hbm_to_vmem [thread:$0]  (!%p3116_p5), %s3635_s1, 64, %s410_s23, [#allocation4]  }
  0x9d   : > { %p3636_p4 = scmp.ne.s32.totalorder %s3634_s26, 0  ;;  %s2993_s16 = smov [#allocation7]  }
  0x9e   : > { %s430_s15 = sshll.u32 %s2993_s16, 4  ;;  %s2800_s29 = scalar_lea.hbm %s3599_s3, 512  ;;  %s431_s15 = int_to_ptr.vmem [resolvable:$true] %s430_s15 }
  0x9f   : > { %s3647_s14 = smov (%p3636_p4, %s43_s14), 0  ;;  %p2801_p2 = scmp.ne.s32.totalorder %s3599_s3, %s2800_s29 }
  0xa0   : > { %p2807_p6 = scmp.lt.u32.totalorder %s2800_s29, %s3599_s3 }
  0xa1   : > { %p2803_p3 = pnand %p2801_p2, %p3132_p7 }
  0xa3   : > { %p2804_p1 = pneg %p2803_p3 }
  0xa5   : > { %p2809_p8 = pnand %p2807_p6, %p2804_p1 }
  0xa7   : > { %2812 = shalt.err (!%p2809_p8)
}
  0xa8   : > { %s2813_s23 = scalar_lea.vmem %s431_s15, 512  ;;  %p2821_p12 = scmp.lt.s32.totalorder %s431_s15, %s431_s15 }
  0xa9   : > { %p2814_p9 = scmp.ne.s32.totalorder %s431_s15, %s2813_s23  ;;  %p2822_p13 = scmp.lt.s32.totalorder %s2813_s23, %s2813_s23 }
  0xab   : > { %p2816_p10 = pnand %p2814_p9, %p3132_p7  ;;  %p2823_p0 = por %p2822_p13, %p2821_p12 }
  0xad   : > { %p2817_p11 = pneg %p2816_p10 }
  0xaf   : > { %p2824_p4 = pnand %p2823_p0, %p2817_p11 }
  0xb1   : > { %2827 = shalt.err (!%p2824_p4)
}
  0xb2   : > { %s2994_s26 = smov 64   ;;  %s2995_s21 = smov 4  }
  0xb3   : > { %2536 = dma.hbm_to_vmem [thread:$0]  (!%p3116_p5), %s3599_s3, 512, %s431_s15, [#allocation6], %s2994_s26, %s2994_s26, %s2995_s21  }
  0xb4   : > { %s2996_s22 = smov [#allocation10]   ;;  %s2997_s17 = smov [#allocation13]  }
  0xb5   : > { %s454_s29 = sshll.u32 %s2996_s22, 4  ;;  %s482_s27 = sshll.u32 %s2997_s17, 4  ;;  %s455_s29 = int_to_ptr.vmem [resolvable:$true] %s454_s29  ;;  %s483_s27 = int_to_ptr.vmem [resolvable:$true] %s482_s27 }
  0xb6   : > { %s2828_s23 = scalar_lea.hbm %s3601_s5, 512 }
  0xb7   : > { %p2829_p2 = scmp.ne.s32.totalorder %s3601_s5, %s2828_s23  ;;  %p2835_p6 = scmp.lt.u32.totalorder %s2828_s23, %s3601_s5 }
  0xb9   : > { %p2831_p3 = pnand %p2829_p2, %p3132_p7 }
  0xbb   : > { %p2832_p1 = pneg %p2831_p3 }
  0xbd   : > { %p2837_p8 = pnand %p2835_p6, %p2832_p1 }
  0xbf   : > { %2840 = shalt.err (!%p2837_p8)
}
  0xc0   : > { %s2841_s15 = scalar_lea.vmem %s455_s29, 512  ;;  %p2849_p12 = scmp.lt.s32.totalorder %s455_s29, %s455_s29 }
  0xc1   : > { %p2842_p9 = scmp.ne.s32.totalorder %s455_s29, %s2841_s15  ;;  %p2850_p13 = scmp.lt.s32.totalorder %s2841_s15, %s2841_s15 }
  0xc3   : > { %p2844_p10 = pnand %p2842_p9, %p3132_p7  ;;  %p2851_p0 = por %p2850_p13, %p2849_p12 }
  0xc5   : > { %p2845_p11 = pneg %p2844_p10 }
  0xc7   : > { %p2852_p4 = pnand %p2851_p0, %p2845_p11 }
  0xc9   : > { %2855 = shalt.err (!%p2852_p4)
}
  0xca   : > { %2542 = dma.hbm_to_vmem [thread:$0]  (!%p3116_p5), %s3601_s5, 512, %s455_s29, [#allocation9], %s2994_s26, %s2994_s26, %s2995_s21  }
  0xcb   : > { %s2856_s16 = scalar_lea.hbm %s3604_s8, 16 }
  0xcc   : > { %p2857_p2 = scmp.ne.s32.totalorder %s3604_s8, %s2856_s16  ;;  %p2863_p6 = scmp.lt.u32.totalorder %s2856_s16, %s3604_s8 }
  0xce   : > { %p2859_p3 = pnand %p2857_p2, %p3132_p7 }
  0xd0   : > { %p2860_p1 = pneg %p2859_p3 }
  0xd2   : > { %p2865_p8 = pnand %p2863_p6, %p2860_p1 }
  0xd4   : > { %2868 = shalt.err (!%p2865_p8)
}
  0xd5   : > { %s2869_s11 = scalar_lea.vmem %s483_s27, 16  ;;  %s2876_s29 = scalar_lea.vmem %s483_s27, 32 }
  0xd6   : > { %p2870_p9 = scmp.ne.s32.totalorder %s483_s27, %s2869_s11  ;;  %p2877_p12 = scmp.lt.s32.totalorder %s483_s27, %s483_s27 }
  0xd7   : > { %p2878_p13 = scmp.lt.s32.totalorder %s2876_s29, %s2869_s11 }
  0xd8   : > { %p2872_p10 = pnand %p2870_p9, %p3132_p7 }
  0xd9   : > { %p2879_p0 = por %p2878_p13, %p2877_p12 }
  0xda   : > { %p2873_p11 = pneg %p2872_p10 }
  0xdc   : > { %p2880_p4 = pnand %p2879_p0, %p2873_p11 }
  0xde   : > { %2883 = shalt.err (!%p2880_p4)
}
  0xdf   : > { %2548 = dma.hbm_to_vmem [thread:$0]  (!%p3116_p5), %s3604_s8, 16, %s483_s27, [#allocation12]  }
  0xe0   : > { %s2998_s1 = smov [#allocation16]   ;;  %s2999_s4 = smov [#allocation17]  }
  0xe1   : > { %s510_s2 = sshll.u32 %s2998_s1, 4  ;;  %s520_s6 = sshll.u32 %s2999_s4, 4  ;;  %s511_s2 = int_to_ptr.vmem [resolvable:$true] %s510_s2  ;;  %s521_s6 = int_to_ptr.vmem [resolvable:$true] %s520_s6 }
  0xe2   : > { %s2884_s22 = scalar_lea.hbm %s3608_s12, 16 }
  0xe3   : > { %p2885_p2 = scmp.ne.s32.totalorder %s3608_s12, %s2884_s22  ;;  %p2891_p6 = scmp.lt.u32.totalorder %s2884_s22, %s3608_s12 }
  0xe5   : > { %p2887_p3 = pnand %p2885_p2, %p3132_p7 }
  0xe7   : > { %p2888_p1 = pneg %p2887_p3 }
  0xe9   : > { %p2893_p8 = pnand %p2891_p6, %p2888_p1 }
  0xeb   : > { %2896 = shalt.err (!%p2893_p8)
}
  0xec   : > { %s2897_s27 = scalar_lea.vmem %s511_s2, 16  ;;  %s2904_s23 = scalar_lea.vmem %s511_s2, 32 }
  0xed   : > { %p2898_p9 = scmp.ne.s32.totalorder %s511_s2, %s2897_s27  ;;  %p2905_p12 = scmp.lt.s32.totalorder %s511_s2, %s511_s2 }
  0xee   : > { %p2906_p13 = scmp.lt.s32.totalorder %s2904_s23, %s2897_s27 }
  0xef   : > { %p2900_p10 = pnand %p2898_p9, %p3132_p7 }
  0xf0   : > { %p2907_p0 = por %p2906_p13, %p2905_p12 }
  0xf1   : > { %p2901_p11 = pneg %p2900_p10 }
  0xf3   : > { %p2908_p4 = pnand %p2907_p0, %p2901_p11 }
  0xf5   : > { %2911 = shalt.err (!%p2908_p4)
}
  0xf6   : > { %2554 = dma.hbm_to_vmem [thread:$0]  (!%p3116_p5), %s3608_s12, 16, %s511_s2, [#allocation15]  }
  0xf7   : > { %s2912_s20 = scalar_lea.hbm %s3609_s13, 512 }
  0xf8   : > { %p2913_p2 = scmp.ne.s32.totalorder %s3609_s13, %s2912_s20  ;;  %p2919_p6 = scmp.lt.u32.totalorder %s2912_s20, %s3609_s13 }
  0xfa   : > { %p2915_p3 = pnand %p2913_p2, %p3132_p7 }
  0xfc   : > { %p2916_p1 = pneg %p2915_p3 }
  0xfe   : > { %p2921_p8 = pnand %p2919_p6, %p2916_p1 }
 0x100   : > { %2924 = shalt.err (!%p2921_p8)
}
 0x101   : > { %s2925_s29 = scalar_lea.vmem %s521_s6, 512  ;;  %p2933_p12 = scmp.lt.s32.totalorder %s521_s6, %s521_s6 }
 0x102   : > { %p2926_p9 = scmp.ne.s32.totalorder %s521_s6, %s2925_s29  ;;  %p2934_p13 = scmp.lt.s32.totalorder %s2925_s29, %s2925_s29 }
 0x104   : > { %p2928_p10 = pnand %p2926_p9, %p3132_p7  ;;  %p2935_p0 = por %p2934_p13, %p2933_p12 }
 0x106   : > { %p2929_p11 = pneg %p2928_p10 }
 0x108   : > { %p2936_p4 = pnand %p2935_p0, %p2929_p11 }
 0x10a   : > { %2939 = shalt.err (!%p2936_p4)
}
 0x10b   : > { %2557 = dma.hbm_to_vmem [thread:$0]  (!%p3116_p5), %s3609_s13, 512, %s521_s6, [#allocation18], %s2994_s26, %s2994_s26, %s2995_s21  }
 0x10c   : > { %p3637_p2 = scmp.ne.s32.totalorder %s3628_s25, 0 }
 0x10d   : > { %p3638_p7 = scmp.ne.s32.totalorder (!%p3637_p2), %s3627_s24, 0 }
 0x10e   : > { %549 = sbr.rel (%p3637_p2) target bundleno = 2357 (0x935), region = 80 }
 0x115   : > { %2953 = dma.done.wait (%p3638_p7), [#allocation4], 64  }
 0x116   : > { %2955 = vsyncadd (%p3638_p7), [#allocation4], 4294967232 }
 0x117   : > { %2957 = dma.done.wait (%p3638_p7), [#allocation6], 528  }
 0x118   : > { %2959 = vsyncadd (%p3638_p7), [#allocation6], 4294966768 }
 0x119   : > { %2961 = dma.done.wait (%p3638_p7), [#allocation9], 528  }
 0x11a   : > { %2963 = vsyncadd (%p3638_p7), [#allocation9], 4294966768 }
 0x11b   : > { %2965 = dma.done.wait (%p3638_p7), [#allocation12], 32  }
 0x11c   : > { %2967 = vsyncadd (%p3638_p7), [#allocation12], 4294967264 }
 0x11d   : > { %2969 = dma.done.wait (%p3638_p7), [#allocation15], 32  }
 0x11e   : > { %2971 = vsyncadd (%p3638_p7), [#allocation15], 4294967264 }
 0x11f   : > { %2973 = dma.done.wait (%p3638_p7), [#allocation18], 512  }
 0x120   : > { %2975 = vsyncadd (%p3638_p7), [#allocation18], 4294966784  ;;  %p635_p5 = scmp.lt.s32.totalorder %s2978_s18, 1  ;;  %v650_v2 = vld [vmem:[#allocation3] sm:$0x7]  ;;  %vm740_vm0 = vcmask 1045504  }
 0x121   : > { %v651_v3 = vunpack.c.l.bf16 %v650_v2  ;;  %vm691_vm1 = vcmask 48128   ;;  %v2616_v20 = vld [vmem:[#allocation7] sm:$0xff]   ;;  %v2617_v21 = vld [vmem:[#allocation7 + $0x8] sm:$0xff]   ;;  %v2618_v22 = vld [vmem:[#allocation7 + $0x10] sm:$0xff]   ;;  %vm952_vm2 = vcmask 523264   ;;  %s3639_s15 = sld [smem:[#allocation30_spill]] }
 0x122   : > { %s3649_s18 = smov (!%p635_p5, %s2978_s18), 1  ;;  %2355 = vmatprep.subr.bf16.mxu1 %v2616_v20  ;;  %v2619_v23 = vld [vmem:[#allocation7 + $0x18] sm:$0xff]   ;;  %v2620_v24 = vld [vmem:[#allocation10] sm:$0xff]   ;;  %v2621_v25 = vld [vmem:[#allocation10 + $0x8] sm:$0xff]   ;;  %vm3001_vm3 = vmmov 0   ;;  %vm1386_vm4 = vcmask 1041409  }
 0x123   : > { %s2158_s25 = sshll.u32 %s3649_s18, 2  ;;  %2329 = vmatprep.subr.msk.mxu0 %vm740_vm0, %v651_v3  ;;  %2356 = vmatpush3.bf16.msra.mxu1 %v2616_v20  ;;  %v2161_v26 = vld [vmem:[#allocation5] ss:$0 sm:$0xff]  ;;  %vm1388_vm5 = vcmask 1042434   ;;  %vm1390_vm6 = vcmask 1043459   ;;  %vm1392_vm7 = vcmask 1044484  }
 0x124   : > { %s641_s26 = scalar_lea.vmem %s3596_s0, %s2158_s25  ;;  %2330 = vmatpush3.msk.msra.mxu0 %vm740_vm0, %v651_v3  ;;  %2357 = vmatprep.subr.bf16.mxu1 %v2617_v21  ;;  %v2623_v20 = vld [vmem:[#allocation10 + $0x18] sm:$0xff]   ;;  %vm1394_vm8 = vcmask 1045509   ;;  %vm1396_vm9 = vcmask 1046534   ;;  %vm1398_vm10 = vcmask 1047559   ;;  %s3640_s25 = sld [smem:[#allocation31_spill]]  ;;  %vm1804_vm11 = vcmask 130048  }
 0x125   : > { %v648_v0 = vld [vmem:[%s641_s26] sm:$0x7]  ;;  %2379 = vmatprep.subr.bf16.mxu0 %v2620_v24  ;;  %s3641_s2 = sld [smem:[#allocation32_spill]]  ;;  %s2244_s27 = sshll.u32 %s3649_s18, 3 }
 0x126   : > { %v649_v1 = vunpack.c.l.bf16 %v648_v0  ;;  %s3642_s26 = sld [smem:[#allocation33_spill]] }
 0x127   : > { %2358 = vmatpush3.bf16.msra.mxu1 %v2617_v21  ;;  %v2179_v21 = vld [vmem:[#allocation8] ss:$0 sm:$0xff] }
 0x128   : > { %659 = vxpose.xlu0.b32.start.end [1/1] (short) %v649_v1, 128  ;;  %2359 = vmatprep.subr.bf16.mxu1 %v2618_v22 }
 0x12b   : > { %2360 = vmatpush3.bf16.msra.mxu1 %v2618_v22 }
 0x12c   : > { %2361 = vmatprep.subr.bf16.mxu1 %v2619_v23  ;;  %s646_s24 = scalar_lea.vmem %s3642_s26, %s2244_s27 }
 0x12f   : > { %2362 = vmatpush3.bf16.msra.mxu1 %v2619_v23 }
 0x1a8   : > { %v675_v4 = vpop.trf.xlu0 }
 0x1a9   : > { %2331 = vmatprep.mubr.msk.f32.mxu0 %vm691_vm1, %v675_v4 }
 0x1ac   : > { %v676_v5 = vpop.trf.xlu0 }
 0x1ad   : > { %2332 = vmatmul.mubr.msk.f32.vlgmr.msra.gmra.mrb[0].mxu0 %vm691_vm1, %v676_v5 }
 0x1ae   : > { %2380 = vmatpush3.bf16.msra.mxu0 %v2620_v24 }
 0x1af   : > { %2381 = vmatprep.subr.bf16.mxu0 %v2621_v25 }
 0x1b0   : > { %v677_v6 = vpop.trf.xlu0 }
 0x1b1   : > { %2334 = vmatprep.mubr.msk.f32.mxu0 %vm691_vm1, %v677_v6 }
 0x1b2   : > { %2382 = vmatpush3.bf16.msra.mxu0 %v2621_v25 }
 0x1b4   : > { %v678_v7 = vpop.trf.xlu0 }
 0x1b5   : > { %2335 = vmatmul.mubr.msk.f32.gmra.mrb[2].mxu0 %vm691_vm1, %v678_v7 }
 0x1b8   : > { %v679_v8 = vpop.trf.xlu0 }
 0x1b9   : > { %2337 = vmatprep.mubr.msk.f32.mxu0 %vm691_vm1, %v679_v8 }
 0x1bc   : > { %v680_v9 = vpop.trf.xlu0 }
 0x1bd   : > { %2338 = vmatmul.mubr.msk.f32.gmra.mrb[4].mxu0 %vm691_vm1, %v680_v9 }
 0x1c0   : > { %v681_v10 = vpop.trf.xlu0 }
 0x1c1   : > { %2340 = vmatprep.mubr.msk.f32.mxu0 %vm691_vm1, %v681_v10 }
 0x1c4   : > { %v682_v11 = vpop.trf.xlu0 }
 0x1c5   : > { %2341 = vmatmul.mubr.msk.f32.gmra.mrb[6].mxu0 %vm691_vm1, %v682_v11 }
 0x1c8   : > { %v683_v12 = vpop.trf.xlu0 }
 0x1c9   : > { %2343 = vmatprep.mubr.msk.f32.mxu0 %vm691_vm1, %v683_v12 }
 0x1cc   : > { %v684_v13 = vpop.trf.xlu0 }
 0x1cd   : > { %2344 = vmatmul.mubr.msk.f32.gmra.mrb[8].mxu0 %vm691_vm1, %v684_v13 }
 0x1d0   : > { %v685_v14 = vpop.trf.xlu0 }
 0x1d1   : > { %2346 = vmatprep.mubr.msk.f32.mxu0 %vm691_vm1, %v685_v14 }
 0x1d4   : > { %v686_v15 = vpop.trf.xlu0 }
 0x1d5   : > { %2347 = vmatmul.mubr.msk.f32.gmra.mrb[10].mxu0 %vm691_vm1, %v686_v15 }
 0x1d8   : > { %v687_v16 = vpop.trf.xlu0 }
 0x1d9   : > { %2349 = vmatprep.mubr.msk.f32.mxu0 %vm691_vm1, %v687_v16 }
 0x1dc   : > { %v688_v17 = vpop.trf.xlu0 }
 0x1dd   : > { %2350 = vmatmul.mubr.msk.f32.gmra.mrb[12].mxu0 %vm691_vm1, %v688_v17 }
 0x1e0   : > { %v689_v18 = vpop.trf.xlu0 }
 0x1e1   : > { %2352 = vmatprep.mubr.msk.f32.mxu0 %vm691_vm1, %v689_v18 }
 0x1e4   : > { %v690_v19 = vpop.trf.xlu0 }
 0x1e5   : > { %2353 = vmatmul.mubr.msk.f32.gmra.mrb[14].mxu0 %vm691_vm1, %v690_v19  ;;  %v2622_v19 = vld [vmem:[#allocation10 + $0x10] sm:$0xff]  }
 0x1e6   : > { %2383 = vmatprep.subr.bf16.mxu0 %v2622_v19 }
 0x1e7   : > { %2384 = vmatpush3.bf16.msra.mxu0 %v2622_v19  ;;  %v2628_v19 = vld [vmem:[%s3603_s7 + $0x10] sm:$0xff]  }
 0x1e8   : > { %2385 = vmatprep.subr.bf16.mxu0 %v2623_v20 }
 0x1eb   : > { %2386 = vmatpush3.bf16.msra.mxu0 %v2623_v20  ;;  %v2629_v20 = vld [vmem:[%s3639_s15 + $0x10] sm:$0xff]  }
 0x280   : > { %v2333_v27 = vpop.f32.mrb[0].mxu0 }
 0x281   : > { %v816_v28 = vadd.f32 %v2333_v27, %v2161_v26  ;;  %v810_v29 = vpop.f32.mrb[1].mxu0 }
 0x282   : > { %v811_v30 = vadd.f32 %v2161_v26, %v810_v29 }
 0x283   : > { %v890_v31 = vmax.f32 %v816_v28, 0.0 }
 0x284   : > { %v889_v32 = vmax.f32 %v811_v30, 0.0 }
 0x286   : > { %v905_v33 = vpack.c.bf16 %v890_v31, %v889_v32 }
 0x288   : > { %v2336_v34 = vpop.f32.mrb[2].mxu0  ;;  %2363 = vmatprep.mubr.msk.bf16.mxu1 %vm952_vm2, %v905_v33 }
 0x289   : > { %v826_v35 = vadd.f32 %v2336_v34, %v2161_v26  ;;  %v820_v36 = vpop.f32.mrb[3].mxu0 }
 0x28a   : > { %v821_v37 = vadd.f32 %v2161_v26, %v820_v36 }
 0x28b   : > { %v892_v38 = vmax.f32 %v826_v35, 0.0 }
 0x28c   : > { %v891_v39 = vmax.f32 %v821_v37, 0.0 }
 0x28e   : > { %v906_v40 = vpack.c.bf16 %v892_v38, %v891_v39 }
 0x290   : > { %v2339_v41 = vpop.f32.mrb[4].mxu0  ;;  %2364 = vmatmul.mubr.msk.bf16.vlgmr.msra.gmra.mrb[0].mxu1 %vm952_vm2, %v906_v40 }
 0x291   : > { %v836_v42 = vadd.f32 %v2339_v41, %v2161_v26  ;;  %v830_v43 = vpop.f32.mrb[5].mxu0 }
 0x292   : > { %v831_v44 = vadd.f32 %v2161_v26, %v830_v43 }
 0x293   : > { %v894_v45 = vmax.f32 %v836_v42, 0.0 }
 0x294   : > { %v893_v46 = vmax.f32 %v831_v44, 0.0 }
 0x296   : > { %v907_v47 = vpack.c.bf16 %v894_v45, %v893_v46 }
 0x298   : > { %v2342_v48 = vpop.f32.mrb[6].mxu0  ;;  %2367 = vmatprep.mubr.msk.bf16.mxu1 %vm952_vm2, %v907_v47 }
 0x299   : > { %v846_v49 = vadd.f32 %v2342_v48, %v2161_v26  ;;  %v840_v50 = vpop.f32.mrb[7].mxu0 }
 0x29a   : > { %v841_v51 = vadd.f32 %v2161_v26, %v840_v50 }
 0x29b   : > { %v896_v52 = vmax.f32 %v846_v49, 0.0 }
 0x29c   : > { %v895_v53 = vmax.f32 %v841_v51, 0.0 }
 0x29e   : > { %v908_v54 = vpack.c.bf16 %v896_v52, %v895_v53 }
 0x2a0   : > { %v2345_v55 = vpop.f32.mrb[8].mxu0  ;;  %2368 = vmatmul.mubr.msk.bf16.gmra.mrb[4].mxu1 %vm952_vm2, %v908_v54 }
 0x2a1   : > { %v856_v56 = vadd.f32 %v2345_v55, %v2161_v26  ;;  %v850_v57 = vpop.f32.mrb[9].mxu0 }
 0x2a2   : > { %v851_v58 = vadd.f32 %v2161_v26, %v850_v57 }
 0x2a3   : > { %v898_v59 = vmax.f32 %v856_v56, 0.0 }
 0x2a4   : > { %v897_v60 = vmax.f32 %v851_v58, 0.0 }
 0x2a6   : > { %v909_v61 = vpack.c.bf16 %v898_v59, %v897_v60 }
 0x2a8   : > { %v2348_v62 = vpop.f32.mrb[10].mxu0  ;;  %2371 = vmatprep.mubr.msk.bf16.mxu1 %vm952_vm2, %v909_v61 }
 0x2a9   : > { %v866_v63 = vadd.f32 %v2348_v62, %v2161_v26  ;;  %v860_v0 = vpop.f32.mrb[11].mxu0 }
 0x2aa   : > { %v861_v1 = vadd.f32 %v2161_v26, %v860_v0 }
 0x2ab   : > { %v900_v2 = vmax.f32 %v866_v63, 0.0 }
 0x2ac   : > { %v899_v3 = vmax.f32 %v861_v1, 0.0 }
 0x2ae   : > { %v910_v4 = vpack.c.bf16 %v900_v2, %v899_v3 }
 0x2b0   : > { %v2351_v5 = vpop.f32.mrb[12].mxu0  ;;  %2372 = vmatmul.mubr.msk.bf16.gmra.mrb[8].mxu1 %vm952_vm2, %v910_v4 }
 0x2b1   : > { %v876_v6 = vadd.f32 %v2351_v5, %v2161_v26  ;;  %v870_v7 = vpop.f32.mrb[13].mxu0 }
 0x2b2   : > { %v871_v8 = vadd.f32 %v2161_v26, %v870_v7 }
 0x2b3   : > { %v902_v9 = vmax.f32 %v876_v6, 0.0 }
 0x2b4   : > { %v901_v10 = vmax.f32 %v871_v8, 0.0 }
 0x2b6   : > { %v911_v11 = vpack.c.bf16 %v902_v9, %v901_v10 }
 0x2b8   : > { %v2354_v12 = vpop.f32.mrb[14].mxu0  ;;  %2375 = vmatprep.mubr.msk.bf16.mxu1 %vm952_vm2, %v911_v11 }
 0x2b9   : > { %v886_v13 = vadd.f32 %v2354_v12, %v2161_v26  ;;  %v880_v14 = vpop.f32.mrb[15].mxu0 }
 0x2ba   : > { %v881_v15 = vadd.f32 %v2161_v26, %v880_v14  ;;  %v2624_v14 = vld [vmem:[%s3603_s7] sm:$0xff]  }
 0x2bb   : > { %v904_v16 = vmax.f32 %v886_v13, 0.0 }
 0x2bc   : > { %v903_v17 = vmax.f32 %v881_v15, 0.0  ;;  %v3000_v15 = vmov 0.0  }
 0x2bd   : > { %2403 = vmatprep.subr.bf16.mxu1 %v3000_v15  ;;  %2423 = vmatprep.subr.bf16.mxu0 %v3000_v15 }
 0x2be   : > { %v912_v18 = vpack.c.bf16 %v904_v16, %v903_v17  ;;  %v2625_v16 = vld [vmem:[%s3639_s15] sm:$0xff]   ;;  %2404 = vmatpush3.bf16.msra.mxu1 %v2624_v14  ;;  %v2626_v17 = vld [vmem:[%s3603_s7 + $0x8] sm:$0xff]  }
 0x2bf   : > { %2405 = vmatprep.subr.bf16.mxu1 %v3000_v15 }
 0x2c0   : > { %2376 = vmatmul.mubr.msk.bf16.gmra.mrb[12].mxu1 %vm952_vm2, %v912_v18  ;;  %v2627_v18 = vld [vmem:[%s3639_s15 + $0x8] sm:$0xff]  }
 0x2c1   : > { %2419 = vmatprep.mubr.msk.bf16.mxu1 %vm3001_vm3, %v3000_v15 }
 0x2c2   : > { %2406 = vmatpush3.bf16.msra.mxu1 %v2626_v17 }
 0x2c3   : > { %2407 = vmatprep.subr.bf16.mxu1 %v3000_v15 }
 0x2c6   : > { %2408 = vmatpush3.bf16.msra.mxu1 %v2628_v19 }
 0x2c7   : > { %2409 = vmatprep.subr.bf16.mxu1 %v3000_v15 }
 0x363   : > { %v2365_v22 = vpop.f32.mrb[0].mxu1 }
 0x364   : > { %v1020_v23 = vadd.f32 %v2365_v22, %v2179_v21  ;;  %v1011_v24 = vpop.f32.mrb[1].mxu1  ;;  %v2631_v22 = vld [vmem:[%s3639_s15 + $0x18] sm:$0xff]  }
 0x365   : > { %v1012_v25 = vadd.f32 %v2179_v21, %v1011_v24  ;;  %v2366_v27 = vpop.f32.mrb[2].mxu1  ;;  %v2633_v24 = vld [vmem:[%s3639_s15 + $0x20] sm:$0xff]  }
 0x366   : > { %v1023_v28 = vadd.f32 %v2366_v27, %v2179_v21  ;;  %v1014_v29 = vpop.f32.mrb[3].mxu1  ;;  %v1076_v30 = vmax.f32 %v1020_v23, 0.0  ;;  %v2632_v23 = vld [vmem:[%s3603_s7 + $0x20] sm:$0xff]   ;;  %v2635_v27 = vld [vmem:[%s3639_s15 + $0x28] sm:$0xff]  }
 0x367   : > { %v1015_v26 = vadd.f32 %v2179_v21, %v1014_v29  ;;  %v1074_v32 = vmax.f32 %v1012_v25, 0.0  ;;  %v2634_v25 = vld [vmem:[%s3603_s7 + $0x28] sm:$0xff]   ;;  %v2637_v29 = vld [vmem:[%s3639_s15 + $0x30] sm:$0xff]  }
 0x368   : > { %v1077_v31 = vmax.f32 %v1023_v28, 0.0  ;;  %v2636_v28 = vld [vmem:[%s3603_s7 + $0x30] sm:$0xff]  }
 0x369   : > { %v1075_v33 = vmax.f32 %v1015_v26, 0.0  ;;  %v2638_v26 = vld [vmem:[%s3603_s7 + $0x38] sm:$0xff]  }
 0x36a   : > { %v1091_v34 = vpack.c.bf16 %v1077_v31, %v1076_v30  ;;  %v2639_v30 = vld [vmem:[%s3639_s15 + $0x38] sm:$0xff]   ;;  %v3488_v31 = vld [vmem:[#allocation11] ss:$0 sm:$0xff] }
 0x36b   : > { %v1090_v35 = vpack.c.bf16 %v1075_v33, %v1074_v32 }
 0x36d   : > { %2387 = vmatprep.mubr.msk.bf16.mxu0 %vm952_vm2, %v1090_v35 }
 0x36e   : > { %2388 = vmatmul.mubr.msk.bf16.vlgmr.msra.gmra.mrb[16].mxu0 %vm952_vm2, %v1091_v34 }
 0x36f   : > { %2424 = vmatpush3.bf16.msra.mxu0 %v2625_v16 }
 0x370   : > { %2425 = vmatprep.subr.bf16.mxu0 %v3000_v15 }
 0x373   : > { %v2369_v36 = vpop.f32.mrb[4].mxu1  ;;  %2426 = vmatpush3.bf16.msra.mxu0 %v2627_v18 }
 0x374   : > { %v1036_v37 = vadd.f32 %v2369_v36, %v2179_v21  ;;  %v1027_v38 = vpop.f32.mrb[5].mxu1  ;;  %2427 = vmatprep.subr.bf16.mxu0 %v3000_v15 }
 0x375   : > { %v1028_v39 = vadd.f32 %v2179_v21, %v1027_v38  ;;  %v2370_v40 = vpop.f32.mrb[6].mxu1 }
 0x376   : > { %v1039_v41 = vadd.f32 %v2370_v40, %v2179_v21  ;;  %v1030_v42 = vpop.f32.mrb[7].mxu1  ;;  %v1080_v44 = vmax.f32 %v1036_v37, 0.0 }
 0x377   : > { %v1031_v43 = vadd.f32 %v2179_v21, %v1030_v42  ;;  %v1078_v46 = vmax.f32 %v1028_v39, 0.0  ;;  %2428 = vmatpush3.bf16.msra.mxu0 %v2629_v20 }
 0x378   : > { %v1081_v45 = vmax.f32 %v1039_v41, 0.0  ;;  %2429 = vmatprep.subr.bf16.mxu0 %v3000_v15 }
 0x379   : > { %v1079_v47 = vmax.f32 %v1031_v43, 0.0 }
 0x37a   : > { %v1093_v48 = vpack.c.bf16 %v1081_v45, %v1080_v44 }
 0x37b   : > { %v1092_v49 = vpack.c.bf16 %v1079_v47, %v1078_v46  ;;  %2430 = vmatpush3.bf16.msra.mxu0 %v2631_v22 }
 0x37c   : > { %2431 = vmatprep.subr.bf16.mxu0 %v3000_v15 }
 0x37d   : > { %2391 = vmatprep.mubr.msk.bf16.mxu0 %vm952_vm2, %v1092_v49 }
 0x37e   : > { %2392 = vmatmul.mubr.msk.bf16.gmra.mrb[20].mxu0 %vm952_vm2, %v1093_v48 }
 0x37f   : > { %2432 = vmatpush3.bf16.msra.mxu0 %v2633_v24 }
 0x380   : > { %2433 = vmatprep.subr.bf16.mxu0 %v3000_v15 }
 0x383   : > { %v2373_v50 = vpop.f32.mrb[8].mxu1  ;;  %2434 = vmatpush3.bf16.msra.mxu0 %v2635_v27 }
 0x384   : > { %v1052_v51 = vadd.f32 %v2373_v50, %v2179_v21  ;;  %v1043_v52 = vpop.f32.mrb[9].mxu1  ;;  %2435 = vmatprep.subr.bf16.mxu0 %v3000_v15 }
 0x385   : > { %v1044_v53 = vadd.f32 %v2179_v21, %v1043_v52  ;;  %v2374_v54 = vpop.f32.mrb[10].mxu1 }
 0x386   : > { %v1055_v55 = vadd.f32 %v2374_v54, %v2179_v21  ;;  %v1046_v56 = vpop.f32.mrb[11].mxu1  ;;  %v1084_v58 = vmax.f32 %v1052_v51, 0.0 }
 0x387   : > { %v1047_v57 = vadd.f32 %v2179_v21, %v1046_v56  ;;  %v1082_v60 = vmax.f32 %v1044_v53, 0.0  ;;  %2436 = vmatpush3.bf16.msra.mxu0 %v2637_v29 }
 0x388   : > { %v1085_v59 = vmax.f32 %v1055_v55, 0.0  ;;  %2437 = vmatprep.subr.bf16.mxu0 %v3000_v15 }
 0x389   : > { %v1083_v61 = vmax.f32 %v1047_v57, 0.0 }
 0x38a   : > { %v1095_v62 = vpack.c.bf16 %v1085_v59, %v1084_v58 }
 0x38b   : > { %v1094_v63 = vpack.c.bf16 %v1083_v61, %v1082_v60  ;;  %2438 = vmatpush3.bf16.msra.mxu0 %v2639_v30 }
 0x38c   : > { %2463 = vmatprep.subr.bf16.mxu0 %v3000_v15 }
 0x38d   : > { %2395 = vmatprep.mubr.msk.bf16.mxu0 %vm952_vm2, %v1094_v63 }
 0x38e   : > { %2396 = vmatmul.mubr.msk.bf16.gmra.mrb[24].mxu0 %vm952_vm2, %v1095_v62 }
 0x393   : > { %v2377_v0 = vpop.f32.mrb[12].mxu1 }
 0x394   : > { %v1068_v1 = vadd.f32 %v2377_v0, %v2179_v21  ;;  %v1059_v2 = vpop.f32.mrb[13].mxu1 }
 0x395   : > { %v1060_v3 = vadd.f32 %v2179_v21, %v1059_v2  ;;  %v2378_v4 = vpop.f32.mrb[14].mxu1 }
 0x396   : > { %v1071_v5 = vadd.f32 %v2378_v4, %v2179_v21  ;;  %v1062_v6 = vpop.f32.mrb[15].mxu1  ;;  %v1088_v8 = vmax.f32 %v1068_v1, 0.0 }
 0x397   : > { %v1063_v7 = vadd.f32 %v2179_v21, %v1062_v6  ;;  %v1086_v10 = vmax.f32 %v1060_v3, 0.0  ;;  %v2630_v21 = vld [vmem:[%s3603_s7 + $0x18] sm:$0xff]  }
 0x398   : > { %v1089_v9 = vmax.f32 %v1071_v5, 0.0  ;;  %2410 = vmatpush3.bf16.msra.mxu1 %v2630_v21 }
 0x399   : > { %v1087_v11 = vmax.f32 %v1063_v7, 0.0  ;;  %2411 = vmatprep.subr.bf16.mxu1 %v3000_v15 }
 0x39a   : > { %v1097_v12 = vpack.c.bf16 %v1089_v9, %v1088_v8 }
 0x39b   : > { %v1096_v13 = vpack.c.bf16 %v1087_v11, %v1086_v10 }
 0x39c   : > { %2412 = vmatpush3.bf16.msra.mxu1 %v2632_v23 }
 0x39d   : > { %2399 = vmatprep.mubr.msk.bf16.mxu0 %vm952_vm2, %v1096_v13  ;;  %2413 = vmatprep.subr.bf16.mxu1 %v3000_v15 }
 0x39e   : > { %2400 = vmatmul.mubr.msk.bf16.gmra.mrb[28].mxu0 %vm952_vm2, %v1097_v12 }
 0x39f   : > { %2439 = vmatprep.mubr.msk.bf16.mxu0 %vm3001_vm3, %v3000_v15 }
 0x3a0   : > { %2414 = vmatpush3.bf16.msra.mxu1 %v2634_v25 }
 0x3a1   : > { %2415 = vmatprep.subr.bf16.mxu1 %v3000_v15 }
 0x3a4   : > { %2416 = vmatpush3.bf16.msra.mxu1 %v2636_v28 }
 0x3a5   : > { %2417 = vmatprep.subr.bf16.mxu1 %v3000_v15 }
 0x3a8   : > { %2418 = vmatpush3.bf16.msra.mxu1 %v2638_v26 }
 0x3a9   : > { %2443 = vmatprep.subr.bf16.mxu1 %v3000_v15 }
 0x441   : > { %v2389_v32 = vpop.f32.mrb[16].mxu0 }
 0x442   : > { %v1204_v33 = vadd.f32 %v2389_v32, %v3488_v31  ;;  %v1195_v34 = vpop.f32.mrb[17].mxu0 }
 0x443   : > { %v1196_v35 = vadd.f32 %v3488_v31, %v1195_v34  ;;  %v2390_v36 = vpop.f32.mrb[18].mxu0 }
 0x444   : > { %v1260_v37 = vmax.f32 %v1204_v33, 0.0  ;;  %v1207_v38 = vadd.f32 %v2390_v36, %v3488_v31  ;;  %v1198_v39 = vpop.f32.mrb[19].mxu0 }
 0x445   : > { %v1258_v40 = vmax.f32 %v1196_v35, 0.0  ;;  %v1199_v41 = vadd.f32 %v3488_v31, %v1198_v39 }
 0x446   : > { %v1286_v42 = vrot.slane %v1260_v37, 4  ;;  %v1261_v43 = vmax.f32 %v1207_v38, 0.0 }
 0x447   : > { %v1274_v44 = vrot.slane %v1258_v40, 4  ;;  %v1259_v45 = vmax.f32 %v1199_v41, 0.0 }
 0x448   : > { %v1287_v46 = vmax.f32 %v1260_v37, %v1286_v42  ;;  %v1292_v47 = vrot.slane %v1261_v43, 4 }
 0x449   : > { %v1275_v48 = vmax.f32 %v1258_v40, %v1274_v44  ;;  %v1280_v49 = vrot.slane %v1259_v45, 4 }
 0x44a   : > { %v1288_v50 = vrot.slane %v1287_v46, 2  ;;  %v1293_v51 = vmax.f32 %v1261_v43, %v1292_v47 }
 0x44b   : > { %v1276_v52 = vrot.slane %v1275_v48, 2  ;;  %v1281_v53 = vmax.f32 %v1259_v45, %v1280_v49 }
 0x44c   : > { %v1289_v54 = vmax.f32 %v1287_v46, %v1288_v50  ;;  %v1294_v55 = vrot.slane %v1293_v51, 2 }
 0x44d   : > { %v1277_v56 = vmax.f32 %v1275_v48, %v1276_v52  ;;  %v1282_v57 = vrot.slane %v1281_v53, 2 }
 0x44e   : > { %v1295_v58 = vmax.f32 %v1293_v51, %v1294_v55  ;;  %v1290_v61 = vrot.slane %v1289_v54, 1 }
 0x44f   : > { %v1278_v59 = vrot.slane %v1277_v56, 1  ;;  %v1283_v60 = vmax.f32 %v1281_v53, %v1282_v57 }
 0x450   : > { %v1296_v62 = vrot.slane %v1295_v58, 1  ;;  %v1291_v7 = vmax.f32 %v1289_v54, %v1290_v61 }
 0x451   : > { %v1284_v63 = vrot.slane %v1283_v60, 1  ;;  %v2393_v0 = vpop.f32.mrb[20].mxu0  ;;  %v1279_v3 = vmax.f32 %v1277_v56, %v1278_v59 }
 0x452   : > { %v1220_v1 = vadd.f32 %v2393_v0, %v3488_v31  ;;  %v1211_v2 = vpop.f32.mrb[21].mxu0  ;;  %v1297_v11 = vmax.f32 %v1295_v58, %v1296_v62 }
 0x453   : > { %v1285_v4 = vmax.f32 %v1283_v60, %v1284_v63  ;;  %v1212_v5 = vadd.f32 %v3488_v31, %v1211_v2  ;;  %v2394_v6 = vpop.f32.mrb[22].mxu0 }
 0x454   : > { %v1264_v8 = vmax.f32 %v1220_v1, 0.0  ;;  %v1223_v9 = vadd.f32 %v2394_v6, %v3488_v31  ;;  %v1214_v10 = vpop.f32.mrb[23].mxu0 }
 0x455   : > { %v1387_v12 = vsel %vm1386_vm4, %v1285_v4, %v1279_v3  ;;  %v1262_v13 = vmax.f32 %v1212_v5, 0.0  ;;  %v1215_v14 = vadd.f32 %v3488_v31, %v1214_v10 }
 0x456   : > { %v1389_v16 = vsel %vm1388_vm5, %v1291_v7, %v1387_v12  ;;  %v1310_v17 = vrot.slane %v1264_v8, 4  ;;  %v1265_v18 = vmax.f32 %v1223_v9, 0.0 }
 0x457   : > { %v1298_v19 = vrot.slane %v1262_v13, 4  ;;  %v1391_v20 = vsel %vm1390_vm6, %v1297_v11, %v1389_v16  ;;  %v1263_v21 = vmax.f32 %v1215_v14, 0.0 }
 0x458   : > { %v1311_v22 = vmax.f32 %v1264_v8, %v1310_v17  ;;  %v1316_v23 = vrot.slane %v1265_v18, 4 }
 0x459   : > { %v1299_v24 = vmax.f32 %v1262_v13, %v1298_v19  ;;  %v1304_v25 = vrot.slane %v1263_v21, 4 }
 0x45a   : > { %v1312_v27 = vrot.slane %v1311_v22, 2  ;;  %v1317_v28 = vmax.f32 %v1265_v18, %v1316_v23 }
 0x45b   : > { %v1300_v29 = vrot.slane %v1299_v24, 2  ;;  %v1305_v26 = vmax.f32 %v1263_v21, %v1304_v25 }
 0x45c   : > { %v1313_v30 = vmax.f32 %v1311_v22, %v1312_v27  ;;  %v1318_v32 = vrot.slane %v1317_v28, 2 }
 0x45d   : > { %v1301_v33 = vmax.f32 %v1299_v24, %v1300_v29  ;;  %v1306_v34 = vrot.slane %v1305_v26, 2 }
 0x45e   : > { %v1319_v35 = vmax.f32 %v1317_v28, %v1318_v32  ;;  %v1314_v38 = vrot.slane %v1313_v30, 1 }
 0x45f   : > { %v1302_v36 = vrot.slane %v1301_v33, 1  ;;  %v1307_v37 = vmax.f32 %v1305_v26, %v1306_v34 }
 0x460   : > { %v1320_v40 = vrot.slane %v1319_v35, 1  ;;  %v1315_v49 = vmax.f32 %v1313_v30, %v1314_v38 }
 0x461   : > { %v1303_v39 = vmax.f32 %v1301_v33, %v1302_v36  ;;  %v1308_v41 = vrot.slane %v1307_v37, 1  ;;  %v2397_v42 = vpop.f32.mrb[24].mxu0 }
 0x462   : > { %v1236_v43 = vadd.f32 %v2397_v42, %v3488_v31  ;;  %v1227_v44 = vpop.f32.mrb[25].mxu0  ;;  %v1321_v53 = vmax.f32 %v1319_v35, %v1320_v40 }
 0x463   : > { %v1393_v45 = vsel %vm1392_vm7, %v1303_v39, %v1391_v20  ;;  %v1309_v46 = vmax.f32 %v1307_v37, %v1308_v41  ;;  %v1228_v47 = vadd.f32 %v3488_v31, %v1227_v44  ;;  %v2398_v48 = vpop.f32.mrb[26].mxu0 }
 0x464   : > { %v1268_v50 = vmax.f32 %v1236_v43, 0.0  ;;  %v1239_v51 = vadd.f32 %v2398_v48, %v3488_v31  ;;  %v1230_v52 = vpop.f32.mrb[27].mxu0 }
 0x465   : > { %v1395_v54 = vsel %vm1394_vm8, %v1309_v46, %v1393_v45  ;;  %v1266_v55 = vmax.f32 %v1228_v47, 0.0  ;;  %v1231_v56 = vadd.f32 %v3488_v31, %v1230_v52 }
 0x466   : > { %v1397_v57 = vsel %vm1396_vm9, %v1315_v49, %v1395_v54  ;;  %v1334_v58 = vrot.slane %v1268_v50, 4  ;;  %v1269_v59 = vmax.f32 %v1239_v51, 0.0 }
 0x467   : > { %v1322_v60 = vrot.slane %v1266_v55, 4  ;;  %v1267_v61 = vmax.f32 %v1231_v56, 0.0  ;;  %v3509_v62 = vsel %vm1398_vm10, %v1321_v53, %v1397_v57 }
 0x468   : > { %v1335_v63 = vmax.f32 %v1268_v50, %v1334_v58  ;;  %v1340_v0 = vrot.slane %v1269_v59, 4 }
 0x469   : > { %v1323_v1 = vmax.f32 %v1266_v55, %v1322_v60  ;;  %v1328_v2 = vrot.slane %v1267_v61, 4 }
 0x46a   : > { %v1336_v3 = vrot.slane %v1335_v63, 2  ;;  %v1341_v4 = vmax.f32 %v1269_v59, %v1340_v0 }
 0x46b   : > { %v1324_v5 = vrot.slane %v1323_v1, 2  ;;  %v1329_v6 = vmax.f32 %v1267_v61, %v1328_v2  ;;  %v2640_v2 = vld [vmem:[%s3640_s25] sm:$0xff]  }
 0x46c   : > { %v1337_v7 = vmax.f32 %v1335_v63, %v1336_v3  ;;  %v1342_v8 = vrot.slane %v1341_v4, 2 }
 0x46d   : > { %v1325_v9 = vmax.f32 %v1323_v1, %v1324_v5  ;;  %v1330_v10 = vrot.slane %v1329_v6, 2  ;;  %v2642_v5 = vld [vmem:[%s3640_s25 + $0x10] sm:$0xff]  }
 0x46e   : > { %v1343_v11 = vmax.f32 %v1341_v4, %v1342_v8  ;;  %v1338_v14 = vrot.slane %v1337_v7, 1  ;;  %v2641_v4 = vld [vmem:[%s3640_s25 + $0x8] sm:$0xff]  }
 0x46f   : > { %v1326_v12 = vrot.slane %v1325_v9, 1  ;;  %v1331_v13 = vmax.f32 %v1329_v6, %v1330_v10  ;;  %v2643_v6 = vld [vmem:[%s3640_s25 + $0x18] sm:$0xff]   ;;  %v2645_v8 = vld [vmem:[%s3640_s25 + $0x28] sm:$0xff]  }
 0x470   : > { %v1344_v16 = vrot.slane %v1343_v11, 1  ;;  %v1339_v25 = vmax.f32 %v1337_v7, %v1338_v14  ;;  %v2644_v7 = vld [vmem:[%s3640_s25 + $0x20] sm:$0xff]   ;;  %v2647_v10 = vld [vmem:[%s3640_s25 + $0x38] sm:$0xff]  }
 0x471   : > { %v1332_v17 = vrot.slane %v1331_v13, 1  ;;  %v2401_v18 = vpop.f32.mrb[28].mxu0  ;;  %v1327_v21 = vmax.f32 %v1325_v9, %v1326_v12  ;;  %v2646_v9 = vld [vmem:[%s3640_s25 + $0x30] sm:$0xff]  }
 0x472   : > { %v1252_v19 = vadd.f32 %v2401_v18, %v3488_v31  ;;  %v1243_v20 = vpop.f32.mrb[29].mxu0  ;;  %v1345_v26 = vmax.f32 %v1343_v11, %v1344_v16  ;;  %v2205_v11 = vld [vmem:[#allocation13] ss:$0 sm:$0xff] }
 0x473   : > { %v1333_v22 = vmax.f32 %v1331_v13, %v1332_v17  ;;  %v1244_v23 = vadd.f32 %v3488_v31, %v1243_v20  ;;  %v2402_v24 = vpop.f32.mrb[30].mxu0  ;;  %v2214_v13 = vld [vmem:[#allocation14] ss:$0 sm:$0xff] }
 0x474   : > { %v1272_v27 = vmax.f32 %v1252_v19, 0.0  ;;  %v1255_v28 = vadd.f32 %v2402_v24, %v3488_v31  ;;  %v1246_v29 = vpop.f32.mrb[31].mxu0 }
 0x475   : > { %v1400_v30 = vsel %vm1386_vm4, %v1333_v22, %v1327_v21  ;;  %v1270_v32 = vmax.f32 %v1244_v23, 0.0  ;;  %v1247_v33 = vadd.f32 %v3488_v31, %v1246_v29 }
 0x476   : > { %v1401_v34 = vsel %vm1388_vm5, %v1339_v25, %v1400_v30  ;;  %v1358_v35 = vrot.slane %v1272_v27, 4  ;;  %v1273_v36 = vmax.f32 %v1255_v28, 0.0 }
 0x477   : > { %v1346_v37 = vrot.slane %v1270_v32, 4  ;;  %v1402_v38 = vsel %vm1390_vm6, %v1345_v26, %v1401_v34  ;;  %v1271_v39 = vmax.f32 %v1247_v33, 0.0  ;;  %v2223_v26 = vld [vmem:[#allocation16] ss:$0 sm:$0xff] }
 0x478   : > { %v1359_v40 = vmax.f32 %v1272_v27, %v1358_v35  ;;  %v1364_v41 = vrot.slane %v1273_v36, 4 }
 0x479   : > { %v1347_v42 = vmax.f32 %v1270_v32, %v1346_v37  ;;  %v1352_v43 = vrot.slane %v1271_v39, 4 }
 0x47a   : > { %v1360_v44 = vrot.slane %v1359_v40, 2  ;;  %v1365_v45 = vmax.f32 %v1273_v36, %v1364_v41 }
 0x47b   : > { %v1348_v46 = vrot.slane %v1347_v42, 2  ;;  %v1353_v47 = vmax.f32 %v1271_v39, %v1352_v43 }
 0x47c   : > { %v1361_v48 = vmax.f32 %v1359_v40, %v1360_v44  ;;  %v1366_v49 = vrot.slane %v1365_v45, 2 }
 0x47d   : > { %v1349_v50 = vmax.f32 %v1347_v42, %v1348_v46  ;;  %v1354_v31 = vrot.slane %v1353_v47, 2 }
 0x47e   : > { %v1367_v51 = vmax.f32 %v1365_v45, %v1366_v49  ;;  %v1362_v54 = vrot.slane %v1361_v48, 1 }
 0x47f   : > { %v1350_v52 = vrot.slane %v1349_v50, 1  ;;  %v1355_v53 = vmax.f32 %v1353_v47, %v1354_v31 }
 0x480   : > { %v1368_v56 = vrot.slane %v1367_v51, 1  ;;  %v1363_v60 = vmax.f32 %v1361_v48, %v1362_v54  ;;  %v2649_v54 = vld [vmem:[#allocation17 + $0x8] sm:$0xff]  }
 0x481   : > { %v1351_v55 = vmax.f32 %v1349_v50, %v1350_v52  ;;  %v1356_v57 = vrot.slane %v1355_v53, 1 }
 0x482   : > { %v1369_v61 = vmax.f32 %v1367_v51, %v1368_v56 }
 0x483   : > { %v1403_v58 = vsel %vm1392_vm7, %v1351_v55, %v1402_v38  ;;  %v1357_v59 = vmax.f32 %v1355_v53, %v1356_v57  ;;  %v2648_v53 = vld [vmem:[#allocation17] sm:$0xff]   ;;  %v2650_v55 = vld [vmem:[#allocation17 + $0x10] sm:$0xff]  }
 0x485   : > { %v1404_v63 = vsel %vm1394_vm8, %v1357_v59, %v1403_v58 }
 0x486   : > { %v1405_v0 = vsel %vm1396_vm9, %v1363_v60, %v1404_v63 }
 0x487   : > { %v3522_v1 = vsel %vm1398_vm10, %v1369_v61, %v1405_v0  ;;  %v2651_v0 = vld [vmem:[#allocation17 + $0x18] sm:$0xff]  }
 0x488   : > { %v1417_v3 = vpack.c.bf16 %v3522_v1, %v3509_v62 }
 0x48a   : > { %2420 = vmatmul.mubr.bf16.vlgmr.msra.gmra.mrb[16].mxu1 %v1417_v3  ;;  %2440 = vmatmul.mubr.bf16.vlgmr.msra.gmra.mrb[32].mxu0 %v1417_v3 }
 0x48b   : > { %2444 = vmatpush3.bf16.msra.mxu1 %v2640_v2  ;;  %2459 = vmatprep.mubr.msk.bf16.mxu1 %vm3001_vm3, %v3000_v15 }
 0x48c   : > { %2445 = vmatprep.subr.bf16.mxu1 %v3000_v15  ;;  %2465 = vmatprep.mubr.msk.bf16.mxu0 %vm3001_vm3, %v3000_v15 }
 0x48f   : > { %2446 = vmatpush3.bf16.msra.mxu1 %v2641_v4 }
 0x490   : > { %2447 = vmatprep.subr.bf16.mxu1 %v3000_v15 }
 0x493   : > { %2448 = vmatpush3.bf16.msra.mxu1 %v2642_v5 }
 0x494   : > { %2449 = vmatprep.subr.bf16.mxu1 %v3000_v15 }
 0x497   : > { %2450 = vmatpush3.bf16.msra.mxu1 %v2643_v6 }
 0x498   : > { %2451 = vmatprep.subr.bf16.mxu1 %v3000_v15 }
 0x49b   : > { %2452 = vmatpush3.bf16.msra.mxu1 %v2644_v7 }
 0x49c   : > { %2453 = vmatprep.subr.bf16.mxu1 %v3000_v15 }
 0x49f   : > { %2454 = vmatpush3.bf16.msra.mxu1 %v2645_v8 }
 0x4a0   : > { %2455 = vmatprep.subr.bf16.mxu1 %v3000_v15 }
 0x4a3   : > { %2456 = vmatpush3.bf16.msra.mxu1 %v2646_v9 }
 0x4a4   : > { %2457 = vmatprep.subr.bf16.mxu1 %v3000_v15 }
 0x4a7   : > { %2458 = vmatpush3.bf16.msra.mxu1 %v2647_v10 }
 0x4a8   : > { %2475 = vmatprep.subr.bf16.mxu1 %v3000_v15 }
 0x4aa   : > { %2460 = vmatmul.mubr.bf16.vlgmr.msra.gmra.mrb[20].mxu1 %v1417_v3 }
 0x4ab   : > { %2483 = vmatprep.mubr.msk.bf16.mxu1 %vm3001_vm3, %v3000_v15  ;;  %2476 = vmatpush3.bf16.msra.mxu1 %v2648_v53 }
 0x4ac   : > { %2477 = vmatprep.subr.bf16.mxu1 %v3000_v15 }
 0x4af   : > { %2478 = vmatpush3.bf16.msra.mxu1 %v2649_v54 }
 0x4b0   : > { %2479 = vmatprep.subr.bf16.mxu1 %v3000_v15 }
 0x4b3   : > { %2480 = vmatpush3.bf16.msra.mxu1 %v2650_v55 }
 0x4b4   : > { %2481 = vmatprep.subr.bf16.mxu1 %v3000_v15 }
 0x4b7   : > { %2482 = vmatpush3.bf16.msra.mxu1 %v2651_v0 }
 0x55d   : > { %v1523_v12 = vpop.f32.mrb[16].mxu1  ;;  %v1636_v14 = vpop.f32.mrb[32].mxu0 }
 0x55e   : > { %v2421_v16 = vpop.f32.mrb[17].mxu1  ;;  %v2441_v17 = vpop.f32.mrb[33].mxu0  ;;  %v1524_v20 = vadd.f32 %v2205_v11, %v1523_v12  ;;  %v1637_v21 = vadd.f32 %v2214_v13, %v1636_v14 }
 0x55f   : > { %v1526_v18 = vpop.f32.mrb[18].mxu1  ;;  %v1639_v19 = vpop.f32.mrb[34].mxu0 }
 0x560   : > { %v1527_v22 = vadd.f32 %v2205_v11, %v1526_v18  ;;  %v1640_v23 = vadd.f32 %v2214_v13, %v1639_v19  ;;  %v2422_v24 = vpop.f32.mrb[19].mxu1  ;;  %v2442_v25 = vpop.f32.mrb[35].mxu0 }
 0x562   : > { %v1530_v27 = vpack.c.bf16 %v1527_v22, %v1524_v20  ;;  %v1643_v28 = vpack.c.bf16 %v1640_v23, %v1637_v21 }
 0x564   : > { %v1761_v29 = vsel %vm952_vm2, %v1643_v28, 0 }
 0x565   : > { %2464 = vmatpush3.bf16.xpose.msra.mxu0 %v1761_v29 }
 0x566   : > { %2469 = vmatprep.subr.bf16.mxu0 %v3000_v15 }
 0x56c   : > { %2466 = vmatmul.mubr.msk.bf16.vlgmr.msra.gmra.mrb[36].mxu0 %vm952_vm2, %v1530_v27 }
 0x56d   : > { %2471 = vmatprep.mubr.msk.bf16.mxu0 %vm3001_vm3, %v3000_v15  ;;  %v2234_v15 = vld [vmem:[%s3641_s2] ss:$0 sm:$0xff] }
 0x57d   : > { %v1749_v30 = vpop.f32.mrb[20].mxu1 }
 0x57e   : > { %v2461_v32 = vpop.f32.mrb[21].mxu1  ;;  %v1750_v34 = vadd.f32 %v2223_v26, %v1749_v30 }
 0x57f   : > { %v1752_v33 = vpop.f32.mrb[22].mxu1 }
 0x580   : > { %v1753_v35 = vadd.f32 %v2223_v26, %v1752_v33  ;;  %v2462_v36 = vpop.f32.mrb[23].mxu1 }
 0x582   : > { %v1756_v37 = vpack.c.bf16 %v1753_v35, %v1750_v34 }
 0x584   : > { %2470 = vmatpush3.bf16.msra.mxu0 %v1756_v37 }
 0x63f   : > { %v1797_v38 = vpop.f32.mrb[36].mxu0 }
 0x640   : > { %v2467_v39 = vpop.f32.mrb[37].mxu0  ;;  %v1805_v40 = vsel %vm1804_vm11, %v1797_v38, -inf }
 0x641   : > { %1806 = vmax.xlane.f32.xlu0 %v1805_v40  ;;  %v1800_v41 = vpop.f32.mrb[38].mxu0 }
 0x642   : > { %v2468_v42 = vpop.f32.mrb[39].mxu0  ;;  %v1808_v43 = vsel %vm1804_vm11, %v1800_v41, -inf }
 0x643   : > { %1809 = vmax.xlane.f32.xlu1 %v1808_v43 }
 0x6ce   : > { %v1807_v44 = vpop.xlane.xlu0 %1806 }
 0x6cf   : > { %v1811_v45 = vsub.f32 %v1797_v38, %v1807_v44 }
 0x6d0   : > { %v1810_v46 = vpop.xlane.xlu1 %1809 }
 0x6d1   : > { %v1813_v47 = vmul.f32 1.442695, %v1811_v45  ;;  %v1812_v48 = vsub.f32 %v1800_v41, %v1810_v46 }
 0x6d3   : > { %2652 = vpow2.f32 %v1813_v47  ;;  %v1815_v49 = vmul.f32 1.442695, %v1812_v48 }
 0x6d5   : > { %2654 = vpow2.f32 %v1815_v49 }
 0x6dd   : > { %v2653_v50 = vpop.eup %2652 }
 0x6de   : > { %v1817_v31 = vsel %vm1804_vm11, %v2653_v50, 0.0 }
 0x6df   : > { %v2655_v51 = vpop.eup %2654  ;;  %1818 = vadd.xlane.f32.xlu1 %v1817_v31 }
 0x6e0   : > { %v1820_v52 = vsel %vm1804_vm11, %v2655_v51, 0.0 }
 0x6e3   : > { %1821 = vadd.xlane.f32.xlu1 %v1820_v52 }
 0x76c   : > { %v1819_v56 = vpop.xlane.xlu1 %1818 }
 0x76d   : > { %2656 = vrcp.f32 %v1819_v56 }
 0x770   : > { %v1822_v57 = vpop.xlane.xlu1 %1821 }
 0x771   : > { %2658 = vrcp.f32 %v1822_v57 }
 0x777   : > { %v2657_v58 = vpop.eup %2656 }
 0x778   : > { %v1825_v60 = vmul.f32 %v2657_v58, %v2653_v50 }
 0x77b   : > { %v2659_v59 = vpop.eup %2658 }
 0x77c   : > { %v1826_v61 = vmul.f32 %v2659_v59, %v2655_v51 }
 0x77e   : > { %v1827_v63 = vpack.c.bf16 %v1826_v61, %v1825_v60 }
 0x780   : > { %2472 = vmatmul.mubr.msk.bf16.vlgmr.msra.gmra.mrb[40].mxu0 %vm1804_vm11, %v1827_v63 }
 0x853   : > { %v1865_v2 = vpop.f32.mrb[40].mxu0 }
 0x854   : > { %v2473_v3 = vpop.f32.mrb[41].mxu0 }
 0x855   : > { %v1868_v4 = vpop.f32.mrb[42].mxu0 }
 0x856   : > { %v1872_v5 = vpack.c.bf16 %v1868_v4, %v1865_v2  ;;  %v2474_v6 = vpop.f32.mrb[43].mxu0 }
 0x858   : > { %2484 = vmatmul.mubr.msk.bf16.vlgmr.msra.gmra.mrb[24].mxu1 %vm952_vm2, %v1872_v5 }
 0x92b   : > { %v1949_v7 = vpop.f32.mrb[24].mxu1 }
 0x92c   : > { %v1950_v8 = vadd.f32 %v2234_v15, %v1949_v7  ;;  %v2485_v9 = vpop.f32.mrb[25].mxu1 }
 0x92d   : > { %v1952_v10 = vpop.f32.mrb[26].mxu1 }
 0x92e   : > { %v1953_v11 = vadd.f32 %v2234_v15, %v1952_v10  ;;  %v2486_v12 = vpop.f32.mrb[27].mxu1  ;;  %v1956_v13 = vadd.f32 %v1950_v8, %v3509_v62 }
 0x930   : > { %v1957_v14 = vadd.f32 %v1953_v11, %v3522_v1 }
 0x932   : > { %v2250_v16 = vpack.c.bf16 %v1957_v14, %v1956_v13 }
 0x934   : > { %2251 = vst [vmem:[%s646_s24] sm:$0xff] %v2250_v16  }
 0x935 PF: > { %s3643_s21 = sld [smem:[#allocation25_spill]]  ;;  %s3644_s18 = smov %s2982_s19 }
 0x936   : > { %s3645_s19 = smov %s3647_s14 }
 0x93b   : > { %s31_s20 = sadd.s32 1, %s3643_s21  }
 0x93c   : > { %p28_p3 = scmp.ge.s32.totalorder %s31_s20, 4  }
 0x93e   :  { %30 = sbr.rel (!%p28_p3) target bundleno = 16 (0x10), region = 155 }
 0x945   :  { %1989 = vsyncpa [#allocation4], 1 }
 0x946   :  { %1991 = vsyncpa [#allocation4 + $0x1], 1 }
 0x947   :  { %1992 = vsyncpa [#allocation6], 1 }
 0x948   :  { %1993 = vsyncpa [#allocation9], 1 }
 0x949   :  { %1994 = vsyncpa [#allocation12], 1 }
 0x94a   :  { %1995 = vsyncpa [#allocation15], 1 }
 0x94b   :  { %1996 = vsyncpa [#allocation18], 1 }

// kernel: attension_point_forward.5
= control target key start
LH: loop header
LB: loop body
LE: loop exit
PB: predicated region body
PF: predicated region fallthrough
CT: control target
= control target key end

     0   :  { %s6919_s0 = inlined_call_operand.vmem [shape: bf16[2,8,3], index: 0, kind: input, shape index: {}]   ;;  %s6920_s1 = inlined_call_operand.vmem [shape: bf16[2,8,256], index: 1, kind: input, shape index: {}]   ;;  %s6921_s2 = inlined_call_operand.hbm [shape: bf16[3,256], index: 2, kind: input, shape index: {}]   ;;  %s6922_s3 = inlined_call_operand.vmem [shape: bf16[256,256], index: 3, kind: input, shape index: {}]   ;;  %s6923_s4 = inlined_call_operand.vmem [shape: f32[1,256], index: 4, kind: input, shape index: {}]   ;;  %s6924_s5 = inlined_call_operand.hbm [shape: bf16[256,512], index: 5, kind: input, shape index: {}]   ;;  %s6925_s6 = inlined_call_operand.hbm [shape: f32[1,512], index: 6, kind: input, shape index: {}]   ;;  %s6926_s7 = inlined_call_operand.vmem [shape: bf16[512,1024], index: 7, kind: input, shape index: {}]   ;;  %s6927_s8 = inlined_call_operand.hbm [shape: f32[1,1024], index: 8, kind: input, shape index: {}]   ;;  %s6928_s9 = inlined_call_operand.hbm [shape: f32[1,1024], index: 9, kind: input, shape index: {}]   ;;  %s6929_s10 = inlined_call_operand.hbm [shape: f32[1,1024], index: 10, kind: input, shape index: {}]   ;;  %s6930_s11 = inlined_call_operand.hbm [shape: bf16[1024,256], index: 11, kind: input, shape index: {}]   ;;  %s6931_s12 = inlined_call_operand.hbm [shape: f32[1,256], index: 12, kind: input, shape index: {}]   ;;  %s6932_s13 = inlined_call_operand.vmem [shape: bf16[256,128], index: 13, kind: input, shape index: {}]   ;;  %s6933_s14 = inlined_call_operand.hbm [shape: f32[1,128], index: 14, kind: input, shape index: {}]   ;;  %s6934_s15 = inlined_call_operand.hbm [shape: f32[2,128], index: 15, kind: output, shape index: {}]  }
   0x1   :  { %6936 = sst [smem:[#allocation24_spill]] %s6934_s15 }
   0x2   :  { %20 = vsyncpa [#allocation3], 0 }
   0x3   :  { %21 = vsyncpa [#allocation6], 0 }
   0x4   :  { %22 = vsyncpa [#allocation9], 0 }
   0x5   :  { %23 = vsyncpa [#allocation12], 0 }
   0x6   :  { %24 = vsyncpa [#allocation15], 0 }
   0x7   :  { %25 = vsyncpa [#allocation4], 0  ;;  %s5575_s18 = smov [#allocation5]   ;;  %s5343_s22 = scalar_lea.hbm %s6924_s5, 8192 }
   0x8   :  { %s49_s19 = sshll.u32 %s5575_s18, 4  ;;  %p5344_p0 = scmp.ne.s32.totalorder %s6924_s5, %s5343_s22  ;;  %s50_s19 = int_to_ptr.vmem [resolvable:$true] %s49_s19 }
   0x9   :  { %p5347_p1 = scmp.lt.u32.totalorder %s5343_s22, %s6924_s5 }
   0xb   :  { %p5349_p2 = pnand %p5347_p1, %p5344_p0 }
   0xd   :  { %5352 = shalt.err (!%p5349_p2)
}
   0xe   :  { %s5353_s27 = scalar_lea.vmem %s50_s19, 8192  ;;  %p5358_p4 = scmp.lt.s32.totalorder %s50_s19, %s50_s19 }
   0xf   :  { %p5354_p3 = scmp.ne.s32.totalorder %s50_s19, %s5353_s27  ;;  %p5359_p5 = scmp.lt.s32.totalorder %s5353_s27, %s5353_s27 }
  0x11   :  { %p5360_p6 = por %p5359_p5, %p5358_p4 }
  0x13   :  { %p5361_p7 = pnand %p5360_p6, %p5354_p3 }
  0x15   :  { %5364 = shalt.err (!%p5361_p7)
}
  0x16   :  { %s5576_s28 = smov 256   ;;  %s5577_s29 = smov 16  }
  0x17   :  { %55 = dma.hbm_to_vmem [thread:$0]  %s6924_s5, 8192, %s50_s19, [#allocation6], %s5576_s28, %s5576_s28, %s5577_s29  }
  0x18   :  { %s5578_s17 = smov [#allocation8]   ;;  %s5579_s20 = smov [#allocation11]  }
  0x19   :  { %s74_s18 = sshll.u32 %s5578_s17, 4  ;;  %s94_s21 = sshll.u32 %s5579_s20, 4  ;;  %s75_s18 = int_to_ptr.vmem [resolvable:$true] %s74_s18  ;;  %s95_s21 = int_to_ptr.vmem [resolvable:$true] %s94_s21 }
  0x1a   :  { %s5365_s24 = scalar_lea.hbm %s6927_s8, 128 }
  0x1b   :  { %p5366_p8 = scmp.ne.s32.totalorder %s6927_s8, %s5365_s24  ;;  %p5369_p9 = scmp.lt.u32.totalorder %s5365_s24, %s6927_s8 }
  0x1d   :  { %p5371_p10 = pnand %p5369_p9, %p5366_p8 }
  0x1f   :  { %5374 = shalt.err (!%p5371_p10)
}
  0x20   :  { %s5375_s5 = scalar_lea.vmem %s75_s18, 128  ;;  %p5380_p12 = scmp.lt.s32.totalorder %s75_s18, %s75_s18 }
  0x21   :  { %p5376_p11 = scmp.ne.s32.totalorder %s75_s18, %s5375_s5  ;;  %p5381_p13 = scmp.lt.s32.totalorder %s5375_s5, %s5375_s5 }
  0x23   :  { %p5382_p0 = por %p5381_p13, %p5380_p12 }
  0x25   :  { %p5383_p1 = pnand %p5382_p0, %p5376_p11 }
  0x27   :  { %5386 = shalt.err (!%p5383_p1)
}
  0x28   :  { %77 = dma.hbm_to_vmem [thread:$0]  %s6927_s8, 128, %s75_s18, [#allocation9]  }
  0x29   :  { %s5387_s16 = scalar_lea.hbm %s6929_s10, 128 }
  0x2a   :  { %p5388_p2 = scmp.ne.s32.totalorder %s6929_s10, %s5387_s16  ;;  %p5391_p3 = scmp.lt.u32.totalorder %s5387_s16, %s6929_s10 }
  0x2c   :  { %p5393_p4 = pnand %p5391_p3, %p5388_p2 }
  0x2e   :  { %5396 = shalt.err (!%p5393_p4)
}
  0x2f   :  { %s5397_s23 = scalar_lea.vmem %s95_s21, 128  ;;  %p5402_p6 = scmp.lt.s32.totalorder %s95_s21, %s95_s21 }
  0x30   :  { %p5398_p5 = scmp.ne.s32.totalorder %s95_s21, %s5397_s23  ;;  %p5403_p7 = scmp.lt.s32.totalorder %s5397_s23, %s5397_s23 }
  0x32   :  { %p5404_p8 = por %p5403_p7, %p5402_p6 }
  0x34   :  { %p5405_p9 = pnand %p5404_p8, %p5398_p5 }
  0x36   :  { %5408 = shalt.err (!%p5405_p9)
}
  0x37   :  { %97 = dma.hbm_to_vmem [thread:$0]  %s6929_s10, 128, %s95_s21, [#allocation12]  }
  0x38   :  { %s5580_s24 = smov [#allocation14]   ;;  %s5581_s26 = smov [#allocation2]  }
  0x39   :  { %s116_s25 = sshll.u32 %s5580_s24, 4  ;;  %s36_s27 = sshll.u32 %s5581_s26, 4  ;;  %s117_s25 = int_to_ptr.vmem [resolvable:$true] %s116_s25  ;;  %s37_s27 = int_to_ptr.vmem [resolvable:$true] %s36_s27 }
  0x3a   :  { %s5409_s28 = scalar_lea.hbm %s6931_s12, 32 }
  0x3b   :  { %p5410_p10 = scmp.ne.s32.totalorder %s6931_s12, %s5409_s28  ;;  %p5413_p11 = scmp.lt.u32.totalorder %s5409_s28, %s6931_s12 }
  0x3d   :  { %p5415_p12 = pnand %p5413_p11, %p5410_p10 }
  0x3f   :  { %5418 = shalt.err (!%p5415_p12)
}
  0x40   :  { %s5419_s10 = scalar_lea.vmem %s117_s25, 32  ;;  %p5424_p0 = scmp.lt.s32.totalorder %s117_s25, %s117_s25 }
  0x41   :  { %p5420_p13 = scmp.ne.s32.totalorder %s117_s25, %s5419_s10  ;;  %p5425_p1 = scmp.lt.s32.totalorder %s5419_s10, %s5419_s10 }
  0x43   :  { %p5426_p2 = por %p5425_p1, %p5424_p0 }
  0x45   :  { %p5427_p3 = pnand %p5426_p2, %p5420_p13 }
  0x47   :  { %5430 = shalt.err (!%p5427_p3)
}
  0x48   :  { %119 = dma.hbm_to_vmem [thread:$0]  %s6931_s12, 32, %s117_s25, [#allocation15]  }
  0x49   :  { %s5431_s23 = scalar_lea.hbm %s6921_s2, 64 }
  0x4a   :  { %p5432_p4 = scmp.ne.s32.totalorder %s6921_s2, %s5431_s23  ;;  %p5435_p5 = scmp.lt.u32.totalorder %s5431_s23, %s6921_s2 }
  0x4c   :  { %p5437_p6 = pnand %p5435_p5, %p5432_p4 }
  0x4e   :  { %5440 = shalt.err (!%p5437_p6)
}
  0x4f   :  { %s5441_s5 = scalar_lea.vmem %s37_s27, 64  ;;  %p5446_p8 = scmp.lt.s32.totalorder %s37_s27, %s37_s27 }
  0x50   :  { %p5442_p7 = scmp.ne.s32.totalorder %s37_s27, %s5441_s5  ;;  %p5447_p9 = scmp.lt.s32.totalorder %s5441_s5, %s5441_s5 }
  0x52   :  { %p5448_p10 = por %p5447_p9, %p5446_p8 }
  0x54   :  { %p5449_p11 = pnand %p5448_p10, %p5442_p7 }
  0x56   :  { %5452 = shalt.err (!%p5449_p11)
}
  0x57   :  { %39 = dma.hbm_to_vmem [thread:$0]  %s6921_s2, 64, %s37_s27, [#allocation3]  }
  0x58   :  { %s5582_s19 = smov [#allocation7]   ;;  %s5583_s29 = smov [#allocation10]  }
  0x59   :  { %s62_s28 = sshll.u32 %s5582_s19, 4  ;;  %s84_s30 = sshll.u32 %s5583_s29, 4  ;;  %s63_s28 = int_to_ptr.vmem [resolvable:$true] %s62_s28  ;;  %s85_s30 = int_to_ptr.vmem [resolvable:$true] %s84_s30 }
  0x5a   :  { %s5453_s10 = scalar_lea.hbm %s6925_s6, 64 }
  0x5b   :  { %p5454_p12 = scmp.ne.s32.totalorder %s6925_s6, %s5453_s10  ;;  %p5457_p13 = scmp.lt.u32.totalorder %s5453_s10, %s6925_s6 }
  0x5d   :  { %p5459_p0 = pnand %p5457_p13, %p5454_p12 }
  0x5f   :  { %5462 = shalt.err (!%p5459_p0)
}
  0x60   :  { %s5463_s2 = scalar_lea.vmem %s63_s28, 64  ;;  %p5468_p2 = scmp.lt.s32.totalorder %s63_s28, %s63_s28 }
  0x61   :  { %p5464_p1 = scmp.ne.s32.totalorder %s63_s28, %s5463_s2  ;;  %p5469_p3 = scmp.lt.s32.totalorder %s5463_s2, %s5463_s2 }
  0x63   :  { %p5470_p4 = por %p5469_p3, %p5468_p2 }
  0x65   :  { %p5471_p5 = pnand %p5470_p4, %p5464_p1 }
  0x67   :  { %5474 = shalt.err (!%p5471_p5)
}
  0x68   :  { %65 = dma.hbm_to_vmem [thread:$0]  %s6925_s6, 64, %s63_s28, [#allocation6]  }
  0x69   :  { %s5475_s24 = scalar_lea.hbm %s6928_s9, 128 }
  0x6a   :  { %p5476_p6 = scmp.ne.s32.totalorder %s6928_s9, %s5475_s24  ;;  %p5479_p7 = scmp.lt.u32.totalorder %s5475_s24, %s6928_s9 }
  0x6c   :  { %p5481_p8 = pnand %p5479_p7, %p5476_p6 }
  0x6e   :  { %5484 = shalt.err (!%p5481_p8)
}
  0x6f   :  { %s5485_s19 = scalar_lea.vmem %s85_s30, 128  ;;  %p5490_p10 = scmp.lt.s32.totalorder %s85_s30, %s85_s30 }
  0x70   :  { %p5486_p9 = scmp.ne.s32.totalorder %s85_s30, %s5485_s19  ;;  %p5491_p11 = scmp.lt.s32.totalorder %s5485_s19, %s5485_s19 }
  0x72   :  { %p5492_p12 = por %p5491_p11, %p5490_p10 }
  0x74   :  { %p5493_p13 = pnand %p5492_p12, %p5486_p9 }
  0x76   :  { %5496 = shalt.err (!%p5493_p13)
}
  0x77   :  { %87 = dma.hbm_to_vmem [thread:$0]  %s6928_s9, 128, %s85_s30, [#allocation9]  }
  0x78   :  { %s5584_s29 = smov [#allocation13]   ;;  %s5497_s21 = scalar_lea.hbm %s6930_s11, 16384 }
  0x79   :  { %s103_s16 = sshll.u32 %s5584_s29, 4  ;;  %p5498_p0 = scmp.ne.s32.totalorder %s6930_s11, %s5497_s21  ;;  %s104_s16 = int_to_ptr.vmem [resolvable:$true] %s103_s16 }
  0x7a   :  { %p5501_p1 = scmp.lt.u32.totalorder %s5497_s21, %s6930_s11 }
  0x7c   :  { %p5503_p2 = pnand %p5501_p1, %p5498_p0 }
  0x7e   :  { %5506 = shalt.err (!%p5503_p2)
}
  0x7f   :  { %s5507_s27 = scalar_lea.vmem %s104_s16, 16384  ;;  %p5512_p4 = scmp.lt.s32.totalorder %s104_s16, %s104_s16 }
  0x80   :  { %p5508_p3 = scmp.ne.s32.totalorder %s104_s16, %s5507_s27  ;;  %p5513_p5 = scmp.lt.s32.totalorder %s5507_s27, %s5507_s27 }
  0x82   :  { %p5514_p6 = por %p5513_p5, %p5512_p4 }
  0x84   :  { %p5515_p7 = pnand %p5514_p6, %p5508_p3 }
  0x86   :  { %5518 = shalt.err (!%p5515_p7)
}
  0x87   :  { %s5585_s9 = smov 128   ;;  %s5586_s30 = smov 8  }
  0x88   :  { %109 = dma.hbm_to_vmem [thread:$0]  %s6930_s11, 16384, %s104_s16, [#allocation12], %s5585_s9, %s5585_s9, %s5586_s30  }
  0x89   :  { %s5587_s18 = smov [#allocation16]   ;;  %s5519_s12 = scalar_lea.hbm %s6933_s14, 16 }
  0x8a   :  { %s128_s24 = sshll.u32 %s5587_s18, 4  ;;  %p5520_p8 = scmp.ne.s32.totalorder %s6933_s14, %s5519_s12  ;;  %s129_s24 = int_to_ptr.vmem [resolvable:$true] %s128_s24 }
  0x8b   :  { %p5523_p9 = scmp.lt.u32.totalorder %s5519_s12, %s6933_s14 }
  0x8d   :  { %p5525_p10 = pnand %p5523_p9, %p5520_p8 }
  0x8f   :  { %5528 = shalt.err (!%p5525_p10)
}
  0x90   :  { %s5529_s29 = scalar_lea.vmem %s129_s24, 16  ;;  %s5533_s11 = scalar_lea.vmem %s129_s24, 32 }
  0x91   :  { %p5530_p11 = scmp.ne.s32.totalorder %s129_s24, %s5529_s29  ;;  %p5534_p12 = scmp.lt.s32.totalorder %s129_s24, %s129_s24 }
  0x92   :  { %p5535_p13 = scmp.lt.s32.totalorder %s5533_s11, %s5529_s29 }
  0x94   :  { %p5536_p0 = por %p5535_p13, %p5534_p12 }
  0x96   :  { %p5537_p1 = pnand %p5536_p0, %p5530_p11 }
  0x98   :  { %5540 = shalt.err (!%p5537_p1)
}
  0x99   :  { %131 = dma.hbm_to_vmem [thread:$0]  %s6933_s14, 16, %s129_s24, [#allocation15]  }
  0x9a   :  { %5563 = dma.done.wait [#allocation3], 64  }
  0x9b   :  { %5564 = vsyncadd [#allocation3], 4294967232 }
  0x9c   :  { %5565 = dma.done.wait [#allocation6], 8256  }
  0x9d   :  { %5566 = vsyncadd [#allocation6], 4294959040 }
  0x9e   :  { %5567 = dma.done.wait [#allocation9], 256  }
  0x9f   :  { %5568 = vsyncadd [#allocation9], 4294967040 }
  0xa0   :  { %5569 = dma.done.wait [#allocation12], 16512  }
  0xa1   :  { %5570 = vsyncadd [#allocation12], 4294950784 }
  0xa2   :  { %5571 = dma.done.wait [#allocation15], 48  }
  0xa3   :  { %5572 = vsyncadd [#allocation15], 4294967248  ;;  %vm215_vm0 = vcmask 1040384   ;;  %v5588_v0 = vmov 0   ;;  %vm216_vm1 = vcmask 1041408   ;;  %v5589_v1 = vmov 65535  }
  0xa4   :  { %257 = vmatprep.mubr.bf16.mxu1 %v5588_v0  ;;  %v217_v2 = vsel %vm215_vm0, 4294967295, %v5589_v1  ;;  %v4398_v4 = vld.sshfl [vmem:[#allocation2] sm:$0x33 pattern:$0x76325410]  ;;  %vm211_vm2 = vcmask 23552  }
  0xa5   :  { %v218_v3 = vsel %vm216_vm1, %v217_v2, 0  ;;  %v210_v5 = vcombine.high %v4398_v4, %v4398_v4  ;;  %v4989_v8 = vld [vmem:[%s6922_s3 + $0x4] ss:$8 sps:$4 sm:$0xff]   ;;  %v4987_v10 = vld [vmem:[%s6922_s3] ss:$8 sps:$4 sm:$0xff]   ;;  %vm3362_vm3 = vcmask 1041409  }
  0xa6   :  { %v220_v6 = vand.u32 %v4398_v4, %v218_v3  ;;  %v4990_v9 = vld [vmem:[%s6919_s0] sm:$0xff]   ;;  %v4993_v11 = vld [vmem:[%s6922_s3 + $0x14] ss:$8 sps:$4 sm:$0xff]   ;;  %v4991_v12 = vld [vmem:[%s6922_s3 + $0x10] ss:$8 sps:$4 sm:$0xff]  }
  0xa7   :  { %v223_v7 = vand.u32 %v218_v3, %v210_v5  ;;  %v4996_v13 = vld [vmem:[%s6922_s3 + $0x24] ss:$8 sps:$4 sm:$0xff]   ;;  %v4994_v14 = vld [vmem:[%s6922_s3 + $0x20] ss:$8 sps:$4 sm:$0xff]   ;;  %v4999_v15 = vld [vmem:[%s6922_s3 + $0x34] ss:$8 sps:$4 sm:$0xff]  }
  0xa8   :  { %v4997_v16 = vld [vmem:[%s6922_s3 + $0x30] ss:$8 sps:$4 sm:$0xff]   ;;  %v5002_v17 = vld [vmem:[%s6922_s3 + $0x44] ss:$8 sps:$4 sm:$0xff]   ;;  %v5000_v18 = vld [vmem:[%s6922_s3 + $0x40] ss:$8 sps:$4 sm:$0xff]  }
  0xa9   :  { %225 = vmatprep.subr.bf16.mxu1 %v223_v7  ;;  %v5005_v19 = vld [vmem:[%s6922_s3 + $0x54] ss:$8 sps:$4 sm:$0xff]   ;;  %v5038_v20 = vld [vmem:[%s6920_s1 + $0x4] ss:$8 sps:$4 sm:$0xff]   ;;  %v5003_v21 = vld [vmem:[%s6922_s3 + $0x50] ss:$8 sps:$4 sm:$0xff]  }
  0xaa   :  { %226 = vmatpush1.bf16.msra.mxu1 %v220_v6  ;;  %v5008_v22 = vld [vmem:[%s6922_s3 + $0x64] ss:$8 sps:$4 sm:$0xff]   ;;  %v5006_v23 = vld [vmem:[%s6922_s3 + $0x60] ss:$8 sps:$4 sm:$0xff]   ;;  %v5011_v24 = vld [vmem:[%s6922_s3 + $0x74] ss:$8 sps:$4 sm:$0xff]  }
  0xab   :  { %438 = vmatprep.subr.bf16.mxu1 %v4989_v8  ;;  %v5009_v25 = vld [vmem:[%s6922_s3 + $0x70] ss:$8 sps:$4 sm:$0xff]   ;;  %v5014_v26 = vld [vmem:[%s6922_s3 + $0x84] ss:$8 sps:$4 sm:$0xff]   ;;  %v5012_v27 = vld [vmem:[%s6922_s3 + $0x80] ss:$8 sps:$4 sm:$0xff]  }
  0xac   :  { %v5017_v28 = vld [vmem:[%s6922_s3 + $0x94] ss:$8 sps:$4 sm:$0xff]   ;;  %v5015_v29 = vld [vmem:[%s6922_s3 + $0x90] ss:$8 sps:$4 sm:$0xff]   ;;  %v5020_v30 = vld [vmem:[%s6922_s3 + $0xa4] ss:$8 sps:$4 sm:$0xff]  }
  0xad   :  { %4399 = vmatmul.mubr.msk.bf16.vlgmr.msra.gmra.mrb[0].mxu1 %vm211_vm2, %v4990_v9  ;;  %v5018_v31 = vld [vmem:[%s6922_s3 + $0xa0] ss:$8 sps:$4 sm:$0xff]   ;;  %v5023_v32 = vld [vmem:[%s6922_s3 + $0xb4] ss:$8 sps:$4 sm:$0xff]   ;;  %v5021_v33 = vld [vmem:[%s6922_s3 + $0xb0] ss:$8 sps:$4 sm:$0xff]  }
  0xae   :  { %439 = vmatpush1.bf16.msra.mxu1 %v4987_v10  ;;  %470 = vmatprep.mubr.bf16.mxu1 %v5038_v20  ;;  %v5026_v34 = vld [vmem:[%s6922_s3 + $0xc4] ss:$8 sps:$4 sm:$0xff]   ;;  %v5024_v35 = vld [vmem:[%s6922_s3 + $0xc0] ss:$8 sps:$4 sm:$0xff]   ;;  %v5029_v36 = vld [vmem:[%s6922_s3 + $0xd4] ss:$8 sps:$4 sm:$0xff]  }
  0xaf   :  { %440 = vmatprep.subr.bf16.mxu1 %v4993_v11  ;;  %v5027_v37 = vld [vmem:[%s6922_s3 + $0xd0] ss:$8 sps:$4 sm:$0xff]   ;;  %v5032_v38 = vld [vmem:[%s6922_s3 + $0xe4] ss:$8 sps:$4 sm:$0xff]   ;;  %v5030_v39 = vld [vmem:[%s6922_s3 + $0xe0] ss:$8 sps:$4 sm:$0xff]  }
  0xb0   :  { %v5035_v40 = vld [vmem:[%s6922_s3 + $0xf4] ss:$8 sps:$4 sm:$0xff]   ;;  %v5033_v41 = vld [vmem:[%s6922_s3 + $0xf0] ss:$8 sps:$4 sm:$0xff]   ;;  %v5036_v43 = vld [vmem:[%s6920_s1] ss:$8 sps:$4 sm:$0xff]  }
  0xb1   :  { %v5041_v42 = vld [vmem:[#allocation5 + $0x4] ss:$16 sps:$4 sm:$0xff]   ;;  %v5039_v44 = vld [vmem:[#allocation5] ss:$16 sps:$4 sm:$0xff]   ;;  %v5089_v11 = vld [vmem:[#allocation5 + $0xc] ss:$16 sps:$4 sm:$0xff]  }
  0xb2   :  { %441 = vmatpush1.bf16.msra.mxu1 %v4991_v12  ;;  %v5044_v45 = vld [vmem:[#allocation5 + $0x24] ss:$16 sps:$4 sm:$0xff]   ;;  %v5042_v46 = vld [vmem:[#allocation5 + $0x20] ss:$16 sps:$4 sm:$0xff]  }
  0xb3   :  { %442 = vmatprep.subr.bf16.mxu1 %v4996_v13  ;;  %v5047_v47 = vld [vmem:[#allocation5 + $0x44] ss:$16 sps:$4 sm:$0xff]   ;;  %v5045_v48 = vld [vmem:[#allocation5 + $0x40] ss:$16 sps:$4 sm:$0xff]  }
  0xb4   :  { %v5050_v49 = vld [vmem:[#allocation5 + $0x64] ss:$16 sps:$4 sm:$0xff]   ;;  %v5048_v50 = vld [vmem:[#allocation5 + $0x60] ss:$16 sps:$4 sm:$0xff]  }
  0xb5   :  { %v5053_v51 = vld [vmem:[#allocation5 + $0x84] ss:$16 sps:$4 sm:$0xff]   ;;  %v5051_v52 = vld [vmem:[#allocation5 + $0x80] ss:$16 sps:$4 sm:$0xff]  }
  0xb6   :  { %443 = vmatpush1.bf16.msra.mxu1 %v4994_v14  ;;  %v5056_v53 = vld [vmem:[#allocation5 + $0xa4] ss:$16 sps:$4 sm:$0xff]   ;;  %v5054_v54 = vld [vmem:[#allocation5 + $0xa0] ss:$16 sps:$4 sm:$0xff]  }
  0xb7   :  { %444 = vmatprep.subr.bf16.mxu1 %v4999_v15  ;;  %v5059_v55 = vld [vmem:[#allocation5 + $0xc4] ss:$16 sps:$4 sm:$0xff]   ;;  %v5057_v56 = vld [vmem:[#allocation5 + $0xc0] ss:$16 sps:$4 sm:$0xff]  }
  0xb8   :  { %v5062_v57 = vld [vmem:[#allocation5 + $0xe4] ss:$16 sps:$4 sm:$0xff]   ;;  %v5060_v58 = vld [vmem:[#allocation5 + $0xe0] ss:$16 sps:$4 sm:$0xff]  }
  0xb9   :  { %v5065_v59 = vld [vmem:[#allocation5 + $0x104] ss:$16 sps:$4 sm:$0xff]   ;;  %v5063_v60 = vld [vmem:[#allocation5 + $0x100] ss:$16 sps:$4 sm:$0xff]  }
  0xba   :  { %445 = vmatpush1.bf16.msra.mxu1 %v4997_v16  ;;  %v5068_v61 = vld [vmem:[#allocation5 + $0x124] ss:$16 sps:$4 sm:$0xff]   ;;  %v5066_v62 = vld [vmem:[#allocation5 + $0x120] ss:$16 sps:$4 sm:$0xff]  }
  0xbb   :  { %446 = vmatprep.subr.bf16.mxu1 %v5002_v17  ;;  %v5071_v63 = vld [vmem:[#allocation5 + $0x144] ss:$16 sps:$4 sm:$0xff]   ;;  %v5069_v0 = vld [vmem:[#allocation5 + $0x140] ss:$16 sps:$4 sm:$0xff]  }
  0xbc   :  { %v5074_v1 = vld [vmem:[#allocation5 + $0x164] ss:$16 sps:$4 sm:$0xff]   ;;  %v5072_v2 = vld [vmem:[#allocation5 + $0x160] ss:$16 sps:$4 sm:$0xff]  }
  0xbd   :  { %v5077_v3 = vld [vmem:[#allocation5 + $0x184] ss:$16 sps:$4 sm:$0xff]   ;;  %v5075_v4 = vld [vmem:[#allocation5 + $0x180] ss:$16 sps:$4 sm:$0xff]  }
  0xbe   :  { %447 = vmatpush1.bf16.msra.mxu1 %v5000_v18  ;;  %v5080_v5 = vld [vmem:[#allocation5 + $0x1a4] ss:$16 sps:$4 sm:$0xff]   ;;  %v5078_v6 = vld [vmem:[#allocation5 + $0x1a0] ss:$16 sps:$4 sm:$0xff]  }
  0xbf   :  { %448 = vmatprep.subr.bf16.mxu1 %v5005_v19  ;;  %v5083_v7 = vld [vmem:[#allocation5 + $0x1c4] ss:$16 sps:$4 sm:$0xff]   ;;  %v5081_v8 = vld [vmem:[#allocation5 + $0x1c0] ss:$16 sps:$4 sm:$0xff]  }
  0xc0   :  { %v5086_v9 = vld [vmem:[#allocation5 + $0x1e4] ss:$16 sps:$4 sm:$0xff]   ;;  %v5084_v10 = vld [vmem:[#allocation5 + $0x1e0] ss:$16 sps:$4 sm:$0xff]  }
  0xc1   :  { %v1007_v12 = vld [vmem:[%s6926_s7] sm:$0xff] }
  0xc2   :  { %449 = vmatpush1.bf16.msra.mxu1 %v5003_v21  ;;  %v1011_v13 = vld [vmem:[%s6926_s7 + $0x20] sm:$0xff] }
  0xc3   :  { %450 = vmatprep.subr.bf16.mxu1 %v5008_v22  ;;  %v4499_v14 = vcombine.high %v1007_v12, %v1011_v13  ;;  %v4498_v15 = vcombine.low %v1007_v12, %v1011_v13  ;;  %v1015_v16 = vld [vmem:[%s6926_s7 + $0x40] sm:$0xff] }
  0xc4   :  { %v1019_v17 = vld [vmem:[%s6926_s7 + $0x60] sm:$0xff] }
  0xc5   :  { %v4507_v18 = vcombine.high %v1015_v16, %v1019_v17  ;;  %2585 = vmatprep.subr.bf16.mxu0 %v4499_v14  ;;  %v4506_v19 = vcombine.low %v1015_v16, %v1019_v17  ;;  %v1023_v20 = vld [vmem:[%s6926_s7 + $0x80] sm:$0xff] }
  0xc6   :  { %451 = vmatpush1.bf16.msra.mxu1 %v5006_v23  ;;  %2586 = vmatpush1.bf16.msra.mxu0 %v4498_v15  ;;  %v1027_v21 = vld [vmem:[%s6926_s7 + $0xa0] sm:$0xff] }
  0xc7   :  { %452 = vmatprep.subr.bf16.mxu1 %v5011_v24  ;;  %2587 = vmatprep.subr.bf16.mxu0 %v4507_v18  ;;  %v4515_v22 = vcombine.high %v1023_v20, %v1027_v21  ;;  %v4514_v23 = vcombine.low %v1023_v20, %v1027_v21  ;;  %v1031_v24 = vld [vmem:[%s6926_s7 + $0xc0] sm:$0xff] }
  0xca   :  { %453 = vmatpush1.bf16.msra.mxu1 %v5009_v25  ;;  %2588 = vmatpush1.bf16.msra.mxu0 %v4506_v19  ;;  %v1035_v25 = vld [vmem:[%s6926_s7 + $0xe0] sm:$0xff] }
  0xcb   :  { %454 = vmatprep.subr.bf16.mxu1 %v5014_v26  ;;  %2589 = vmatprep.subr.bf16.mxu0 %v4515_v22  ;;  %v4523_v26 = vcombine.high %v1031_v24, %v1035_v25 }
  0xce   :  { %455 = vmatpush1.bf16.msra.mxu1 %v5012_v27  ;;  %2590 = vmatpush1.bf16.msra.mxu0 %v4514_v23  ;;  %v4522_v27 = vcombine.low %v1031_v24, %v1035_v25  ;;  %v5087_v25 = vld [vmem:[#allocation5 + $0x8] ss:$16 sps:$4 sm:$0xff]  }
  0xcf   :  { %456 = vmatprep.subr.bf16.mxu1 %v5017_v28  ;;  %2591 = vmatprep.subr.bf16.mxu0 %v4523_v26  ;;  %v1039_v28 = vld [vmem:[%s6926_s7 + $0x100] sm:$0xff] }
  0xd0   :  { %v5092_v26 = vld [vmem:[#allocation5 + $0x2c] ss:$16 sps:$4 sm:$0xff]  }
  0xd2   :  { %457 = vmatpush1.bf16.msra.mxu1 %v5015_v29  ;;  %v1043_v29 = vld [vmem:[%s6926_s7 + $0x120] sm:$0xff]  ;;  %2592 = vmatpush1.bf16.msra.mxu0 %v4522_v27  ;;  %v5090_v27 = vld [vmem:[#allocation5 + $0x28] ss:$16 sps:$4 sm:$0xff]  }
  0xd3   :  { %458 = vmatprep.subr.bf16.mxu1 %v5020_v30  ;;  %v4531_v30 = vcombine.high %v1039_v28, %v1043_v29 }
  0xd5   :  { %2593 = vmatprep.subr.bf16.mxu0 %v4531_v30  ;;  %v5098_v30 = vld [vmem:[#allocation5 + $0x6c] ss:$16 sps:$4 sm:$0xff]  }
  0xd6   :  { %459 = vmatpush1.bf16.msra.mxu1 %v5018_v31  ;;  %v4530_v31 = vcombine.low %v1039_v28, %v1043_v29  ;;  %v5095_v28 = vld [vmem:[#allocation5 + $0x4c] ss:$16 sps:$4 sm:$0xff]   ;;  %v5093_v29 = vld [vmem:[#allocation5 + $0x48] ss:$16 sps:$4 sm:$0xff]  }
  0xd7   :  { %460 = vmatprep.subr.bf16.mxu1 %v5023_v32  ;;  %v1047_v32 = vld [vmem:[%s6926_s7 + $0x140] sm:$0xff] }
  0xd8   :  { %2594 = vmatpush1.bf16.msra.mxu0 %v4530_v31  ;;  %v5096_v31 = vld [vmem:[#allocation5 + $0x68] ss:$16 sps:$4 sm:$0xff]  }
  0xda   :  { %461 = vmatpush1.bf16.msra.mxu1 %v5021_v33  ;;  %v1051_v33 = vld [vmem:[%s6926_s7 + $0x160] sm:$0xff] }
  0xdb   :  { %462 = vmatprep.subr.bf16.mxu1 %v5026_v34  ;;  %v4539_v34 = vcombine.high %v1047_v32, %v1051_v33 }
  0xdd   :  { %2595 = vmatprep.subr.bf16.mxu0 %v4539_v34  ;;  %v5104_v34 = vld [vmem:[#allocation5 + $0xac] ss:$16 sps:$4 sm:$0xff]  }
  0xde   :  { %463 = vmatpush1.bf16.msra.mxu1 %v5024_v35  ;;  %v4538_v35 = vcombine.low %v1047_v32, %v1051_v33  ;;  %v5101_v32 = vld [vmem:[#allocation5 + $0x8c] ss:$16 sps:$4 sm:$0xff]   ;;  %v5099_v33 = vld [vmem:[#allocation5 + $0x88] ss:$16 sps:$4 sm:$0xff]  }
  0xdf   :  { %464 = vmatprep.subr.bf16.mxu1 %v5029_v36  ;;  %v1055_v36 = vld [vmem:[%s6926_s7 + $0x180] sm:$0xff] }
  0xe0   :  { %2596 = vmatpush1.bf16.msra.mxu0 %v4538_v35  ;;  %v5102_v35 = vld [vmem:[#allocation5 + $0xa8] ss:$16 sps:$4 sm:$0xff]  }
  0xe2   :  { %465 = vmatpush1.bf16.msra.mxu1 %v5027_v37  ;;  %v1059_v37 = vld [vmem:[%s6926_s7 + $0x1a0] sm:$0xff] }
  0xe3   :  { %466 = vmatprep.subr.bf16.mxu1 %v5032_v38  ;;  %v4547_v38 = vcombine.high %v1055_v36, %v1059_v37 }
  0xe5   :  { %2597 = vmatprep.subr.bf16.mxu0 %v4547_v38  ;;  %v5110_v38 = vld [vmem:[#allocation5 + $0xec] ss:$16 sps:$4 sm:$0xff]  }
  0xe6   :  { %467 = vmatpush1.bf16.msra.mxu1 %v5030_v39  ;;  %v4546_v39 = vcombine.low %v1055_v36, %v1059_v37  ;;  %v5107_v36 = vld [vmem:[#allocation5 + $0xcc] ss:$16 sps:$4 sm:$0xff]   ;;  %v5105_v37 = vld [vmem:[#allocation5 + $0xc8] ss:$16 sps:$4 sm:$0xff]  }
  0xe7   :  { %468 = vmatprep.subr.bf16.mxu1 %v5035_v40  ;;  %v1063_v40 = vld [vmem:[%s6926_s7 + $0x1c0] sm:$0xff] }
  0xe8   :  { %2598 = vmatpush1.bf16.msra.mxu0 %v4546_v39  ;;  %v5108_v39 = vld [vmem:[#allocation5 + $0xe8] ss:$16 sps:$4 sm:$0xff]  }
  0xea   :  { %469 = vmatpush1.bf16.msra.mxu1 %v5033_v41  ;;  %v1067_v41 = vld [vmem:[%s6926_s7 + $0x1e0] sm:$0xff] }
  0xeb   :  { %909 = vmatprep.subr.bf16.mxu1 %v5041_v42  ;;  %v4555_v42 = vcombine.high %v1063_v40, %v1067_v41 }
  0xed   :  { %471 = vmatmul.mubr.bf16.vlgmr.msra.gmra.mrb[0].mxu1 %v5036_v43  ;;  %v4554_v43 = vcombine.low %v1063_v40, %v1067_v41  ;;  %2599 = vmatprep.subr.bf16.mxu0 %v4555_v42  ;;  %v5113_v40 = vld [vmem:[#allocation5 + $0x10c] ss:$16 sps:$4 sm:$0xff]   ;;  %v5111_v41 = vld [vmem:[#allocation5 + $0x108] ss:$16 sps:$4 sm:$0xff]  }
  0xee   :  { %910 = vmatpush1.bf16.msra.mxu1 %v5039_v44  ;;  %v1071_v44 = vld [vmem:[%s6926_s7 + $0x200] sm:$0xff] }
  0xef   :  { %911 = vmatprep.subr.bf16.mxu1 %v5044_v45  ;;  %v1075_v45 = vld [vmem:[%s6926_s7 + $0x220] sm:$0xff]  ;;  %2600 = vmatpush1.bf16.msra.mxu0 %v4554_v43  ;;  %v5114_v43 = vld [vmem:[#allocation5 + $0x128] ss:$16 sps:$4 sm:$0xff]  }
  0xf0   :  { %v5116_v42 = vld [vmem:[#allocation5 + $0x12c] ss:$16 sps:$4 sm:$0xff]  }
  0xf2   :  { %912 = vmatpush1.bf16.msra.mxu1 %v5042_v46  ;;  %v4563_v46 = vcombine.high %v1071_v44, %v1075_v45 }
  0xf3   :  { %913 = vmatprep.subr.bf16.mxu1 %v5047_v47  ;;  %v4562_v47 = vcombine.low %v1071_v44, %v1075_v45  ;;  %v5119_v44 = vld [vmem:[#allocation5 + $0x14c] ss:$16 sps:$4 sm:$0xff]   ;;  %v5117_v45 = vld [vmem:[#allocation5 + $0x148] ss:$16 sps:$4 sm:$0xff]  }
  0xf4   :  { %2601 = vmatprep.subr.bf16.mxu0 %v4563_v46  ;;  %v5122_v46 = vld [vmem:[#allocation5 + $0x16c] ss:$16 sps:$4 sm:$0xff]  }
  0xf5   :  { %2602 = vmatpush1.bf16.msra.mxu0 %v4562_v47  ;;  %v5120_v47 = vld [vmem:[#allocation5 + $0x168] ss:$16 sps:$4 sm:$0xff]  }
  0xf6   :  { %914 = vmatpush1.bf16.msra.mxu1 %v5045_v48  ;;  %v1079_v48 = vld [vmem:[%s6926_s7 + $0x240] sm:$0xff] }
  0xf7   :  { %915 = vmatprep.subr.bf16.mxu1 %v5050_v49  ;;  %v1083_v49 = vld [vmem:[%s6926_s7 + $0x260] sm:$0xff] }
  0xfa   :  { %916 = vmatpush1.bf16.msra.mxu1 %v5048_v50  ;;  %v4571_v50 = vcombine.high %v1079_v48, %v1083_v49 }
  0xfb   :  { %917 = vmatprep.subr.bf16.mxu1 %v5053_v51  ;;  %v4570_v51 = vcombine.low %v1079_v48, %v1083_v49  ;;  %v5125_v48 = vld [vmem:[#allocation5 + $0x18c] ss:$16 sps:$4 sm:$0xff]   ;;  %v5123_v49 = vld [vmem:[#allocation5 + $0x188] ss:$16 sps:$4 sm:$0xff]  }
  0xfc   :  { %2603 = vmatprep.subr.bf16.mxu0 %v4571_v50  ;;  %v5128_v50 = vld [vmem:[#allocation5 + $0x1ac] ss:$16 sps:$4 sm:$0xff]  }
  0xfd   :  { %2604 = vmatpush1.bf16.msra.mxu0 %v4570_v51  ;;  %v5126_v51 = vld [vmem:[#allocation5 + $0x1a8] ss:$16 sps:$4 sm:$0xff]  }
  0xfe   :  { %918 = vmatpush1.bf16.msra.mxu1 %v5051_v52  ;;  %v1087_v52 = vld [vmem:[%s6926_s7 + $0x280] sm:$0xff] }
  0xff   :  { %919 = vmatprep.subr.bf16.mxu1 %v5056_v53  ;;  %v1091_v53 = vld [vmem:[%s6926_s7 + $0x2a0] sm:$0xff] }
 0x102   :  { %920 = vmatpush1.bf16.msra.mxu1 %v5054_v54  ;;  %v483_v54 = vlaneseq }
 0x103   :  { %921 = vmatprep.subr.bf16.mxu1 %v5059_v55  ;;  %v4579_v55 = vcombine.high %v1087_v52, %v1091_v53 }
 0x105   :  { %2605 = vmatprep.subr.bf16.mxu0 %v4579_v55  ;;  %v1008_v55 = vld [vmem:[%s6926_s7 + $0x8] sm:$0xff] }
 0x106   :  { %922 = vmatpush1.bf16.msra.mxu1 %v5057_v56  ;;  %v4578_v56 = vcombine.low %v1087_v52, %v1091_v53  ;;  %v5131_v52 = vld [vmem:[#allocation5 + $0x1cc] ss:$16 sps:$4 sm:$0xff]   ;;  %v5129_v53 = vld [vmem:[#allocation5 + $0x1c8] ss:$16 sps:$4 sm:$0xff]  }
 0x107   :  { %923 = vmatprep.subr.bf16.mxu1 %v5062_v57  ;;  %v1095_v57 = vld [vmem:[%s6926_s7 + $0x2c0] sm:$0xff] }
 0x108   :  { %2606 = vmatpush1.bf16.msra.mxu0 %v4578_v56  ;;  %v1012_v56 = vld [vmem:[%s6926_s7 + $0x28] sm:$0xff] }
 0x10a   :  { %924 = vmatpush1.bf16.msra.mxu1 %v5060_v58  ;;  %v1099_v58 = vld [vmem:[%s6926_s7 + $0x2e0] sm:$0xff] }
 0x10b   :  { %925 = vmatprep.subr.bf16.mxu1 %v5065_v59  ;;  %v5956_v59 = vshrl.u32 %v483_v54, 7  ;;  %v5134_v54 = vld [vmem:[#allocation5 + $0x1ec] ss:$16 sps:$4 sm:$0xff]  }
 0x10e   :  { %926 = vmatpush1.bf16.msra.mxu1 %v5063_v60  ;;  %v4587_v60 = vcombine.high %v1095_v57, %v1099_v58 }
 0x10f   :  { %927 = vmatprep.subr.bf16.mxu1 %v5068_v61  ;;  %v4586_v61 = vcombine.low %v1095_v57, %v1099_v58  ;;  %v5132_v57 = vld [vmem:[#allocation5 + $0x1e8] ss:$16 sps:$4 sm:$0xff]   ;;  %v4501_v58 = vcombine.high %v1008_v55, %v1012_v56 }
 0x110   :  { %2607 = vmatprep.subr.bf16.mxu0 %v4587_v60  ;;  %v1016_v60 = vld [vmem:[%s6926_s7 + $0x48] sm:$0xff] }
 0x111   :  { %2608 = vmatpush1.bf16.msra.mxu0 %v4586_v61  ;;  %v1020_v61 = vld [vmem:[%s6926_s7 + $0x68] sm:$0xff] }
 0x112   :  { %928 = vmatpush1.bf16.msra.mxu1 %v5066_v62  ;;  %v1103_v62 = vld [vmem:[%s6926_s7 + $0x300] sm:$0xff] }
 0x113   :  { %929 = vmatprep.subr.bf16.mxu1 %v5071_v63  ;;  %v1107_v63 = vld [vmem:[%s6926_s7 + $0x320] sm:$0xff] }
 0x116   :  { %930 = vmatpush1.bf16.msra.mxu1 %v5069_v0  ;;  %v5965_v0 = vsub.s32 0, %v5956_v59 }
 0x117   :  { %931 = vmatprep.subr.bf16.mxu1 %v5074_v1  ;;  %v4595_v1 = vcombine.high %v1103_v62, %v1107_v63 }
 0x119   :  { %2609 = vmatprep.subr.bf16.mxu0 %v4595_v1  ;;  %v1024_v1 = vld [vmem:[%s6926_s7 + $0x88] sm:$0xff] }
 0x11a   :  { %932 = vmatpush1.bf16.msra.mxu1 %v5072_v2  ;;  %v481_v2 = vld [vmem:[%s6923_s4] sm:$0x3] }
 0x11b   :  { %933 = vmatprep.subr.bf16.mxu1 %v5077_v3  ;;  %v5971_v3 = vsub.s32 1, %v5956_v59 }
 0x11e   :  { %934 = vmatpush1.bf16.msra.mxu1 %v5075_v4  ;;  %v4594_v4 = vcombine.low %v1103_v62, %v1107_v63  ;;  %v4500_v62 = vcombine.low %v1008_v55, %v1012_v56  ;;  %v4509_v63 = vcombine.high %v1016_v60, %v1020_v61 }
 0x11f   :  { %935 = vmatprep.subr.bf16.mxu1 %v5080_v5  ;;  %v1111_v5 = vld [vmem:[%s6926_s7 + $0x340] sm:$0xff] }
 0x120   :  { %2610 = vmatpush1.bf16.msra.mxu0 %v4594_v4  ;;  %v4508_v4 = vcombine.low %v1016_v60, %v1020_v61 }
 0x122   :  { %936 = vmatpush1.bf16.msra.mxu1 %v5078_v6  ;;  %v1115_v6 = vld [vmem:[%s6926_s7 + $0x360] sm:$0xff] }
 0x123   :  { %937 = vmatprep.subr.bf16.mxu1 %v5083_v7  ;;  %v486_v7 = vrot.slane %v481_v2, %v5965_v0 }
 0x126   :  { %938 = vmatpush1.bf16.msra.mxu1 %v5081_v8  ;;  %v4603_v8 = vcombine.high %v1111_v5, %v1115_v6 }
 0x127   :  { %939 = vmatprep.subr.bf16.mxu1 %v5086_v9  ;;  %v490_v9 = vrot.slane %v481_v2, %v5971_v3  ;;  %v1028_v2 = vld [vmem:[%s6926_s7 + $0xa8] sm:$0xff] }
 0x128   :  { %2611 = vmatprep.subr.bf16.mxu0 %v4603_v8  ;;  %v4516_v8 = vcombine.low %v1024_v1, %v1028_v2 }
 0x12a   :  { %940 = vmatpush1.bf16.msra.mxu1 %v5084_v10  ;;  %v4602_v10 = vcombine.low %v1111_v5, %v1115_v6  ;;  %v4517_v5 = vcombine.high %v1024_v1, %v1028_v2  ;;  %v1032_v6 = vld [vmem:[%s6926_s7 + $0xc8] sm:$0xff] }
 0x12b   :  { %952 = vmatprep.subr.bf16.mxu1 %v5089_v11 }
 0x12c   :  { %2612 = vmatpush1.bf16.msra.mxu0 %v4602_v10  ;;  %v1040_v10 = vld [vmem:[%s6926_s7 + $0x108] sm:$0xff] }
 0x1c0   :  { %v472_v11 = vpop.f32.mrb[0].mxu1 }
 0x1c1   :  { %v493_v12 = vadd.f32 %v486_v7, %v472_v11  ;;  %v474_v13 = vpop.f32.mrb[1].mxu1  ;;  %v1044_v11 = vld [vmem:[%s6926_s7 + $0x128] sm:$0xff] }
 0x1c2   :  { %v494_v14 = vadd.f32 %v490_v9, %v474_v13  ;;  %v476_v15 = vpop.f32.mrb[2].mxu1  ;;  %v4533_v13 = vcombine.high %v1040_v10, %v1044_v11 }
 0x1c3   :  { %v495_v16 = vadd.f32 %v486_v7, %v476_v15  ;;  %v478_v17 = vpop.f32.mrb[3].mxu1  ;;  %v497_v19 = vmax.f32 %v493_v12, 0.0  ;;  %v1036_v7 = vld [vmem:[%s6926_s7 + $0xe8] sm:$0xff] }
 0x1c4   :  { %v496_v18 = vadd.f32 %v490_v9, %v478_v17  ;;  %v498_v21 = vmax.f32 %v494_v14, 0.0  ;;  %v4525_v9 = vcombine.high %v1032_v6, %v1036_v7  ;;  %v4524_v12 = vcombine.low %v1032_v6, %v1036_v7  ;;  %v1048_v14 = vld [vmem:[%s6926_s7 + $0x148] sm:$0xff] }
 0x1c5   :  { %v499_v20 = vmax.f32 %v495_v16, 0.0  ;;  %v1052_v15 = vld [vmem:[%s6926_s7 + $0x168] sm:$0xff]  ;;  %v4532_v16 = vcombine.low %v1040_v10, %v1044_v11 }
 0x1c6   :  { %v500_v22 = vmax.f32 %v496_v18, 0.0  ;;  %v4541_v17 = vcombine.high %v1048_v14, %v1052_v15  ;;  %v1056_v18 = vld [vmem:[%s6926_s7 + $0x188] sm:$0xff] }
 0x1c7   :  { %v5981_v23 = vpack.c.bf16 %v499_v20, %v497_v19  ;;  %v1060_v19 = vld [vmem:[%s6926_s7 + $0x1a8] sm:$0xff]  ;;  %v4540_v20 = vcombine.low %v1048_v14, %v1052_v15  ;;  %v6121_v14 = vld [vmem:[#allocation7] sm:$0xf] }
 0x1c8   :  { %v502_v24 = vpack.c.bf16 %v500_v22, %v498_v21  ;;  %v4549_v21 = vcombine.high %v1056_v18, %v1060_v19  ;;  %v1064_v22 = vld [vmem:[%s6926_s7 + $0x1c8] sm:$0xff]  ;;  %v572_v15 = vrot.slane %v6121_v14, %v5965_v0 }
 0x1ca   :  { %941 = vmatprep.mubr.bf16.mxu1 %v502_v24 }
 0x1cb   :  { %942 = vmatmul.mubr.bf16.vlgmr.msra.gmra.mrb[4].mxu1 %v5981_v23 }
 0x1cc   :  { %953 = vmatpush1.bf16.msra.mxu1 %v5087_v25  ;;  %984 = vmatprep.mubr.bf16.mxu1 %v502_v24  ;;  %v1119_v24 = vld [vmem:[%s6926_s7 + $0x380] sm:$0xff] }
 0x1cd   :  { %954 = vmatprep.subr.bf16.mxu1 %v5092_v26  ;;  %v1123_v25 = vld [vmem:[%s6926_s7 + $0x3a0] sm:$0xff] }
 0x1ce   :  { %v4611_v26 = vcombine.high %v1119_v24, %v1123_v25 }
 0x1d0   :  { %955 = vmatpush1.bf16.msra.mxu1 %v5090_v27  ;;  %v4548_v27 = vcombine.low %v1056_v18, %v1060_v19  ;;  %2613 = vmatprep.subr.bf16.mxu0 %v4611_v26 }
 0x1d1   :  { %956 = vmatprep.subr.bf16.mxu1 %v5095_v28  ;;  %v4610_v28 = vcombine.low %v1119_v24, %v1123_v25 }
 0x1d3   :  { %2614 = vmatpush1.bf16.msra.mxu0 %v4610_v28 }
 0x1d4   :  { %957 = vmatpush1.bf16.msra.mxu1 %v5093_v29 }
 0x1d5   :  { %958 = vmatprep.subr.bf16.mxu1 %v5098_v30  ;;  %v1072_v30 = vld [vmem:[%s6926_s7 + $0x208] sm:$0xff] }
 0x1d8   :  { %959 = vmatpush1.bf16.msra.mxu1 %v5096_v31  ;;  %v1076_v31 = vld [vmem:[%s6926_s7 + $0x228] sm:$0xff] }
 0x1d9   :  { %960 = vmatprep.subr.bf16.mxu1 %v5101_v32  ;;  %v1127_v32 = vld [vmem:[%s6926_s7 + $0x3c0] sm:$0xff] }
 0x1dc   :  { %961 = vmatpush1.bf16.msra.mxu1 %v5099_v33  ;;  %v1131_v33 = vld [vmem:[%s6926_s7 + $0x3e0] sm:$0xff] }
 0x1dd   :  { %962 = vmatprep.subr.bf16.mxu1 %v5104_v34  ;;  %v4619_v34 = vcombine.high %v1127_v32, %v1131_v33 }
 0x1df   :  { %2615 = vmatprep.subr.bf16.mxu0 %v4619_v34 }
 0x1e0   :  { %963 = vmatpush1.bf16.msra.mxu1 %v5102_v35 }
 0x1e1   :  { %964 = vmatprep.subr.bf16.mxu1 %v5107_v36  ;;  %v4618_v36 = vcombine.low %v1127_v32, %v1131_v33  ;;  %v1148_v32 = vld [vmem:[%s6926_s7 + $0x468] sm:$0xff] }
 0x1e3   :  { %2616 = vmatpush1.bf16.msra.mxu0 %v4618_v36 }
 0x1e4   :  { %965 = vmatpush1.bf16.msra.mxu1 %v5105_v37  ;;  %v4565_v37 = vcombine.high %v1072_v30, %v1076_v31 }
 0x1e5   :  { %966 = vmatprep.subr.bf16.mxu1 %v5110_v38  ;;  %v1080_v38 = vld [vmem:[%s6926_s7 + $0x248] sm:$0xff] }
 0x1e8   :  { %967 = vmatpush1.bf16.msra.mxu1 %v5108_v39  ;;  %v1084_v39 = vld [vmem:[%s6926_s7 + $0x268] sm:$0xff] }
 0x1e9   :  { %968 = vmatprep.subr.bf16.mxu1 %v5113_v40  ;;  %v6060_v40 = vld [vmem:[%s6926_s7 + $0x400] sm:$0xff] }
 0x1ec   :  { %969 = vmatpush1.bf16.msra.mxu1 %v5111_v41  ;;  %v6065_v41 = vld [vmem:[%s6926_s7 + $0x420] sm:$0xff] }
 0x1ed   :  { %970 = vmatprep.subr.bf16.mxu1 %v5116_v42  ;;  %v6070_v42 = vld [vmem:[%s6926_s7 + $0x408] sm:$0xff] }
 0x1f0   :  { %971 = vmatpush1.bf16.msra.mxu1 %v5114_v43  ;;  %v4627_v43 = vcombine.high %v6060_v40, %v6065_v41 }
 0x1f1   :  { %972 = vmatprep.subr.bf16.mxu1 %v5119_v44  ;;  %v6077_v44 = vld [vmem:[%s6926_s7 + $0x428] sm:$0xff] }
 0x1f2   :  { %2628 = vmatprep.subr.bf16.mxu0 %v4627_v43  ;;  %v1156_v43 = vld [vmem:[%s6926_s7 + $0x4a8] sm:$0xff] }
 0x1f4   :  { %973 = vmatpush1.bf16.msra.mxu1 %v5117_v45  ;;  %v4564_v45 = vcombine.low %v1072_v30, %v1076_v31  ;;  %v1147_v30 = vld [vmem:[%s6926_s7 + $0x460] sm:$0xff]  ;;  %v1144_v31 = vld [vmem:[%s6926_s7 + $0x448] sm:$0xff] }
 0x1f5   :  { %974 = vmatprep.subr.bf16.mxu1 %v5122_v46  ;;  %v4626_v46 = vcombine.low %v6060_v40, %v6065_v41  ;;  %v4637_v36 = vcombine.high %v1144_v31, %v1148_v32  ;;  %v1160_v40 = vld [vmem:[%s6926_s7 + $0x4c8] sm:$0xff] }
 0x1f6   :  { %v1164_v41 = vld [vmem:[%s6926_s7 + $0x4e8] sm:$0xff] }
 0x1f8   :  { %975 = vmatpush1.bf16.msra.mxu1 %v5120_v47  ;;  %v4628_v47 = vcombine.low %v6070_v42, %v6077_v44 }
 0x1f9   :  { %976 = vmatprep.subr.bf16.mxu1 %v5125_v48  ;;  %v4573_v48 = vcombine.high %v1080_v38, %v1084_v39 }
 0x1fc   :  { %977 = vmatpush1.bf16.msra.mxu1 %v5123_v49  ;;  %v1088_v49 = vld [vmem:[%s6926_s7 + $0x288] sm:$0xff] }
 0x1fd   :  { %978 = vmatprep.subr.bf16.mxu1 %v5128_v50  ;;  %v1092_v50 = vld [vmem:[%s6926_s7 + $0x2a8] sm:$0xff] }
 0x1fe   :  { %v4580_v55 = vcombine.low %v1088_v49, %v1092_v50 }
 0x200   :  { %979 = vmatpush1.bf16.msra.mxu1 %v5126_v51  ;;  %v4572_v51 = vcombine.low %v1080_v38, %v1084_v39  ;;  %v1155_v38 = vld [vmem:[%s6926_s7 + $0x4a0] sm:$0xff]  ;;  %v1152_v39 = vld [vmem:[%s6926_s7 + $0x488] sm:$0xff] }
 0x201   :  { %980 = vmatprep.subr.bf16.mxu1 %v5131_v52  ;;  %v4581_v52 = vcombine.high %v1088_v49, %v1092_v50  ;;  %v4645_v50 = vcombine.high %v1152_v39, %v1156_v43 }
 0x204   :  { %981 = vmatpush1.bf16.msra.mxu1 %v5129_v53  ;;  %v1096_v53 = vld [vmem:[%s6926_s7 + $0x2c8] sm:$0xff] }
 0x205   :  { %982 = vmatprep.subr.bf16.mxu1 %v5134_v54  ;;  %v1100_v54 = vld [vmem:[%s6926_s7 + $0x2e8] sm:$0xff] }
 0x206   :  { %v4589_v56 = vcombine.high %v1096_v53, %v1100_v54  ;;  %v4588_v60 = vcombine.low %v1096_v53, %v1100_v54  ;;  %v1167_v53 = vld [vmem:[%s6926_s7 + $0x500] sm:$0xff] }
 0x207   :  { %v1171_v54 = vld [vmem:[%s6926_s7 + $0x520] sm:$0xff] }
 0x208   :  { %983 = vmatpush1.bf16.msra.mxu1 %v5132_v57  ;;  %v1104_v57 = vld [vmem:[%s6926_s7 + $0x308] sm:$0xff] }
 0x209   :  { %2671 = vmatprep.subr.bf16.mxu1 %v4501_v58  ;;  %v1108_v58 = vld [vmem:[%s6926_s7 + $0x328] sm:$0xff] }
 0x20a   :  { %v4597_v61 = vcombine.high %v1104_v57, %v1108_v58  ;;  %v4596_v1 = vcombine.low %v1104_v57, %v1108_v58  ;;  %v4652_v58 = vcombine.low %v1160_v40, %v1164_v41 }
 0x20b   :  { %985 = vmatmul.mubr.bf16.vlgmr.msra.gmra.mrb[8].mxu1 %v5981_v23  ;;  %v1068_v23 = vld [vmem:[%s6926_s7 + $0x1e8] sm:$0xff] }
 0x20c   :  { %2672 = vmatpush1.bf16.msra.mxu1 %v4500_v62  ;;  %v4557_v29 = vcombine.high %v1064_v22, %v1068_v23  ;;  %v4556_v35 = vcombine.low %v1064_v22, %v1068_v23  ;;  %v1112_v62 = vld [vmem:[%s6926_s7 + $0x348] sm:$0xff] }
 0x20d   :  { %2673 = vmatprep.subr.bf16.mxu1 %v4509_v63  ;;  %v1116_v63 = vld [vmem:[%s6926_s7 + $0x368] sm:$0xff] }
 0x20e   :  { %v4605_v2 = vcombine.high %v1112_v62, %v1116_v63  ;;  %v4604_v6 = vcombine.low %v1112_v62, %v1116_v63  ;;  %v1175_v62 = vld [vmem:[%s6926_s7 + $0x540] sm:$0xff] }
 0x20f   :  { %v1179_v63 = vld [vmem:[%s6926_s7 + $0x560] sm:$0xff] }
 0x210   :  { %2674 = vmatpush1.bf16.msra.mxu1 %v4508_v4  ;;  %v1120_v4 = vld [vmem:[%s6926_s7 + $0x388] sm:$0xff] }
 0x211   :  { %2675 = vmatprep.subr.bf16.mxu1 %v4517_v5  ;;  %v1124_v5 = vld [vmem:[%s6926_s7 + $0x3a8] sm:$0xff] }
 0x212   :  { %v4613_v7 = vcombine.high %v1120_v4, %v1124_v5  ;;  %v4612_v10 = vcombine.low %v1120_v4, %v1124_v5  ;;  %v4658_v4 = vcombine.low %v1167_v53, %v1171_v54 }
 0x214   :  { %2676 = vmatpush1.bf16.msra.mxu1 %v4516_v8  ;;  %v1128_v8 = vld [vmem:[%s6926_s7 + $0x3c8] sm:$0xff] }
 0x215   :  { %2677 = vmatprep.subr.bf16.mxu1 %v4525_v9  ;;  %v1132_v9 = vld [vmem:[%s6926_s7 + $0x3e8] sm:$0xff] }
 0x216   :  { %v4621_v11 = vcombine.high %v1128_v8, %v1132_v9 }
 0x218   :  { %2678 = vmatpush1.bf16.msra.mxu1 %v4524_v12  ;;  %v4620_v12 = vcombine.low %v1128_v8, %v1132_v9  ;;  %v1183_v8 = vld [vmem:[%s6926_s7 + $0x580] sm:$0xff] }
 0x219   :  { %2679 = vmatprep.subr.bf16.mxu1 %v4533_v13  ;;  %v4629_v13 = vcombine.high %v6070_v42, %v6077_v44  ;;  %v4644_v44 = vcombine.low %v1152_v39, %v1156_v43  ;;  %v1187_v9 = vld [vmem:[%s6926_s7 + $0x5a0] sm:$0xff] }
 0x21c   :  { %2680 = vmatpush1.bf16.msra.mxu1 %v4532_v16  ;;  %v576_v16 = vrot.slane %v6121_v14, %v5971_v3 }
 0x21d   :  { %2681 = vmatprep.subr.bf16.mxu1 %v4541_v17 }
 0x220   :  { %2682 = vmatpush1.bf16.msra.mxu1 %v4540_v20 }
 0x221   :  { %2683 = vmatprep.subr.bf16.mxu1 %v4549_v21 }
 0x224   :  { %2684 = vmatpush1.bf16.msra.mxu1 %v4548_v27  ;;  %v1143_v27 = vld [vmem:[%s6926_s7 + $0x440] sm:$0xff] }
 0x225   :  { %2685 = vmatprep.subr.bf16.mxu1 %v4557_v29 }
 0x228   :  { %2686 = vmatpush1.bf16.msra.mxu1 %v4556_v35  ;;  %v4635_v35 = vcombine.high %v1143_v27, %v1147_v30 }
 0x229   :  { %2687 = vmatprep.subr.bf16.mxu1 %v4565_v37  ;;  %v1151_v37 = vld [vmem:[%s6926_s7 + $0x480] sm:$0xff] }
 0x22a   :  { %v4643_v49 = vcombine.high %v1151_v37, %v1155_v38  ;;  %v4642_v42 = vcombine.low %v1151_v37, %v1155_v38  ;;  %v1208_v37 = vld [vmem:[%s6926_s7 + $0x648] sm:$0xff] }
 0x22b   :  { %v1212_v38 = vld [vmem:[%s6926_s7 + $0x668] sm:$0xff] }
 0x22c   :  { %2688 = vmatpush1.bf16.msra.mxu1 %v4564_v45  ;;  %v4634_v45 = vcombine.low %v1143_v27, %v1147_v30  ;;  %v1200_v27 = vld [vmem:[%s6926_s7 + $0x608] sm:$0xff] }
 0x22d   :  { %2689 = vmatprep.subr.bf16.mxu1 %v4573_v48  ;;  %v4636_v48 = vcombine.low %v1144_v31, %v1148_v32 }
 0x230   :  { %2690 = vmatpush1.bf16.msra.mxu1 %v4572_v51  ;;  %v1159_v51 = vld [vmem:[%s6926_s7 + $0x4c0] sm:$0xff] }
 0x231   :  { %2691 = vmatprep.subr.bf16.mxu1 %v4581_v52  ;;  %v1163_v52 = vld [vmem:[%s6926_s7 + $0x4e0] sm:$0xff] }
 0x232   :  { %v4650_v57 = vcombine.low %v1159_v51, %v1163_v52 }
 0x234   :  { %2692 = vmatpush1.bf16.msra.mxu1 %v4580_v55  ;;  %v1168_v55 = vld [vmem:[%s6926_s7 + $0x508] sm:$0xff] }
 0x235   :  { %2693 = vmatprep.subr.bf16.mxu1 %v4589_v56  ;;  %v1172_v56 = vld [vmem:[%s6926_s7 + $0x528] sm:$0xff] }
 0x236   :  { %v4660_v5 = vcombine.low %v1168_v55, %v1172_v56 }
 0x238   :  { %2694 = vmatpush1.bf16.msra.mxu1 %v4588_v60  ;;  %v4659_v60 = vcombine.high %v1167_v53, %v1171_v54  ;;  %v1224_v53 = vld [vmem:[%s6926_s7 + $0x6c8] sm:$0xff] }
 0x239   :  { %2695 = vmatprep.subr.bf16.mxu1 %v4597_v61  ;;  %v4661_v61 = vcombine.high %v1168_v55, %v1172_v56  ;;  %v1228_v54 = vld [vmem:[%s6926_s7 + $0x6e8] sm:$0xff] }
 0x23c   :  { %2696 = vmatpush1.bf16.msra.mxu1 %v4596_v1  ;;  %v1176_v1 = vld [vmem:[%s6926_s7 + $0x548] sm:$0xff] }
 0x23d   :  { %2697 = vmatprep.subr.bf16.mxu1 %v4605_v2  ;;  %v1180_v2 = vld [vmem:[%s6926_s7 + $0x568] sm:$0xff] }
 0x240   :  { %2698 = vmatpush1.bf16.msra.mxu1 %v4604_v6  ;;  %v4667_v6 = vcombine.high %v1175_v62, %v1179_v63 }
 0x241   :  { %2699 = vmatprep.subr.bf16.mxu1 %v4613_v7  ;;  %v4669_v7 = vcombine.high %v1176_v1, %v1180_v2 }
 0x244   :  { %2700 = vmatpush1.bf16.msra.mxu1 %v4612_v10  ;;  %v1184_v10 = vld [vmem:[%s6926_s7 + $0x588] sm:$0xff] }
 0x245   :  { %2701 = vmatprep.subr.bf16.mxu1 %v4621_v11  ;;  %v1188_v11 = vld [vmem:[%s6926_s7 + $0x5a8] sm:$0xff] }
 0x248   :  { %2702 = vmatpush1.bf16.msra.mxu1 %v4620_v12  ;;  %v4666_v12 = vcombine.low %v1175_v62, %v1179_v63  ;;  %v1232_v62 = vld [vmem:[%s6926_s7 + $0x708] sm:$0xff] }
 0x249   :  { %2714 = vmatprep.subr.bf16.mxu1 %v4629_v13  ;;  %v4668_v13 = vcombine.low %v1176_v1, %v1180_v2  ;;  %v1236_v63 = vld [vmem:[%s6926_s7 + $0x728] sm:$0xff]  ;;  %v4716_v2 = vcombine.low %v1224_v53, %v1228_v54 }
 0x29e   :  { %v943_v17 = vpop.f32.mrb[4].mxu1 }
 0x29f   :  { %v944_v18 = vadd.f32 %v943_v17, %v572_v15  ;;  %v945_v19 = vpop.f32.mrb[5].mxu1  ;;  %v1191_v17 = vld [vmem:[%s6926_s7 + $0x5c0] sm:$0xff] }
 0x2a0   :  { %v946_v20 = vadd.f32 %v945_v19, %v576_v16  ;;  %v947_v21 = vpop.f32.mrb[6].mxu1  ;;  %v1192_v19 = vld [vmem:[%s6926_s7 + $0x5c8] sm:$0xff] }
 0x2a1   :  { %v948_v22 = vadd.f32 %v947_v21, %v572_v15  ;;  %v949_v23 = vpop.f32.mrb[7].mxu1  ;;  %v995_v25 = vmax.f32 %v944_v18, 0.0  ;;  %v4675_v15 = vcombine.high %v1183_v8, %v1187_v9  ;;  %v1195_v18 = vld [vmem:[%s6926_s7 + $0x5e0] sm:$0xff]  ;;  %v4674_v21 = vcombine.low %v1183_v8, %v1187_v9  ;;  %v1240_v8 = vld [vmem:[%s6926_s7 + $0x748] sm:$0xff] }
 0x2a2   :  { %v950_v24 = vadd.f32 %v949_v23, %v576_v16  ;;  %v996_v28 = vmax.f32 %v946_v20, 0.0  ;;  %v4677_v16 = vcombine.high %v1184_v10, %v1188_v11  ;;  %v1196_v20 = vld [vmem:[%s6926_s7 + $0x5e8] sm:$0xff]  ;;  %v4683_v23 = vcombine.high %v1191_v17, %v1195_v18 }
 0x2a3   :  { %v999_v26 = vmax.f32 %v948_v22, 0.0  ;;  %v4676_v22 = vcombine.low %v1184_v10, %v1188_v11  ;;  %v4684_v30 = vcombine.low %v1192_v19, %v1196_v20  ;;  %v1244_v9 = vld [vmem:[%s6926_s7 + $0x768] sm:$0xff]  ;;  %v4724_v11 = vcombine.low %v1232_v62, %v1236_v63 }
 0x2a4   :  { %v1000_v29 = vmax.f32 %v950_v24, 0.0  ;;  %v4685_v24 = vcombine.high %v1192_v19, %v1196_v20  ;;  %v1248_v19 = vld [vmem:[%s6926_s7 + $0x788] sm:$0xff] }
 0x2a5   :  { %v6139_v33 = vpack.c.bf16 %v999_v26, %v995_v25  ;;  %v1199_v25 = vld [vmem:[%s6926_s7 + $0x600] sm:$0xff]  ;;  %v1252_v20 = vld [vmem:[%s6926_s7 + $0x7a8] sm:$0xff] }
 0x2a6   :  { %v6141_v34 = vpack.c.bf16 %v1000_v29, %v996_v28  ;;  %v1203_v26 = vld [vmem:[%s6926_s7 + $0x620] sm:$0xff]  ;;  %v1204_v28 = vld [vmem:[%s6926_s7 + $0x628] sm:$0xff]  ;;  %v4682_v29 = vcombine.low %v1191_v17, %v1195_v18  ;;  %v6304_v17 = vsub.s32 3, %v5956_v59 }
 0x2a7   :  { %v4691_v31 = vcombine.high %v1199_v25, %v1203_v26  ;;  %v4693_v32 = vcombine.high %v1200_v27, %v1204_v28  ;;  %v4690_v39 = vcombine.low %v1199_v25, %v1203_v26  ;;  %v4692_v43 = vcombine.low %v1200_v27, %v1204_v28  ;;  %v1251_v18 = vld [vmem:[%s6926_s7 + $0x7a0] sm:$0xff] }
 0x2a8   :  { %2617 = vmatprep.mubr.bf16.mxu0 %v6141_v34  ;;  %2703 = vmatprep.mubr.bf16.mxu1 %v6141_v34  ;;  %v4741_v25 = vcombine.high %v1248_v19, %v1252_v20  ;;  %v1255_v26 = vld [vmem:[%s6926_s7 + $0x7c0] sm:$0xff]  ;;  %v584_v27 = vrot.slane %v6121_v14, %v6304_v17 }
 0x2a9   :  { %2618 = vmatmul.mubr.bf16.vlgmr.msra.gmra.mrb[0].mxu0 %v6139_v33  ;;  %2704 = vmatmul.mubr.bf16.vlgmr.msra.gmra.mrb[12].mxu1 %v6139_v33  ;;  %v1259_v28 = vld [vmem:[%s6926_s7 + $0x7e0] sm:$0xff] }
 0x2aa   :  { %2629 = vmatpush1.bf16.msra.mxu0 %v4626_v46  ;;  %2715 = vmatpush1.bf16.msra.mxu1 %v4628_v47  ;;  %v4651_v46 = vcombine.high %v1159_v51, %v1163_v52  ;;  %v4653_v47 = vcombine.high %v1160_v40, %v1164_v41  ;;  %v1216_v51 = vld [vmem:[%s6926_s7 + $0x688] sm:$0xff]  ;;  %v4700_v41 = vcombine.low %v1208_v37, %v1212_v38 }
 0x2ab   :  { %2630 = vmatprep.subr.bf16.mxu0 %v4635_v35  ;;  %2716 = vmatprep.subr.bf16.mxu1 %v4637_v36  ;;  %v1207_v35 = vld [vmem:[%s6926_s7 + $0x640] sm:$0xff]  ;;  %v1220_v52 = vld [vmem:[%s6926_s7 + $0x6a8] sm:$0xff] }
 0x2ac   :  { %v1211_v36 = vld [vmem:[%s6926_s7 + $0x660] sm:$0xff]  ;;  %v4708_v56 = vcombine.low %v1216_v51, %v1220_v52 }
 0x2ad   :  { %v4698_v40 = vcombine.low %v1207_v35, %v1211_v36 }
 0x2ae   :  { %2631 = vmatpush1.bf16.msra.mxu0 %v4634_v45  ;;  %2717 = vmatpush1.bf16.msra.mxu1 %v4636_v48  ;;  %v4699_v45 = vcombine.high %v1207_v35, %v1211_v36  ;;  %v4701_v48 = vcombine.high %v1208_v37, %v1212_v38  ;;  %v4740_v35 = vcombine.low %v1248_v19, %v1252_v20 }
 0x2af   :  { %2632 = vmatprep.subr.bf16.mxu0 %v4643_v49  ;;  %2718 = vmatprep.subr.bf16.mxu1 %v4645_v50  ;;  %v1215_v49 = vld [vmem:[%s6926_s7 + $0x680] sm:$0xff] }
 0x2b0   :  { %v1219_v50 = vld [vmem:[%s6926_s7 + $0x6a0] sm:$0xff] }
 0x2b1   :  { %v4706_v55 = vcombine.low %v1215_v49, %v1219_v50 }
 0x2b2   :  { %2633 = vmatpush1.bf16.msra.mxu0 %v4642_v42  ;;  %2719 = vmatpush1.bf16.msra.mxu1 %v4644_v44  ;;  %v4707_v42 = vcombine.high %v1215_v49, %v1219_v50  ;;  %v4709_v44 = vcombine.high %v1216_v51, %v1220_v52  ;;  %v1010_v49 = vld [vmem:[%s6926_s7 + $0x18] sm:$0xff] }
 0x2b3   :  { %2634 = vmatprep.subr.bf16.mxu0 %v4651_v46  ;;  %2720 = vmatprep.subr.bf16.mxu1 %v4653_v47  ;;  %v1223_v46 = vld [vmem:[%s6926_s7 + $0x6c0] sm:$0xff]  ;;  %v1014_v50 = vld [vmem:[%s6926_s7 + $0x38] sm:$0xff] }
 0x2b4   :  { %v1227_v47 = vld [vmem:[%s6926_s7 + $0x6e0] sm:$0xff] }
 0x2b5   :  { %v4714_v1 = vcombine.low %v1223_v46, %v1227_v47 }
 0x2b6   :  { %2635 = vmatpush1.bf16.msra.mxu0 %v4650_v57  ;;  %2721 = vmatpush1.bf16.msra.mxu1 %v4652_v58  ;;  %v4715_v57 = vcombine.high %v1223_v46, %v1227_v47  ;;  %v4717_v58 = vcombine.high %v1224_v53, %v1228_v54  ;;  %v4505_v53 = vcombine.high %v1010_v49, %v1014_v50 }
 0x2b7   :  { %2636 = vmatprep.subr.bf16.mxu0 %v4659_v60  ;;  %2722 = vmatprep.subr.bf16.mxu1 %v4661_v61  ;;  %v1231_v60 = vld [vmem:[%s6926_s7 + $0x700] sm:$0xff] }
 0x2b8   :  { %v1235_v61 = vld [vmem:[%s6926_s7 + $0x720] sm:$0xff] }
 0x2b9   :  { %v4722_v10 = vcombine.low %v1231_v60, %v1235_v61 }
 0x2ba   :  { %2637 = vmatpush1.bf16.msra.mxu0 %v4658_v4  ;;  %2723 = vmatpush1.bf16.msra.mxu1 %v4660_v5  ;;  %v4723_v4 = vcombine.high %v1231_v60, %v1235_v61  ;;  %v4725_v5 = vcombine.high %v1232_v62, %v1236_v63  ;;  %v1018_v60 = vld [vmem:[%s6926_s7 + $0x58] sm:$0xff] }
 0x2bb   :  { %2638 = vmatprep.subr.bf16.mxu0 %v4667_v6  ;;  %2724 = vmatprep.subr.bf16.mxu1 %v4669_v7  ;;  %v1239_v6 = vld [vmem:[%s6926_s7 + $0x740] sm:$0xff]  ;;  %v1022_v61 = vld [vmem:[%s6926_s7 + $0x78] sm:$0xff] }
 0x2bc   :  { %v1243_v7 = vld [vmem:[%s6926_s7 + $0x760] sm:$0xff] }
 0x2be   :  { %2639 = vmatpush1.bf16.msra.mxu0 %v4666_v12  ;;  %2725 = vmatpush1.bf16.msra.mxu1 %v4668_v13  ;;  %v4731_v12 = vcombine.high %v1239_v6, %v1243_v7  ;;  %v4733_v13 = vcombine.high %v1240_v8, %v1244_v9 }
 0x2bf   :  { %2640 = vmatprep.subr.bf16.mxu0 %v4675_v15  ;;  %2726 = vmatprep.subr.bf16.mxu1 %v4677_v16  ;;  %v6298_v15 = vsub.s32 2, %v5956_v59  ;;  %v1247_v16 = vld [vmem:[%s6926_s7 + $0x780] sm:$0xff] }
 0x2c2   :  { %2641 = vmatpush1.bf16.msra.mxu0 %v4674_v21  ;;  %2727 = vmatpush1.bf16.msra.mxu1 %v4676_v22  ;;  %v4730_v21 = vcombine.low %v1239_v6, %v1243_v7  ;;  %v4732_v22 = vcombine.low %v1240_v8, %v1244_v9  ;;  %v1029_v6 = vld [vmem:[%s6926_s7 + $0xb0] sm:$0xff]  ;;  %v1026_v7 = vld [vmem:[%s6926_s7 + $0x98] sm:$0xff] }
 0x2c3   :  { %2642 = vmatprep.subr.bf16.mxu0 %v4683_v23  ;;  %2728 = vmatprep.subr.bf16.mxu1 %v4685_v24  ;;  %v580_v23 = vrot.slane %v6121_v14, %v6298_v15  ;;  %v4739_v24 = vcombine.high %v1247_v16, %v1251_v18  ;;  %v4747_v14 = vcombine.high %v1255_v26, %v1259_v28  ;;  %v1030_v8 = vld [vmem:[%s6926_s7 + $0xb8] sm:$0xff] }
 0x2c4   :  { %v4520_v20 = vcombine.low %v1026_v7, %v1030_v8 }
 0x2c6   :  { %2643 = vmatpush1.bf16.msra.mxu0 %v4682_v29  ;;  %2729 = vmatpush1.bf16.msra.mxu1 %v4684_v30  ;;  %v1256_v29 = vld [vmem:[%s6926_s7 + $0x7c8] sm:$0xff] }
 0x2c7   :  { %2644 = vmatprep.subr.bf16.mxu0 %v4691_v31  ;;  %2730 = vmatprep.subr.bf16.mxu1 %v4693_v32  ;;  %v1260_v30 = vld [vmem:[%s6926_s7 + $0x7e8] sm:$0xff]  ;;  %v4738_v32 = vcombine.low %v1247_v16, %v1251_v18  ;;  %v1037_v16 = vld [vmem:[%s6926_s7 + $0xf0] sm:$0xff]  ;;  %v1034_v18 = vld [vmem:[%s6926_s7 + $0xd8] sm:$0xff] }
 0x2c8   :  { %v4749_v38 = vcombine.high %v1256_v29, %v1260_v30 }
 0x2ca   :  { %2645 = vmatpush1.bf16.msra.mxu0 %v4690_v39  ;;  %2731 = vmatpush1.bf16.msra.mxu1 %v4692_v43  ;;  %v1009_v39 = vld [vmem:[%s6926_s7 + $0x10] sm:$0xff] }
 0x2cb   :  { %2646 = vmatprep.subr.bf16.mxu0 %v4699_v45  ;;  %2732 = vmatprep.subr.bf16.mxu1 %v4701_v48  ;;  %v1013_v48 = vld [vmem:[%s6926_s7 + $0x30] sm:$0xff] }
 0x2cc   :  { %v4503_v47 = vcombine.high %v1009_v39, %v1013_v48  ;;  %v4502_v63 = vcombine.low %v1009_v39, %v1013_v48  ;;  %v1058_v48 = vld [vmem:[%s6926_s7 + $0x198] sm:$0xff] }
 0x2ce   :  { %2647 = vmatpush1.bf16.msra.mxu0 %v4698_v40  ;;  %2733 = vmatpush1.bf16.msra.mxu1 %v4700_v41  ;;  %v4746_v41 = vcombine.low %v1255_v26, %v1259_v28  ;;  %v1046_v26 = vld [vmem:[%s6926_s7 + $0x138] sm:$0xff] }
 0x2cf   :  { %2648 = vmatprep.subr.bf16.mxu0 %v4707_v42  ;;  %2734 = vmatprep.subr.bf16.mxu1 %v4709_v44  ;;  %v4748_v42 = vcombine.low %v1256_v29, %v1260_v30 }
 0x2d2   :  { %2649 = vmatpush1.bf16.msra.mxu0 %v4706_v55  ;;  %2735 = vmatpush1.bf16.msra.mxu1 %v4708_v56  ;;  %v1017_v56 = vld [vmem:[%s6926_s7 + $0x50] sm:$0xff] }
 0x2d3   :  { %2650 = vmatprep.subr.bf16.mxu0 %v4715_v57  ;;  %2736 = vmatprep.subr.bf16.mxu1 %v4717_v58  ;;  %v1021_v58 = vld [vmem:[%s6926_s7 + $0x70] sm:$0xff] }
 0x2d4   :  { %v4510_v9 = vcombine.low %v1017_v56, %v1021_v58 }
 0x2d6   :  { %2651 = vmatpush1.bf16.msra.mxu0 %v4714_v1  ;;  %2737 = vmatpush1.bf16.msra.mxu1 %v4716_v2  ;;  %v4504_v1 = vcombine.low %v1010_v49, %v1014_v50  ;;  %v4511_v2 = vcombine.high %v1017_v56, %v1021_v58  ;;  %v1062_v49 = vld [vmem:[%s6926_s7 + $0x1b8] sm:$0xff]  ;;  %v1073_v56 = vld [vmem:[%s6926_s7 + $0x210] sm:$0xff] }
 0x2d7   :  { %2652 = vmatprep.subr.bf16.mxu0 %v4723_v4  ;;  %2738 = vmatprep.subr.bf16.mxu1 %v4725_v5  ;;  %v4513_v4 = vcombine.high %v1018_v60, %v1022_v61  ;;  %v1025_v5 = vld [vmem:[%s6926_s7 + $0x90] sm:$0xff] }
 0x2d8   :  { %v4518_v19 = vcombine.low %v1025_v5, %v1029_v6  ;;  %v1077_v58 = vld [vmem:[%s6926_s7 + $0x230] sm:$0xff] }
 0x2da   :  { %2653 = vmatpush1.bf16.msra.mxu0 %v4722_v10  ;;  %2739 = vmatpush1.bf16.msra.mxu1 %v4724_v11  ;;  %v4512_v10 = vcombine.low %v1018_v60, %v1022_v61  ;;  %v4519_v11 = vcombine.high %v1025_v5, %v1029_v6  ;;  %v1074_v60 = vld [vmem:[%s6926_s7 + $0x218] sm:$0xff]  ;;  %v1081_v5 = vld [vmem:[%s6926_s7 + $0x250] sm:$0xff] }
 0x2db   :  { %2654 = vmatprep.subr.bf16.mxu0 %v4731_v12  ;;  %2740 = vmatprep.subr.bf16.mxu1 %v4733_v13  ;;  %v4521_v12 = vcombine.high %v1026_v7, %v1030_v8  ;;  %v1033_v13 = vld [vmem:[%s6926_s7 + $0xd0] sm:$0xff]  ;;  %v1078_v61 = vld [vmem:[%s6926_s7 + $0x238] sm:$0xff] }
 0x2dc   :  { %v1085_v6 = vld [vmem:[%s6926_s7 + $0x270] sm:$0xff]  ;;  %v1082_v7 = vld [vmem:[%s6926_s7 + $0x258] sm:$0xff] }
 0x2dd   :  { %v1086_v8 = vld [vmem:[%s6926_s7 + $0x278] sm:$0xff] }
 0x2de   :  { %v986_v31 = vpop.f32.mrb[8].mxu1  ;;  %2655 = vmatpush1.bf16.msra.mxu0 %v4730_v21  ;;  %2741 = vmatpush1.bf16.msra.mxu1 %v4732_v22  ;;  %v4527_v21 = vcombine.high %v1033_v13, %v1037_v16 }
 0x2df   :  { %v987_v36 = vadd.f32 %v986_v31, %v580_v23  ;;  %v988_v37 = vpop.f32.mrb[9].mxu1  ;;  %2656 = vmatprep.subr.bf16.mxu0 %v4739_v24  ;;  %2742 = vmatprep.subr.bf16.mxu1 %v4741_v25  ;;  %v1045_v24 = vld [vmem:[%s6926_s7 + $0x130] sm:$0xff]  ;;  %v1042_v25 = vld [vmem:[%s6926_s7 + $0x118] sm:$0xff] }
 0x2e0   :  { %v989_v43 = vadd.f32 %v988_v37, %v584_v27  ;;  %v990_v45 = vpop.f32.mrb[10].mxu1  ;;  %v4537_v30 = vcombine.high %v1042_v25, %v1046_v26  ;;  %v1049_v31 = vld [vmem:[%s6926_s7 + $0x150] sm:$0xff] }
 0x2e1   :  { %v991_v51 = vadd.f32 %v990_v45, %v580_v23  ;;  %v992_v52 = vpop.f32.mrb[11].mxu1  ;;  %v997_v44 = vmax.f32 %v987_v36, 0.0  ;;  %v1041_v23 = vld [vmem:[%s6926_s7 + $0x110] sm:$0xff]  ;;  %v1054_v36 = vld [vmem:[%s6926_s7 + $0x178] sm:$0xff] }
 0x2e2   :  { %v993_v40 = vadd.f32 %v992_v52, %v584_v27  ;;  %2657 = vmatpush1.bf16.msra.mxu0 %v4738_v32  ;;  %2743 = vmatpush1.bf16.msra.mxu1 %v4740_v35  ;;  %v998_v54 = vmax.f32 %v989_v43, 0.0  ;;  %v4526_v27 = vcombine.low %v1033_v13, %v1037_v16  ;;  %v4535_v29 = vcombine.high %v1041_v23, %v1045_v24  ;;  %v1053_v32 = vld [vmem:[%s6926_s7 + $0x170] sm:$0xff]  ;;  %v1050_v35 = vld [vmem:[%s6926_s7 + $0x158] sm:$0xff] }
 0x2e3   :  { %v1001_v46 = vmax.f32 %v991_v51, 0.0  ;;  %2658 = vmatprep.subr.bf16.mxu0 %v4747_v14  ;;  %2744 = vmatprep.subr.bf16.mxu1 %v4749_v38  ;;  %v4534_v37 = vcombine.low %v1041_v23, %v1045_v24  ;;  %v4536_v14 = vcombine.low %v1042_v25, %v1046_v26  ;;  %v4543_v38 = vcombine.high %v1049_v31, %v1053_v32  ;;  %v1057_v43 = vld [vmem:[%s6926_s7 + $0x190] sm:$0xff]  ;;  %v1098_v25 = vld [vmem:[%s6926_s7 + $0x2d8] sm:$0xff] }
 0x2e4   :  { %v1002_v55 = vmax.f32 %v993_v40, 0.0  ;;  %v4545_v39 = vcombine.high %v1050_v35, %v1054_v36  ;;  %v1061_v45 = vld [vmem:[%s6926_s7 + $0x1b0] sm:$0xff]  ;;  %v4542_v50 = vcombine.low %v1049_v31, %v1053_v32  ;;  %v4544_v51 = vcombine.low %v1050_v35, %v1054_v36  ;;  %v1102_v26 = vld [vmem:[%s6926_s7 + $0x2f8] sm:$0xff] }
 0x2e5   :  { %v6346_v57 = vpack.c.bf16 %v1001_v46, %v997_v44  ;;  %v4551_v52 = vcombine.high %v1057_v43, %v1061_v45  ;;  %v4553_v40 = vcombine.high %v1058_v48, %v1062_v49  ;;  %v1066_v44 = vld [vmem:[%s6926_s7 + $0x1d8] sm:$0xff]  ;;  %v1089_v13 = vld [vmem:[%s6926_s7 + $0x290] sm:$0xff] }
 0x2e6   :  { %v6357_v62 = vpack.c.bf16 %v1002_v55, %v998_v54  ;;  %2659 = vmatpush1.bf16.msra.mxu0 %v4746_v41  ;;  %2745 = vmatpush1.bf16.msra.mxu1 %v4748_v42  ;;  %v1065_v41 = vld [vmem:[%s6926_s7 + $0x1d0] sm:$0xff]  ;;  %v1070_v46 = vld [vmem:[%s6926_s7 + $0x1f8] sm:$0xff] }
 0x2e7   :  { %2757 = vmatprep.subr.bf16.mxu0 %v4503_v47  ;;  %2843 = vmatprep.subr.bf16.mxu1 %v4505_v53  ;;  %v1069_v42 = vld [vmem:[%s6926_s7 + $0x1f0] sm:$0xff]  ;;  %v4550_v47 = vcombine.low %v1057_v43, %v1061_v45  ;;  %v4552_v53 = vcombine.low %v1058_v48, %v1062_v49  ;;  %v4561_v55 = vcombine.high %v1066_v44, %v1070_v46  ;;  %v1106_v35 = vld [vmem:[%s6926_s7 + $0x318] sm:$0xff] }
 0x2e8   :  { %2660 = vmatprep.mubr.bf16.mxu0 %v6357_v62  ;;  %2746 = vmatprep.mubr.bf16.mxu1 %v6357_v62  ;;  %v4559_v54 = vcombine.high %v1065_v41, %v1069_v42  ;;  %v1093_v16 = vld [vmem:[%s6926_s7 + $0x2b0] sm:$0xff]  ;;  %v1110_v36 = vld [vmem:[%s6926_s7 + $0x338] sm:$0xff] }
 0x2e9   :  { %2661 = vmatmul.mubr.bf16.vlgmr.msra.gmra.mrb[0].mxu0 %v6346_v57  ;;  %2747 = vmatmul.mubr.bf16.vlgmr.msra.gmra.mrb[12].mxu1 %v6346_v57  ;;  %v1097_v23 = vld [vmem:[%s6926_s7 + $0x2d0] sm:$0xff]  ;;  %v1114_v48 = vld [vmem:[%s6926_s7 + $0x358] sm:$0xff] }
 0x2ea   :  { %2758 = vmatpush1.bf16.msra.mxu0 %v4502_v63  ;;  %2789 = vmatprep.mubr.bf16.mxu0 %v6141_v34  ;;  %v4558_v63 = vcombine.low %v1065_v41, %v1069_v42  ;;  %v1101_v24 = vld [vmem:[%s6926_s7 + $0x2f0] sm:$0xff]  ;;  %v1118_v49 = vld [vmem:[%s6926_s7 + $0x378] sm:$0xff] }
 0x2eb   :  { %2844 = vmatpush1.bf16.msra.mxu1 %v4504_v1  ;;  %2875 = vmatprep.mubr.bf16.mxu1 %v6141_v34  ;;  %v1038_v34 = vld [vmem:[%s6926_s7 + $0xf8] sm:$0xff]  ;;  %v4560_v1 = vcombine.low %v1066_v44, %v1070_v46  ;;  %v1105_v31 = vld [vmem:[%s6926_s7 + $0x310] sm:$0xff] }
 0x2ec   :  { %2759 = vmatprep.subr.bf16.mxu0 %v4511_v2  ;;  %2845 = vmatprep.subr.bf16.mxu1 %v4513_v4  ;;  %v4529_v22 = vcombine.high %v1034_v18, %v1038_v34  ;;  %v4528_v28 = vcombine.low %v1034_v18, %v1038_v34  ;;  %v4567_v2 = vcombine.high %v1073_v56, %v1077_v58  ;;  %v1090_v18 = vld [vmem:[%s6926_s7 + $0x298] sm:$0xff]  ;;  %v1109_v32 = vld [vmem:[%s6926_s7 + $0x330] sm:$0xff] }
 0x2ed   :  { %v4569_v4 = vcombine.high %v1074_v60, %v1078_v61  ;;  %v1094_v34 = vld [vmem:[%s6926_s7 + $0x2b8] sm:$0xff]  ;;  %v1113_v43 = vld [vmem:[%s6926_s7 + $0x350] sm:$0xff] }
 0x2ee   :  { %2760 = vmatpush1.bf16.msra.mxu0 %v4510_v9  ;;  %v4566_v9 = vcombine.low %v1073_v56, %v1077_v58  ;;  %v1117_v45 = vld [vmem:[%s6926_s7 + $0x370] sm:$0xff]  ;;  %v1122_v44 = vld [vmem:[%s6926_s7 + $0x398] sm:$0xff] }
 0x2ef   :  { %2846 = vmatpush1.bf16.msra.mxu1 %v4512_v10  ;;  %2761 = vmatprep.subr.bf16.mxu0 %v4519_v11  ;;  %v4568_v10 = vcombine.low %v1074_v60, %v1078_v61  ;;  %v4575_v11 = vcombine.high %v1081_v5, %v1085_v6  ;;  %v1121_v41 = vld [vmem:[%s6926_s7 + $0x390] sm:$0xff]  ;;  %v1126_v46 = vld [vmem:[%s6926_s7 + $0x3b8] sm:$0xff] }
 0x2f0   :  { %2847 = vmatprep.subr.bf16.mxu1 %v4521_v12  ;;  %v4577_v12 = vcombine.high %v1082_v7, %v1086_v8  ;;  %v1125_v42 = vld [vmem:[%s6926_s7 + $0x3b0] sm:$0xff]  ;;  %v1130_v60 = vld [vmem:[%s6926_s7 + $0x3d8] sm:$0xff] }
 0x2f1   :  { %v1129_v56 = vld [vmem:[%s6926_s7 + $0x3d0] sm:$0xff]  ;;  %v1134_v61 = vld [vmem:[%s6926_s7 + $0x3f8] sm:$0xff] }
 0x2f2   :  { %2762 = vmatpush1.bf16.msra.mxu0 %v4518_v19  ;;  %v4574_v19 = vcombine.low %v1081_v5, %v1085_v6  ;;  %v1133_v58 = vld [vmem:[%s6926_s7 + $0x3f0] sm:$0xff] }
 0x2f3   :  { %2848 = vmatpush1.bf16.msra.mxu1 %v4520_v20  ;;  %2763 = vmatprep.subr.bf16.mxu0 %v4527_v21  ;;  %v4576_v20 = vcombine.low %v1082_v7, %v1086_v8  ;;  %v4583_v21 = vcombine.high %v1089_v13, %v1093_v16  ;;  %v1137_v5 = vld [vmem:[%s6926_s7 + $0x410] sm:$0xff]  ;;  %v1138_v7 = vld [vmem:[%s6926_s7 + $0x418] sm:$0xff] }
 0x2f4   :  { %2849 = vmatprep.subr.bf16.mxu1 %v4529_v22  ;;  %v4585_v22 = vcombine.high %v1090_v18, %v1094_v34  ;;  %v1141_v6 = vld [vmem:[%s6926_s7 + $0x430] sm:$0xff]  ;;  %v1142_v8 = vld [vmem:[%s6926_s7 + $0x438] sm:$0xff] }
 0x2f6   :  { %2764 = vmatpush1.bf16.msra.mxu0 %v4526_v27  ;;  %v4582_v27 = vcombine.low %v1089_v13, %v1093_v16  ;;  %v1145_v13 = vld [vmem:[%s6926_s7 + $0x450] sm:$0xff] }
 0x2f7   :  { %2850 = vmatpush1.bf16.msra.mxu1 %v4528_v28  ;;  %2765 = vmatprep.subr.bf16.mxu0 %v4535_v29  ;;  %v4584_v28 = vcombine.low %v1090_v18, %v1094_v34  ;;  %v4591_v29 = vcombine.high %v1097_v23, %v1101_v24  ;;  %v1149_v16 = vld [vmem:[%s6926_s7 + $0x470] sm:$0xff]  ;;  %v4630_v18 = vcombine.low %v1137_v5, %v1141_v6  ;;  %v1146_v34 = vld [vmem:[%s6926_s7 + $0x458] sm:$0xff] }
 0x2f8   :  { %2851 = vmatprep.subr.bf16.mxu1 %v4537_v30  ;;  %v4593_v30 = vcombine.high %v1098_v25, %v1102_v26 }
 0x2fa   :  { %2766 = vmatpush1.bf16.msra.mxu0 %v4534_v37  ;;  %v4590_v37 = vcombine.low %v1097_v23, %v1101_v24  ;;  %v1157_v23 = vld [vmem:[%s6926_s7 + $0x4b0] sm:$0xff] }
 0x2fb   :  { %2852 = vmatpush1.bf16.msra.mxu1 %v4536_v14  ;;  %2767 = vmatprep.subr.bf16.mxu0 %v4543_v38  ;;  %v4592_v14 = vcombine.low %v1098_v25, %v1102_v26  ;;  %v4599_v38 = vcombine.high %v1105_v31, %v1109_v32  ;;  %v1154_v25 = vld [vmem:[%s6926_s7 + $0x498] sm:$0xff] }
 0x2fc   :  { %2853 = vmatprep.subr.bf16.mxu1 %v4545_v39  ;;  %v4601_v39 = vcombine.high %v1106_v35, %v1110_v36  ;;  %v1158_v26 = vld [vmem:[%s6926_s7 + $0x4b8] sm:$0xff] }
 0x2fe   :  { %2768 = vmatpush1.bf16.msra.mxu0 %v4542_v50  ;;  %v4598_v50 = vcombine.low %v1105_v31, %v1109_v32  ;;  %v1161_v31 = vld [vmem:[%s6926_s7 + $0x4d0] sm:$0xff] }
 0x2ff   :  { %2854 = vmatpush1.bf16.msra.mxu1 %v4544_v51  ;;  %2769 = vmatprep.subr.bf16.mxu0 %v4551_v52  ;;  %v4600_v51 = vcombine.low %v1106_v35, %v1110_v36  ;;  %v4607_v52 = vcombine.high %v1113_v43, %v1117_v45  ;;  %v1165_v32 = vld [vmem:[%s6926_s7 + $0x4f0] sm:$0xff]  ;;  %v1166_v35 = vld [vmem:[%s6926_s7 + $0x4f8] sm:$0xff]  ;;  %v4648_v36 = vcombine.low %v1154_v25, %v1158_v26 }
 0x300   :  { %2855 = vmatprep.subr.bf16.mxu1 %v4553_v40  ;;  %v4609_v40 = vcombine.high %v1114_v48, %v1118_v49 }
 0x302   :  { %2770 = vmatpush1.bf16.msra.mxu0 %v4550_v47  ;;  %v4606_v47 = vcombine.low %v1113_v43, %v1117_v45  ;;  %v1170_v43 = vld [vmem:[%s6926_s7 + $0x518] sm:$0xff] }
 0x303   :  { %2856 = vmatpush1.bf16.msra.mxu1 %v4552_v53  ;;  %2771 = vmatprep.subr.bf16.mxu0 %v4559_v54  ;;  %v4608_v53 = vcombine.low %v1114_v48, %v1118_v49  ;;  %v4615_v54 = vcombine.high %v1121_v41, %v1125_v42  ;;  %v1174_v45 = vld [vmem:[%s6926_s7 + $0x538] sm:$0xff]  ;;  %v4654_v48 = vcombine.low %v1161_v31, %v1165_v32 }
 0x304   :  { %2857 = vmatprep.subr.bf16.mxu1 %v4561_v55  ;;  %v4617_v55 = vcombine.high %v1122_v44, %v1126_v46 }
 0x306   :  { %2772 = vmatpush1.bf16.msra.mxu0 %v4558_v63  ;;  %v4614_v63 = vcombine.low %v1121_v41, %v1125_v42  ;;  %v1178_v41 = vld [vmem:[%s6926_s7 + $0x558] sm:$0xff] }
 0x307   :  { %2858 = vmatpush1.bf16.msra.mxu1 %v4560_v1  ;;  %2773 = vmatprep.subr.bf16.mxu0 %v4567_v2  ;;  %v4616_v1 = vcombine.low %v1122_v44, %v1126_v46  ;;  %v4623_v2 = vcombine.high %v1129_v56, %v1133_v58  ;;  %v1182_v42 = vld [vmem:[%s6926_s7 + $0x578] sm:$0xff]  ;;  %v4664_v46 = vcombine.low %v1170_v43, %v1174_v45 }
 0x308   :  { %2859 = vmatprep.subr.bf16.mxu1 %v4569_v4  ;;  %v4625_v4 = vcombine.high %v1130_v60, %v1134_v61 }
 0x30a   :  { %2774 = vmatpush1.bf16.msra.mxu0 %v4566_v9  ;;  %v4622_v9 = vcombine.low %v1129_v56, %v1133_v58  ;;  %v1186_v56 = vld [vmem:[%s6926_s7 + $0x598] sm:$0xff] }
 0x30b   :  { %2860 = vmatpush1.bf16.msra.mxu1 %v4568_v10  ;;  %2775 = vmatprep.subr.bf16.mxu0 %v4575_v11  ;;  %v4624_v10 = vcombine.low %v1130_v60, %v1134_v61  ;;  %v4631_v11 = vcombine.high %v1137_v5, %v1141_v6  ;;  %v1190_v58 = vld [vmem:[%s6926_s7 + $0x5b8] sm:$0xff]  ;;  %v4672_v61 = vcombine.low %v1178_v41, %v1182_v42 }
 0x30c   :  { %2861 = vmatprep.subr.bf16.mxu1 %v4577_v12  ;;  %v4633_v12 = vcombine.high %v1138_v7, %v1142_v8  ;;  %v1194_v5 = vld [vmem:[%s6926_s7 + $0x5d8] sm:$0xff] }
 0x30d   :  { %v1198_v6 = vld [vmem:[%s6926_s7 + $0x5f8] sm:$0xff] }
 0x30e   :  { %2776 = vmatpush1.bf16.msra.mxu0 %v4574_v19  ;;  %v1150_v19 = vld [vmem:[%s6926_s7 + $0x478] sm:$0xff] }
 0x30f   :  { %2862 = vmatpush1.bf16.msra.mxu1 %v4576_v20  ;;  %2777 = vmatprep.subr.bf16.mxu0 %v4583_v21  ;;  %v4632_v20 = vcombine.low %v1138_v7, %v1142_v8  ;;  %v4639_v21 = vcombine.high %v1145_v13, %v1149_v16  ;;  %v4641_v24 = vcombine.high %v1146_v34, %v1150_v19 }
 0x310   :  { %2863 = vmatprep.subr.bf16.mxu1 %v4585_v22  ;;  %v1153_v22 = vld [vmem:[%s6926_s7 + $0x490] sm:$0xff]  ;;  %v4680_v8 = vcombine.low %v1186_v56, %v1190_v58 }
 0x312   :  { %2778 = vmatpush1.bf16.msra.mxu0 %v4582_v27  ;;  %v4638_v27 = vcombine.low %v1145_v13, %v1149_v16  ;;  %v1202_v13 = vld [vmem:[%s6926_s7 + $0x618] sm:$0xff] }
 0x313   :  { %2864 = vmatpush1.bf16.msra.mxu1 %v4584_v28  ;;  %2779 = vmatprep.subr.bf16.mxu0 %v4591_v29  ;;  %v4640_v28 = vcombine.low %v1146_v34, %v1150_v19  ;;  %v4647_v29 = vcombine.high %v1153_v22, %v1157_v23  ;;  %v1206_v16 = vld [vmem:[%s6926_s7 + $0x638] sm:$0xff]  ;;  %v4688_v34 = vcombine.low %v1194_v5, %v1198_v6 }
 0x314   :  { %2865 = vmatprep.subr.bf16.mxu1 %v4593_v30  ;;  %v4649_v30 = vcombine.high %v1154_v25, %v1158_v26  ;;  %v4696_v26 = vcombine.low %v1202_v13, %v1206_v16 }
 0x316   :  { %2780 = vmatpush1.bf16.msra.mxu0 %v4590_v37  ;;  %v4655_v37 = vcombine.high %v1161_v31, %v1165_v32  ;;  %v1218_v31 = vld [vmem:[%s6926_s7 + $0x698] sm:$0xff] }
 0x317   :  { %2866 = vmatpush1.bf16.msra.mxu1 %v4592_v14  ;;  %2781 = vmatprep.subr.bf16.mxu0 %v4599_v38  ;;  %v1169_v38 = vld [vmem:[%s6926_s7 + $0x510] sm:$0xff]  ;;  %v1222_v32 = vld [vmem:[%s6926_s7 + $0x6b8] sm:$0xff] }
 0x318   :  { %2867 = vmatprep.subr.bf16.mxu1 %v4601_v39  ;;  %v1173_v39 = vld [vmem:[%s6926_s7 + $0x530] sm:$0xff] }
 0x319   :  { %v4662_v44 = vcombine.low %v1169_v38, %v1173_v39 }
 0x31a   :  { %2782 = vmatpush1.bf16.msra.mxu0 %v4598_v50  ;;  %v4663_v50 = vcombine.high %v1169_v38, %v1173_v39  ;;  %v1226_v38 = vld [vmem:[%s6926_s7 + $0x6d8] sm:$0xff] }
 0x31b   :  { %2868 = vmatpush1.bf16.msra.mxu1 %v4600_v51  ;;  %2783 = vmatprep.subr.bf16.mxu0 %v4607_v52  ;;  %v4665_v51 = vcombine.high %v1170_v43, %v1174_v45  ;;  %v1177_v52 = vld [vmem:[%s6926_s7 + $0x550] sm:$0xff]  ;;  %v1230_v39 = vld [vmem:[%s6926_s7 + $0x6f8] sm:$0xff]  ;;  %v4712_v45 = vcombine.low %v1218_v31, %v1222_v32 }
 0x31c   :  { %2869 = vmatprep.subr.bf16.mxu1 %v4609_v40  ;;  %v1181_v40 = vld [vmem:[%s6926_s7 + $0x570] sm:$0xff] }
 0x31d   :  { %v4670_v60 = vcombine.low %v1177_v52, %v1181_v40 }
 0x31e   :  { %2784 = vmatpush1.bf16.msra.mxu0 %v4606_v47  ;;  %v4671_v47 = vcombine.high %v1177_v52, %v1181_v40  ;;  %v1234_v52 = vld [vmem:[%s6926_s7 + $0x718] sm:$0xff] }
 0x31f   :  { %2870 = vmatpush1.bf16.msra.mxu1 %v4608_v53  ;;  %2785 = vmatprep.subr.bf16.mxu0 %v4615_v54  ;;  %v4673_v53 = vcombine.high %v1178_v41, %v1182_v42  ;;  %v1185_v54 = vld [vmem:[%s6926_s7 + $0x590] sm:$0xff]  ;;  %v1238_v40 = vld [vmem:[%s6926_s7 + $0x738] sm:$0xff]  ;;  %v4720_v42 = vcombine.low %v1226_v38, %v1230_v39 }
 0x320   :  { %2871 = vmatprep.subr.bf16.mxu1 %v4617_v55  ;;  %v1189_v55 = vld [vmem:[%s6926_s7 + $0x5b0] sm:$0xff] }
 0x321   :  { %v4678_v7 = vcombine.low %v1185_v54, %v1189_v55 }
 0x322   :  { %2786 = vmatpush1.bf16.msra.mxu0 %v4614_v63  ;;  %v4679_v63 = vcombine.high %v1185_v54, %v1189_v55  ;;  %v1242_v54 = vld [vmem:[%s6926_s7 + $0x758] sm:$0xff] }
 0x323   :  { %2872 = vmatpush1.bf16.msra.mxu1 %v4616_v1  ;;  %2787 = vmatprep.subr.bf16.mxu0 %v4623_v2  ;;  %v4681_v1 = vcombine.high %v1186_v56, %v1190_v58  ;;  %v1193_v2 = vld [vmem:[%s6926_s7 + $0x5d0] sm:$0xff]  ;;  %v1246_v55 = vld [vmem:[%s6926_s7 + $0x778] sm:$0xff]  ;;  %v4728_v58 = vcombine.low %v1234_v52, %v1238_v40 }
 0x324   :  { %2873 = vmatprep.subr.bf16.mxu1 %v4625_v4  ;;  %v1197_v4 = vld [vmem:[%s6926_s7 + $0x5f0] sm:$0xff] }
 0x326   :  { %2788 = vmatpush1.bf16.msra.mxu0 %v4622_v9  ;;  %v4687_v9 = vcombine.high %v1193_v2, %v1197_v4 }
 0x327   :  { %2874 = vmatpush1.bf16.msra.mxu1 %v4624_v10  ;;  %2800 = vmatprep.subr.bf16.mxu0 %v4631_v11  ;;  %v4689_v10 = vcombine.high %v1194_v5, %v1198_v6  ;;  %v1201_v11 = vld [vmem:[%s6926_s7 + $0x610] sm:$0xff]  ;;  %v4736_v6 = vcombine.low %v1242_v54, %v1246_v55 }
 0x328   :  { %2886 = vmatprep.subr.bf16.mxu1 %v4633_v12  ;;  %v1205_v12 = vld [vmem:[%s6926_s7 + $0x630] sm:$0xff] }
 0x329   :  { %2790 = vmatmul.mubr.bf16.vlgmr.msra.gmra.mrb[4].mxu0 %v6139_v33  ;;  %v4695_v19 = vcombine.high %v1201_v11, %v1205_v12  ;;  %v4694_v25 = vcombine.low %v1201_v11, %v1205_v12  ;;  %v1258_v11 = vld [vmem:[%s6926_s7 + $0x7d8] sm:$0xff] }
 0x32a   :  { %2876 = vmatmul.mubr.bf16.vlgmr.msra.gmra.mrb[16].mxu1 %v6139_v33  ;;  %2801 = vmatpush1.bf16.msra.mxu0 %v4630_v18  ;;  %v1162_v33 = vld [vmem:[%s6926_s7 + $0x4d8] sm:$0xff]  ;;  %v4686_v18 = vcombine.low %v1193_v2, %v1197_v4 }
 0x32b   :  { %2832 = vmatprep.mubr.bf16.mxu0 %v6357_v62  ;;  %2887 = vmatpush1.bf16.msra.mxu1 %v4632_v20  ;;  %v4657_v14 = vcombine.high %v1162_v33, %v1166_v35  ;;  %v4656_v49 = vcombine.low %v1162_v33, %v1166_v35  ;;  %v4697_v20 = vcombine.high %v1202_v13, %v1206_v16  ;;  %v1250_v2 = vld [vmem:[%s6926_s7 + $0x798] sm:$0xff] }
 0x32c   :  { %2918 = vmatprep.mubr.bf16.mxu1 %v6357_v62  ;;  %2802 = vmatprep.subr.bf16.mxu0 %v4639_v21  ;;  %v4646_v62 = vcombine.low %v1153_v22, %v1157_v23  ;;  %v1209_v21 = vld [vmem:[%s6926_s7 + $0x650] sm:$0xff]  ;;  %v1210_v23 = vld [vmem:[%s6926_s7 + $0x658] sm:$0xff] }
 0x32d   :  { %2888 = vmatprep.subr.bf16.mxu1 %v4641_v24  ;;  %v1213_v22 = vld [vmem:[%s6926_s7 + $0x670] sm:$0xff]  ;;  %v1214_v24 = vld [vmem:[%s6926_s7 + $0x678] sm:$0xff] }
 0x32e   :  { %2803 = vmatpush1.bf16.msra.mxu0 %v4638_v27  ;;  %v4703_v27 = vcombine.high %v1209_v21, %v1213_v22  ;;  %v4702_v33 = vcombine.low %v1209_v21, %v1213_v22  ;;  %v4704_v35 = vcombine.low %v1210_v23, %v1214_v24  ;;  %v1254_v4 = vld [vmem:[%s6926_s7 + $0x7b8] sm:$0xff]  ;;  %v5137_v21 = vld [vmem:[#allocation13 + $0x4] ss:$8 sps:$4 sm:$0xff]   ;;  %v5135_v22 = vld [vmem:[#allocation13] ss:$8 sps:$4 sm:$0xff]  }
 0x32f   :  { %2889 = vmatpush1.bf16.msra.mxu1 %v4640_v28  ;;  %2804 = vmatprep.subr.bf16.mxu0 %v4647_v29  ;;  %v4705_v28 = vcombine.high %v1210_v23, %v1214_v24  ;;  %v1217_v29 = vld [vmem:[%s6926_s7 + $0x690] sm:$0xff]  ;;  %v1262_v12 = vld [vmem:[%s6926_s7 + $0x7f8] sm:$0xff]  ;;  %v4744_v16 = vcombine.low %v1250_v2, %v1254_v4 }
 0x330   :  { %2890 = vmatprep.subr.bf16.mxu1 %v4649_v30  ;;  %v1221_v30 = vld [vmem:[%s6926_s7 + $0x6b0] sm:$0xff] }
 0x331   :  { %v4710_v43 = vcombine.low %v1217_v29, %v1221_v30  ;;  %v5140_v23 = vld [vmem:[#allocation13 + $0x14] ss:$8 sps:$4 sm:$0xff]   ;;  %v5138_v24 = vld [vmem:[#allocation13 + $0x10] ss:$8 sps:$4 sm:$0xff]  }
 0x332   :  { %2805 = vmatpush1.bf16.msra.mxu0 %v4646_v62  ;;  %v4711_v62 = vcombine.high %v1217_v29, %v1221_v30  ;;  %v5149_v29 = vld [vmem:[#allocation13 + $0x44] ss:$8 sps:$4 sm:$0xff]   ;;  %v5147_v30 = vld [vmem:[#allocation13 + $0x40] ss:$8 sps:$4 sm:$0xff]  }
 0x333   :  { %2891 = vmatpush1.bf16.msra.mxu1 %v4648_v36  ;;  %2806 = vmatprep.subr.bf16.mxu0 %v4655_v37  ;;  %v4713_v36 = vcombine.high %v1218_v31, %v1222_v32  ;;  %v1225_v37 = vld [vmem:[%s6926_s7 + $0x6d0] sm:$0xff] }
 0x334   :  { %2892 = vmatprep.subr.bf16.mxu1 %v4657_v14  ;;  %v1229_v14 = vld [vmem:[%s6926_s7 + $0x6f0] sm:$0xff] }
 0x335   :  { %v4718_v41 = vcombine.low %v1225_v37, %v1229_v14  ;;  %v5152_v31 = vld [vmem:[#allocation13 + $0x54] ss:$8 sps:$4 sm:$0xff]   ;;  %v5150_v32 = vld [vmem:[#allocation13 + $0x50] ss:$8 sps:$4 sm:$0xff]  }
 0x336   :  { %2807 = vmatpush1.bf16.msra.mxu0 %v4654_v48  ;;  %v4719_v48 = vcombine.high %v1225_v37, %v1229_v14  ;;  %v5159_v37 = vld [vmem:[#allocation13 + $0x80] ss:$8 sps:$4 sm:$0xff]   ;;  %v5164_v14 = vld [vmem:[#allocation13 + $0x94] ss:$8 sps:$4 sm:$0xff]  }
 0x337   :  { %2893 = vmatpush1.bf16.msra.mxu1 %v4656_v49  ;;  %2808 = vmatprep.subr.bf16.mxu0 %v4663_v50  ;;  %v4721_v49 = vcombine.high %v1226_v38, %v1230_v39  ;;  %v1233_v50 = vld [vmem:[%s6926_s7 + $0x710] sm:$0xff]  ;;  %v5167_v39 = vld [vmem:[#allocation13 + $0xa4] ss:$8 sps:$4 sm:$0xff]  }
 0x338   :  { %2894 = vmatprep.subr.bf16.mxu1 %v4665_v51  ;;  %v1237_v51 = vld [vmem:[%s6926_s7 + $0x730] sm:$0xff] }
 0x339   :  { %v4726_v56 = vcombine.low %v1233_v50, %v1237_v51  ;;  %v5162_v38 = vld [vmem:[#allocation13 + $0x90] ss:$8 sps:$4 sm:$0xff]  }
 0x33a   :  { %2809 = vmatpush1.bf16.msra.mxu0 %v4662_v44  ;;  %v4727_v44 = vcombine.high %v1233_v50, %v1237_v51  ;;  %v5171_v50 = vld [vmem:[#allocation13 + $0xc0] ss:$8 sps:$4 sm:$0xff]   ;;  %v5176_v51 = vld [vmem:[#allocation13 + $0xd4] ss:$8 sps:$4 sm:$0xff]  }
 0x33b   :  { %2895 = vmatpush1.bf16.msra.mxu1 %v4664_v46  ;;  %2810 = vmatprep.subr.bf16.mxu0 %v4671_v47  ;;  %v4729_v46 = vcombine.high %v1234_v52, %v1238_v40  ;;  %v1241_v47 = vld [vmem:[%s6926_s7 + $0x750] sm:$0xff]  ;;  %v5179_v40 = vld [vmem:[#allocation13 + $0xe4] ss:$8 sps:$4 sm:$0xff]  }
 0x33c   :  { %2896 = vmatprep.subr.bf16.mxu1 %v4673_v53  ;;  %v1245_v53 = vld [vmem:[%s6926_s7 + $0x770] sm:$0xff] }
 0x33d   :  { %v4734_v5 = vcombine.low %v1241_v47, %v1245_v53  ;;  %v5174_v52 = vld [vmem:[#allocation13 + $0xd0] ss:$8 sps:$4 sm:$0xff]  }
 0x33e   :  { %2811 = vmatpush1.bf16.msra.mxu0 %v4670_v60  ;;  %v4735_v60 = vcombine.high %v1241_v47, %v1245_v53  ;;  %v6731_v47 = vld [vmem:[#allocation8] sm:$0xff] }
 0x33f   :  { %2897 = vmatpush1.bf16.msra.mxu1 %v4672_v61  ;;  %2812 = vmatprep.subr.bf16.mxu0 %v4679_v63  ;;  %v4737_v61 = vcombine.high %v1242_v54, %v1246_v55  ;;  %v1249_v63 = vld [vmem:[%s6926_s7 + $0x790] sm:$0xff]  ;;  %v1268_v53 = vrot.slane %v6731_v47, %v5965_v0  ;;  %v6737_v55 = vld [vmem:[#allocation11] sm:$0xff] }
 0x340   :  { %2898 = vmatprep.subr.bf16.mxu1 %v4681_v1  ;;  %v1253_v1 = vld [vmem:[%s6926_s7 + $0x7b0] sm:$0xff] }
 0x341   :  { %v4742_v13 = vcombine.low %v1249_v63, %v1253_v1  ;;  %v6735_v54 = vld [vmem:[#allocation10] sm:$0xff] }
 0x342   :  { %2813 = vmatpush1.bf16.msra.mxu0 %v4678_v7  ;;  %v4743_v7 = vcombine.high %v1249_v63, %v1253_v1  ;;  %v6747_v63 = vrot.slane %v6735_v54, %v5965_v0  ;;  %v6751_v1 = vrot.slane %v6737_v55, %v5965_v0 }
 0x343   :  { %2899 = vmatpush1.bf16.msra.mxu1 %v4680_v8  ;;  %2814 = vmatprep.subr.bf16.mxu0 %v4687_v9  ;;  %v4745_v8 = vcombine.high %v1250_v2, %v1254_v4  ;;  %v1257_v9 = vld [vmem:[%s6926_s7 + $0x7d0] sm:$0xff]  ;;  %v6755_v4 = vrot.slane %v6735_v54, %v6298_v15 }
 0x344   :  { %2900 = vmatprep.subr.bf16.mxu1 %v4689_v10  ;;  %v1261_v10 = vld [vmem:[%s6926_s7 + $0x7f0] sm:$0xff] }
 0x346   :  { %2815 = vmatpush1.bf16.msra.mxu0 %v4686_v18  ;;  %v4751_v18 = vcombine.high %v1257_v9, %v1261_v10 }
 0x347   :  { %2901 = vmatpush1.bf16.msra.mxu1 %v4688_v34  ;;  %2816 = vmatprep.subr.bf16.mxu0 %v4695_v19  ;;  %v4753_v34 = vcombine.high %v1258_v11, %v1262_v12  ;;  %v4750_v19 = vcombine.low %v1257_v9, %v1261_v10 }
 0x348   :  { %2902 = vmatprep.subr.bf16.mxu1 %v4697_v20  ;;  %v4752_v20 = vcombine.low %v1258_v11, %v1262_v12  ;;  %v6767_v11 = vrot.slane %v6735_v54, %v6304_v17 }
 0x34a   :  { %2817 = vmatpush1.bf16.msra.mxu0 %v4694_v25  ;;  %v5143_v25 = vld [vmem:[#allocation13 + $0x24] ss:$8 sps:$4 sm:$0xff]  }
 0x34b   :  { %2903 = vmatpush1.bf16.msra.mxu1 %v4696_v26  ;;  %2818 = vmatprep.subr.bf16.mxu0 %v4703_v27  ;;  %v5141_v26 = vld [vmem:[#allocation13 + $0x20] ss:$8 sps:$4 sm:$0xff]   ;;  %v5146_v27 = vld [vmem:[#allocation13 + $0x34] ss:$8 sps:$4 sm:$0xff]  }
 0x34c   :  { %2904 = vmatprep.subr.bf16.mxu1 %v4705_v28  ;;  %v5144_v28 = vld [vmem:[#allocation13 + $0x30] ss:$8 sps:$4 sm:$0xff]  }
 0x34e   :  { %2819 = vmatpush1.bf16.msra.mxu0 %v4702_v33  ;;  %v5153_v33 = vld [vmem:[#allocation13 + $0x60] ss:$8 sps:$4 sm:$0xff]  }
 0x34f   :  { %2905 = vmatpush1.bf16.msra.mxu1 %v4704_v35  ;;  %2820 = vmatprep.subr.bf16.mxu0 %v4711_v62  ;;  %v5158_v35 = vld [vmem:[#allocation13 + $0x74] ss:$8 sps:$4 sm:$0xff]   ;;  %v5156_v62 = vld [vmem:[#allocation13 + $0x70] ss:$8 sps:$4 sm:$0xff]  }
 0x350   :  { %2906 = vmatprep.subr.bf16.mxu1 %v4713_v36  ;;  %v5161_v36 = vld [vmem:[#allocation13 + $0x84] ss:$8 sps:$4 sm:$0xff]  }
 0x352   :  { %2821 = vmatpush1.bf16.msra.mxu0 %v4710_v43  ;;  %v5165_v43 = vld [vmem:[#allocation13 + $0xa0] ss:$8 sps:$4 sm:$0xff]  }
 0x353   :  { %2907 = vmatpush1.bf16.msra.mxu1 %v4712_v45  ;;  %2822 = vmatprep.subr.bf16.mxu0 %v4719_v48  ;;  %v5170_v45 = vld [vmem:[#allocation13 + $0xb4] ss:$8 sps:$4 sm:$0xff]   ;;  %v5168_v48 = vld [vmem:[#allocation13 + $0xb0] ss:$8 sps:$4 sm:$0xff]  }
 0x354   :  { %2908 = vmatprep.subr.bf16.mxu1 %v4721_v49  ;;  %v5173_v49 = vld [vmem:[#allocation13 + $0xc4] ss:$8 sps:$4 sm:$0xff]  }
 0x356   :  { %2823 = vmatpush1.bf16.msra.mxu0 %v4718_v41  ;;  %v5177_v41 = vld [vmem:[#allocation13 + $0xe0] ss:$8 sps:$4 sm:$0xff]  }
 0x357   :  { %2909 = vmatpush1.bf16.msra.mxu1 %v4720_v42  ;;  %2824 = vmatprep.subr.bf16.mxu0 %v4727_v44  ;;  %v5182_v42 = vld [vmem:[#allocation13 + $0xf4] ss:$8 sps:$4 sm:$0xff]   ;;  %v5180_v44 = vld [vmem:[#allocation13 + $0xf0] ss:$8 sps:$4 sm:$0xff]  }
 0x358   :  { %2910 = vmatprep.subr.bf16.mxu1 %v4729_v46  ;;  %v5185_v46 = vld [vmem:[#allocation13 + $0x104] ss:$8 sps:$4 sm:$0xff]  }
 0x35a   :  { %2825 = vmatpush1.bf16.msra.mxu0 %v4726_v56  ;;  %v1276_v56 = vrot.slane %v6731_v47, %v6298_v15 }
 0x35b   :  { %2911 = vmatpush1.bf16.msra.mxu1 %v4728_v58  ;;  %2826 = vmatprep.subr.bf16.mxu0 %v4735_v60  ;;  %v1272_v58 = vrot.slane %v6731_v47, %v5971_v3  ;;  %v1280_v60 = vrot.slane %v6731_v47, %v6304_v17 }
 0x35c   :  { %2912 = vmatprep.subr.bf16.mxu1 %v4737_v61 }
 0x35e   :  { %2827 = vmatpush1.bf16.msra.mxu0 %v4734_v5  ;;  %v6759_v5 = vrot.slane %v6735_v54, %v5971_v3 }
 0x35f   :  { %2913 = vmatpush1.bf16.msra.mxu1 %v4736_v6  ;;  %2828 = vmatprep.subr.bf16.mxu0 %v4743_v7 }
 0x360   :  { %2914 = vmatprep.subr.bf16.mxu1 %v4745_v8  ;;  %v6763_v8 = vrot.slane %v6737_v55, %v6298_v15 }
 0x362   :  { %2829 = vmatpush1.bf16.msra.mxu0 %v4742_v13 }
 0x363   :  { %2915 = vmatpush1.bf16.msra.mxu1 %v4744_v16  ;;  %2830 = vmatprep.subr.bf16.mxu0 %v4751_v18 }
 0x364   :  { %2916 = vmatprep.subr.bf16.mxu1 %v4753_v34  ;;  %v6771_v34 = vrot.slane %v6737_v55, %v5971_v3 }
 0x366   :  { %2831 = vmatpush1.bf16.msra.mxu0 %v4750_v19  ;;  %v6775_v19 = vrot.slane %v6737_v55, %v6304_v17 }
 0x367   :  { %2917 = vmatpush1.bf16.msra.mxu1 %v4752_v20  ;;  %4034 = vmatprep.subr.bf16.mxu0 %v5137_v21 }
 0x369   :  { %2833 = vmatmul.mubr.bf16.vlgmr.msra.gmra.mrb[4].mxu0 %v6346_v57 }
 0x36a   :  { %2919 = vmatmul.mubr.bf16.vlgmr.msra.gmra.mrb[16].mxu1 %v6346_v57  ;;  %4035 = vmatpush1.bf16.msra.mxu0 %v5135_v22  ;;  %v5155_v57 = vld [vmem:[#allocation13 + $0x64] ss:$8 sps:$4 sm:$0xff]  }
 0x36b   :  { %4036 = vmatprep.subr.bf16.mxu0 %v5140_v23 }
 0x36e   :  { %4037 = vmatpush1.bf16.msra.mxu0 %v5138_v24 }
 0x36f   :  { %4038 = vmatprep.subr.bf16.mxu0 %v5143_v25 }
 0x372   :  { %4039 = vmatpush1.bf16.msra.mxu0 %v5141_v26 }
 0x373   :  { %4040 = vmatprep.subr.bf16.mxu0 %v5146_v27 }
 0x376   :  { %4041 = vmatpush1.bf16.msra.mxu0 %v5144_v28 }
 0x377   :  { %4042 = vmatprep.subr.bf16.mxu0 %v5149_v29 }
 0x37a   :  { %4043 = vmatpush1.bf16.msra.mxu0 %v5147_v30 }
 0x37b   :  { %4044 = vmatprep.subr.bf16.mxu0 %v5152_v31 }
 0x37e   :  { %4045 = vmatpush1.bf16.msra.mxu0 %v5150_v32 }
 0x37f   :  { %4046 = vmatprep.subr.bf16.mxu0 %v5155_v57 }
 0x382   :  { %4047 = vmatpush1.bf16.msra.mxu0 %v5153_v33 }
 0x383   :  { %4048 = vmatprep.subr.bf16.mxu0 %v5158_v35 }
 0x386   :  { %4049 = vmatpush1.bf16.msra.mxu0 %v5156_v62 }
 0x387   :  { %4050 = vmatprep.subr.bf16.mxu0 %v5161_v36 }
 0x38a   :  { %4051 = vmatpush1.bf16.msra.mxu0 %v5159_v37 }
 0x38b   :  { %4052 = vmatprep.subr.bf16.mxu0 %v5164_v14 }
 0x38e   :  { %4053 = vmatpush1.bf16.msra.mxu0 %v5162_v38 }
 0x38f   :  { %4054 = vmatprep.subr.bf16.mxu0 %v5167_v39 }
 0x392   :  { %4055 = vmatpush1.bf16.msra.mxu0 %v5165_v43 }
 0x393   :  { %4056 = vmatprep.subr.bf16.mxu0 %v5170_v45 }
 0x396   :  { %4057 = vmatpush1.bf16.msra.mxu0 %v5168_v48 }
 0x397   :  { %4058 = vmatprep.subr.bf16.mxu0 %v5173_v49 }
 0x39a   :  { %4059 = vmatpush1.bf16.msra.mxu0 %v5171_v50 }
 0x39b   :  { %4060 = vmatprep.subr.bf16.mxu0 %v5176_v51 }
 0x39e   :  { %4061 = vmatpush1.bf16.msra.mxu0 %v5174_v52 }
 0x39f   :  { %4062 = vmatprep.subr.bf16.mxu0 %v5179_v40 }
 0x3a2   :  { %4063 = vmatpush1.bf16.msra.mxu0 %v5177_v41 }
 0x3a3   :  { %4064 = vmatprep.subr.bf16.mxu0 %v5182_v42 }
 0x3a6   :  { %4065 = vmatpush1.bf16.msra.mxu0 %v5180_v44 }
 0x3a7   :  { %4075 = vmatprep.subr.bf16.mxu0 %v5185_v46 }
 0x3bc   :  { %v2662_v61 = vpop.f32.mrb[0].mxu0  ;;  %v2748_v2 = vpop.f32.mrb[12].mxu1 }
 0x3bd   :  { %v4921_v6 = vadd.f32 %v2662_v61, %v1268_v53  ;;  %v4925_v7 = vadd.f32 %v2748_v2, %v1276_v56  ;;  %v2664_v9 = vpop.f32.mrb[1].mxu0  ;;  %v2750_v10 = vpop.f32.mrb[13].mxu1 }
 0x3be   :  { %v4922_v12 = vadd.f32 %v2664_v9, %v1272_v58  ;;  %v4926_v13 = vadd.f32 %v2750_v10, %v1280_v60  ;;  %v2666_v16 = vpop.f32.mrb[2].mxu0  ;;  %v2752_v18 = vpop.f32.mrb[14].mxu1 }
 0x3bf   :  { %v2929_v15 = vmax.f32 %v4921_v6, 0.0  ;;  %v2931_v20 = vmax.f32 %v4925_v7, 0.0  ;;  %v4923_v21 = vadd.f32 %v2666_v16, %v1268_v53  ;;  %v4927_v22 = vadd.f32 %v2752_v18, %v1276_v56  ;;  %v2668_v23 = vpop.f32.mrb[3].mxu0  ;;  %v2754_v24 = vpop.f32.mrb[15].mxu1 }
 0x3c0   :  { %v2930_v25 = vmax.f32 %v4922_v12, 0.0  ;;  %v2932_v26 = vmax.f32 %v4926_v13, 0.0  ;;  %v4924_v27 = vadd.f32 %v2668_v23, %v1272_v58  ;;  %v4928_v28 = vadd.f32 %v2754_v24, %v1280_v60 }
 0x3c1   :  { %v2945_v29 = vrot.slane %v2929_v15, 4  ;;  %v2957_v30 = vrot.slane %v2931_v20, 4  ;;  %v2937_v31 = vmax.f32 %v4923_v21, 0.0  ;;  %v2939_v32 = vmax.f32 %v4927_v22, 0.0 }
 0x3c2   :  { %v2951_v57 = vrot.slane %v2930_v25, 4  ;;  %v2963_v33 = vrot.slane %v2932_v26, 4  ;;  %v2938_v35 = vmax.f32 %v4924_v27, 0.0  ;;  %v2940_v62 = vmax.f32 %v4928_v28, 0.0 }
 0x3c3   :  { %v2946_v17 = vmax.f32 %v2929_v15, %v2945_v29  ;;  %v2958_v36 = vmax.f32 %v2931_v20, %v2957_v30  ;;  %v2993_v37 = vrot.slane %v2937_v31, 4  ;;  %v3005_v14 = vrot.slane %v2939_v32, 4 }
 0x3c4   :  { %v2952_v38 = vmax.f32 %v2930_v25, %v2951_v57  ;;  %v2964_v39 = vmax.f32 %v2932_v26, %v2963_v33  ;;  %v2999_v43 = vrot.slane %v2938_v35, 4  ;;  %v3011_v45 = vrot.slane %v2940_v62, 4 }
 0x3c5   :  { %v2947_v48 = vrot.slane %v2946_v17, 2  ;;  %v2959_v49 = vrot.slane %v2958_v36, 2  ;;  %v2994_v50 = vmax.f32 %v2937_v31, %v2993_v37  ;;  %v3006_v51 = vmax.f32 %v2939_v32, %v3005_v14 }
 0x3c6   :  { %v2953_v52 = vrot.slane %v2952_v38, 2  ;;  %v2965_v40 = vrot.slane %v2964_v39, 2  ;;  %v3000_v41 = vmax.f32 %v2938_v35, %v2999_v43  ;;  %v3012_v42 = vmax.f32 %v2940_v62, %v3011_v45 }
 0x3c7   :  { %v2948_v44 = vmax.f32 %v2946_v17, %v2947_v48  ;;  %v2960_v46 = vmax.f32 %v2958_v36, %v2959_v49  ;;  %v2995_v53 = vrot.slane %v2994_v50, 2  ;;  %v3007_v56 = vrot.slane %v3006_v51, 2 }
 0x3c8   :  { %v2954_v58 = vmax.f32 %v2952_v38, %v2953_v52  ;;  %v2966_v60 = vmax.f32 %v2964_v39, %v2965_v40  ;;  %v3001_v61 = vrot.slane %v3000_v41, 2  ;;  %v3013_v2 = vrot.slane %v3012_v42, 2 }
 0x3c9   :  { %v2949_v6 = vrot.slane %v2948_v44, 1  ;;  %v2961_v7 = vrot.slane %v2960_v46, 1  ;;  %v2996_v9 = vmax.f32 %v2994_v50, %v2995_v53  ;;  %v3008_v10 = vmax.f32 %v3006_v51, %v3007_v56 }
 0x3ca   :  { %v2955_v12 = vrot.slane %v2954_v58, 1  ;;  %v2967_v13 = vrot.slane %v2966_v60, 1  ;;  %v3002_v16 = vmax.f32 %v3000_v41, %v3001_v61  ;;  %v3014_v18 = vmax.f32 %v3012_v42, %v3013_v2 }
 0x3cb   :  { %v2950_v15 = vmax.f32 %v2948_v44, %v2949_v6  ;;  %v2962_v20 = vmax.f32 %v2960_v46, %v2961_v7  ;;  %v2997_v21 = vrot.slane %v2996_v9, 1  ;;  %v3009_v22 = vrot.slane %v3008_v10, 1 }
 0x3cc   :  { %v2956_v23 = vmax.f32 %v2954_v58, %v2955_v12  ;;  %v2968_v24 = vmax.f32 %v2966_v60, %v2967_v13  ;;  %v3003_v25 = vrot.slane %v3002_v16, 1  ;;  %v3015_v26 = vrot.slane %v3014_v18, 1 }
 0x3cd   :  { %v3083_v27 = vmul.f32 %v6747_v63, %v2950_v15  ;;  %v3085_v28 = vmul.f32 %v6755_v4, %v2962_v20  ;;  %v2998_v29 = vmax.f32 %v2996_v9, %v2997_v21  ;;  %v3010_v30 = vmax.f32 %v3008_v10, %v3009_v22  ;;  %v5183_v22 = vld [vmem:[#allocation13 + $0x100] ss:$8 sps:$4 sm:$0xff]  }
 0x3ce   :  { %v3084_v31 = vmul.f32 %v6759_v5, %v2956_v23  ;;  %v3086_v32 = vmul.f32 %v6767_v11, %v2968_v24  ;;  %v3004_v57 = vmax.f32 %v3002_v16, %v3003_v25  ;;  %v3016_v33 = vmax.f32 %v3014_v18, %v3015_v26  ;;  %v5188_v24 = vld [vmem:[#allocation13 + $0x114] ss:$8 sps:$4 sm:$0xff]   ;;  %v5186_v26 = vld [vmem:[#allocation13 + $0x110] ss:$8 sps:$4 sm:$0xff]  }
 0x3cf   :  { %v3141_v35 = vadd.f32 %v6751_v1, %v3083_v27  ;;  %v3143_v62 = vadd.f32 %v6763_v8, %v3085_v28  ;;  %v3091_v17 = vmul.f32 %v6747_v63, %v2998_v29  ;;  %v3093_v36 = vmul.f32 %v6755_v4, %v3010_v30  ;;  %v5191_v27 = vld [vmem:[#allocation13 + $0x124] ss:$8 sps:$4 sm:$0xff]   ;;  %v5189_v28 = vld [vmem:[#allocation13 + $0x120] ss:$8 sps:$4 sm:$0xff]   ;;  %v5194_v29 = vld [vmem:[#allocation13 + $0x134] ss:$8 sps:$4 sm:$0xff]  }
 0x3d0   :  { %v3092_v37 = vmul.f32 %v6759_v5, %v3004_v57  ;;  %v3094_v14 = vmul.f32 %v6767_v11, %v3016_v33  ;;  %v3142_v38 = vadd.f32 %v6771_v34, %v3084_v31  ;;  %v3144_v39 = vadd.f32 %v6775_v19, %v3086_v32  ;;  %v5192_v30 = vld [vmem:[#allocation13 + $0x130] ss:$8 sps:$4 sm:$0xff]   ;;  %v5197_v31 = vld [vmem:[#allocation13 + $0x144] ss:$8 sps:$4 sm:$0xff]   ;;  %v5195_v32 = vld [vmem:[#allocation13 + $0x140] ss:$8 sps:$4 sm:$0xff]  }
 0x3d1   :  { %v3157_v43 = vmax.f32 %v3141_v35, 0.0  ;;  %v3159_v45 = vmax.f32 %v3143_v62, 0.0  ;;  %v3149_v48 = vadd.f32 %v6751_v1, %v3091_v17  ;;  %v3151_v49 = vadd.f32 %v6763_v8, %v3093_v36  ;;  %v5200_v57 = vld [vmem:[#allocation13 + $0x154] ss:$8 sps:$4 sm:$0xff]   ;;  %v5198_v33 = vld [vmem:[#allocation13 + $0x150] ss:$8 sps:$4 sm:$0xff]  }
 0x3d2   :  { %v3150_v50 = vadd.f32 %v6771_v34, %v3092_v37  ;;  %v3158_v51 = vmax.f32 %v3142_v38, 0.0  ;;  %v3152_v63 = vadd.f32 %v6775_v19, %v3094_v14  ;;  %v3160_v4 = vmax.f32 %v3144_v39, 0.0  ;;  %v5203_v35 = vld [vmem:[#allocation13 + $0x164] ss:$8 sps:$4 sm:$0xff]   ;;  %v5201_v62 = vld [vmem:[#allocation13 + $0x160] ss:$8 sps:$4 sm:$0xff]  }
 0x3d3   :  { %v3165_v52 = vmax.f32 %v3149_v48, 0.0  ;;  %v3167_v5 = vmax.f32 %v3151_v49, 0.0  ;;  %v3173_v41 = vpack.c.bf16 %v3157_v43, %v3157_v43  ;;  %v3175_v42 = vpack.c.bf16 %v3159_v45, %v3159_v45  ;;  %v5206_v17 = vld [vmem:[#allocation13 + $0x174] ss:$8 sps:$4 sm:$0xff]   ;;  %v5204_v36 = vld [vmem:[#allocation13 + $0x170] ss:$8 sps:$4 sm:$0xff]  }
 0x3d4   :  { %v3166_v40 = vmax.f32 %v3150_v50, 0.0  ;;  %v3168_v11 = vmax.f32 %v3152_v63, 0.0  ;;  %v3174_v53 = vpack.c.bf16 %v3158_v51, %v3158_v51  ;;  %v3176_v58 = vpack.c.bf16 %v3160_v4, %v3160_v4  ;;  %v5209_v37 = vld [vmem:[#allocation13 + $0x184] ss:$8 sps:$4 sm:$0xff]   ;;  %v5207_v14 = vld [vmem:[#allocation13 + $0x180] ss:$8 sps:$4 sm:$0xff]  }
 0x3d5   :  { %v3181_v44 = vpack.c.bf16 %v3165_v52, %v3165_v52  ;;  %v3183_v46 = vpack.c.bf16 %v3167_v5, %v3167_v5  ;;  %v3345_v2 = vunpack.c.l.b16 %v3173_v41  ;;  %v3347_v6 = vunpack.c.l.b16 %v3175_v42  ;;  %v5212_v38 = vld [vmem:[#allocation13 + $0x194] ss:$8 sps:$4 sm:$0xff]   ;;  %v5210_v39 = vld [vmem:[#allocation13 + $0x190] ss:$8 sps:$4 sm:$0xff]   ;;  %v5215_v43 = vld [vmem:[#allocation13 + $0x1a4] ss:$8 sps:$4 sm:$0xff]  }
 0x3d6   :  { %v3182_v56 = vpack.c.bf16 %v3166_v40, %v3166_v40  ;;  %v3184_v1 = vpack.c.bf16 %v3168_v11, %v3168_v11  ;;  %v3346_v9 = vunpack.c.l.b16 %v3174_v53  ;;  %v3348_v12 = vunpack.c.l.b16 %v3176_v58  ;;  %v5213_v45 = vld [vmem:[#allocation13 + $0x1a0] ss:$8 sps:$4 sm:$0xff]   ;;  %v5218_v48 = vld [vmem:[#allocation13 + $0x1b4] ss:$8 sps:$4 sm:$0xff]   ;;  %v5216_v49 = vld [vmem:[#allocation13 + $0x1b0] ss:$8 sps:$4 sm:$0xff]  }
 0x3d7   :  { %v3353_v60 = vunpack.c.l.b16 %v3181_v44  ;;  %v3355_v8 = vunpack.c.l.b16 %v3183_v46  ;;  %v5221_v50 = vld [vmem:[#allocation13 + $0x1c4] ss:$8 sps:$4 sm:$0xff]   ;;  %v5219_v51 = vld [vmem:[#allocation13 + $0x1c0] ss:$8 sps:$4 sm:$0xff]   ;;  %v5224_v63 = vld [vmem:[#allocation13 + $0x1d4] ss:$8 sps:$4 sm:$0xff]  }
 0x3d8   :  { %v3354_v61 = vunpack.c.l.b16 %v3182_v56  ;;  %v3356_v34 = vunpack.c.l.b16 %v3184_v1  ;;  %v5222_v4 = vld [vmem:[#allocation13 + $0x1d0] ss:$8 sps:$4 sm:$0xff]   ;;  %v5227_v52 = vld [vmem:[#allocation13 + $0x1e4] ss:$8 sps:$4 sm:$0xff]   ;;  %v5225_v5 = vld [vmem:[#allocation13 + $0x1e0] ss:$8 sps:$4 sm:$0xff]  }
 0x3d9   :  { %v3361_v19 = vrot.slane %v3353_v60, 7  ;;  %v3366_v7 = vrot.slane %v3355_v8, 7  ;;  %v5230_v40 = vld [vmem:[#allocation13 + $0x1f4] ss:$8 sps:$4 sm:$0xff]   ;;  %v5228_v11 = vld [vmem:[#allocation13 + $0x1f0] ss:$8 sps:$4 sm:$0xff]  }
 0x3da   :  { %v3364_v10 = vrot.slane %v3354_v61, 7  ;;  %v3368_v13 = vrot.slane %v3356_v34, 7  ;;  %v5233_v41 = vld [vmem:[#allocation13 + $0x204] ss:$8 sps:$4 sm:$0xff]   ;;  %v5231_v42 = vld [vmem:[#allocation13 + $0x200] ss:$8 sps:$4 sm:$0xff]  }
 0x3db   :  { %v3363_v16 = vsel %vm3362_vm3, %v3361_v19, %v3345_v2  ;;  %v6795_v18 = vsel %vm3362_vm3, %v3366_v7, %v3347_v6  ;;  %v5236_v46 = vld [vmem:[#allocation13 + $0x214] ss:$8 sps:$4 sm:$0xff]   ;;  %v5327_v53 = vld [vmem:[%s6932_s13 + $0x40] sm:$0xff]   ;;  %v5329_v58 = vld [vmem:[%s6932_s13 + $0x48] sm:$0xff]  }
 0x3dc   :  { %v3365_v15 = vsel %vm3362_vm3, %v3364_v10, %v3346_v9  ;;  %v3369_v20 = vsel %vm3362_vm3, %v3368_v13, %v3348_v12  ;;  %v3378_v23 = vpack.c.b16 %v3363_v16, %v3363_v16  ;;  %v3380_v44 = vpack.c.b16 %v6795_v18, %v6795_v18  ;;  %v5328_v56 = vld [vmem:[%s6932_s13] sm:$0xff]   ;;  %v5234_v1 = vld [vmem:[#allocation13 + $0x210] ss:$8 sps:$4 sm:$0xff]   ;;  %4899 = vmatprep.subr.bf16.mxu1 %v5327_v53  ;;  %v5330_v8 = vld [vmem:[%s6932_s13 + $0x8] sm:$0xff]  }
 0x3dd   :  { %v3379_v21 = vpack.c.b16 %v3365_v15, %v3365_v15  ;;  %v3381_v25 = vpack.c.b16 %v3369_v20, %v3369_v20  ;;  %v5239_v60 = vld [vmem:[#allocation13 + $0x224] ss:$8 sps:$4 sm:$0xff]   ;;  %4900 = vmatpush3.bf16.msra.mxu1 %v5328_v56  ;;  %v5331_v61 = vld [vmem:[%s6932_s13 + $0x50] sm:$0xff]   ;;  %v5237_v34 = vld [vmem:[#allocation13 + $0x220] ss:$8 sps:$4 sm:$0xff]  }
 0x3de   :  { %4901 = vmatprep.subr.bf16.mxu1 %v5329_v58  ;;  %v5242_v2 = vld [vmem:[#allocation13 + $0x234] ss:$8 sps:$4 sm:$0xff]   ;;  %v5240_v7 = vld [vmem:[#allocation13 + $0x230] ss:$8 sps:$4 sm:$0xff]   ;;  %v5245_v9 = vld [vmem:[#allocation13 + $0x244] ss:$8 sps:$4 sm:$0xff]  }
 0x3df   :  { %4066 = vmatprep.mubr.bf16.mxu0 %v3379_v21  ;;  %v5332_v19 = vld [vmem:[%s6932_s13 + $0x10] sm:$0xff]   ;;  %v5333_v6 = vld [vmem:[%s6932_s13 + $0x58] sm:$0xff]   ;;  %v5335_v12 = vld [vmem:[%s6932_s13 + $0x60] sm:$0xff]  }
 0x3e0   :  { %4067 = vmatmul.mubr.bf16.vlgmr.msra.gmra.mrb[8].mxu0 %v3378_v23  ;;  %v5334_v10 = vld [vmem:[%s6932_s13 + $0x18] sm:$0xff]   ;;  %v5243_v13 = vld [vmem:[#allocation13 + $0x240] ss:$8 sps:$4 sm:$0xff]   ;;  %v5251_v21 = vld [vmem:[#allocation13 + $0x264] ss:$8 sps:$4 sm:$0xff]  }
 0x3e1   :  { %4076 = vmatpush1.bf16.msra.mxu0 %v5183_v22  ;;  %4107 = vmatprep.mubr.bf16.mxu0 %v3381_v25  ;;  %v5248_v16 = vld [vmem:[#allocation13 + $0x254] ss:$8 sps:$4 sm:$0xff]   ;;  %v5336_v18 = vld [vmem:[%s6932_s13 + $0x20] sm:$0xff]   ;;  %v5337_v15 = vld [vmem:[%s6932_s13 + $0x68] sm:$0xff]  }
 0x3e2   :  { %4077 = vmatprep.subr.bf16.mxu0 %v5188_v24  ;;  %4902 = vmatpush3.bf16.msra.mxu1 %v5330_v8  ;;  %v5246_v20 = vld [vmem:[#allocation13 + $0x250] ss:$8 sps:$4 sm:$0xff]   ;;  %v5338_v22 = vld [vmem:[%s6932_s13 + $0x28] sm:$0xff]   ;;  %v1283_v24 = vsub.s32 4, %v5956_v59  ;;  %v5254_v25 = vld [vmem:[#allocation13 + $0x274] ss:$8 sps:$4 sm:$0xff]  }
 0x3e3   :  { %4903 = vmatprep.subr.bf16.mxu1 %v5331_v61  ;;  %v5249_v23 = vld [vmem:[#allocation13 + $0x260] ss:$8 sps:$4 sm:$0xff]   ;;  %v5258_v8 = vld [vmem:[#allocation13 + $0x290] ss:$8 sps:$4 sm:$0xff]  }
 0x3e5   :  { %4078 = vmatpush1.bf16.msra.mxu0 %v5186_v26  ;;  %v1291_v26 = vsub.s32 6, %v5956_v59 }
 0x3e6   :  { %4079 = vmatprep.subr.bf16.mxu0 %v5191_v27  ;;  %4904 = vmatpush3.bf16.msra.mxu1 %v5332_v19  ;;  %v1287_v27 = vsub.s32 5, %v5956_v59 }
 0x3e7   :  { %4905 = vmatprep.subr.bf16.mxu1 %v5333_v6 }
 0x3e9   :  { %4080 = vmatpush1.bf16.msra.mxu0 %v5189_v28  ;;  %v1295_v28 = vsub.s32 7, %v5956_v59 }
 0x3ea   :  { %4081 = vmatprep.subr.bf16.mxu0 %v5194_v29  ;;  %4906 = vmatpush3.bf16.msra.mxu1 %v5334_v10  ;;  %v5252_v29 = vld [vmem:[#allocation13 + $0x270] ss:$8 sps:$4 sm:$0xff]  }
 0x3eb   :  { %4907 = vmatprep.subr.bf16.mxu1 %v5335_v12 }
 0x3ed   :  { %4082 = vmatpush1.bf16.msra.mxu0 %v5192_v30  ;;  %v1284_v30 = vrot.slane %v6731_v47, %v1283_v24 }
 0x3ee   :  { %4083 = vmatprep.subr.bf16.mxu0 %v5197_v31  ;;  %4908 = vmatpush3.bf16.msra.mxu1 %v5336_v18  ;;  %v1292_v31 = vrot.slane %v6731_v47, %v1291_v26 }
 0x3ef   :  { %4909 = vmatprep.subr.bf16.mxu1 %v5337_v15 }
 0x3f1   :  { %4084 = vmatpush1.bf16.msra.mxu0 %v5195_v32  ;;  %v1288_v32 = vrot.slane %v6731_v47, %v1287_v27 }
 0x3f2   :  { %4085 = vmatprep.subr.bf16.mxu0 %v5200_v57  ;;  %4910 = vmatpush3.bf16.msra.mxu1 %v5338_v22  ;;  %v5257_v57 = vld [vmem:[#allocation13 + $0x284] ss:$8 sps:$4 sm:$0xff]  }
 0x3f5   :  { %4086 = vmatpush1.bf16.msra.mxu0 %v5198_v33  ;;  %v1296_v33 = vrot.slane %v6731_v47, %v1295_v28  ;;  %v5255_v47 = vld [vmem:[#allocation13 + $0x280] ss:$8 sps:$4 sm:$0xff]  }
 0x3f6   :  { %4087 = vmatprep.subr.bf16.mxu0 %v5203_v35 }
 0x3f9   :  { %4088 = vmatpush1.bf16.msra.mxu0 %v5201_v62  ;;  %v6846_v62 = vrot.slane %v6735_v54, %v1283_v24 }
 0x3fa   :  { %4089 = vmatprep.subr.bf16.mxu0 %v5206_v17  ;;  %v6849_v17 = vrot.slane %v6737_v55, %v1283_v24 }
 0x3fd   :  { %4090 = vmatpush1.bf16.msra.mxu0 %v5204_v36 }
 0x3fe   :  { %4091 = vmatprep.subr.bf16.mxu0 %v5209_v37  ;;  %v6852_v37 = vrot.slane %v6735_v54, %v1291_v26 }
 0x401   :  { %4092 = vmatpush1.bf16.msra.mxu0 %v5207_v14  ;;  %v6855_v14 = vrot.slane %v6737_v55, %v1291_v26 }
 0x402   :  { %4093 = vmatprep.subr.bf16.mxu0 %v5212_v38 }
 0x405   :  { %4094 = vmatpush1.bf16.msra.mxu0 %v5210_v39  ;;  %v6858_v39 = vrot.slane %v6735_v54, %v1287_v27 }
 0x406   :  { %4095 = vmatprep.subr.bf16.mxu0 %v5215_v43 }
 0x409   :  { %4096 = vmatpush1.bf16.msra.mxu0 %v5213_v45 }
 0x40a   :  { %4097 = vmatprep.subr.bf16.mxu0 %v5218_v48  ;;  %v6861_v48 = vrot.slane %v6737_v55, %v1287_v27 }
 0x40d   :  { %4098 = vmatpush1.bf16.msra.mxu0 %v5216_v49 }
 0x40e   :  { %4099 = vmatprep.subr.bf16.mxu0 %v5221_v50  ;;  %v6864_v50 = vrot.slane %v6735_v54, %v1295_v28 }
 0x411   :  { %4100 = vmatpush1.bf16.msra.mxu0 %v5219_v51 }
 0x412   :  { %4101 = vmatprep.subr.bf16.mxu0 %v5224_v63  ;;  %v5260_v63 = vld [vmem:[#allocation13 + $0x294] ss:$8 sps:$4 sm:$0xff]  }
 0x415   :  { %4102 = vmatpush1.bf16.msra.mxu0 %v5222_v4 }
 0x416   :  { %4103 = vmatprep.subr.bf16.mxu0 %v5227_v52 }
 0x419   :  { %4104 = vmatpush1.bf16.msra.mxu0 %v5225_v5  ;;  %v6867_v5 = vrot.slane %v6737_v55, %v1295_v28  ;;  %v5263_v55 = vld [vmem:[#allocation13 + $0x2a4] ss:$8 sps:$4 sm:$0xff]   ;;  %v5266_v28 = vld [vmem:[#allocation13 + $0x2b4] ss:$8 sps:$4 sm:$0xff]  }
 0x41a   :  { %4105 = vmatprep.subr.bf16.mxu0 %v5230_v40 }
 0x41d   :  { %4106 = vmatpush1.bf16.msra.mxu0 %v5228_v11 }
 0x41e   :  { %4116 = vmatprep.subr.bf16.mxu0 %v5233_v41 }
 0x420   :  { %4108 = vmatmul.mubr.bf16.vlgmr.msra.gmra.mrb[8].mxu0 %v3380_v44 }
 0x421   :  { %4117 = vmatpush1.bf16.msra.mxu0 %v5231_v42 }
 0x422   :  { %4118 = vmatprep.subr.bf16.mxu0 %v5236_v46 }
 0x425   :  { %4119 = vmatpush1.bf16.msra.mxu0 %v5234_v1 }
 0x426   :  { %4120 = vmatprep.subr.bf16.mxu0 %v5239_v60 }
 0x429   :  { %4121 = vmatpush1.bf16.msra.mxu0 %v5237_v34 }
 0x42a   :  { %4122 = vmatprep.subr.bf16.mxu0 %v5242_v2 }
 0x42d   :  { %4123 = vmatpush1.bf16.msra.mxu0 %v5240_v7 }
 0x42e   :  { %4124 = vmatprep.subr.bf16.mxu0 %v5245_v9 }
 0x431   :  { %4125 = vmatpush1.bf16.msra.mxu0 %v5243_v13 }
 0x432   :  { %4126 = vmatprep.subr.bf16.mxu0 %v5248_v16 }
 0x435   :  { %4127 = vmatpush1.bf16.msra.mxu0 %v5246_v20 }
 0x436   :  { %4128 = vmatprep.subr.bf16.mxu0 %v5251_v21 }
 0x439   :  { %4129 = vmatpush1.bf16.msra.mxu0 %v5249_v23  ;;  %v5261_v23 = vld [vmem:[#allocation13 + $0x2a0] ss:$8 sps:$4 sm:$0xff]  }
 0x43a   :  { %4130 = vmatprep.subr.bf16.mxu0 %v5254_v25 }
 0x43c   :  { %v2834_v35 = vpop.f32.mrb[4].mxu0 }
 0x43d   :  { %v4929_v59 = vadd.f32 %v2834_v35, %v1284_v30  ;;  %v2920_v36 = vpop.f32.mrb[16].mxu1  ;;  %4131 = vmatpush1.bf16.msra.mxu0 %v5252_v29  ;;  %v2836_v38 = vpop.f32.mrb[5].mxu0 }
 0x43e   :  { %v4933_v43 = vadd.f32 %v2920_v36, %v1292_v31  ;;  %v4930_v45 = vadd.f32 %v2836_v38, %v1288_v32  ;;  %v2922_v49 = vpop.f32.mrb[17].mxu1  ;;  %v2838_v51 = vpop.f32.mrb[6].mxu0  ;;  %4132 = vmatprep.subr.bf16.mxu0 %v5257_v57 }
 0x43f   :  { %v2933_v4 = vmax.f32 %v4929_v59, 0.0  ;;  %v4934_v52 = vadd.f32 %v2922_v49, %v1296_v33  ;;  %v4931_v40 = vadd.f32 %v2838_v51, %v1284_v30  ;;  %v2924_v11 = vpop.f32.mrb[18].mxu1  ;;  %v2840_v41 = vpop.f32.mrb[7].mxu0 }
 0x440   :  { %v2935_v42 = vmax.f32 %v4933_v43, 0.0  ;;  %v2934_v44 = vmax.f32 %v4930_v45, 0.0  ;;  %v4935_v46 = vadd.f32 %v2924_v11, %v1292_v31  ;;  %v4932_v53 = vadd.f32 %v2840_v41, %v1288_v32  ;;  %v2926_v56 = vpop.f32.mrb[19].mxu1  ;;  %v5264_v45 = vld [vmem:[#allocation13 + $0x2b0] ss:$8 sps:$4 sm:$0xff]  }
 0x441   :  { %v2969_v58 = vrot.slane %v2933_v4, 4  ;;  %v2936_v1 = vmax.f32 %v4934_v52, 0.0  ;;  %v2941_v54 = vmax.f32 %v4931_v40, 0.0  ;;  %v4936_v60 = vadd.f32 %v2926_v56, %v1296_v33  ;;  %4133 = vmatpush1.bf16.msra.mxu0 %v5255_v47  ;;  %v5269_v52 = vld [vmem:[#allocation13 + $0x2c4] ss:$8 sps:$4 sm:$0xff]  }
 0x442   :  { %v2981_v61 = vrot.slane %v2935_v42, 4  ;;  %v2975_v34 = vrot.slane %v2934_v44, 4  ;;  %v2943_v2 = vmax.f32 %v4935_v46, 0.0  ;;  %v2942_v19 = vmax.f32 %v4932_v53, 0.0  ;;  %4134 = vmatprep.subr.bf16.mxu0 %v5260_v63 }
 0x443   :  { %v2970_v6 = vmax.f32 %v2933_v4, %v2969_v58  ;;  %v2987_v7 = vrot.slane %v2936_v1, 4  ;;  %v3017_v9 = vrot.slane %v2941_v54, 4  ;;  %v2944_v10 = vmax.f32 %v4936_v60, 0.0 }
 0x444   :  { %v2982_v12 = vmax.f32 %v2935_v42, %v2981_v61  ;;  %v2976_v13 = vmax.f32 %v2934_v44, %v2975_v34  ;;  %v3029_v16 = vrot.slane %v2943_v2, 4  ;;  %v3023_v18 = vrot.slane %v2942_v19, 4 }
 0x445   :  { %v2971_v15 = vrot.slane %v2970_v6, 2  ;;  %v2988_v20 = vmax.f32 %v2936_v1, %v2987_v7  ;;  %v3018_v21 = vmax.f32 %v2941_v54, %v3017_v9  ;;  %v3035_v22 = vrot.slane %v2944_v10, 4  ;;  %4135 = vmatpush1.bf16.msra.mxu0 %v5258_v8  ;;  %v5267_v8 = vld [vmem:[#allocation13 + $0x2c0] ss:$8 sps:$4 sm:$0xff]  }
 0x446   :  { %v2983_v24 = vrot.slane %v2982_v12, 2  ;;  %v2977_v25 = vrot.slane %v2976_v13, 2  ;;  %v3030_v26 = vmax.f32 %v2943_v2, %v3029_v16  ;;  %v3024_v27 = vmax.f32 %v2942_v19, %v3023_v18  ;;  %4136 = vmatprep.subr.bf16.mxu0 %v5263_v55  ;;  %v5272_v55 = vld [vmem:[#allocation13 + $0x2d4] ss:$8 sps:$4 sm:$0xff]  }
 0x447   :  { %v2972_v29 = vmax.f32 %v2970_v6, %v2971_v15  ;;  %v2989_v30 = vrot.slane %v2988_v20, 2  ;;  %v3019_v31 = vrot.slane %v3018_v21, 2  ;;  %v3036_v32 = vmax.f32 %v2944_v10, %v3035_v22  ;;  %v5270_v22 = vld [vmem:[#allocation13 + $0x2d0] ss:$8 sps:$4 sm:$0xff]  }
 0x448   :  { %v2984_v57 = vmax.f32 %v2982_v12, %v2983_v24  ;;  %v2978_v33 = vmax.f32 %v2976_v13, %v2977_v25  ;;  %v3031_v35 = vrot.slane %v3030_v26, 2  ;;  %v3025_v59 = vrot.slane %v3024_v27, 2  ;;  %v5275_v25 = vld [vmem:[#allocation13 + $0x2e4] ss:$8 sps:$4 sm:$0xff]  }
 0x449   :  { %v2973_v36 = vrot.slane %v2972_v29, 1  ;;  %v2990_v38 = vmax.f32 %v2988_v20, %v2989_v30  ;;  %v3020_v47 = vmax.f32 %v3018_v21, %v3019_v31  ;;  %v3037_v43 = vrot.slane %v3036_v32, 2  ;;  %4137 = vmatpush1.bf16.msra.mxu0 %v5261_v23  ;;  %v5273_v31 = vld [vmem:[#allocation13 + $0x2e0] ss:$8 sps:$4 sm:$0xff]  }
 0x44a   :  { %v2985_v49 = vrot.slane %v2984_v57, 1  ;;  %v2979_v51 = vrot.slane %v2978_v33, 1  ;;  %v3032_v63 = vmax.f32 %v3030_v26, %v3031_v35  ;;  %v3026_v4 = vmax.f32 %v3024_v27, %v3025_v59  ;;  %4138 = vmatprep.subr.bf16.mxu0 %v5266_v28 }
 0x44b   :  { %v2974_v40 = vmax.f32 %v2972_v29, %v2973_v36  ;;  %v2991_v11 = vrot.slane %v2990_v38, 1  ;;  %v3021_v41 = vrot.slane %v3020_v47, 1  ;;  %v3038_v42 = vmax.f32 %v3036_v32, %v3037_v43 }
 0x44c   :  { %v2986_v44 = vmax.f32 %v2984_v57, %v2985_v49  ;;  %v2980_v46 = vmax.f32 %v2978_v33, %v2979_v51  ;;  %v3033_v53 = vrot.slane %v3032_v63, 1  ;;  %v3027_v56 = vrot.slane %v3026_v4, 1 }
 0x44d   :  { %v3087_v58 = vmul.f32 %v6846_v62, %v2974_v40  ;;  %v2992_v1 = vmax.f32 %v2990_v38, %v2991_v11  ;;  %v3022_v54 = vmax.f32 %v3020_v47, %v3021_v41  ;;  %v3039_v60 = vrot.slane %v3038_v42, 1  ;;  %4139 = vmatpush1.bf16.msra.mxu0 %v5264_v45 }
 0x44e   :  { %v3089_v61 = vmul.f32 %v6852_v37, %v2986_v44  ;;  %v3088_v34 = vmul.f32 %v6858_v39, %v2980_v46  ;;  %v3034_v2 = vmax.f32 %v3032_v63, %v3033_v53  ;;  %v3028_v19 = vmax.f32 %v3026_v4, %v3027_v56  ;;  %4140 = vmatprep.subr.bf16.mxu0 %v5269_v52  ;;  %v5281_v52 = vld [vmem:[#allocation13 + $0x304] ss:$8 sps:$4 sm:$0xff]  }
 0x44f   :  { %v3145_v6 = vadd.f32 %v6849_v17, %v3087_v58  ;;  %v3090_v7 = vmul.f32 %v6864_v50, %v2992_v1  ;;  %v3095_v9 = vmul.f32 %v6846_v62, %v3022_v54  ;;  %v3040_v10 = vmax.f32 %v3038_v42, %v3039_v60  ;;  %v5279_v58 = vld [vmem:[#allocation13 + $0x300] ss:$8 sps:$4 sm:$0xff]   ;;  %v5284_v60 = vld [vmem:[#allocation13 + $0x314] ss:$8 sps:$4 sm:$0xff]  }
 0x450   :  { %v3147_v12 = vadd.f32 %v6855_v14, %v3089_v61  ;;  %v3097_v13 = vmul.f32 %v6852_v37, %v3034_v2  ;;  %v3096_v16 = vmul.f32 %v6858_v39, %v3028_v19  ;;  %v3146_v18 = vadd.f32 %v6861_v48, %v3088_v34  ;;  %v5282_v61 = vld [vmem:[#allocation13 + $0x310] ss:$8 sps:$4 sm:$0xff]   ;;  %v5287_v34 = vld [vmem:[#allocation13 + $0x324] ss:$8 sps:$4 sm:$0xff]   ;;  %v5285_v2 = vld [vmem:[#allocation13 + $0x320] ss:$8 sps:$4 sm:$0xff]  }
 0x451   :  { %v3161_v15 = vmax.f32 %v3145_v6, 0.0  ;;  %v3153_v20 = vadd.f32 %v6849_v17, %v3095_v9  ;;  %v3098_v21 = vmul.f32 %v6864_v50, %v3040_v10  ;;  %4141 = vmatpush1.bf16.msra.mxu0 %v5267_v8  ;;  %v3148_v23 = vadd.f32 %v6867_v5, %v3090_v7  ;;  %v5290_v19 = vld [vmem:[#allocation13 + $0x334] ss:$8 sps:$4 sm:$0xff]   ;;  %v5293_v6 = vld [vmem:[#allocation13 + $0x344] ss:$8 sps:$4 sm:$0xff]  }
 0x452   :  { %v3163_v24 = vmax.f32 %v3147_v12, 0.0  ;;  %v3155_v62 = vadd.f32 %v6855_v14, %v3097_v13  ;;  %4142 = vmatprep.subr.bf16.mxu0 %v5272_v55  ;;  %v3154_v37 = vadd.f32 %v6861_v48, %v3096_v16  ;;  %v3162_v26 = vmax.f32 %v3146_v18, 0.0  ;;  %v5278_v14 = vld [vmem:[#allocation13 + $0x2f4] ss:$8 sps:$4 sm:$0xff]   ;;  %v5288_v55 = vld [vmem:[#allocation13 + $0x330] ss:$8 sps:$4 sm:$0xff]  }
 0x453   :  { %v3169_v39 = vmax.f32 %v3153_v20, 0.0  ;;  %v3156_v27 = vadd.f32 %v6867_v5, %v3098_v21  ;;  %v3164_v28 = vmax.f32 %v3148_v23, 0.0  ;;  %v3177_v30 = vpack.c.bf16 %v3161_v15, %v3161_v15  ;;  %v5276_v5 = vld [vmem:[#allocation13 + $0x2f0] ss:$8 sps:$4 sm:$0xff]   ;;  %v5291_v7 = vld [vmem:[#allocation13 + $0x340] ss:$8 sps:$4 sm:$0xff]  }
 0x454   :  { %v3171_v29 = vmax.f32 %v3155_v62, 0.0  ;;  %v3170_v17 = vmax.f32 %v3154_v37, 0.0  ;;  %v3179_v57 = vpack.c.bf16 %v3163_v24, %v3163_v24  ;;  %v3178_v35 = vpack.c.bf16 %v3162_v26, %v3162_v26  ;;  %v5296_v9 = vld [vmem:[#allocation13 + $0x354] ss:$8 sps:$4 sm:$0xff]   ;;  %v5294_v10 = vld [vmem:[#allocation13 + $0x350] ss:$8 sps:$4 sm:$0xff]  }
 0x455   :  { %v3185_v50 = vpack.c.bf16 %v3169_v39, %v3169_v39  ;;  %4143 = vmatpush1.bf16.msra.mxu0 %v5270_v22  ;;  %v3172_v32 = vmax.f32 %v3156_v27, 0.0  ;;  %v3180_v48 = vpack.c.bf16 %v3164_v28, %v3164_v28  ;;  %v3349_v45 = vunpack.c.l.b16 %v3177_v30  ;;  %v5299_v12 = vld [vmem:[#allocation13 + $0x364] ss:$8 sps:$4 sm:$0xff]   ;;  %v5297_v13 = vld [vmem:[#allocation13 + $0x360] ss:$8 sps:$4 sm:$0xff]  }
 0x456   :  { %v3187_v33 = vpack.c.bf16 %v3171_v29, %v3171_v29  ;;  %4144 = vmatprep.subr.bf16.mxu0 %v5275_v25  ;;  %v3186_v59 = vpack.c.bf16 %v3170_v17, %v3170_v17  ;;  %v3350_v63 = vunpack.c.l.b16 %v3178_v35  ;;  %v3351_v40 = vunpack.c.l.b16 %v3179_v57  ;;  %v5302_v16 = vld [vmem:[#allocation13 + $0x374] ss:$8 sps:$4 sm:$0xff]   ;;  %v5300_v18 = vld [vmem:[#allocation13 + $0x370] ss:$8 sps:$4 sm:$0xff]   ;;  %v5305_v15 = vld [vmem:[#allocation13 + $0x384] ss:$8 sps:$4 sm:$0xff]  }
 0x457   :  { %v3357_v36 = vunpack.c.l.b16 %v3185_v50  ;;  %v3188_v38 = vpack.c.bf16 %v3172_v32, %v3172_v32  ;;  %v3352_v42 = vunpack.c.l.b16 %v3180_v48  ;;  %v5303_v20 = vld [vmem:[#allocation13 + $0x380] ss:$8 sps:$4 sm:$0xff]   ;;  %v5308_v21 = vld [vmem:[#allocation13 + $0x394] ss:$8 sps:$4 sm:$0xff]   ;;  %v5306_v22 = vld [vmem:[#allocation13 + $0x390] ss:$8 sps:$4 sm:$0xff]  }
 0x458   :  { %v3359_v47 = vunpack.c.l.b16 %v3187_v33  ;;  %v3358_v43 = vunpack.c.l.b16 %v3186_v59  ;;  %v5311_v23 = vld [vmem:[#allocation13 + $0x3a4] ss:$8 sps:$4 sm:$0xff]   ;;  %v5309_v24 = vld [vmem:[#allocation13 + $0x3a0] ss:$8 sps:$4 sm:$0xff]   ;;  %v5314_v62 = vld [vmem:[#allocation13 + $0x3b4] ss:$8 sps:$4 sm:$0xff]  }
 0x459   :  { %4145 = vmatpush1.bf16.msra.mxu0 %v5273_v31  ;;  %v3370_v49 = vrot.slane %v3357_v36, 7  ;;  %v3360_v51 = vunpack.c.l.b16 %v3188_v38  ;;  %v5312_v25 = vld [vmem:[#allocation13 + $0x3b0] ss:$8 sps:$4 sm:$0xff]   ;;  %v5317_v37 = vld [vmem:[#allocation13 + $0x3c4] ss:$8 sps:$4 sm:$0xff]  }
 0x45a   :  { %4146 = vmatprep.subr.bf16.mxu0 %v5278_v14  ;;  %v3372_v4 = vrot.slane %v3358_v43, 7  ;;  %v3374_v11 = vrot.slane %v3359_v47, 7  ;;  %v5315_v26 = vld [vmem:[#allocation13 + $0x3c0] ss:$8 sps:$4 sm:$0xff]   ;;  %v5320_v39 = vld [vmem:[#allocation13 + $0x3d4] ss:$8 sps:$4 sm:$0xff]  }
 0x45b   :  { %v3371_v41 = vsel %vm3362_vm3, %v3370_v49, %v3349_v45  ;;  %v3376_v44 = vrot.slane %v3360_v51, 7  ;;  %v5318_v27 = vld [vmem:[#allocation13 + $0x3d0] ss:$8 sps:$4 sm:$0xff]   ;;  %v5323_v28 = vld [vmem:[#allocation13 + $0x3e4] ss:$8 sps:$4 sm:$0xff]  }
 0x45c   :  { %v3373_v46 = vsel %vm3362_vm3, %v3372_v4, %v3350_v63  ;;  %v6888_v53 = vsel %vm3362_vm3, %v3374_v11, %v3351_v40  ;;  %v3382_v54 = vpack.c.b16 %v3371_v41, %v3371_v41  ;;  %v5321_v29 = vld [vmem:[#allocation13 + $0x3e0] ss:$8 sps:$4 sm:$0xff]   ;;  %v5326_v17 = vld [vmem:[#allocation13 + $0x3f4] ss:$8 sps:$4 sm:$0xff]   ;;  %v5324_v30 = vld [vmem:[#allocation13 + $0x3f0] ss:$8 sps:$4 sm:$0xff]  }
 0x45d   :  { %4147 = vmatpush1.bf16.msra.mxu0 %v5276_v5  ;;  %v3383_v56 = vpack.c.b16 %v3373_v46, %v3373_v46  ;;  %v3377_v1 = vsel %vm3362_vm3, %v3376_v44, %v3352_v42  ;;  %v3384_v50 = vpack.c.b16 %v6888_v53, %v6888_v53  ;;  %v5339_v31 = vld [vmem:[%s6932_s13 + $0x70] sm:$0xff]   ;;  %v5341_v57 = vld [vmem:[%s6932_s13 + $0x78] sm:$0xff]   ;;  %v3317_v14 = vld [vmem:[#allocation14] sm:$0x3] }
 0x45e   :  { %4157 = vmatprep.subr.bf16.mxu0 %v5281_v52  ;;  %v3385_v8 = vpack.c.b16 %v3377_v1, %v3377_v1  ;;  %v5340_v32 = vld [vmem:[%s6932_s13 + $0x30] sm:$0xff]   ;;  %4911 = vmatprep.subr.bf16.mxu1 %v5339_v31  ;;  %v5342_v33 = vld [vmem:[%s6932_s13 + $0x38] sm:$0xff]   ;;  %v3322_v35 = vrot.slane %v3317_v14, %v5965_v0  ;;  %v3326_v59 = vrot.slane %v3317_v14, %v5971_v3  ;;  %v4882_v52 = vld [vmem:[#allocation16] ss:$0 sm:$0xff]  ;;  %s5590_s13 = smov [#allocation17]  }
 0x45f   :  { %4148 = vmatprep.mubr.bf16.mxu0 %v3383_v56  ;;  %4912 = vmatpush3.bf16.msra.mxu1 %v5340_v32  ;;  %s4384_s18 = sshll.u32 %s5590_s13, 4  ;;  %s4385_s18 = int_to_ptr.vmem [resolvable:$true] %s4384_s18 }
 0x460   :  { %4149 = vmatmul.mubr.bf16.vlgmr.msra.gmra.mrb[8].mxu0 %v3382_v54  ;;  %4913 = vmatprep.subr.bf16.mxu1 %v5341_v57  ;;  %s5541_s24 = scalar_lea.vmem %s4385_s18, 32  ;;  %p5546_p3 = scmp.lt.s32.totalorder %s4385_s18, %s4385_s18 }
 0x461   :  { %4158 = vmatpush1.bf16.msra.mxu0 %v5279_v58  ;;  %4189 = vmatprep.mubr.bf16.mxu0 %v3385_v8  ;;  %p5542_p2 = scmp.ne.s32.totalorder %s4385_s18, %s5541_s24  ;;  %p5547_p4 = scmp.lt.s32.totalorder %s5541_s24, %s5541_s24 }
 0x462   :  { %4159 = vmatprep.subr.bf16.mxu0 %v5284_v60 }
 0x463   :  { %4914 = vmatpush3.bf16.msra.mxu1 %v5342_v33  ;;  %p5548_p5 = por %p5547_p4, %p5546_p3 }
 0x465   :  { %4160 = vmatpush1.bf16.msra.mxu0 %v5282_v61  ;;  %p5549_p6 = pnand %p5548_p5, %p5542_p2 }
 0x466   :  { %4161 = vmatprep.subr.bf16.mxu0 %v5287_v34 }
 0x469   :  { %4162 = vmatpush1.bf16.msra.mxu0 %v5285_v2 }
 0x46a   :  { %4163 = vmatprep.subr.bf16.mxu0 %v5290_v19 }
 0x46d   :  { %4164 = vmatpush1.bf16.msra.mxu0 %v5288_v55 }
 0x46e   :  { %4165 = vmatprep.subr.bf16.mxu0 %v5293_v6 }
 0x471   :  { %4166 = vmatpush1.bf16.msra.mxu0 %v5291_v7 }
 0x472   :  { %4167 = vmatprep.subr.bf16.mxu0 %v5296_v9 }
 0x475   :  { %4168 = vmatpush1.bf16.msra.mxu0 %v5294_v10 }
 0x476   :  { %4169 = vmatprep.subr.bf16.mxu0 %v5299_v12 }
 0x479   :  { %4170 = vmatpush1.bf16.msra.mxu0 %v5297_v13 }
 0x47a   :  { %4171 = vmatprep.subr.bf16.mxu0 %v5302_v16 }
 0x47d   :  { %4172 = vmatpush1.bf16.msra.mxu0 %v5300_v18 }
 0x47e   :  { %4173 = vmatprep.subr.bf16.mxu0 %v5305_v15 }
 0x481   :  { %4174 = vmatpush1.bf16.msra.mxu0 %v5303_v20 }
 0x482   :  { %4175 = vmatprep.subr.bf16.mxu0 %v5308_v21 }
 0x485   :  { %4176 = vmatpush1.bf16.msra.mxu0 %v5306_v22 }
 0x486   :  { %4177 = vmatprep.subr.bf16.mxu0 %v5311_v23 }
 0x489   :  { %4178 = vmatpush1.bf16.msra.mxu0 %v5309_v24 }
 0x48a   :  { %4179 = vmatprep.subr.bf16.mxu0 %v5314_v62 }
 0x48d   :  { %4180 = vmatpush1.bf16.msra.mxu0 %v5312_v25 }
 0x48e   :  { %4181 = vmatprep.subr.bf16.mxu0 %v5317_v37 }
 0x491   :  { %4182 = vmatpush1.bf16.msra.mxu0 %v5315_v26 }
 0x492   :  { %4183 = vmatprep.subr.bf16.mxu0 %v5320_v39 }
 0x495   :  { %4184 = vmatpush1.bf16.msra.mxu0 %v5318_v27 }
 0x496   :  { %4185 = vmatprep.subr.bf16.mxu0 %v5323_v28 }
 0x499   :  { %4186 = vmatpush1.bf16.msra.mxu0 %v5321_v29 }
 0x49a   :  { %4187 = vmatprep.subr.bf16.mxu0 %v5326_v17 }
 0x49d   :  { %4188 = vmatpush1.bf16.msra.mxu0 %v5324_v30 }
 0x4a0   :  { %4190 = vmatmul.mubr.bf16.vlgmr.msra.gmra.mrb[8].mxu0 %v3384_v50 }
 0x573   :  { %v4191_v36 = vpop.f32.mrb[8].mxu0 }
 0x574   :  { %v4937_v48 = vadd.f32 %v4191_v36, %v3322_v35  ;;  %v4193_v38 = vpop.f32.mrb[9].mxu0 }
 0x575   :  { %v4938_v47 = vadd.f32 %v4193_v38, %v3326_v59  ;;  %v4195_v43 = vpop.f32.mrb[10].mxu0 }
 0x576   :  { %v4198_v5 = vmax.f32 %v4937_v48, 0.0  ;;  %v4196_v45 = vpop.f32.mrb[11].mxu0 }
 0x577   :  { %v4199_v49 = vmax.f32 %v4938_v47, 0.0 }
 0x578   :  { %v4200_v63 = vpack.c.bf16 %v4198_v5, %v4198_v5 }
 0x579   :  { %v4201_v51 = vpack.c.bf16 %v4199_v49, %v4199_v49 }
 0x57b   :  { %4369 = vmatprep.mubr.bf16.mxu1 %v4201_v51 }
 0x57c   :  { %4370 = vmatmul.mubr.bf16.vlgmr.msra.gmra.mrb[20].mxu1 %v4200_v63 }
 0x64f   :  { %v4915_v4 = vpop.f32.mrb[20].mxu1 }
 0x650   :  { %v4916_v40 = vpop.f32.mrb[21].mxu1 }
 0x651   :  { %v4917_v0 = vadd.f32 %v4916_v40, %v4915_v4  ;;  %v4918_v11 = vpop.f32.mrb[22].mxu1 }
 0x652   :  { %v4919_v3 = vpop.f32.mrb[23].mxu1 }
 0x653   :  { %v4372_v41 = vadd.f32 %v4917_v0, %v4882_v52 }
 0x655   :  { %4377 = vst [vmem:[#allocation17] sm:$0x3] %v4372_v41 }
 0x656   :  { %5552 = shalt.err (!%p5549_p6)
}
 0x657   :  { %s6937_s12 = sld [smem:[#allocation24_spill]] }
 0x65d   :  { %s5553_s1 = scalar_lea.hbm %s6937_s12, 32 }
 0x65e   :  { %p5554_p7 = scmp.ne.s32.totalorder %s6937_s12, %s5553_s1  ;;  %p5557_p8 = scmp.lt.u32.totalorder %s5553_s1, %s6937_s12 }
 0x660   :  { %p5559_p9 = pnand %p5557_p8, %p5554_p7 }
 0x662   :  { %5562 = shalt.err (!%p5559_p9)
}
 0x663   :  { %4387 = dma.vmem_to_hbm [thread:$0]  %s4385_s18, 32, %s6937_s12, [#allocation4]  }
 0x664   :  { %5573 = dma.done.wait [#allocation4], 32  }
 0x665   :  { %5574 = vsyncadd [#allocation4], 4294967264 }
 0x666   :  { %4391 = vsyncpa [#allocation3], 1 }
 0x667   :  { %4392 = vsyncpa [#allocation6], 1 }
 0x668   :  { %4393 = vsyncpa [#allocation9], 1 }
 0x669   :  { %4394 = vsyncpa [#allocation12], 1 }
 0x66a   :  { %4395 = vsyncpa [#allocation15], 1 }
 0x66b   :  { %4396 = vsyncpa [#allocation4], 1 }

</bundles_post_ra>
